<compile_context>
chip_gen: v7x
topology: tpu7x:2x2x1
jax: 0.10.0
libtpu: 0.0.40
codegen_flags: <defaults>
</compile_context>

<pallas_src>
import functools

import jax
import jax.numpy as jnp
from jax.experimental import pallas as pl
from jax.experimental.pallas import tpu as pltpu


# ----------------------------------------------------------------------------
# Pallas kernels
# ----------------------------------------------------------------------------
def _stem_gap_kernel(x_ref, w_ref, b_ref, o_ref, acc_ref, *, act, inv_s):
    """Fused: (row-tile of im2col patches) @ W + b -> activation -> GAP accumulate.

    grid = (batch, num_row_tiles).  acc_ref holds the running spatial sum for the
    current batch element; it is zeroed on the first row tile and normalized +
    stored on the last one.
    """
    s_idx = pl.program_id(1)

    @pl.when(s_idx == 0)
    def _():
        acc_ref[...] = jnp.zeros_like(acc_ref)

    x = x_ref[0]                                   # (tile_s, Kpad) bf16
    y = jnp.dot(x, w_ref[...], preferred_element_type=jnp.float32)
    y = y + b_ref[...]
    if act == "relu":
        y = jnp.maximum(y, 0.0)
    else:  # SiLU: x * sigmoid(x); reciprocal goes to the EUP slot.
        y = y * pl.reciprocal(1.0 + jnp.exp(-y), approx=True)
    acc_ref[...] += jnp.sum(y, axis=0, keepdims=True)

    @pl.when(s_idx == pl.num_programs(1) - 1)
    def _():
        o_ref[0] = (acc_ref[...] * inv_s).astype(o_ref.dtype)


def _fused_head_kernel(rp_ref, ep_ref,
                       wpr_ref, bpr_ref, wpe_ref, bpe_ref,
                       w1r_ref, w1e_ref, b1_ref, w2_ref, b2_ref, o_ref):
    """Fused: branch projections (trunk stubs) + concat head.

    concat([r, e], axis=1) @ W1 == r @ W1[:2048] + e @ W1[2048:]  (exact).
    Then + b1, ReLU, Dropout(0.3)=identity at inference, @ W2 + b2.
    """
    bf = jnp.bfloat16
    # ResNet branch: project pooled stem features to 2048 (+ ReLU) — trunk stub.
    r = jnp.dot(rp_ref[...].astype(bf), wpr_ref[...],
                preferred_element_type=jnp.float32) + bpr_ref[...]
    r = jnp.maximum(r, 0.0)
    # EfficientNet branch: project pooled stem features to 1280 (+ SiLU) — stub.
    e = jnp.dot(ep_ref[...].astype(bf), wpe_ref[...],
                preferred_element_type=jnp.float32) + bpe_ref[...]
    e = e * pl.reciprocal(1.0 + jnp.exp(-e), approx=True)
    # fc1 on the (virtual) concatenation, via pre-split weights.
    h = jnp.dot(r.astype(bf), w1r_ref[...], preferred_element_type=jnp.float32)
    h = h + jnp.dot(e.astype(bf), w1e_ref[...], preferred_element_type=jnp.float32)
    h = jnp.maximum(h + b1_ref[...], 0.0)
    # nn.Dropout(0.3): identity in eval/inference mode.
    out = jnp.dot(h.astype(bf), w2_ref[...], preferred_element_type=jnp.float32)
    o_ref[...] = (out + b2_ref[...]).astype(o_ref.dtype)


# ----------------------------------------------------------------------------
# Pallas wrappers
# ----------------------------------------------------------------------------
def _full_spec(shape):
    return pl.BlockSpec(shape, lambda: tuple(0 for _ in shape))


def _row_tile(s, cap=512):
    """Largest row tile <= cap that evenly divides s (multiple of 8)."""
    if s <= cap:
        return s
    t = (cap // 8) * 8
    while t > 8 and s % t != 0:
        t -= 8
    return t if s % t == 0 else s


def pallas_stem_gap(patches, w, b, act):
    """patches: (B, S, Kpad) bf16; w: (Kpad, Npad) bf16; b: (1, Npad) f32.

    Returns the global-average-pooled, activated stem features: (B, Npad) f32.
    """
    B, S, Kp = patches.shape
    Np = w.shape[1]
    tile_s = _row_tile(S)
    n_s = S // tile_s
    out = pl.pallas_call(
        functools.partial(_stem_gap_kernel, act=act, inv_s=1.0 / S),
        out_shape=jax.ShapeDtypeStruct((B, 1, Np), jnp.float32),
        grid_spec=pltpu.PrefetchScalarGridSpec(
            num_scalar_prefetch=0,
            grid=(B, n_s),
            in_specs=[
                pl.BlockSpec((1, tile_s, Kp), lambda bi, si: (bi, si, 0)),
                pl.BlockSpec((Kp, Np), lambda bi, si: (0, 0)),
                pl.BlockSpec((1, Np), lambda bi, si: (0, 0)),
            ],
            out_specs=pl.BlockSpec((1, 1, Np), lambda bi, si: (bi, 0, 0)),
            scratch_shapes=[pltpu.VMEM((1, Np), jnp.float32)],
        ),
        compiler_params=pltpu.CompilerParams(
            dimension_semantics=("parallel", "arbitrary"),
            vmem_limit_bytes=32 * 1024 * 1024,
        ),
    )(patches, w, b)
    return out.reshape(B, Np)


def pallas_fused_head(r_pooled, e_pooled, params):
    """Single-kernel: projections to 2048/1280 + concat-fc1-ReLU-fc2 head."""
    B = r_pooled.shape[0]
    wpr, bpr = params["res_proj_w"], params["res_proj_b"]
    wpe, bpe = params["eff_proj_w"], params["eff_proj_b"]
    w1r, w1e, b1 = params["fc1_wr"], params["fc1_we"], params["fc1_b"]
    w2, b2 = params["fc2_w"], params["fc2_b"]
    ncp = w2.shape[1]
    return pl.pallas_call(
        _fused_head_kernel,
        out_shape=jax.ShapeDtypeStruct((B, ncp), jnp.float32),
        in_specs=[
            _full_spec(r_pooled.shape), _full_spec(e_pooled.shape),
            _full_spec(wpr.shape), _full_spec(bpr.shape),
            _full_spec(wpe.shape), _full_spec(bpe.shape),
            _full_spec(w1r.shape), _full_spec(w1e.shape), _full_spec(b1.shape),
            _full_spec(w2.shape), _full_spec(b2.shape),
        ],
        out_specs=_full_spec((B, ncp)),
        compiler_params=pltpu.CompilerParams(
            vmem_limit_bytes=32 * 1024 * 1024,  # valid on v7x (64 MiB physical)
        ),
    )(r_pooled, e_pooled, wpr, bpr, wpe, bpe, w1r, w1e, b1, w2, b2)


# ----------------------------------------------------------------------------
# Plain-JAX glue: patch extraction (layout plumbing; matmuls run in Pallas)
# ----------------------------------------------------------------------------
def extract_patches(x, kh, kw, stride, pad, k_pad):
    """x: (B, C, H, W) f32 NCHW -> (B, OH*OW, k_pad) bf16 (K zero-padded)."""
    patches = jax.lax.conv_general_dilated_patches(
        x,
        filter_shape=(kh, kw),
        window_strides=(stride, stride),
        padding=((pad, pad), (pad, pad)),
        dimension_numbers=("NCHW", "OIHW", "NCHW"),
    )                                             # (B, C*kh*kw, OH, OW)
    B, K, OH, OW = patches.shape
    patches = patches.transpose(0, 2, 3, 1).reshape(B, OH * OW, K)
    patches = jnp.pad(patches, ((0, 0), (0, 0), (0, k_pad - K)))
    return patches.astype(jnp.bfloat16)


# ----------------------------------------------------------------------------
# Deterministic parameter init (synthetic weights, kernel-ready layout)
# ----------------------------------------------------------------------------
def _pad2(a, rows, cols):
    r, c = a.shape
    return jnp.pad(a, ((0, rows - r), (0, cols - c)))


def init_params(key, num_classes):
    ks = jax.random.split(key, 6)
    s = 0.05
    p = {}
    # ResNet50 stem: Conv2d(3, 64, 7, stride=2, padding=3) as (K=147, N=64) matmul,
    # padded to (256, 128), bf16.
    w = s * jax.random.normal(ks[0], (3 * 7 * 7, 64), jnp.float32)
    p["res_stem_w"] = _pad2(w, 256, 128).astype(jnp.bfloat16)
    p["res_stem_b"] = jnp.zeros((1, 128), jnp.float32)
    # Projection to ResNet50 feature width 2048 (padded pooled input rows -> 0).
    w = s * jax.random.normal(ks[1], (64, 2048), jnp.float32)
    p["res_proj_w"] = _pad2(w, 128, 2048).astype(jnp.bfloat16)
    p["res_proj_b"] = jnp.zeros((1, 2048), jnp.float32)
    # EfficientNet-B0 stem: Conv2d(3, 32, 3, stride=2, padding=1) as (27, 32),
    # padded to (128, 128), bf16.
    w = s * jax.random.normal(ks[2], (3 * 3 * 3, 32), jnp.float32)
    p["eff_stem_w"] = _pad2(w, 128, 128).astype(jnp.bfloat16)
    p["eff_stem_b"] = jnp.zeros((1, 128), jnp.float32)
    # Projection to EfficientNet-B0 feature width 1280.
    w = s * jax.random.normal(ks[3], (32, 1280), jnp.float32)
    p["eff_proj_w"] = _pad2(w, 128, 1280).astype(jnp.bfloat16)
    p["eff_proj_b"] = jnp.zeros((1, 1280), jnp.float32)
    # Head fc1: Linear(2048 + 1280, 512); pre-split at 2048 for the concat trick.
    w1 = s * jax.random.normal(ks[4], (2048 + 1280, 512), jnp.float32)
    p["fc1_wr"] = w1[:2048].astype(jnp.bfloat16)
    p["fc1_we"] = w1[2048:].astype(jnp.bfloat16)
    p["fc1_b"] = jnp.zeros((1, 512), jnp.float32)
    # Head fc2: Linear(512, num_classes), lane-padded to 128 output columns.
    ncp = max(128, ((num_classes + 127) // 128) * 128)
    w2 = s * jax.random.normal(ks[5], (512, num_classes), jnp.float32)
    p["fc2_w"] = _pad2(w2, 512, ncp).astype(jnp.bfloat16)
    p["fc2_b"] = jnp.zeros((1, ncp), jnp.float32)
    return p


# ----------------------------------------------------------------------------
# Forward pass
# ----------------------------------------------------------------------------
def hybrid_forward(params, x, num_classes):
    # ResNet50 branch: 7x7/s2 stem -> ReLU -> global-average-pool (one kernel).
    p_r = extract_patches(x, kh=7, kw=7, stride=2, pad=3, k_pad=256)
    res_pooled = pallas_stem_gap(p_r, params["res_stem_w"],
                                 params["res_stem_b"], act="relu")   # (B, 128)
    # EfficientNet-B0 branch: 3x3/s2 stem -> SiLU -> GAP (one kernel).
    p_e = extract_patches(x, kh=3, kw=3, stride=2, pad=1, k_pad=128)
    eff_pooled = pallas_stem_gap(p_e, params["eff_stem_w"],
                                 params["eff_stem_b"], act="silu")   # (B, 128)
    # Fused: projections to 2048/1280 + concat -> fc1 -> ReLU -> Dropout(id) -> fc2.
    out_padded = pallas_fused_head(res_pooled, eff_pooled, params)   # (B, 128)
    return out_padded[:, :num_classes]


if __name__ == "__main__":
    num_classes = 10
    key = jax.random.PRNGKey(0)
    k_param, k_x = jax.random.split(key)

    params = init_params(k_param, num_classes)
    # Small ImageNet-like input: (batch=2, channels=3, H=W=32), NCHW, float32.
    x = jax.random.normal(k_x, (2, 3, 32, 32), jnp.float32)

    fwd = jax.jit(functools.partial(hybrid_forward, num_classes=num_classes))
    out = fwd(params, x)
    out = jax.block_until_ready(out)

    assert out.shape == (2, num_classes), out.shape
    assert out.dtype == jnp.float32
    assert bool(jnp.all(jnp.isfinite(out)))
    print("KERNEL_OK")
</pallas_src>

<mosaic_0001>
module attributes {stable_mosaic.version = 11 : i64} {
  func.func @_stem_gap_kernel(%arg0: i32, %arg1: i32, %arg2: memref<1x256x256xbf16, #tpu.memory_space<vmem>>, %arg3: memref<256x128xbf16, #tpu.memory_space<vmem>>, %arg4: memref<1x128xf32, #tpu.memory_space<vmem>>, %arg5: memref<1x1x128xf32, #tpu.memory_space<vmem>>, %arg6: memref<1x128xf32, #tpu.memory_space<vmem>>) attributes {dimension_semantics = [#tpu.dimension_semantics<parallel>, #tpu.dimension_semantics<arbitrary>], iteration_bounds = array<i64: 2, 1>, scalar_prefetch = 0 : i64, scratch_operands = 1 : i64, tpu.core_type = #tpu.core_type<tc>, window_params = [{transform_indices = @transform_0, window_bounds = array<i64: 1, 256, 256>}, {pipeline_mode = #tpu.pipeline_mode<synchronous>, transform_indices = @transform_1, window_bounds = array<i64: 256, 128>}, {pipeline_mode = #tpu.pipeline_mode<synchronous>, transform_indices = @transform_2, window_bounds = array<i64: 1, 128>}, {transform_indices = @transform_3, window_bounds = array<i64: 1, 1, 128>}]} {
    %c0_i32 = arith.constant 0 : i32
    %0 = arith.cmpi eq, %arg1, %c0_i32 : i32
    %1 = arith.extui %0 : i1 to i32
    %c0_i32_0 = arith.constant 0 : i32
    %2 = arith.cmpi ne, %1, %c0_i32_0 : i32
    scf.if %2 {
      %cst_15 = arith.constant 0.000000e+00 : f32
      %20 = vector.broadcast %cst_15 : f32 to vector<1x128xf32>
      %c0_16 = arith.constant 0 : index
      %c0_17 = arith.constant 0 : index
      %21 = vector.load %arg6[%c0_16, %c0_17] : memref<1x128xf32, #tpu.memory_space<vmem>>, vector<1x128xf32>
      tpu.vector_store %arg6[%c0_16, %c0_17], %20 {strides = array<i32>} : memref<1x128xf32, #tpu.memory_space<vmem>>, vector<1x128xf32>,
    } else {
    }
    %c0 = arith.constant 0 : index
    %c0_1 = arith.constant 0 : index
    %c0_2 = arith.constant 0 : index
    %3 = vector.load %arg2[%c0, %c0_1, %c0_2] : memref<1x256x256xbf16, #tpu.memory_space<vmem>>, vector<1x256x256xbf16>
    %4 = vector.shape_cast %3 : vector<1x256x256xbf16> to vector<256x256xbf16>
    %c0_3 = arith.constant 0 : index
    %c0_4 = arith.constant 0 : index
    %5 = vector.load %arg3[%c0_3, %c0_4] : memref<256x128xbf16, #tpu.memory_space<vmem>>, vector<256x128xbf16>
    %cst = arith.constant dense<0.000000e+00> : vector<256x128xf32>
    %6 = tpu.matmul %4, %5, %cst {dimension_numbers = #tpu.dot_dimension_numbers<[1], [0], [0], [1], [0, 0, 1, 1], [], []>} : vector<256x256xbf16>, vector<256x128xbf16>, vector<256x128xf32> -> vector<256x128xf32>
    %c0_5 = arith.constant 0 : index
    %c0_6 = arith.constant 0 : index
    %7 = vector.load %arg4[%c0_5, %c0_6] : memref<1x128xf32, #tpu.memory_space<vmem>>, vector<1x128xf32>
    %8 = vector.broadcast %7 : vector<1x128xf32> to vector<256x128xf32>
    %9 = arith.addf %6, %8 : vector<256x128xf32>
    %cst_7 = arith.constant 0.000000e+00 : f32
    %10 = vector.broadcast %cst_7 : f32 to vector<256x128xf32>
    %11 = arith.maximumf %9, %10 : vector<256x128xf32>
    %c0_8 = arith.constant 0 : index
    %c0_9 = arith.constant 0 : index
    %12 = vector.load %arg6[%c0_8, %c0_9] : memref<1x128xf32, #tpu.memory_space<vmem>>, vector<1x128xf32>
    %cst_10 = arith.constant dense<0.000000e+00> : vector<128xf32>
    %13 = vector.multi_reduction <add>, %11, %cst_10 [0] : vector<256x128xf32> to vector<128xf32>
    %14 = vector.shape_cast %13 : vector<128xf32> to vector<1x128xf32>
    %15 = arith.addf %12, %14 : vector<1x128xf32>
    %c0_11 = arith.constant 0 : index
    %c0_12 = arith.constant 0 : index
    %16 = vector.load %arg6[%c0_11, %c0_12] : memref<1x128xf32, #tpu.memory_space<vmem>>, vector<1x128xf32>
    tpu.vector_store %arg6[%c0_11, %c0_12], %15 {strides = array<i32>} : memref<1x128xf32, #tpu.memory_space<vmem>>, vector<1x128xf32>,
    %c0_i32_13 = arith.constant 0 : i32
    %17 = arith.cmpi eq, %arg1, %c0_i32_13 : i32
    %18 = arith.extui %17 : i1 to i32
    %c0_i32_14 = arith.constant 0 : i32
    %19 = arith.cmpi ne, %18, %c0_i32_14 : i32
    scf.if %19 {
      %c0_15 = arith.constant 0 : index
      %c0_16 = arith.constant 0 : index
      %20 = vector.load %arg6[%c0_15, %c0_16] : memref<1x128xf32, #tpu.memory_space<vmem>>, vector<1x128xf32>
      %cst_17 = arith.constant 3.906250e-03 : f32
      %21 = vector.broadcast %cst_17 : f32 to vector<1x128xf32>
      %22 = arith.mulf %20, %21 : vector<1x128xf32>
      %c0_18 = arith.constant 0 : index
      %c0_19 = arith.constant 0 : index
      %c0_20 = arith.constant 0 : index
      %23 = vector.load %arg5[%c0_18, %c0_19, %c0_20] : memref<1x1x128xf32, #tpu.memory_space<vmem>>, vector<1x1x128xf32>
      %24 = vector.shape_cast %23 : vector<1x1x128xf32> to vector<1x128xf32>
      %25 = vector.shape_cast %22 : vector<1x128xf32> to vector<1x1x128xf32>
      tpu.vector_store %arg5[%c0_18, %c0_19, %c0_20], %25 {strides = array<i32>} : memref<1x1x128xf32, #tpu.memory_space<vmem>>, vector<1x1x128xf32>,
    } else {
    }
    return
  }
  func.func @transform_0(%arg0: i32, %arg1: i32) -> (i32, i32, i32) {
    %c0_i32 = arith.constant 0 : i32
    %c0_i32_0 = arith.constant 0 : i32
    return %arg0, %arg1, %c0_i32 : i32, i32, i32
  }
  func.func @transform_1(%arg0: i32, %arg1: i32) -> (i32, i32) {
    %c0_i32 = arith.constant 0 : i32
    %c0_i32_0 = arith.constant 0 : i32
    %c0_i32_1 = arith.constant 0 : i32
    return %c0_i32, %c0_i32_0 : i32, i32
  }
  func.func @transform_2(%arg0: i32, %arg1: i32) -> (i32, i32) {
    %c0_i32 = arith.constant 0 : i32
    %c0_i32_0 = arith.constant 0 : i32
    %c0_i32_1 = arith.constant 0 : i32
    return %c0_i32, %c0_i32_0 : i32, i32
  }
  func.func @transform_3(%arg0: i32, %arg1: i32) -> (i32, i32, i32) {
    %c0_i32 = arith.constant 0 : i32
    %c0_i32_0 = arith.constant 0 : i32
    %c0_i32_1 = arith.constant 0 : i32
    return %arg0, %c0_i32, %c0_i32_0 : i32, i32, i32
  }
}

module attributes {stable_mosaic.version = 11 : i64} {
  func.func @_stem_gap_kernel(%arg0: i32, %arg1: i32, %arg2: memref<1x256x128xbf16, #tpu.memory_space<vmem>>, %arg3: memref<128x128xbf16, #tpu.memory_space<vmem>>, %arg4: memref<1x128xf32, #tpu.memory_space<vmem>>, %arg5: memref<1x1x128xf32, #tpu.memory_space<vmem>>, %arg6: memref<1x128xf32, #tpu.memory_space<vmem>>) attributes {dimension_semantics = [#tpu.dimension_semantics<parallel>, #tpu.dimension_semantics<arbitrary>], iteration_bounds = array<i64: 2, 1>, scalar_prefetch = 0 : i64, scratch_operands = 1 : i64, tpu.core_type = #tpu.core_type<tc>, window_params = [{transform_indices = @transform_0, window_bounds = array<i64: 1, 256, 128>}, {pipeline_mode = #tpu.pipeline_mode<synchronous>, transform_indices = @transform_1, window_bounds = array<i64: 128, 128>}, {pipeline_mode = #tpu.pipeline_mode<synchronous>, transform_indices = @transform_2, window_bounds = array<i64: 1, 128>}, {transform_indices = @transform_3, window_bounds = array<i64: 1, 1, 128>}]} {
    %c0_i32 = arith.constant 0 : i32
    %0 = arith.cmpi eq, %arg1, %c0_i32 : i32
    %1 = arith.extui %0 : i1 to i32
    %c0_i32_0 = arith.constant 0 : i32
    %2 = arith.cmpi ne, %1, %c0_i32_0 : i32
    scf.if %2 {
      %cst_16 = arith.constant 0.000000e+00 : f32
      %25 = vector.broadcast %cst_16 : f32 to vector<1x128xf32>
      %c0_17 = arith.constant 0 : index
      %c0_18 = arith.constant 0 : index
      %26 = vector.load %arg6[%c0_17, %c0_18] : memref<1x128xf32, #tpu.memory_space<vmem>>, vector<1x128xf32>
      tpu.vector_store %arg6[%c0_17, %c0_18], %25 {strides = array<i32>} : memref<1x128xf32, #tpu.memory_space<vmem>>, vector<1x128xf32>,
    } else {
    }
    %c0 = arith.constant 0 : index
    %c0_1 = arith.constant 0 : index
    %c0_2 = arith.constant 0 : index
    %3 = vector.load %arg2[%c0, %c0_1, %c0_2] : memref<1x256x128xbf16, #tpu.memory_space<vmem>>, vector<1x256x128xbf16>
    %4 = vector.shape_cast %3 : vector<1x256x128xbf16> to vector<256x128xbf16>
    %c0_3 = arith.constant 0 : index
    %c0_4 = arith.constant 0 : index
    %5 = vector.load %arg3[%c0_3, %c0_4] : memref<128x128xbf16, #tpu.memory_space<vmem>>, vector<128x128xbf16>
    %cst = arith.constant dense<0.000000e+00> : vector<256x128xf32>
    %6 = tpu.matmul %4, %5, %cst {dimension_numbers = #tpu.dot_dimension_numbers<[1], [0], [0], [1], [0, 0, 1, 1], [], []>} : vector<256x128xbf16>, vector<128x128xbf16>, vector<256x128xf32> -> vector<256x128xf32>
    %c0_5 = arith.constant 0 : index
    %c0_6 = arith.constant 0 : index
    %7 = vector.load %arg4[%c0_5, %c0_6] : memref<1x128xf32, #tpu.memory_space<vmem>>, vector<1x128xf32>
    %8 = vector.broadcast %7 : vector<1x128xf32> to vector<256x128xf32>
    %9 = arith.addf %6, %8 : vector<256x128xf32>
    %cst_7 = arith.constant 0.000000e+00 : f32
    %10 = vector.broadcast %cst_7 : f32 to vector<256x128xf32>
    %11 = arith.subf %10, %9 : vector<256x128xf32>
    %12 = math.exp %11 : vector<256x128xf32>
    %cst_8 = arith.constant 1.000000e+00 : f32
    %13 = vector.broadcast %cst_8 : f32 to vector<256x128xf32>
    %14 = arith.addf %13, %12 : vector<256x128xf32>
    %15 = tpu.reciprocal %14 {approx = true} : vector<256x128xf32> -> vector<256x128xf32>
    %16 = arith.mulf %9, %15 : vector<256x128xf32>
    %c0_9 = arith.constant 0 : index
    %c0_10 = arith.constant 0 : index
    %17 = vector.load %arg6[%c0_9, %c0_10] : memref<1x128xf32, #tpu.memory_space<vmem>>, vector<1x128xf32>
    %cst_11 = arith.constant dense<0.000000e+00> : vector<128xf32>
    %18 = vector.multi_reduction <add>, %16, %cst_11 [0] : vector<256x128xf32> to vector<128xf32>
    %19 = vector.shape_cast %18 : vector<128xf32> to vector<1x128xf32>
    %20 = arith.addf %17, %19 : vector<1x128xf32>
    %c0_12 = arith.constant 0 : index
    %c0_13 = arith.constant 0 : index
    %21 = vector.load %arg6[%c0_12, %c0_13] : memref<1x128xf32, #tpu.memory_space<vmem>>, vector<1x128xf32>
    tpu.vector_store %arg6[%c0_12, %c0_13], %20 {strides = array<i32>} : memref<1x128xf32, #tpu.memory_space<vmem>>, vector<1x128xf32>,
    %c0_i32_14 = arith.constant 0 : i32
    %22 = arith.cmpi eq, %arg1, %c0_i32_14 : i32
    %23 = arith.extui %22 : i1 to i32
    %c0_i32_15 = arith.constant 0 : i32
    %24 = arith.cmpi ne, %23, %c0_i32_15 : i32
    scf.if %24 {
      %c0_16 = arith.constant 0 : index
      %c0_17 = arith.constant 0 : index
      %25 = vector.load %arg6[%c0_16, %c0_17] : memref<1x128xf32, #tpu.memory_space<vmem>>, vector<1x128xf32>
      %cst_18 = arith.constant 3.906250e-03 : f32
      %26 = vector.broadcast %cst_18 : f32 to vector<1x128xf32>
      %27 = arith.mulf %25, %26 : vector<1x128xf32>
      %c0_19 = arith.constant 0 : index
      %c0_20 = arith.constant 0 : index
      %c0_21 = arith.constant 0 : index
      %28 = vector.load %arg5[%c0_19, %c0_20, %c0_21] : memref<1x1x128xf32, #tpu.memory_space<vmem>>, vector<1x1x128xf32>
      %29 = vector.shape_cast %28 : vector<1x1x128xf32> to vector<1x128xf32>
      %30 = vector.shape_cast %27 : vector<1x128xf32> to vector<1x1x128xf32>
      tpu.vector_store %arg5[%c0_19, %c0_20, %c0_21], %30 {strides = array<i32>} : memref<1x1x128xf32, #tpu.memory_space<vmem>>, vector<1x1x128xf32>,
    } else {
    }
    return
  }
  func.func @transform_0(%arg0: i32, %arg1: i32) -> (i32, i32, i32) {
    %c0_i32 = arith.constant 0 : i32
    %c0_i32_0 = arith.constant 0 : i32
    return %arg0, %arg1, %c0_i32 : i32, i32, i32
  }
  func.func @transform_1(%arg0: i32, %arg1: i32) -> (i32, i32) {
    %c0_i32 = arith.constant 0 : i32
    %c0_i32_0 = arith.constant 0 : i32
    %c0_i32_1 = arith.constant 0 : i32
    return %c0_i32, %c0_i32_0 : i32, i32
  }
  func.func @transform_2(%arg0: i32, %arg1: i32) -> (i32, i32) {
    %c0_i32 = arith.constant 0 : i32
    %c0_i32_0 = arith.constant 0 : i32
    %c0_i32_1 = arith.constant 0 : i32
    return %c0_i32, %c0_i32_0 : i32, i32
  }
  func.func @transform_3(%arg0: i32, %arg1: i32) -> (i32, i32, i32) {
    %c0_i32 = arith.constant 0 : i32
    %c0_i32_0 = arith.constant 0 : i32
    %c0_i32_1 = arith.constant 0 : i32
    return %arg0, %c0_i32, %c0_i32_0 : i32, i32, i32
  }
}

module attributes {stable_mosaic.version = 11 : i64} {
  func.func @_fused_head_kernel(%arg0: memref<2x128xf32, #tpu.memory_space<vmem>>, %arg1: memref<2x128xf32, #tpu.memory_space<vmem>>, %arg2: memref<128x2048xbf16, #tpu.memory_space<vmem>>, %arg3: memref<1x2048xf32, #tpu.memory_space<vmem>>, %arg4: memref<128x1280xbf16, #tpu.memory_space<vmem>>, %arg5: memref<1x1280xf32, #tpu.memory_space<vmem>>, %arg6: memref<2048x512xbf16, #tpu.memory_space<vmem>>, %arg7: memref<1280x512xbf16, #tpu.memory_space<vmem>>, %arg8: memref<1x512xf32, #tpu.memory_space<vmem>>, %arg9: memref<512x128xbf16, #tpu.memory_space<vmem>>, %arg10: memref<1x128xf32, #tpu.memory_space<vmem>>, %arg11: memref<2x128xf32, #tpu.memory_space<vmem>>) attributes {dimension_semantics = [], scalar_prefetch = 0 : i64, scratch_operands = 0 : i64, tpu.core_type = #tpu.core_type<tc>} {
    %c0 = arith.constant 0 : index
    %c0_0 = arith.constant 0 : index
    %0 = vector.load %arg0[%c0, %c0_0] : memref<2x128xf32, #tpu.memory_space<vmem>>, vector<2x128xf32>
    %1 = arith.truncf %0 : vector<2x128xf32> to vector<2x128xbf16>
    %c0_1 = arith.constant 0 : index
    %c0_2 = arith.constant 0 : index
    %2 = vector.load %arg2[%c0_1, %c0_2] : memref<128x2048xbf16, #tpu.memory_space<vmem>>, vector<128x2048xbf16>
    %cst = arith.constant dense<0.000000e+00> : vector<2x2048xf32>
    %3 = tpu.matmul %1, %2, %cst {dimension_numbers = #tpu.dot_dimension_numbers<[1], [0], [0], [1], [0, 0, 1, 1], [], []>} : vector<2x128xbf16>, vector<128x2048xbf16>, vector<2x2048xf32> -> vector<2x2048xf32>
    %c0_3 = arith.constant 0 : index
    %c0_4 = arith.constant 0 : index
    %4 = vector.load %arg3[%c0_3, %c0_4] : memref<1x2048xf32, #tpu.memory_space<vmem>>, vector<1x2048xf32>
    %5 = vector.broadcast %4 : vector<1x2048xf32> to vector<2x2048xf32>
    %6 = arith.addf %3, %5 : vector<2x2048xf32>
    %cst_5 = arith.constant 0.000000e+00 : f32
    %7 = vector.broadcast %cst_5 : f32 to vector<2x2048xf32>
    %8 = arith.maximumf %6, %7 : vector<2x2048xf32>
    %c0_6 = arith.constant 0 : index
    %c0_7 = arith.constant 0 : index
    %9 = vector.load %arg1[%c0_6, %c0_7] : memref<2x128xf32, #tpu.memory_space<vmem>>, vector<2x128xf32>
    %10 = arith.truncf %9 : vector<2x128xf32> to vector<2x128xbf16>
    %c0_8 = arith.constant 0 : index
    %c0_9 = arith.constant 0 : index
    %11 = vector.load %arg4[%c0_8, %c0_9] : memref<128x1280xbf16, #tpu.memory_space<vmem>>, vector<128x1280xbf16>
    %cst_10 = arith.constant dense<0.000000e+00> : vector<2x1280xf32>
    %12 = tpu.matmul %10, %11, %cst_10 {dimension_numbers = #tpu.dot_dimension_numbers<[1], [0], [0], [1], [0, 0, 1, 1], [], []>} : vector<2x128xbf16>, vector<128x1280xbf16>, vector<2x1280xf32> -> vector<2x1280xf32>
    %c0_11 = arith.constant 0 : index
    %c0_12 = arith.constant 0 : index
    %13 = vector.load %arg5[%c0_11, %c0_12] : memref<1x1280xf32, #tpu.memory_space<vmem>>, vector<1x1280xf32>
    %14 = vector.broadcast %13 : vector<1x1280xf32> to vector<2x1280xf32>
    %15 = arith.addf %12, %14 : vector<2x1280xf32>
    %cst_13 = arith.constant 0.000000e+00 : f32
    %16 = vector.broadcast %cst_13 : f32 to vector<2x1280xf32>
    %17 = arith.subf %16, %15 : vector<2x1280xf32>
    %18 = math.exp %17 : vector<2x1280xf32>
    %cst_14 = arith.constant 1.000000e+00 : f32
    %19 = vector.broadcast %cst_14 : f32 to vector<2x1280xf32>
    %20 = arith.addf %19, %18 : vector<2x1280xf32>
    %21 = tpu.reciprocal %20 {approx = true} : vector<2x1280xf32> -> vector<2x1280xf32>
    %22 = arith.mulf %15, %21 : vector<2x1280xf32>
    %23 = arith.truncf %8 : vector<2x2048xf32> to vector<2x2048xbf16>
    %c0_15 = arith.constant 0 : index
    %c0_16 = arith.constant 0 : index
    %24 = vector.load %arg6[%c0_15, %c0_16] : memref<2048x512xbf16, #tpu.memory_space<vmem>>, vector<2048x512xbf16>
    %cst_17 = arith.constant dense<0.000000e+00> : vector<2x512xf32>
    %25 = tpu.matmul %23, %24, %cst_17 {dimension_numbers = #tpu.dot_dimension_numbers<[1], [0], [0], [1], [0, 0, 1, 1], [], []>} : vector<2x2048xbf16>, vector<2048x512xbf16>, vector<2x512xf32> -> vector<2x512xf32>
    %26 = arith.truncf %22 : vector<2x1280xf32> to vector<2x1280xbf16>
    %c0_18 = arith.constant 0 : index
    %c0_19 = arith.constant 0 : index
    %27 = vector.load %arg7[%c0_18, %c0_19] : memref<1280x512xbf16, #tpu.memory_space<vmem>>, vector<1280x512xbf16>
    %cst_20 = arith.constant dense<0.000000e+00> : vector<2x512xf32>
    %28 = tpu.matmul %26, %27, %cst_20 {dimension_numbers = #tpu.dot_dimension_numbers<[1], [0], [0], [1], [0, 0, 1, 1], [], []>} : vector<2x1280xbf16>, vector<1280x512xbf16>, vector<2x512xf32> -> vector<2x512xf32>
    %29 = arith.addf %25, %28 : vector<2x512xf32>
    %c0_21 = arith.constant 0 : index
    %c0_22 = arith.constant 0 : index
    %30 = vector.load %arg8[%c0_21, %c0_22] : memref<1x512xf32, #tpu.memory_space<vmem>>, vector<1x512xf32>
    %31 = vector.broadcast %30 : vector<1x512xf32> to vector<2x512xf32>
    %32 = arith.addf %29, %31 : vector<2x512xf32>
    %cst_23 = arith.constant 0.000000e+00 : f32
    %33 = vector.broadcast %cst_23 : f32 to vector<2x512xf32>
    %34 = arith.maximumf %32, %33 : vector<2x512xf32>
    %35 = arith.truncf %34 : vector<2x512xf32> to vector<2x512xbf16>
    %c0_24 = arith.constant 0 : index
    %c0_25 = arith.constant 0 : index
    %36 = vector.load %arg9[%c0_24, %c0_25] : memref<512x128xbf16, #tpu.memory_space<vmem>>, vector<512x128xbf16>
    %cst_26 = arith.constant dense<0.000000e+00> : vector<2x128xf32>
    %37 = tpu.matmul %35, %36, %cst_26 {dimension_numbers = #tpu.dot_dimension_numbers<[1], [0], [0], [1], [0, 0, 1, 1], [], []>} : vector<2x512xbf16>, vector<512x128xbf16>, vector<2x128xf32> -> vector<2x128xf32>
    %c0_27 = arith.constant 0 : index
    %c0_28 = arith.constant 0 : index
    %38 = vector.load %arg10[%c0_27, %c0_28] : memref<1x128xf32, #tpu.memory_space<vmem>>, vector<1x128xf32>
    %39 = vector.broadcast %38 : vector<1x128xf32> to vector<2x128xf32>
    %40 = arith.addf %37, %39 : vector<2x128xf32>
    %c0_29 = arith.constant 0 : index
    %c0_30 = arith.constant 0 : index
    %41 = vector.load %arg11[%c0_29, %c0_30] : memref<2x128xf32, #tpu.memory_space<vmem>>, vector<2x128xf32>
    tpu.vector_store %arg11[%c0_29, %c0_30], %40 {strides = array<i32>} : memref<2x128xf32, #tpu.memory_space<vmem>>, vector<2x128xf32>,
    return
  }
}

</mosaic_0001>

<bundles_post_ra>
// kernel: hybrid_forward.3
= control target key start
LH: loop header
LB: loop body
LE: loop exit
PB: predicated region body
PF: predicated region fallthrough
CT: control target
= control target key end

     0   :  { %s1155_s12 = smov 0   ;;  %s1157_s13 = smov 0   ;;  %s1347_s0 = inlined_call_operand.vmem [shape: bf16[2,256,256], index: 0, kind: input, shape index: {}]   ;;  %s1348_s1 = inlined_call_operand.vmem [shape: bf16[256,128], index: 1, kind: input, shape index: {}]   ;;  %s1349_s2 = inlined_call_operand.vmem [shape: f32[1,128], index: 2, kind: input, shape index: {}]   ;;  %s1350_s3 = inlined_call_operand.vmem [shape: f32[2,1,128], index: 3, kind: output, shape index: {}]  }
   0x1   :  { %s1159_s14 = smov 0  }
   0x2 LB: > { %s25_s15 = sadd.s32 1, %s1128_s13  ;;  %p838_p0 = scmp.ge.s32.totalorder %s1132_s14, 1  ;;  %s1132_s14 = sphi %s1159_s14, %s13_s14   ;;  %s1128_s13 = sphi %s1157_s13, %s1352_s13   ;;  %s1124_s12 = sphi %s1155_s12, %s1351_s12  }
   0x3   : > { %p27_p1 = scmp.ge.s32.totalorder %s25_s15, 2  ;;  %p157_p2 = scmp.lt.s32.totalorder %s1132_s14, 3 }
   0x5   : > { %s1354_s15 = smov (%p27_p1, %s25_s15), 0  ;;  %p158_p3 = pnand %p838_p0, %p157_p2 }
   0x6   : > { %v1046_v0 = vld [vmem:[%s1348_s1 + $0x40] sm:$0xff] (!%p158_p3)   ;;  %v1048_v2 = vld [vmem:[%s1348_s1 + $0x48] sm:$0xff] (!%p158_p3)   ;;  %p185_p4 = scmp.lt.s32.totalorder (!%p158_p3), %s1124_s12, 1  ;;  %v1050_v4 = vld [vmem:[%s1348_s1 + $0x50] sm:$0xff] (!%p158_p3)   ;;  %v1134_v48 = vmov (!%p158_p3), 0.0  }
   0x7   : > { %161 = sbr.rel (%p158_p3) target bundleno = 375 (0x177), region = 32  ;;  %v1047_v1 = vld [vmem:[%s1348_s1] sm:$0xff] (!%p158_p3)   ;;  %893 = vmatprep.subr.bf16.mxu0 (!%p158_p3), %v1046_v0  ;;  %1005 = vmatprep.subr.bf16.mxu1 (!%p158_p3), %v1046_v0  ;;  %v1049_v3 = vld [vmem:[%s1348_s1 + $0x8] sm:$0xff] (!%p158_p3)   ;;  %v1051_v5 = vld [vmem:[%s1348_s1 + $0x10] sm:$0xff] (!%p158_p3)   ;;  %203 = vst [vmem:[#allocation2] sm:$0x1] (!%p158_p3), %v1134_v48 }
   0x8   : > { %894 = vmatpush3.bf16.msra.mxu0 (!%p158_p3), %v1047_v1  ;;  %1013 = vmatpush3.bf16.msra.mxu1 (!%p158_p3), %v1047_v1  ;;  %v1052_v6 = vld [vmem:[%s1348_s1 + $0x58] sm:$0xff] (!%p158_p3)   ;;  %v1054_v8 = vld [vmem:[%s1348_s1 + $0x60] sm:$0xff] (!%p158_p3)   ;;  %v1056_v10 = vld [vmem:[%s1348_s1 + $0x68] sm:$0xff] (!%p158_p3)  }
   0x9   : > { %895 = vmatprep.subr.bf16.mxu0 (!%p158_p3), %v1048_v2  ;;  %1006 = vmatprep.subr.bf16.mxu1 (!%p158_p3), %v1048_v2  ;;  %v1053_v7 = vld [vmem:[%s1348_s1 + $0x18] sm:$0xff] (!%p158_p3)   ;;  %v1055_v9 = vld [vmem:[%s1348_s1 + $0x20] sm:$0xff] (!%p158_p3)   ;;  %v1057_v12 = vld [vmem:[%s1348_s1 + $0x28] sm:$0xff] (!%p158_p3)  }
   0xa   : > { %v1058_v13 = vld [vmem:[%s1348_s1 + $0x70] sm:$0xff] (!%p158_p3)   ;;  %v1060_v16 = vld [vmem:[%s1348_s1 + $0x78] sm:$0xff] (!%p158_p3)   ;;  %v1264_v50 = vld [vmem:[%s1349_s2] ss:$0 sm:$0xff] (!%p158_p3) }
   0xb   : > { %v1059_v15 = vld [vmem:[%s1348_s1 + $0x30] sm:$0xff] (!%p158_p3)   ;;  %v1061_v17 = vld [vmem:[%s1348_s1 + $0x38] sm:$0xff] (!%p158_p3)  }
   0xc   : > { %896 = vmatpush3.bf16.msra.mxu0 (!%p158_p3), %v1049_v3  ;;  %1014 = vmatpush3.bf16.msra.mxu1 (!%p158_p3), %v1049_v3 }
   0xd   : > { %897 = vmatprep.subr.bf16.mxu0 (!%p158_p3), %v1050_v4  ;;  %1007 = vmatprep.subr.bf16.mxu1 (!%p158_p3), %v1050_v4 }
   0xe   : > { %s1356_s12 = smov (!%p185_p4, %s1124_s12), 1 }
   0xf   : > { %s892_s5 = sshll.u32 %s1356_s12, 8  ;;  %s197_s6 = scalar_lea.vmem %s1350_s3, %s1356_s12 }
  0x10   : > { %898 = vmatpush3.bf16.msra.mxu0 %v1051_v5  ;;  %1015 = vmatpush3.bf16.msra.mxu1 %v1051_v5  ;;  %s1206_s10 = scalar_lea.vmem %s1347_s0, %s892_s5 }
  0x11   : > { %899 = vmatprep.subr.bf16.mxu0 %v1052_v6  ;;  %1008 = vmatprep.subr.bf16.mxu1 %v1052_v6  ;;  %v1064_v11 = vld [vmem:[%s1206_s10 + $0x4] ss:$8 sps:$4 sm:$0xff]   ;;  %v1062_v18 = vld [vmem:[%s1206_s10] ss:$8 sps:$4 sm:$0xff]   ;;  %v1065_v19 = vld [vmem:[%s1206_s10 + $0x14] ss:$8 sps:$4 sm:$0xff]  }
  0x12   : > { %563 = vmatprep.mubr.bf16.mxu0 %v1064_v11  ;;  %v1076_v14 = vld [vmem:[%s1206_s10 + $0x84] ss:$8 sps:$4 sm:$0xff]   ;;  %v1074_v20 = vld [vmem:[%s1206_s10 + $0x80] ss:$8 sps:$4 sm:$0xff]   ;;  %v1080_v21 = vld [vmem:[%s1206_s10 + $0x94] ss:$8 sps:$4 sm:$0xff]  }
  0x13   : > { %627 = vmatprep.mubr.bf16.mxu1 %v1076_v14  ;;  %v1067_v22 = vld [vmem:[%s1206_s10 + $0x10] ss:$8 sps:$4 sm:$0xff]   ;;  %v1068_v23 = vld [vmem:[%s1206_s10 + $0x24] ss:$8 sps:$4 sm:$0xff]   ;;  %v1070_v26 = vld [vmem:[%s1206_s10 + $0x20] ss:$8 sps:$4 sm:$0xff]  }
  0x14   : > { %900 = vmatpush3.bf16.msra.mxu0 %v1053_v7  ;;  %1016 = vmatpush3.bf16.msra.mxu1 %v1053_v7  ;;  %v1082_v24 = vld [vmem:[%s1206_s10 + $0x90] ss:$8 sps:$4 sm:$0xff]   ;;  %v1086_v25 = vld [vmem:[%s1206_s10 + $0xa4] ss:$8 sps:$4 sm:$0xff]   ;;  %v1071_v27 = vld [vmem:[%s1206_s10 + $0x34] ss:$8 sps:$4 sm:$0xff]  }
  0x15   : > { %901 = vmatprep.subr.bf16.mxu0 %v1054_v8  ;;  %1009 = vmatprep.subr.bf16.mxu1 %v1054_v8  ;;  %v1088_v28 = vld [vmem:[%s1206_s10 + $0xa0] ss:$8 sps:$4 sm:$0xff]   ;;  %v1092_v29 = vld [vmem:[%s1206_s10 + $0xb4] ss:$8 sps:$4 sm:$0xff]   ;;  %v1073_v30 = vld [vmem:[%s1206_s10 + $0x30] ss:$8 sps:$4 sm:$0xff]  }
  0x16   : > { %v1077_v31 = vld [vmem:[%s1206_s10 + $0x44] ss:$8 sps:$4 sm:$0xff]   ;;  %v1094_v32 = vld [vmem:[%s1206_s10 + $0xb0] ss:$8 sps:$4 sm:$0xff]   ;;  %v1079_v34 = vld [vmem:[%s1206_s10 + $0x40] ss:$8 sps:$4 sm:$0xff]  }
  0x17   : > { %v1098_v33 = vld [vmem:[%s1206_s10 + $0xc4] ss:$8 sps:$4 sm:$0xff]   ;;  %v1083_v35 = vld [vmem:[%s1206_s10 + $0x54] ss:$8 sps:$4 sm:$0xff]   ;;  %v1100_v36 = vld [vmem:[%s1206_s10 + $0xc0] ss:$8 sps:$4 sm:$0xff]  }
  0x18   : > { %902 = vmatpush3.bf16.msra.mxu0 %v1055_v9  ;;  %1017 = vmatpush3.bf16.msra.mxu1 %v1055_v9  ;;  %v1101_v37 = vld [vmem:[%s1206_s10 + $0xd4] ss:$8 sps:$4 sm:$0xff]   ;;  %v1085_v38 = vld [vmem:[%s1206_s10 + $0x50] ss:$8 sps:$4 sm:$0xff]   ;;  %v1089_v39 = vld [vmem:[%s1206_s10 + $0x64] ss:$8 sps:$4 sm:$0xff]  }
  0x19   : > { %903 = vmatprep.subr.bf16.mxu0 %v1056_v10  ;;  %1010 = vmatprep.subr.bf16.mxu1 %v1056_v10  ;;  %v1103_v40 = vld [vmem:[%s1206_s10 + $0xd0] ss:$8 sps:$4 sm:$0xff]   ;;  %v1104_v41 = vld [vmem:[%s1206_s10 + $0xe4] ss:$8 sps:$4 sm:$0xff]   ;;  %v1091_v42 = vld [vmem:[%s1206_s10 + $0x60] ss:$8 sps:$4 sm:$0xff]  }
  0x1a   : > { %v1095_v43 = vld [vmem:[%s1206_s10 + $0x74] ss:$8 sps:$4 sm:$0xff]   ;;  %v1106_v44 = vld [vmem:[%s1206_s10 + $0xe0] ss:$8 sps:$4 sm:$0xff]   ;;  %v1097_v46 = vld [vmem:[%s1206_s10 + $0x70] ss:$8 sps:$4 sm:$0xff]  }
  0x1b   : > { %v1107_v45 = vld [vmem:[%s1206_s10 + $0xf4] ss:$8 sps:$4 sm:$0xff]   ;;  %v1109_v47 = vld [vmem:[%s1206_s10 + $0xf0] ss:$8 sps:$4 sm:$0xff]  }
  0x1c   : > { %904 = vmatpush3.bf16.msra.mxu0 %v1057_v12  ;;  %1018 = vmatpush3.bf16.msra.mxu1 %v1057_v12 }
  0x1d   : > { %905 = vmatprep.subr.bf16.mxu0 %v1058_v13  ;;  %1011 = vmatprep.subr.bf16.mxu1 %v1058_v13 }
  0x20   : > { %906 = vmatpush3.bf16.msra.mxu0 %v1059_v15  ;;  %1019 = vmatpush3.bf16.msra.mxu1 %v1059_v15 }
  0x21   : > { %907 = vmatprep.subr.bf16.mxu0 %v1060_v16  ;;  %1012 = vmatprep.subr.bf16.mxu1 %v1060_v16 }
  0x24   : > { %908 = vmatpush3.bf16.msra.mxu0 %v1061_v17  ;;  %1020 = vmatpush3.bf16.msra.mxu1 %v1061_v17 }
  0x27   : > { %564 = vmatmul.mubr.bf16.vlgmr.msra.gmra.mrb[0].mxu0 %v1062_v18  ;;  %628 = vmatmul.mubr.bf16.vlgmr.msra.gmra.mrb[0].mxu1 %v1074_v20 }
  0x28   : > { %571 = vmatprep.mubr.bf16.mxu0 %v1065_v19  ;;  %635 = vmatprep.mubr.bf16.mxu1 %v1080_v21 }
  0x2f   : > { %572 = vmatmul.mubr.bf16.gmra.mrb[4].mxu0 %v1067_v22  ;;  %636 = vmatmul.mubr.bf16.gmra.mrb[4].mxu1 %v1082_v24 }
  0x30   : > { %579 = vmatprep.mubr.bf16.mxu0 %v1068_v23  ;;  %643 = vmatprep.mubr.bf16.mxu1 %v1086_v25 }
  0x37   : > { %580 = vmatmul.mubr.bf16.gmra.mrb[8].mxu0 %v1070_v26  ;;  %644 = vmatmul.mubr.bf16.gmra.mrb[8].mxu1 %v1088_v28 }
  0x38   : > { %587 = vmatprep.mubr.bf16.mxu0 %v1071_v27  ;;  %651 = vmatprep.mubr.bf16.mxu1 %v1092_v29 }
  0x3f   : > { %588 = vmatmul.mubr.bf16.gmra.mrb[12].mxu0 %v1073_v30  ;;  %652 = vmatmul.mubr.bf16.gmra.mrb[12].mxu1 %v1094_v32 }
  0x40   : > { %595 = vmatprep.mubr.bf16.mxu0 %v1077_v31  ;;  %659 = vmatprep.mubr.bf16.mxu1 %v1098_v33 }
  0x47   : > { %596 = vmatmul.mubr.bf16.gmra.mrb[16].mxu0 %v1079_v34  ;;  %660 = vmatmul.mubr.bf16.gmra.mrb[16].mxu1 %v1100_v36 }
  0x48   : > { %603 = vmatprep.mubr.bf16.mxu0 %v1083_v35  ;;  %667 = vmatprep.mubr.bf16.mxu1 %v1101_v37 }
  0x4f   : > { %604 = vmatmul.mubr.bf16.gmra.mrb[20].mxu0 %v1085_v38  ;;  %668 = vmatmul.mubr.bf16.gmra.mrb[20].mxu1 %v1103_v40 }
  0x50   : > { %611 = vmatprep.mubr.bf16.mxu0 %v1089_v39  ;;  %675 = vmatprep.mubr.bf16.mxu1 %v1104_v41 }
  0x57   : > { %612 = vmatmul.mubr.bf16.gmra.mrb[24].mxu0 %v1091_v42  ;;  %676 = vmatmul.mubr.bf16.gmra.mrb[24].mxu1 %v1106_v44 }
  0x58   : > { %619 = vmatprep.mubr.bf16.mxu0 %v1095_v43  ;;  %683 = vmatprep.mubr.bf16.mxu1 %v1107_v45 }
  0x5f   : > { %620 = vmatmul.mubr.bf16.gmra.mrb[28].mxu0 %v1097_v46  ;;  %684 = vmatmul.mubr.bf16.gmra.mrb[28].mxu1 %v1109_v47 }
  0xfa   : > { %v909_v49 = vpop.f32.mrb[0].mxu0  ;;  %v957_v52 = vpop.f32.mrb[0].mxu1 }
  0xfb   : > { %v910_v51 = vpop.f32.mrb[1].mxu0  ;;  %v958_v55 = vpop.f32.mrb[1].mxu1 }
  0xfc   : > { %v911_v53 = vadd.f32 %v910_v51, %v909_v49  ;;  %v912_v54 = vpop.f32.mrb[2].mxu0  ;;  %v1266_v57 = vadd.f32 %v958_v55, %v957_v52  ;;  %v960_v58 = vpop.f32.mrb[2].mxu1 }
  0xfd   : > { %v913_v56 = vpop.f32.mrb[3].mxu0  ;;  %v961_v61 = vpop.f32.mrb[3].mxu1 }
  0xfe   : > { %v566_v59 = vadd.f32 %v911_v53, %v1264_v50  ;;  %v914_v60 = vadd.f32 %v913_v56, %v912_v54  ;;  %v1269_v62 = vadd.f32 %v961_v61, %v960_v58 }
 0x100   : > { %v569_v63 = vadd.f32 %v914_v60, %v1264_v50  ;;  %v692_v0 = vmax.f32 %v566_v59, 0.0 }
 0x102   : > { %v693_v1 = vmax.f32 %v569_v63, 0.0  ;;  %v915_v2 = vpop.f32.mrb[4].mxu0  ;;  %v963_v4 = vpop.f32.mrb[4].mxu1 }
 0x103   : > { %v916_v3 = vpop.f32.mrb[5].mxu0  ;;  %v964_v8 = vpop.f32.mrb[5].mxu1 }
 0x104   : > { %v725_v5 = vadd.f32 %v693_v1, %v692_v0  ;;  %v917_v6 = vadd.f32 %v916_v3, %v915_v2  ;;  %v918_v7 = vpop.f32.mrb[6].mxu0  ;;  %v1272_v10 = vadd.f32 %v964_v8, %v963_v4  ;;  %v966_v11 = vpop.f32.mrb[6].mxu1 }
 0x105   : > { %v919_v9 = vpop.f32.mrb[7].mxu0  ;;  %v967_v14 = vpop.f32.mrb[7].mxu1 }
 0x106   : > { %v574_v12 = vadd.f32 %v917_v6, %v1264_v50  ;;  %v920_v13 = vadd.f32 %v919_v9, %v918_v7  ;;  %v1275_v15 = vadd.f32 %v967_v14, %v966_v11 }
 0x108   : > { %v694_v16 = vmax.f32 %v574_v12, 0.0  ;;  %v577_v17 = vadd.f32 %v920_v13, %v1264_v50 }
 0x10a   : > { %v726_v18 = vadd.f32 %v725_v5, %v694_v16  ;;  %v695_v19 = vmax.f32 %v577_v17, 0.0  ;;  %v921_v20 = vpop.f32.mrb[8].mxu0  ;;  %v969_v22 = vpop.f32.mrb[8].mxu1 }
 0x10b   : > { %v922_v21 = vpop.f32.mrb[9].mxu0  ;;  %v970_v26 = vpop.f32.mrb[9].mxu1 }
 0x10c   : > { %v727_v23 = vadd.f32 %v726_v18, %v695_v19  ;;  %v923_v24 = vadd.f32 %v922_v21, %v921_v20  ;;  %v924_v25 = vpop.f32.mrb[10].mxu0  ;;  %v1278_v28 = vadd.f32 %v970_v26, %v969_v22  ;;  %v972_v29 = vpop.f32.mrb[10].mxu1 }
 0x10d   : > { %v925_v27 = vpop.f32.mrb[11].mxu0  ;;  %v973_v32 = vpop.f32.mrb[11].mxu1 }
 0x10e   : > { %v582_v30 = vadd.f32 %v923_v24, %v1264_v50  ;;  %v926_v31 = vadd.f32 %v925_v27, %v924_v25  ;;  %v1281_v33 = vadd.f32 %v973_v32, %v972_v29 }
 0x110   : > { %v696_v34 = vmax.f32 %v582_v30, 0.0  ;;  %v585_v35 = vadd.f32 %v926_v31, %v1264_v50 }
 0x112   : > { %v728_v36 = vadd.f32 %v727_v23, %v696_v34  ;;  %v697_v37 = vmax.f32 %v585_v35, 0.0  ;;  %v927_v38 = vpop.f32.mrb[12].mxu0  ;;  %v975_v40 = vpop.f32.mrb[12].mxu1 }
 0x113   : > { %v928_v39 = vpop.f32.mrb[13].mxu0  ;;  %v976_v44 = vpop.f32.mrb[13].mxu1 }
 0x114   : > { %v729_v41 = vadd.f32 %v728_v36, %v697_v37  ;;  %v929_v42 = vadd.f32 %v928_v39, %v927_v38  ;;  %v930_v43 = vpop.f32.mrb[14].mxu0  ;;  %v1284_v46 = vadd.f32 %v976_v44, %v975_v40  ;;  %v978_v47 = vpop.f32.mrb[14].mxu1 }
 0x115   : > { %v931_v45 = vpop.f32.mrb[15].mxu0  ;;  %v979_v51 = vpop.f32.mrb[15].mxu1 }
 0x116   : > { %v590_v48 = vadd.f32 %v929_v42, %v1264_v50  ;;  %v932_v49 = vadd.f32 %v931_v45, %v930_v43  ;;  %v1287_v52 = vadd.f32 %v979_v51, %v978_v47 }
 0x118   : > { %v698_v53 = vmax.f32 %v590_v48, 0.0  ;;  %v593_v54 = vadd.f32 %v932_v49, %v1264_v50 }
 0x11a   : > { %v730_v55 = vadd.f32 %v729_v41, %v698_v53  ;;  %v699_v56 = vmax.f32 %v593_v54, 0.0  ;;  %v933_v58 = vpop.f32.mrb[16].mxu0  ;;  %v981_v60 = vpop.f32.mrb[16].mxu1 }
 0x11b   : > { %v934_v59 = vpop.f32.mrb[17].mxu0  ;;  %v982_v1 = vpop.f32.mrb[17].mxu1 }
 0x11c   : > { %v731_v61 = vadd.f32 %v730_v55, %v699_v56  ;;  %v935_v63 = vadd.f32 %v934_v59, %v933_v58  ;;  %v936_v0 = vpop.f32.mrb[18].mxu0  ;;  %v1290_v3 = vadd.f32 %v982_v1, %v981_v60  ;;  %v984_v4 = vpop.f32.mrb[18].mxu1 }
 0x11d   : > { %v937_v2 = vpop.f32.mrb[19].mxu0  ;;  %v985_v7 = vpop.f32.mrb[19].mxu1 }
 0x11e   : > { %v598_v5 = vadd.f32 %v935_v63, %v1264_v50  ;;  %v938_v6 = vadd.f32 %v937_v2, %v936_v0  ;;  %v1293_v8 = vadd.f32 %v985_v7, %v984_v4 }
 0x120   : > { %v700_v9 = vmax.f32 %v598_v5, 0.0  ;;  %v601_v11 = vadd.f32 %v938_v6, %v1264_v50 }
 0x122   : > { %v732_v12 = vadd.f32 %v731_v61, %v700_v9  ;;  %v701_v13 = vmax.f32 %v601_v11, 0.0  ;;  %v939_v14 = vpop.f32.mrb[20].mxu0  ;;  %v987_v17 = vpop.f32.mrb[20].mxu1  ;;  %v630_v11 = vadd.f32 %v1266_v57, %v1264_v50  ;;  %v646_v57 = vadd.f32 %v1278_v28, %v1264_v50 }
 0x123   : > { %v940_v16 = vpop.f32.mrb[21].mxu0  ;;  %v988_v21 = vpop.f32.mrb[21].mxu1  ;;  %v662_v28 = vadd.f32 %v1290_v3, %v1264_v50 }
 0x124   : > { %v733_v18 = vadd.f32 %v732_v12, %v701_v13  ;;  %v941_v19 = vadd.f32 %v940_v16, %v939_v14  ;;  %v942_v20 = vpop.f32.mrb[22].mxu0  ;;  %v1296_v23 = vadd.f32 %v988_v21, %v987_v17  ;;  %v990_v24 = vpop.f32.mrb[22].mxu1  ;;  %v633_v14 = vadd.f32 %v1269_v62, %v1264_v50 }
 0x125   : > { %v943_v22 = vpop.f32.mrb[23].mxu0  ;;  %v991_v27 = vpop.f32.mrb[23].mxu1  ;;  %v649_v62 = vadd.f32 %v1281_v33, %v1264_v50  ;;  %v665_v33 = vadd.f32 %v1293_v8, %v1264_v50 }
 0x126   : > { %v606_v25 = vadd.f32 %v941_v19, %v1264_v50  ;;  %v944_v26 = vadd.f32 %v943_v22, %v942_v20  ;;  %v1299_v29 = vadd.f32 %v991_v27, %v990_v24  ;;  %v638_v19 = vadd.f32 %v1272_v10, %v1264_v50 }
 0x127   : > { %v709_v21 = vmax.f32 %v633_v14, 0.0  ;;  %v641_v22 = vadd.f32 %v1275_v15, %v1264_v50  ;;  %v654_v10 = vadd.f32 %v1284_v46, %v1264_v50  ;;  %v657_v15 = vadd.f32 %v1287_v52, %v1264_v50 }
 0x128   : > { %v702_v30 = vmax.f32 %v606_v25, 0.0  ;;  %v609_v31 = vadd.f32 %v944_v26, %v1264_v50  ;;  %v710_v25 = vmax.f32 %v638_v19, 0.0  ;;  %v670_v46 = vadd.f32 %v1296_v23, %v1264_v50 }
 0x129   : > { %v711_v27 = vmax.f32 %v641_v22, 0.0  ;;  %v673_v52 = vadd.f32 %v1299_v29, %v1264_v50 }
 0x12a   : > { %v734_v32 = vadd.f32 %v733_v18, %v702_v30  ;;  %v703_v34 = vmax.f32 %v609_v31, 0.0  ;;  %v945_v35 = vpop.f32.mrb[24].mxu0  ;;  %v993_v37 = vpop.f32.mrb[24].mxu1  ;;  %v708_v18 = vmax.f32 %v630_v11, 0.0  ;;  %v712_v31 = vmax.f32 %v646_v57, 0.0 }
 0x12b   : > { %v946_v36 = vpop.f32.mrb[25].mxu0  ;;  %v994_v41 = vpop.f32.mrb[25].mxu1 }
 0x12c   : > { %v735_v38 = vadd.f32 %v734_v32, %v703_v34  ;;  %v947_v39 = vadd.f32 %v946_v36, %v945_v35  ;;  %v948_v40 = vpop.f32.mrb[26].mxu0  ;;  %v995_v43 = vadd.f32 %v994_v41, %v993_v37  ;;  %v996_v44 = vpop.f32.mrb[26].mxu1  ;;  %v713_v34 = vmax.f32 %v649_v62, 0.0 }
 0x12d   : > { %v949_v42 = vpop.f32.mrb[27].mxu0  ;;  %v997_v48 = vpop.f32.mrb[27].mxu1  ;;  %v714_v36 = vmax.f32 %v654_v10, 0.0 }
 0x12e   : > { %v614_v45 = vadd.f32 %v947_v39, %v1264_v50  ;;  %v950_v47 = vadd.f32 %v949_v42, %v948_v40  ;;  %v998_v49 = vadd.f32 %v997_v48, %v996_v44  ;;  %v716_v40 = vmax.f32 %v662_v28, 0.0 }
 0x12f   : > { %v717_v44 = vmax.f32 %v665_v33, 0.0  ;;  %v678_v3 = vadd.f32 %v995_v43, %v1264_v50 }
 0x130   : > { %v704_v51 = vmax.f32 %v614_v45, 0.0  ;;  %v617_v53 = vadd.f32 %v950_v47, %v1264_v50  ;;  %v718_v47 = vmax.f32 %v670_v46, 0.0 }
 0x132   : > { %v736_v54 = vadd.f32 %v735_v38, %v704_v51  ;;  %v705_v55 = vmax.f32 %v617_v53, 0.0  ;;  %v951_v56 = vpop.f32.mrb[28].mxu0  ;;  %v999_v59 = vpop.f32.mrb[28].mxu1  ;;  %v715_v38 = vmax.f32 %v657_v15, 0.0  ;;  %v719_v51 = vmax.f32 %v673_v52, 0.0 }
 0x133   : > { %v952_v58 = vpop.f32.mrb[29].mxu0  ;;  %v1000_v0 = vpop.f32.mrb[29].mxu1  ;;  %v681_v53 = vadd.f32 %v998_v49, %v1264_v50  ;;  %v724_v49 = vld [vmem:[#allocation2] sm:$0x1] }
 0x134   : > { %v737_v60 = vadd.f32 %v736_v54, %v705_v55  ;;  %v953_v61 = vadd.f32 %v952_v58, %v951_v56  ;;  %v954_v63 = vpop.f32.mrb[30].mxu0  ;;  %v1001_v2 = vadd.f32 %v1000_v0, %v999_v59  ;;  %v1002_v4 = vpop.f32.mrb[30].mxu1  ;;  %v720_v55 = vmax.f32 %v678_v3, 0.0 }
 0x135   : > { %v955_v1 = vpop.f32.mrb[31].mxu0  ;;  %v1003_v7 = vpop.f32.mrb[31].mxu1  ;;  %v721_v58 = vmax.f32 %v681_v53, 0.0 }
 0x136   : > { %v622_v5 = vadd.f32 %v953_v61, %v1264_v50  ;;  %v956_v6 = vadd.f32 %v955_v1, %v954_v63  ;;  %v1004_v9 = vadd.f32 %v1003_v7, %v1002_v4  ;;  %v686_v8 = vadd.f32 %v1001_v2, %v1264_v50 }
 0x138   : > { %v706_v12 = vmax.f32 %v622_v5, 0.0  ;;  %v625_v13 = vadd.f32 %v956_v6, %v1264_v50  ;;  %v722_v23 = vmax.f32 %v686_v8, 0.0  ;;  %v689_v59 = vadd.f32 %v1004_v9, %v1264_v50 }
 0x13a   : > { %v738_v16 = vadd.f32 %v737_v60, %v706_v12  ;;  %v707_v17 = vmax.f32 %v625_v13, 0.0  ;;  %v723_v61 = vmax.f32 %v689_v59, 0.0 }
 0x13c   : > { %v739_v20 = vadd.f32 %v738_v16, %v707_v17 }
 0x13e   : > { %v740_v24 = vadd.f32 %v739_v20, %v708_v18 }
 0x140   : > { %v741_v26 = vadd.f32 %v740_v24, %v709_v21 }
 0x142   : > { %v742_v30 = vadd.f32 %v741_v26, %v710_v25 }
 0x144   : > { %v743_v32 = vadd.f32 %v742_v30, %v711_v27 }
 0x146   : > { %v744_v35 = vadd.f32 %v743_v32, %v712_v31 }
 0x148   : > { %v745_v37 = vadd.f32 %v744_v35, %v713_v34 }
 0x14a   : > { %v746_v39 = vadd.f32 %v745_v37, %v714_v36 }
 0x14c   : > { %v747_v41 = vadd.f32 %v746_v39, %v715_v38 }
 0x14e   : > { %v748_v42 = vadd.f32 %v747_v41, %v716_v40 }
 0x150   : > { %v749_v45 = vadd.f32 %v748_v42, %v717_v44 }
 0x152   : > { %v750_v48 = vadd.f32 %v749_v45, %v718_v47 }
 0x154   : > { %v751_v54 = vadd.f32 %v750_v48, %v719_v51 }
 0x156   : > { %v752_v56 = vadd.f32 %v751_v54, %v720_v55 }
 0x158   : > { %v753_v60 = vadd.f32 %v752_v56, %v721_v58 }
 0x15a   : > { %v754_v29 = vadd.f32 %v753_v60, %v722_v23 }
 0x15c   : > { %v755_v63 = vadd.f32 %v754_v29, %v723_v61 }
 0x15e   : > { %v756_v0 = vrot.slane %v755_v63, 4 }
 0x160   : > { %v757_v43 = vadd.f32 %v756_v0, %v755_v63 }
 0x162   : > { %v758_v1 = vrot.slane %v757_v43, 2 }
 0x164   : > { %v759_v4 = vadd.f32 %v758_v1, %v757_v43 }
 0x166   : > { %v760_v5 = vrot.slane %v759_v4, 1 }
 0x168   : > { %v761_v6 = vadd.f32 %v760_v5, %v759_v4 }
 0x16a   : > { %v762_v2 = vadd.f32 %v761_v6, %v724_v49 }
 0x16c   : > { %763 = vst [vmem:[#allocation2] sm:$0x1] %v762_v2 }
 0x173   : > { %v767_v7 = vld [vmem:[#allocation2] sm:$0x1] }
 0x174   : > { %v768_v11 = vmul.f32 0.00390625, %v767_v7 }
 0x176   : > { %769 = vst [vmem:[%s197_s6] sm:$0x1] %v768_v11 }
 0x177 PF: > { %s13_s14 = sadd.s32 1, %s1132_s14   ;;  %s1351_s12 = smov %s1128_s13 }
 0x178   : > { %p10_p5 = scmp.ge.s32.totalorder %s13_s14, 4   ;;  %s1352_s13 = smov %s1354_s15 }
 0x17a   :  { %12 = sbr.rel (!%p10_p5) target bundleno = 2 (0x2), region = 70 }

// kernel: hybrid_forward.4
= control target key start
LH: loop header
LB: loop body
LE: loop exit
PB: predicated region body
PF: predicated region fallthrough
CT: control target
= control target key end

     0   :  { %s1205_s12 = smov 0   ;;  %s1207_s13 = smov 0   ;;  %s1497_s0 = inlined_call_operand.vmem [shape: bf16[2,256,128], index: 0, kind: input, shape index: {}]   ;;  %s1498_s1 = inlined_call_operand.vmem [shape: bf16[128,128], index: 1, kind: input, shape index: {}]   ;;  %s1499_s2 = inlined_call_operand.vmem [shape: f32[1,128], index: 2, kind: input, shape index: {}]   ;;  %s1500_s3 = inlined_call_operand.vmem [shape: f32[2,1,128], index: 3, kind: output, shape index: {}]  }
   0x1   :  { %s1209_s14 = smov 0  }
   0x2 LB: > { %s25_s15 = sadd.s32 1, %s1178_s13  ;;  %p864_p0 = scmp.ge.s32.totalorder %s1182_s14, 1  ;;  %s1182_s14 = sphi %s1209_s14, %s13_s14   ;;  %s1178_s13 = sphi %s1207_s13, %s1502_s13   ;;  %s1174_s12 = sphi %s1205_s12, %s1501_s12  }
   0x3   : > { %p27_p1 = scmp.ge.s32.totalorder %s25_s15, 2  ;;  %p156_p2 = scmp.lt.s32.totalorder %s1182_s14, 3 }
   0x5   : > { %s1504_s15 = smov (%p27_p1, %s25_s15), 0  ;;  %p157_p3 = pnand %p864_p0, %p156_p2 }
   0x6   : > { %v1008_v0 = vld [vmem:[%s1498_s1] sm:$0xff] (!%p157_p3)   ;;  %p183_p4 = scmp.lt.s32.totalorder (!%p157_p3), %s1174_s12, 1  ;;  %v1009_v1 = vld [vmem:[%s1498_s1 + $0x8] sm:$0xff] (!%p157_p3)   ;;  %v1010_v2 = vld [vmem:[%s1498_s1 + $0x10] sm:$0xff] (!%p157_p3)   ;;  %v1184_v24 = vmov (!%p157_p3), 0.0  }
   0x7   : > { %160 = sbr.rel (%p157_p3) target bundleno = 394 (0x18a), region = 32  ;;  %919 = vmatprep.subr.bf16.mxu0 (!%p157_p3), %v1008_v0  ;;  %967 = vmatprep.subr.bf16.mxu1 (!%p157_p3), %v1008_v0  ;;  %v1011_v3 = vld [vmem:[%s1498_s1 + $0x18] sm:$0xff] (!%p157_p3)   ;;  %v1012_v6 = vld [vmem:[%s1498_s1 + $0x20] sm:$0xff] (!%p157_p3)   ;;  %v1013_v7 = vld [vmem:[%s1498_s1 + $0x28] sm:$0xff] (!%p157_p3)   ;;  %200 = vst [vmem:[#allocation2] sm:$0x1] (!%p157_p3), %v1184_v24 }
   0x8   : > { %920 = vmatpush3.bf16.msra.mxu0 (!%p157_p3), %v1008_v0  ;;  %975 = vmatpush3.bf16.msra.mxu1 (!%p157_p3), %v1008_v0  ;;  %v1014_v8 = vld [vmem:[%s1498_s1 + $0x30] sm:$0xff] (!%p157_p3)   ;;  %v1015_v9 = vld [vmem:[%s1498_s1 + $0x38] sm:$0xff] (!%p157_p3)   ;;  %v1274_v25 = vld [vmem:[%s1499_s2] ss:$0 sm:$0xff] (!%p157_p3) }
   0x9   : > { %921 = vmatprep.subr.bf16.mxu0 (!%p157_p3), %v1009_v1  ;;  %968 = vmatprep.subr.bf16.mxu1 (!%p157_p3), %v1009_v1 }
   0xc   : > { %922 = vmatpush3.bf16.msra.mxu0 (!%p157_p3), %v1009_v1  ;;  %976 = vmatpush3.bf16.msra.mxu1 (!%p157_p3), %v1009_v1 }
   0xd   : > { %923 = vmatprep.subr.bf16.mxu0 (!%p157_p3), %v1010_v2  ;;  %969 = vmatprep.subr.bf16.mxu1 (!%p157_p3), %v1010_v2 }
   0xe   : > { %s1506_s12 = smov (!%p183_p4, %s1174_s12), 1 }
   0xf   : > { %s894_s22 = sshll.u32 %s1506_s12, 7  ;;  %s194_s17 = scalar_lea.vmem %s1500_s3, %s1506_s12 }
  0x10   : > { %s1238_s25 = scalar_lea.vmem %s1497_s0, %s894_s22  ;;  %924 = vmatpush3.bf16.msra.mxu0 %v1010_v2  ;;  %977 = vmatpush3.bf16.msra.mxu1 %v1010_v2 }
  0x11   : > { %v1016_v4 = vld [vmem:[%s1238_s25] sm:$0xff]   ;;  %925 = vmatprep.subr.bf16.mxu0 %v1011_v3  ;;  %970 = vmatprep.subr.bf16.mxu1 %v1011_v3  ;;  %v1017_v10 = vld [vmem:[%s1238_s25 + $0x8] sm:$0xff]   ;;  %v1020_v12 = vld [vmem:[%s1238_s25 + $0x10] sm:$0xff]  }
  0x12   : > { %935 = vmatprep.mubr.bf16.mxu0 %v1016_v4  ;;  %v1018_v5 = vld [vmem:[%s1238_s25 + $0x40] sm:$0xff]   ;;  %v1019_v11 = vld [vmem:[%s1238_s25 + $0x48] sm:$0xff]   ;;  %v1022_v13 = vld [vmem:[%s1238_s25 + $0x50] sm:$0xff]  }
  0x13   : > { %951 = vmatprep.mubr.bf16.mxu1 %v1018_v5  ;;  %v1021_v14 = vld [vmem:[%s1238_s25 + $0x18] sm:$0xff]   ;;  %v1024_v16 = vld [vmem:[%s1238_s25 + $0x20] sm:$0xff]   ;;  %v1025_v18 = vld [vmem:[%s1238_s25 + $0x28] sm:$0xff]  }
  0x14   : > { %926 = vmatpush3.bf16.msra.mxu0 %v1011_v3  ;;  %978 = vmatpush3.bf16.msra.mxu1 %v1011_v3  ;;  %v1023_v15 = vld [vmem:[%s1238_s25 + $0x58] sm:$0xff]   ;;  %v1026_v17 = vld [vmem:[%s1238_s25 + $0x60] sm:$0xff]   ;;  %v1027_v19 = vld [vmem:[%s1238_s25 + $0x68] sm:$0xff]  }
  0x15   : > { %927 = vmatprep.subr.bf16.mxu0 %v1012_v6  ;;  %971 = vmatprep.subr.bf16.mxu1 %v1012_v6  ;;  %v1028_v20 = vld [vmem:[%s1238_s25 + $0x30] sm:$0xff]   ;;  %v1029_v22 = vld [vmem:[%s1238_s25 + $0x38] sm:$0xff]  }
  0x16   : > { %v1030_v21 = vld [vmem:[%s1238_s25 + $0x70] sm:$0xff]   ;;  %v1031_v23 = vld [vmem:[%s1238_s25 + $0x78] sm:$0xff]  }
  0x18   : > { %928 = vmatpush3.bf16.msra.mxu0 %v1012_v6  ;;  %979 = vmatpush3.bf16.msra.mxu1 %v1012_v6 }
  0x19   : > { %929 = vmatprep.subr.bf16.mxu0 %v1013_v7  ;;  %972 = vmatprep.subr.bf16.mxu1 %v1013_v7 }
  0x1c   : > { %930 = vmatpush3.bf16.msra.mxu0 %v1013_v7  ;;  %980 = vmatpush3.bf16.msra.mxu1 %v1013_v7 }
  0x1d   : > { %931 = vmatprep.subr.bf16.mxu0 %v1014_v8  ;;  %973 = vmatprep.subr.bf16.mxu1 %v1014_v8 }
  0x20   : > { %932 = vmatpush3.bf16.msra.mxu0 %v1014_v8  ;;  %981 = vmatpush3.bf16.msra.mxu1 %v1014_v8 }
  0x21   : > { %933 = vmatprep.subr.bf16.mxu0 %v1015_v9  ;;  %974 = vmatprep.subr.bf16.mxu1 %v1015_v9 }
  0x24   : > { %934 = vmatpush3.bf16.msra.mxu0 %v1015_v9  ;;  %982 = vmatpush3.bf16.msra.mxu1 %v1015_v9 }
  0x27   : > { %936 = vmatmul.mubr.bf16.vlgmr.msra.gmra.mrb[0].mxu0 %v1017_v10  ;;  %952 = vmatmul.mubr.bf16.vlgmr.msra.gmra.mrb[0].mxu1 %v1019_v11 }
  0x28   : > { %939 = vmatprep.mubr.bf16.mxu0 %v1020_v12  ;;  %955 = vmatprep.mubr.bf16.mxu1 %v1022_v13 }
  0x2f   : > { %940 = vmatmul.mubr.bf16.gmra.mrb[4].mxu0 %v1021_v14  ;;  %956 = vmatmul.mubr.bf16.gmra.mrb[4].mxu1 %v1023_v15 }
  0x30   : > { %943 = vmatprep.mubr.bf16.mxu0 %v1024_v16  ;;  %959 = vmatprep.mubr.bf16.mxu1 %v1026_v17 }
  0x37   : > { %944 = vmatmul.mubr.bf16.gmra.mrb[8].mxu0 %v1025_v18  ;;  %960 = vmatmul.mubr.bf16.gmra.mrb[8].mxu1 %v1027_v19 }
  0x38   : > { %947 = vmatprep.mubr.bf16.mxu0 %v1028_v20  ;;  %963 = vmatprep.mubr.bf16.mxu1 %v1030_v21 }
  0x3f   : > { %948 = vmatmul.mubr.bf16.gmra.mrb[12].mxu0 %v1029_v22  ;;  %964 = vmatmul.mubr.bf16.gmra.mrb[12].mxu1 %v1031_v23 }
  0xfa   : > { %v937_v26 = vpop.f32.mrb[0].mxu0  ;;  %v1276_v27 = vpop.f32.mrb[0].mxu1 }
  0xfb   : > { %v1279_v28 = vadd.f32 %v937_v26, %v1274_v25  ;;  %v434_v29 = vpop.f32.mrb[1].mxu0  ;;  %v1281_v30 = vpop.f32.mrb[1].mxu1 }
  0xfc   : > { %v1284_v31 = vadd.f32 %v1274_v25, %v434_v29  ;;  %v938_v32 = vpop.f32.mrb[2].mxu0  ;;  %v1286_v33 = vpop.f32.mrb[2].mxu1 }
  0xfd   : > { %v563_v34 = vsub.f32 0.0, %v1279_v28  ;;  %v1290_v35 = vadd.f32 %v938_v32, %v1274_v25  ;;  %v437_v36 = vpop.f32.mrb[3].mxu0  ;;  %v1292_v37 = vpop.f32.mrb[3].mxu1 }
  0xfe   : > { %v561_v38 = vsub.f32 0.0, %v1284_v31  ;;  %v1296_v39 = vadd.f32 %v1274_v25, %v437_v36 }
  0xff   : > { %v597_v40 = vmul.f32 1.442695, %v563_v34  ;;  %v564_v41 = vsub.f32 0.0, %v1290_v35 }
 0x100   : > { %v593_v42 = vmul.f32 1.442695, %v561_v38  ;;  %v562_v43 = vsub.f32 0.0, %v1296_v39 }
 0x101   : > { %1032 = vpow2.f32 %v597_v40  ;;  %v599_v44 = vmul.f32 1.442695, %v564_v41 }
 0x102   : > { %1034 = vpow2.f32 %v593_v42  ;;  %v595_v45 = vmul.f32 1.442695, %v562_v43  ;;  %v941_v46 = vpop.f32.mrb[4].mxu0  ;;  %v1300_v47 = vpop.f32.mrb[4].mxu1 }
 0x103   : > { %v450_v48 = vpop.f32.mrb[5].mxu0  ;;  %v1302_v49 = vpop.f32.mrb[5].mxu1  ;;  %1036 = vpow2.f32 %v599_v44  ;;  %v1313_v56 = vadd.f32 %v941_v46, %v1274_v25 }
 0x104   : > { %v1305_v50 = vadd.f32 %v1274_v25, %v450_v48  ;;  %v942_v51 = vpop.f32.mrb[6].mxu0  ;;  %v1307_v52 = vpop.f32.mrb[6].mxu1  ;;  %1038 = vpow2.f32 %v595_v45 }
 0x105   : > { %v453_v53 = vpop.f32.mrb[7].mxu0  ;;  %v1309_v54 = vpop.f32.mrb[7].mxu1  ;;  %v567_v0 = vsub.f32 0.0, %v1313_v56  ;;  %v1323_v4 = vadd.f32 %v942_v51, %v1274_v25 }
 0x106   : > { %v565_v55 = vsub.f32 0.0, %v1305_v50  ;;  %v1328_v9 = vadd.f32 %v1274_v25, %v453_v53 }
 0x107   : > { %v605_v11 = vmul.f32 1.442695, %v567_v0  ;;  %v568_v14 = vsub.f32 0.0, %v1323_v4 }
 0x108   : > { %v601_v57 = vmul.f32 1.442695, %v565_v55  ;;  %v566_v18 = vsub.f32 0.0, %v1328_v9 }
 0x109   : > { %v607_v29 = vmul.f32 1.442695, %v568_v14 }
 0x10a   : > { %1040 = vpow2.f32 %v601_v57  ;;  %v945_v58 = vpop.f32.mrb[8].mxu0  ;;  %v1315_v59 = vpop.f32.mrb[8].mxu1  ;;  %v603_v40 = vmul.f32 1.442695, %v566_v18 }
 0x10b   : > { %v1033_v60 = vpop.eup %1032  ;;  %v466_v61 = vpop.f32.mrb[9].mxu0  ;;  %v1332_v15 = vadd.f32 %v945_v58, %v1274_v25 }
 0x10c   : > { %v1317_v62 = vpop.f32.mrb[9].mxu1  ;;  %v1035_v63 = vpop.eup %1034  ;;  %v659_v7 = vadd.f32 1.0, %v1033_v60  ;;  %v1338_v19 = vadd.f32 %v1274_v25, %v466_v61 }
 0x10d   : > { %v946_v1 = vpop.f32.mrb[10].mxu0  ;;  %v1320_v2 = vpop.f32.mrb[10].mxu1  ;;  %v657_v3 = vadd.f32 1.0, %v1035_v63  ;;  %v571_v38 = vsub.f32 0.0, %v1332_v15 }
 0x10e   : > { %v469_v5 = vpop.f32.mrb[11].mxu0  ;;  %v1037_v6 = vpop.eup %1036  ;;  %v1345_v32 = vadd.f32 %v946_v1, %v1274_v25  ;;  %v569_v41 = vsub.f32 0.0, %v1338_v19 }
 0x10f   : > { %v1325_v8 = vpop.f32.mrb[11].mxu1  ;;  %v1039_v10 = vpop.eup %1038  ;;  %1042 = vrcp.f32 %v657_v3  ;;  %v660_v12 = vadd.f32 1.0, %v1037_v6  ;;  %v1352_v42 = vadd.f32 %v1274_v25, %v469_v5  ;;  %v613_v44 = vmul.f32 1.442695, %v571_v38 }
 0x110   : > { %v658_v13 = vadd.f32 1.0, %v1039_v10  ;;  %1044 = vrcp.f32 %v659_v7  ;;  %v572_v43 = vsub.f32 0.0, %v1345_v32  ;;  %v609_v46 = vmul.f32 1.442695, %v569_v41 }
 0x111   : > { %v570_v48 = vsub.f32 0.0, %v1352_v42 }
 0x112   : > { %v949_v16 = vpop.f32.mrb[12].mxu0  ;;  %v1334_v17 = vpop.f32.mrb[12].mxu1  ;;  %1046 = vrcp.f32 %v658_v13  ;;  %v615_v57 = vmul.f32 1.442695, %v572_v43 }
 0x113   : > { %v482_v20 = vpop.f32.mrb[13].mxu0  ;;  %v1340_v21 = vpop.f32.mrb[13].mxu1  ;;  %1048 = vpow2.f32 %v605_v11  ;;  %v611_v0 = vmul.f32 1.442695, %v570_v48 }
 0x114   : > { %v1041_v22 = vpop.eup %1040  ;;  %v950_v23 = vpop.f32.mrb[14].mxu0  ;;  %1050 = vrcp.f32 %v660_v12  ;;  %v1357_v51 = vadd.f32 %v1274_v25, %v482_v20 }
 0x115   : > { %v1342_v24 = vpop.f32.mrb[14].mxu1  ;;  %v661_v26 = vadd.f32 1.0, %v1041_v22  ;;  %v485_v34 = vpop.f32.mrb[15].mxu0 }
 0x116   : > { %v1347_v36 = vpop.f32.mrb[15].mxu1  ;;  %v573_v1 = vsub.f32 0.0, %v1357_v51 }
 0x117   : > { %1052 = vrcp.f32 %v661_v26 }
 0x118   : > { %1054 = vpow2.f32 %v607_v29 }
 0x119   : > { %v1043_v45 = vpop.eup %1042  ;;  %1056 = vpow2.f32 %v603_v40  ;;  %v1373_v40 = vadd.f32 %v1274_v25, %v1281_v30 }
 0x11a   : > { %v1045_v53 = vpop.eup %1044  ;;  %v721_v60 = vmul.f32 %v1043_v45, %v1284_v31  ;;  %1058 = vpow2.f32 %v613_v44  ;;  %v1381_v45 = vadd.f32 %v1274_v25, %v1292_v37  ;;  %v1392_v37 = vadd.f32 %v1286_v33, %v1274_v25 }
 0x11b   : > { %1060 = vpow2.f32 %v609_v46  ;;  %v723_v3 = vmul.f32 %v1045_v53, %v1279_v28  ;;  %v1366_v28 = vadd.f32 %v949_v16, %v1274_v25  ;;  %v1377_v16 = vadd.f32 %v1274_v25, %v485_v34 }
 0x11c   : > { %v1047_v55 = vpop.eup %1046  ;;  %1062 = vpow2.f32 %v615_v57  ;;  %v577_v53 = vsub.f32 0.0, %v1373_v40  ;;  %v1387_v57 = vadd.f32 %v1276_v27, %v1274_v25 }
 0x11d   : > { %v1049_v58 = vpop.eup %1048  ;;  %v722_v61 = vmul.f32 %v1047_v55, %v1296_v39  ;;  %1064 = vpow2.f32 %v611_v0  ;;  %v617_v39 = vmul.f32 1.442695, %v573_v1  ;;  %v575_v43 = vsub.f32 0.0, %v1366_v28 }
 0x11e   : > { %v1051_v63 = vpop.eup %1050  ;;  %v663_v11 = vadd.f32 1.0, %v1049_v58  ;;  %v574_v34 = vsub.f32 0.0, %v1377_v16  ;;  %v625_v1 = vmul.f32 1.442695, %v577_v53 }
 0x11f   : > { %v754_v5 = vadd.f32 %v722_v61, %v721_v60  ;;  %v724_v7 = vmul.f32 %v1051_v63, %v1290_v35  ;;  %v621_v30 = vmul.f32 1.442695, %v575_v43  ;;  %v578_v61 = vsub.f32 0.0, %v1381_v45 }
 0x120   : > { %1066 = vrcp.f32 %v663_v11  ;;  %v619_v33 = vmul.f32 1.442695, %v574_v34  ;;  %v1423_v43 = vadd.f32 %v1274_v25, %v1317_v62 }
 0x121   : > { %v1053_v6 = vpop.eup %1052  ;;  %v755_v10 = vadd.f32 %v754_v5, %v723_v3  ;;  %1068 = vpow2.f32 %v617_v39  ;;  %v579_v5 = vsub.f32 0.0, %v1387_v57  ;;  %v1409_v39 = vadd.f32 %v1274_v25, %v1309_v54 }
 0x122   : > { %v725_v12 = vmul.f32 %v1053_v6, %v1305_v50  ;;  %v1055_v31 = vpop.eup %1054  ;;  %v1369_v50 = vadd.f32 %v950_v23, %v1274_v25  ;;  %v1399_v6 = vadd.f32 %v1274_v25, %v1302_v49  ;;  %v1416_v54 = vadd.f32 %v1307_v52, %v1274_v25 }
 0x123   : > { %v756_v13 = vadd.f32 %v755_v10, %v724_v7  ;;  %v1057_v14 = vpop.eup %1056  ;;  %v664_v20 = vadd.f32 1.0, %v1055_v31  ;;  %v580_v7 = vsub.f32 0.0, %v1392_v37  ;;  %v627_v31 = vmul.f32 1.442695, %v578_v61 }
 0x124   : > { %v662_v22 = vadd.f32 1.0, %v1057_v14  ;;  %v1059_v26 = vpop.eup %1058  ;;  %v576_v48 = vsub.f32 0.0, %v1369_v50 }
 0x125   : > { %v757_v18 = vadd.f32 %v756_v13, %v725_v12  ;;  %v1061_v35 = vpop.eup %1060  ;;  %v667_v41 = vadd.f32 1.0, %v1059_v26 }
 0x126   : > { %1070 = vrcp.f32 %v662_v22  ;;  %v665_v29 = vadd.f32 1.0, %v1061_v35  ;;  %v1063_v38 = vpop.eup %1062  ;;  %v623_v0 = vmul.f32 1.442695, %v576_v48  ;;  %v582_v35 = vsub.f32 0.0, %v1409_v39 }
 0x127   : > { %1072 = vrcp.f32 %v664_v20  ;;  %v1065_v44 = vpop.eup %1064  ;;  %v668_v46 = vadd.f32 1.0, %v1063_v38  ;;  %v629_v20 = vmul.f32 1.442695, %v579_v5  ;;  %v584_v48 = vsub.f32 0.0, %v1416_v54 }
 0x128   : > { %1074 = vrcp.f32 %v665_v29  ;;  %v666_v23 = vadd.f32 1.0, %v1065_v44  ;;  %v635_v53 = vmul.f32 1.442695, %v582_v35 }
 0x129   : > { %1076 = vrcp.f32 %v667_v41 }
 0x12a   : > { %v1067_v55 = vpop.eup %1066  ;;  %1078 = vrcp.f32 %v666_v23 }
 0x12b   : > { %v1069_v58 = vpop.eup %1068  ;;  %1080 = vrcp.f32 %v668_v46  ;;  %v727_v10 = vmul.f32 %v1067_v55, %v1313_v56  ;;  %v581_v56 = vsub.f32 0.0, %v1399_v6 }
 0x12c   : > { %v669_v63 = vadd.f32 1.0, %v1069_v58  ;;  %1082 = vpow2.f32 %v621_v30  ;;  %v1429_v30 = vadd.f32 %v1274_v25, %v1325_v8  ;;  %v639_v8 = vmul.f32 1.442695, %v584_v48 }
 0x12d   : > { %v633_v41 = vmul.f32 1.442695, %v581_v56 }
 0x12e   : > { %1084 = vrcp.f32 %v669_v63 }
 0x12f   : > { %1086 = vpow2.f32 %v623_v0 }
 0x130   : > { %v1071_v60 = vpop.eup %1070  ;;  %1088 = vpow2.f32 %v625_v1 }
 0x131   : > { %v726_v3 = vmul.f32 %v1071_v60, %v1328_v9  ;;  %v1073_v27 = vpop.eup %1072  ;;  %v1405_v9 = vadd.f32 %v1300_v47, %v1274_v25  ;;  %1090 = vpow2.f32 %v619_v33  ;;  %v631_v47 = vmul.f32 1.442695, %v580_v7 }
 0x132   : > { %v1075_v12 = vpop.eup %1074  ;;  %v728_v49 = vmul.f32 %v1073_v27, %v1323_v4  ;;  %1092 = vpow2.f32 %v627_v31  ;;  %v585_v60 = vsub.f32 0.0, %v1423_v43 }
 0x133   : > { %v758_v11 = vadd.f32 %v757_v18, %v726_v3  ;;  %v729_v14 = vmul.f32 %v1075_v12, %v1338_v19  ;;  %v1077_v18 = vpop.eup %1076  ;;  %v583_v4 = vsub.f32 0.0, %v1405_v9  ;;  %1094 = vpow2.f32 %v629_v20 }
 0x134   : > { %v1079_v26 = vpop.eup %1078  ;;  %v731_v46 = vmul.f32 %v1077_v18, %v1332_v15  ;;  %1096 = vpow2.f32 %v631_v47  ;;  %v1435_v15 = vadd.f32 %v1315_v59, %v1274_v25  ;;  %v641_v7 = vmul.f32 1.442695, %v585_v60 }
 0x135   : > { %v759_v13 = vadd.f32 %v758_v11, %v727_v10  ;;  %v730_v19 = vmul.f32 %v1079_v26, %v1352_v42  ;;  %v1081_v38 = vpop.eup %1080  ;;  %v637_v42 = vmul.f32 1.442695, %v583_v4  ;;  %1098 = vpow2.f32 %v633_v41 }
 0x136   : > { %v1083_v44 = vpop.eup %1082  ;;  %v732_v55 = vmul.f32 %v1081_v38, %v1345_v32  ;;  %1100 = vpow2.f32 %v635_v53  ;;  %v1440_v32 = vadd.f32 %v1320_v2, %v1274_v25  ;;  %v587_v33 = vsub.f32 0.0, %v1435_v15 }
 0x137   : > { %v760_v22 = vadd.f32 %v759_v13, %v728_v49  ;;  %v671_v61 = vadd.f32 1.0, %v1083_v44  ;;  %1102 = vpow2.f32 %v637_v42  ;;  %v1446_v10 = vadd.f32 %v1274_v25, %v1340_v21 }
 0x138   : > { %v1085_v52 = vpop.eup %1084  ;;  %v588_v2 = vsub.f32 0.0, %v1440_v32  ;;  %v1451_v49 = vadd.f32 %v1274_v25, %v1347_v36  ;;  %v645_v20 = vmul.f32 1.442695, %v587_v33  ;;  %v1455_v21 = vadd.f32 %v1334_v17, %v1274_v25 }
 0x139   : > { %v761_v29 = vadd.f32 %v760_v22, %v729_v14  ;;  %v733_v62 = vmul.f32 %v1085_v52, %v1357_v51  ;;  %v1087_v58 = vpop.eup %1086  ;;  %v586_v51 = vsub.f32 0.0, %v1429_v30  ;;  %1104 = vrcp.f32 %v671_v61 }
 0x13a   : > { %v1089_v63 = vpop.eup %1088  ;;  %v672_v27 = vadd.f32 1.0, %v1087_v58  ;;  %v589_v56 = vsub.f32 0.0, %v1446_v10  ;;  %v647_v26 = vmul.f32 1.442695, %v588_v2  ;;  %v1460_v36 = vadd.f32 %v1342_v24, %v1274_v25 }
 0x13b   : > { %v762_v23 = vadd.f32 %v761_v29, %v730_v19  ;;  %v1091_v1 = vpop.eup %1090  ;;  %v673_v11 = vadd.f32 1.0, %v1089_v63  ;;  %v643_v31 = vmul.f32 1.442695, %v586_v51  ;;  %v590_v47 = vsub.f32 0.0, %v1451_v49 }
 0x13c   : > { %v670_v5 = vadd.f32 1.0, %v1091_v1  ;;  %v1093_v59 = vpop.eup %1092  ;;  %v591_v17 = vsub.f32 0.0, %v1455_v21  ;;  %v649_v29 = vmul.f32 1.442695, %v589_v56  ;;  %v592_v44 = vsub.f32 0.0, %v1460_v36 }
 0x13d   : > { %v763_v34 = vadd.f32 %v762_v23, %v731_v46  ;;  %v1095_v12 = vpop.eup %1094  ;;  %v674_v13 = vadd.f32 1.0, %v1093_v59  ;;  %v651_v46 = vmul.f32 1.442695, %v590_v47 }
 0x13e   : > { %1106 = vrcp.f32 %v670_v5  ;;  %v1097_v14 = vpop.eup %1096  ;;  %v675_v18 = vadd.f32 1.0, %v1095_v12  ;;  %v653_v52 = vmul.f32 1.442695, %v591_v17  ;;  %v655_v58 = vmul.f32 1.442695, %v592_v44 }
 0x13f   : > { %v764_v0 = vadd.f32 %v763_v34, %v732_v55  ;;  %1108 = vpow2.f32 %v639_v8  ;;  %v1099_v22 = vpop.eup %1098  ;;  %v676_v35 = vadd.f32 1.0, %v1097_v14 }
 0x140   : > { %1110 = vrcp.f32 %v672_v27  ;;  %v1101_v4 = vpop.eup %1100  ;;  %v677_v38 = vadd.f32 1.0, %v1099_v22 }
 0x141   : > { %v765_v3 = vadd.f32 %v764_v0, %v733_v62  ;;  %1112 = vpow2.f32 %v641_v7  ;;  %v1103_v19 = vpop.eup %1102  ;;  %v678_v25 = vadd.f32 1.0, %v1101_v4 }
 0x142   : > { %1114 = vrcp.f32 %v673_v11  ;;  %v679_v42 = vadd.f32 1.0, %v1103_v19 }
 0x143   : > { %1116 = vpow2.f32 %v643_v31  ;;  %v1105_v41 = vpop.eup %1104 }
 0x144   : > { %1118 = vrcp.f32 %v674_v13  ;;  %v735_v34 = vmul.f32 %v1105_v41, %v1366_v28 }
 0x145   : > { %1120 = vpow2.f32 %v645_v20 }
 0x146   : > { %1122 = vrcp.f32 %v675_v18 }
 0x147   : > { %1124 = vpow2.f32 %v647_v26 }
 0x148   : > { %v1107_v23 = vpop.eup %1106  ;;  %1126 = vrcp.f32 %v676_v35 }
 0x149   : > { %v1109_v24 = vpop.eup %1108  ;;  %1128 = vpow2.f32 %v649_v29  ;;  %v734_v48 = vmul.f32 %v1107_v23, %v1377_v16 }
 0x14a   : > { %v1111_v53 = vpop.eup %1110  ;;  %1130 = vrcp.f32 %v677_v38  ;;  %v680_v61 = vadd.f32 1.0, %v1109_v24 }
 0x14b   : > { %v1113_v55 = vpop.eup %1112  ;;  %v766_v62 = vadd.f32 %v765_v3, %v734_v48  ;;  %1132 = vpow2.f32 %v651_v46  ;;  %v736_v0 = vmul.f32 %v1111_v53, %v1369_v50 }
 0x14c   : > { %v1115_v60 = vpop.eup %1114  ;;  %1134 = vrcp.f32 %v678_v25  ;;  %v681_v16 = vadd.f32 1.0, %v1113_v55 }
 0x14d   : > { %v1117_v63 = vpop.eup %1116  ;;  %1136 = vpow2.f32 %v653_v52  ;;  %v767_v1 = vadd.f32 %v766_v62, %v735_v34  ;;  %v737_v27 = vmul.f32 %v1115_v60, %v1373_v40 }
 0x14e   : > { %v1119_v8 = vpop.eup %1118  ;;  %1138 = vrcp.f32 %v679_v42  ;;  %v682_v3 = vadd.f32 1.0, %v1117_v63 }
 0x14f   : > { %v1121_v51 = vpop.eup %1120  ;;  %v768_v5 = vadd.f32 %v767_v1, %v736_v0  ;;  %1140 = vpow2.f32 %v655_v58  ;;  %v738_v33 = vmul.f32 %v1119_v8, %v1381_v45 }
 0x150   : > { %v1123_v28 = vpop.eup %1122  ;;  %1142 = vrcp.f32 %v680_v61  ;;  %v683_v12 = vadd.f32 1.0, %v1121_v51 }
 0x151   : > { %v1125_v59 = vpop.eup %1124  ;;  %v769_v7 = vadd.f32 %v768_v5, %v737_v27  ;;  %1144 = vrcp.f32 %v681_v16  ;;  %v739_v2 = vmul.f32 %v1123_v28, %v1387_v57 }
 0x152   : > { %v1127_v11 = vpop.eup %1126  ;;  %v684_v14 = vadd.f32 1.0, %v1125_v59  ;;  %1146 = vrcp.f32 %v682_v3 }
 0x153   : > { %v1129_v50 = vpop.eup %1128  ;;  %v770_v31 = vadd.f32 %v769_v7, %v738_v33  ;;  %v740_v20 = vmul.f32 %v1127_v11, %v1392_v37  ;;  %1148 = vrcp.f32 %v683_v12 }
 0x154   : > { %v1131_v13 = vpop.eup %1130  ;;  %v685_v22 = vadd.f32 1.0, %v1129_v50  ;;  %1150 = vrcp.f32 %v684_v14 }
 0x155   : > { %v1133_v40 = vpop.eup %1132  ;;  %v771_v56 = vadd.f32 %v770_v31, %v739_v2  ;;  %v741_v45 = vmul.f32 %v1131_v13, %v1399_v6 }
 0x156   : > { %v1135_v18 = vpop.eup %1134  ;;  %v686_v4 = vadd.f32 1.0, %v1133_v40  ;;  %1152 = vrcp.f32 %v685_v22 }
 0x157   : > { %v1137_v26 = vpop.eup %1136  ;;  %v772_v47 = vadd.f32 %v771_v56, %v740_v20  ;;  %v742_v57 = vmul.f32 %v1135_v18, %v1409_v39 }
 0x158   : > { %v1139_v35 = vpop.eup %1138  ;;  %v687_v38 = vadd.f32 1.0, %v1137_v26  ;;  %1154 = vrcp.f32 %v686_v4 }
 0x159   : > { %v1141_v17 = vpop.eup %1140  ;;  %v773_v29 = vadd.f32 %v772_v47, %v741_v45  ;;  %v743_v37 = vmul.f32 %v1139_v35, %v1405_v9 }
 0x15a   : > { %v1143_v19 = vpop.eup %1142  ;;  %v688_v46 = vadd.f32 1.0, %v1141_v17  ;;  %1156 = vrcp.f32 %v687_v38 }
 0x15b   : > { %v774_v41 = vadd.f32 %v773_v29, %v742_v57  ;;  %v1145_v44 = vpop.eup %1144  ;;  %v744_v23 = vmul.f32 %v1143_v19, %v1416_v54 }
 0x15c   : > { %v1147_v25 = vpop.eup %1146  ;;  %v745_v24 = vmul.f32 %v1145_v44, %v1423_v43  ;;  %1158 = vrcp.f32 %v688_v46 }
 0x15d   : > { %v775_v6 = vadd.f32 %v774_v41, %v743_v37  ;;  %v1149_v48 = vpop.eup %1148  ;;  %v746_v39 = vmul.f32 %v1147_v25, %v1429_v30 }
 0x15e   : > { %v1151_v42 = vpop.eup %1150  ;;  %v747_v9 = vmul.f32 %v1149_v48, %v1435_v15 }
 0x15f   : > { %v776_v52 = vadd.f32 %v775_v6, %v744_v23  ;;  %v748_v62 = vmul.f32 %v1151_v42, %v1440_v32 }
 0x160   : > { %v1153_v34 = vpop.eup %1152 }
 0x161   : > { %v777_v53 = vadd.f32 %v776_v52, %v745_v24  ;;  %v749_v60 = vmul.f32 %v1153_v34, %v1446_v10  ;;  %v753_v10 = vld [vmem:[#allocation2] sm:$0x1] }
 0x162   : > { %v1155_v54 = vpop.eup %1154 }
 0x163   : > { %v778_v55 = vadd.f32 %v777_v53, %v746_v39  ;;  %v750_v43 = vmul.f32 %v1155_v54, %v1451_v49 }
 0x164   : > { %v1157_v63 = vpop.eup %1156 }
 0x165   : > { %v779_v58 = vadd.f32 %v778_v55, %v747_v9  ;;  %v751_v30 = vmul.f32 %v1157_v63, %v1455_v21 }
 0x166   : > { %v1159_v1 = vpop.eup %1158 }
 0x167   : > { %v780_v61 = vadd.f32 %v779_v58, %v748_v62  ;;  %v752_v15 = vmul.f32 %v1159_v1, %v1460_v36 }
 0x169   : > { %v781_v0 = vadd.f32 %v780_v61, %v749_v60 }
 0x16b   : > { %v782_v8 = vadd.f32 %v781_v0, %v750_v43 }
 0x16d   : > { %v783_v16 = vadd.f32 %v782_v8, %v751_v30 }
 0x16f   : > { %v784_v51 = vadd.f32 %v783_v16, %v752_v15 }
 0x171   : > { %v785_v27 = vrot.slane %v784_v51, 4 }
 0x173   : > { %v786_v32 = vadd.f32 %v785_v27, %v784_v51 }
 0x175   : > { %v787_v5 = vrot.slane %v786_v32, 2 }
 0x177   : > { %v788_v28 = vadd.f32 %v787_v5, %v786_v32 }
 0x179   : > { %v789_v3 = vrot.slane %v788_v28, 1 }
 0x17b   : > { %v790_v59 = vadd.f32 %v789_v3, %v788_v28 }
 0x17d   : > { %v791_v33 = vadd.f32 %v790_v59, %v753_v10 }
 0x17f   : > { %792 = vst [vmem:[#allocation2] sm:$0x1] %v791_v33 }
 0x186   : > { %v796_v49 = vld [vmem:[#allocation2] sm:$0x1] }
 0x187   : > { %v797_v21 = vmul.f32 0.00390625, %v796_v49 }
 0x189   : > { %798 = vst [vmem:[%s194_s17] sm:$0x1] %v797_v21 }
 0x18a PF: > { %s13_s14 = sadd.s32 1, %s1182_s14   ;;  %s1501_s12 = smov %s1178_s13 }
 0x18b   : > { %p10_p5 = scmp.ge.s32.totalorder %s13_s14, 4   ;;  %s1502_s13 = smov %s1504_s15 }
 0x18d   :  { %12 = sbr.rel (!%p10_p5) target bundleno = 2 (0x2), region = 70 }

// kernel: hybrid_forward.5
= control target key start
LH: loop header
LB: loop body
LE: loop exit
PB: predicated region body
PF: predicated region fallthrough
CT: control target
= control target key end

     0   :  { %v11100_v8 = vmov 0   ;;  %s14777_s0 = inlined_call_operand.vmem [shape: f32[2,128], index: 0, kind: input, shape index: {}]   ;;  %s14778_s1 = inlined_call_operand.vmem [shape: f32[2,128], index: 1, kind: input, shape index: {}]   ;;  %s14779_s2 = inlined_call_operand.vmem [shape: bf16[128,2048], index: 2, kind: input, shape index: {}]   ;;  %s14780_s3 = inlined_call_operand.vmem [shape: f32[1,2048], index: 3, kind: input, shape index: {}]   ;;  %s14781_s4 = inlined_call_operand.vmem [shape: bf16[128,1280], index: 4, kind: input, shape index: {}]   ;;  %s14782_s5 = inlined_call_operand.vmem [shape: f32[1,1280], index: 5, kind: input, shape index: {}]   ;;  %s14783_s6 = inlined_call_operand.vmem [shape: bf16[2048,512], index: 6, kind: input, shape index: {}]   ;;  %s14784_s7 = inlined_call_operand.vmem [shape: bf16[1280,512], index: 7, kind: input, shape index: {}]   ;;  %s14785_s8 = inlined_call_operand.vmem [shape: f32[1,512], index: 8, kind: input, shape index: {}]   ;;  %s14786_s9 = inlined_call_operand.vmem [shape: bf16[512,128], index: 9, kind: input, shape index: {}]   ;;  %s14787_s10 = inlined_call_operand.vmem [shape: f32[1,128], index: 10, kind: input, shape index: {}]   ;;  %s14788_s11 = inlined_call_operand.hbm [shape: f32[2,128], index: 11, kind: output, shape index: {}]  }
   0x1   :  { %v42_v0 = vld [vmem:[%s14779_s2] sm:$0xff]  ;;  %v43_v2 = vld [vmem:[%s14779_s2 + $0x8] sm:$0xff]  ;;  %926 = vmatprep.mubr.bf16.mxu0 %v11100_v8  ;;  %967 = vmatprep.mubr.bf16.mxu1 %v11100_v8  ;;  %v44_v63 = vld [vmem:[%s14779_s2 + $0x10] sm:$0xff] }
   0x2   :  { %v50_v1 = vld [vmem:[%s14779_s2 + $0x40] sm:$0xff]  ;;  %v51_v4 = vld [vmem:[%s14779_s2 + $0x48] sm:$0xff] }
   0x3   :  { %v8516_v3 = vcombine.high %v42_v0, %v50_v1  ;;  %v8515_v5 = vcombine.low %v42_v0, %v50_v1  ;;  %v58_v6 = vld [vmem:[%s14779_s2 + $0x80] sm:$0xff]  ;;  %v8518_v9 = vcombine.high %v43_v2, %v51_v4  ;;  %v8517_v10 = vcombine.low %v43_v2, %v51_v4  ;;  %v59_v12 = vld [vmem:[%s14779_s2 + $0x88] sm:$0xff]  ;;  %v52_v0 = vld [vmem:[%s14779_s2 + $0x50] sm:$0xff] }
   0x4   :  { %v66_v7 = vld [vmem:[%s14779_s2 + $0xc0] sm:$0xff]  ;;  %v67_v13 = vld [vmem:[%s14779_s2 + $0xc8] sm:$0xff]  ;;  %v45_v1 = vld [vmem:[%s14779_s2 + $0x18] sm:$0xff] }
   0x5   :  { %v8532_v11 = vcombine.high %v58_v6, %v66_v7  ;;  %v74_v14 = vld [vmem:[%s14779_s2 + $0x100] sm:$0xff]  ;;  %894 = vmatprep.subr.bf16.mxu0 %v8516_v3  ;;  %v8534_v15 = vcombine.high %v59_v12, %v67_v13  ;;  %v75_v17 = vld [vmem:[%s14779_s2 + $0x108] sm:$0xff]  ;;  %935 = vmatprep.subr.bf16.mxu1 %v8518_v9  ;;  %v8531_v19 = vcombine.low %v58_v6, %v66_v7  ;;  %v53_v2 = vld [vmem:[%s14779_s2 + $0x58] sm:$0xff] }
   0x6   :  { %v82_v16 = vld [vmem:[%s14779_s2 + $0x140] sm:$0xff]  ;;  %v83_v18 = vld [vmem:[%s14779_s2 + $0x148] sm:$0xff]  ;;  %895 = vmatpush1.bf16.msra.mxu0 %v8515_v5  ;;  %936 = vmatpush1.bf16.msra.mxu1 %v8517_v10  ;;  %v8533_v20 = vcombine.low %v59_v12, %v67_v13  ;;  %v8520_v6 = vcombine.high %v44_v63, %v52_v0  ;;  %v8522_v7 = vcombine.high %v45_v1, %v53_v2  ;;  %v60_v9 = vld [vmem:[%s14779_s2 + $0x90] sm:$0xff] }
   0x7   :  { %896 = vmatprep.subr.bf16.mxu0 %v8532_v11  ;;  %v8548_v21 = vcombine.high %v74_v14, %v82_v16  ;;  %937 = vmatprep.subr.bf16.mxu1 %v8534_v15  ;;  %v8550_v22 = vcombine.high %v75_v17, %v83_v18  ;;  %v90_v23 = vld [vmem:[%s14779_s2 + $0x180] sm:$0xff]  ;;  %v91_v25 = vld [vmem:[%s14779_s2 + $0x188] sm:$0xff]  ;;  %v8547_v27 = vcombine.low %v74_v14, %v82_v16  ;;  %v68_v10 = vld [vmem:[%s14779_s2 + $0xd0] sm:$0xff] }
   0x8   :  { %v98_v24 = vld [vmem:[%s14779_s2 + $0x1c0] sm:$0xff]  ;;  %v99_v26 = vld [vmem:[%s14779_s2 + $0x1c8] sm:$0xff]  ;;  %v8549_v28 = vcombine.low %v75_v17, %v83_v18  ;;  %v61_v12 = vld [vmem:[%s14779_s2 + $0x98] sm:$0xff]  ;;  %v8519_v14 = vcombine.low %v44_v63, %v52_v0  ;;  %v8521_v15 = vcombine.low %v45_v1, %v53_v2  ;;  %v8536_v16 = vcombine.high %v60_v9, %v68_v10 }
   0x9   :  { %v8564_v29 = vcombine.high %v90_v23, %v98_v24  ;;  %v8566_v30 = vcombine.high %v91_v25, %v99_v26  ;;  %v106_v31 = vld [vmem:[%s14779_s2 + $0x200] sm:$0xff]  ;;  %v107_v33 = vld [vmem:[%s14779_s2 + $0x208] sm:$0xff]  ;;  %v8563_v35 = vcombine.low %v90_v23, %v98_v24  ;;  %v8565_v36 = vcombine.low %v91_v25, %v99_v26  ;;  %v69_v13 = vld [vmem:[%s14779_s2 + $0xd8] sm:$0xff] }
   0xa   :  { %897 = vmatpush1.bf16.msra.mxu0 %v8531_v19  ;;  %938 = vmatpush1.bf16.msra.mxu1 %v8533_v20  ;;  %v114_v32 = vld [vmem:[%s14779_s2 + $0x240] sm:$0xff]  ;;  %v115_v34 = vld [vmem:[%s14779_s2 + $0x248] sm:$0xff]  ;;  %v8538_v17 = vcombine.high %v61_v12, %v69_v13  ;;  %v76_v18 = vld [vmem:[%s14779_s2 + $0x110] sm:$0xff]  ;;  %v8537_v23 = vcombine.low %v61_v12, %v69_v13 }
   0xb   :  { %898 = vmatprep.subr.bf16.mxu0 %v8548_v21  ;;  %939 = vmatprep.subr.bf16.mxu1 %v8550_v22  ;;  %v8580_v37 = vcombine.high %v106_v31, %v114_v32  ;;  %v8582_v38 = vcombine.high %v107_v33, %v115_v34  ;;  %v122_v39 = vld [vmem:[%s14779_s2 + $0x280] sm:$0xff]  ;;  %v123_v41 = vld [vmem:[%s14779_s2 + $0x288] sm:$0xff]  ;;  %v8579_v43 = vcombine.low %v106_v31, %v114_v32  ;;  %v84_v19 = vld [vmem:[%s14779_s2 + $0x150] sm:$0xff] }
   0xc   :  { %v130_v40 = vld [vmem:[%s14779_s2 + $0x2c0] sm:$0xff]  ;;  %v131_v42 = vld [vmem:[%s14779_s2 + $0x2c8] sm:$0xff]  ;;  %v8581_v44 = vcombine.low %v107_v33, %v115_v34  ;;  %v77_v20 = vld [vmem:[%s14779_s2 + $0x118] sm:$0xff]  ;;  %v8535_v22 = vcombine.low %v60_v9, %v68_v10  ;;  %v8552_v24 = vcombine.high %v76_v18, %v84_v19 }
   0xd   :  { %v8596_v45 = vcombine.high %v122_v39, %v130_v40  ;;  %v8598_v46 = vcombine.high %v123_v41, %v131_v42  ;;  %v138_v47 = vld [vmem:[%s14779_s2 + $0x300] sm:$0xff]  ;;  %v139_v49 = vld [vmem:[%s14779_s2 + $0x308] sm:$0xff]  ;;  %v8595_v51 = vcombine.low %v122_v39, %v130_v40  ;;  %v8597_v52 = vcombine.low %v123_v41, %v131_v42  ;;  %v85_v21 = vld [vmem:[%s14779_s2 + $0x158] sm:$0xff] }
   0xe   :  { %899 = vmatpush1.bf16.msra.mxu0 %v8547_v27  ;;  %940 = vmatpush1.bf16.msra.mxu1 %v8549_v28  ;;  %v146_v48 = vld [vmem:[%s14779_s2 + $0x340] sm:$0xff]  ;;  %v147_v50 = vld [vmem:[%s14779_s2 + $0x348] sm:$0xff]  ;;  %v8554_v25 = vcombine.high %v77_v20, %v85_v21  ;;  %v92_v26 = vld [vmem:[%s14779_s2 + $0x190] sm:$0xff]  ;;  %v8553_v31 = vcombine.low %v77_v20, %v85_v21 }
   0xf   :  { %900 = vmatprep.subr.bf16.mxu0 %v8564_v29  ;;  %941 = vmatprep.subr.bf16.mxu1 %v8566_v30  ;;  %v8612_v53 = vcombine.high %v138_v47, %v146_v48  ;;  %v8614_v54 = vcombine.high %v139_v49, %v147_v50  ;;  %v154_v55 = vld [vmem:[%s14779_s2 + $0x380] sm:$0xff]  ;;  %v155_v57 = vld [vmem:[%s14779_s2 + $0x388] sm:$0xff]  ;;  %v8611_v59 = vcombine.low %v138_v47, %v146_v48  ;;  %v100_v27 = vld [vmem:[%s14779_s2 + $0x1d0] sm:$0xff] }
  0x10   :  { %v162_v56 = vld [vmem:[%s14779_s2 + $0x3c0] sm:$0xff]  ;;  %v163_v58 = vld [vmem:[%s14779_s2 + $0x3c8] sm:$0xff]  ;;  %v8613_v60 = vcombine.low %v139_v49, %v147_v50  ;;  %v93_v28 = vld [vmem:[%s14779_s2 + $0x198] sm:$0xff]  ;;  %v8551_v30 = vcombine.low %v76_v18, %v84_v19  ;;  %v8568_v32 = vcombine.high %v92_v26, %v100_v27 }
  0x11   :  { %v8628_v61 = vcombine.high %v154_v55, %v162_v56  ;;  %v8630_v62 = vcombine.high %v155_v57, %v163_v58  ;;  %v8627_v3 = vcombine.low %v154_v55, %v162_v56  ;;  %v40_v4 = vld [vmem:[%s14777_s0] sm:$0x3]  ;;  %v8629_v5 = vcombine.low %v155_v57, %v163_v58  ;;  %v101_v29 = vld [vmem:[%s14779_s2 + $0x1d8] sm:$0xff]  ;;  %v108_v34 = vld [vmem:[%s14779_s2 + $0x210] sm:$0xff] }
  0x12   :  { %901 = vmatpush1.bf16.msra.mxu0 %v8563_v35  ;;  %942 = vmatpush1.bf16.msra.mxu1 %v8565_v36  ;;  %v11281_v11 = vpack.c.bf16 %v40_v4, %v40_v4  ;;  %v8570_v33 = vcombine.high %v93_v28, %v101_v29  ;;  %v116_v35 = vld [vmem:[%s14779_s2 + $0x250] sm:$0xff]  ;;  %v109_v36 = vld [vmem:[%s14779_s2 + $0x218] sm:$0xff]  ;;  %v8569_v39 = vcombine.low %v93_v28, %v101_v29  ;;  %v46_v1 = vld [vmem:[%s14779_s2 + $0x20] sm:$0xff] }
  0x13   :  { %902 = vmatprep.subr.bf16.mxu0 %v8580_v37  ;;  %943 = vmatprep.subr.bf16.mxu1 %v8582_v38  ;;  %v117_v37 = vld [vmem:[%s14779_s2 + $0x258] sm:$0xff]  ;;  %v8567_v38 = vcombine.low %v92_v26, %v100_v27  ;;  %v8584_v40 = vcombine.high %v108_v34, %v116_v35  ;;  %v124_v41 = vld [vmem:[%s14779_s2 + $0x290] sm:$0xff]  ;;  %v47_v4 = vld [vmem:[%s14779_s2 + $0x28] sm:$0xff] }
  0x14   :  { %v8586_v42 = vcombine.high %v109_v36, %v117_v37  ;;  %v8585_v47 = vcombine.low %v109_v36, %v117_v37  ;;  %v140_v49 = vld [vmem:[%s14779_s2 + $0x310] sm:$0xff]  ;;  %v62_v10 = vld [vmem:[%s14779_s2 + $0xa0] sm:$0xff] }
  0x15   :  { %v156_v57 = vld [vmem:[%s14779_s2 + $0x390] sm:$0xff]  ;;  %v70_v13 = vld [vmem:[%s14779_s2 + $0xe0] sm:$0xff] }
  0x16   :  { %903 = vmatpush1.bf16.msra.mxu0 %v8579_v43  ;;  %944 = vmatpush1.bf16.msra.mxu1 %v8581_v44  ;;  %v132_v43 = vld [vmem:[%s14779_s2 + $0x2d0] sm:$0xff]  ;;  %v125_v44 = vld [vmem:[%s14779_s2 + $0x298] sm:$0xff]  ;;  %v8540_v18 = vcombine.high %v62_v10, %v70_v13  ;;  %v78_v19 = vld [vmem:[%s14779_s2 + $0x120] sm:$0xff] }
  0x17   :  { %904 = vmatprep.subr.bf16.mxu0 %v8596_v45  ;;  %945 = vmatprep.subr.bf16.mxu1 %v8598_v46  ;;  %v133_v45 = vld [vmem:[%s14779_s2 + $0x2d8] sm:$0xff]  ;;  %v8583_v46 = vcombine.low %v108_v34, %v116_v35  ;;  %v8600_v48 = vcombine.high %v124_v41, %v132_v43  ;;  %v86_v20 = vld [vmem:[%s14779_s2 + $0x160] sm:$0xff] }
  0x18   :  { %v8602_v50 = vcombine.high %v125_v44, %v133_v45  ;;  %v8601_v55 = vcombine.low %v125_v44, %v133_v45  ;;  %v8556_v26 = vcombine.high %v78_v19, %v86_v20  ;;  %v94_v27 = vld [vmem:[%s14779_s2 + $0x1a0] sm:$0xff] }
  0x19   :  { %v102_v28 = vld [vmem:[%s14779_s2 + $0x1e0] sm:$0xff] }
  0x1a   :  { %905 = vmatpush1.bf16.msra.mxu0 %v8595_v51  ;;  %946 = vmatpush1.bf16.msra.mxu1 %v8597_v52  ;;  %v148_v51 = vld [vmem:[%s14779_s2 + $0x350] sm:$0xff]  ;;  %v141_v52 = vld [vmem:[%s14779_s2 + $0x318] sm:$0xff]  ;;  %v8572_v34 = vcombine.high %v94_v27, %v102_v28  ;;  %v110_v35 = vld [vmem:[%s14779_s2 + $0x220] sm:$0xff] }
  0x1b   :  { %906 = vmatprep.subr.bf16.mxu0 %v8612_v53  ;;  %947 = vmatprep.subr.bf16.mxu1 %v8614_v54  ;;  %v149_v53 = vld [vmem:[%s14779_s2 + $0x358] sm:$0xff]  ;;  %v8599_v54 = vcombine.low %v124_v41, %v132_v43  ;;  %v8616_v56 = vcombine.high %v140_v49, %v148_v51  ;;  %v118_v36 = vld [vmem:[%s14779_s2 + $0x260] sm:$0xff] }
  0x1c   :  { %v8618_v58 = vcombine.high %v141_v52, %v149_v53  ;;  %v8617_v63 = vcombine.low %v141_v52, %v149_v53  ;;  %v126_v43 = vld [vmem:[%s14779_s2 + $0x2a0] sm:$0xff] }
  0x1d   :  { %v134_v44 = vld [vmem:[%s14779_s2 + $0x2e0] sm:$0xff] }
  0x1e   :  { %907 = vmatpush1.bf16.msra.mxu0 %v8611_v59  ;;  %948 = vmatpush1.bf16.msra.mxu1 %v8613_v60  ;;  %v164_v59 = vld [vmem:[%s14779_s2 + $0x3d0] sm:$0xff]  ;;  %v157_v60 = vld [vmem:[%s14779_s2 + $0x398] sm:$0xff]  ;;  %v150_v52 = vld [vmem:[%s14779_s2 + $0x360] sm:$0xff] }
  0x1f   :  { %908 = vmatprep.subr.bf16.mxu0 %v8628_v61  ;;  %949 = vmatprep.subr.bf16.mxu1 %v8630_v62  ;;  %v165_v61 = vld [vmem:[%s14779_s2 + $0x3d8] sm:$0xff]  ;;  %v8615_v62 = vcombine.low %v140_v49, %v148_v51  ;;  %v8632_v0 = vcombine.high %v156_v57, %v164_v59  ;;  %v142_v51 = vld [vmem:[%s14779_s2 + $0x320] sm:$0xff] }
  0x20   :  { %v8634_v2 = vcombine.high %v157_v60, %v165_v61 }
  0x22   :  { %909 = vmatpush1.bf16.msra.mxu0 %v8627_v3  ;;  %950 = vmatpush1.bf16.msra.mxu1 %v8629_v5  ;;  %v54_v3 = vld [vmem:[%s14779_s2 + $0x60] sm:$0xff]  ;;  %v55_v5 = vld [vmem:[%s14779_s2 + $0x68] sm:$0xff] }
  0x23   :  { %976 = vmatprep.subr.bf16.mxu0 %v8520_v6  ;;  %1017 = vmatprep.subr.bf16.mxu1 %v8522_v7  ;;  %v8631_v6 = vcombine.low %v156_v57, %v164_v59  ;;  %v8633_v7 = vcombine.low %v157_v60, %v165_v61  ;;  %v8524_v9 = vcombine.high %v46_v1, %v54_v3  ;;  %v158_v59 = vld [vmem:[%s14779_s2 + $0x3a0] sm:$0xff] }
  0x24   :  { %v8526_v12 = vcombine.high %v47_v4, %v55_v5  ;;  %v166_v60 = vld [vmem:[%s14779_s2 + $0x3e0] sm:$0xff] }
  0x25   :  { %927 = vmatmul.mubr.bf16.vlgmr.msra.gmra.mrb[0].mxu0 %v11281_v11  ;;  %968 = vmatmul.mubr.bf16.vlgmr.msra.gmra.mrb[0].mxu1 %v11281_v11 }
  0x26   :  { %977 = vmatpush1.bf16.msra.mxu0 %v8519_v14  ;;  %1018 = vmatpush1.bf16.msra.mxu1 %v8521_v15  ;;  %v63_v14 = vld [vmem:[%s14779_s2 + $0xa8] sm:$0xff] }
  0x27   :  { %978 = vmatprep.subr.bf16.mxu0 %v8536_v16  ;;  %1019 = vmatprep.subr.bf16.mxu1 %v8538_v17  ;;  %v71_v15 = vld [vmem:[%s14779_s2 + $0xe8] sm:$0xff]  ;;  %v8523_v16 = vcombine.low %v46_v1, %v54_v3  ;;  %v8525_v17 = vcombine.low %v47_v4, %v55_v5  ;;  %v48_v3 = vld [vmem:[%s14779_s2 + $0x30] sm:$0xff] }
  0x28   :  { %1008 = vmatprep.mubr.bf16.mxu0 %v11100_v8  ;;  %1049 = vmatprep.mubr.bf16.mxu1 %v11100_v8  ;;  %v8542_v21 = vcombine.high %v63_v14, %v71_v15  ;;  %v56_v5 = vld [vmem:[%s14779_s2 + $0x70] sm:$0xff] }
  0x2a   :  { %979 = vmatpush1.bf16.msra.mxu0 %v8535_v22  ;;  %1020 = vmatpush1.bf16.msra.mxu1 %v8537_v23  ;;  %v79_v22 = vld [vmem:[%s14779_s2 + $0x128] sm:$0xff] }
  0x2b   :  { %980 = vmatprep.subr.bf16.mxu0 %v8552_v24  ;;  %1021 = vmatprep.subr.bf16.mxu1 %v8554_v25  ;;  %v87_v23 = vld [vmem:[%s14779_s2 + $0x168] sm:$0xff]  ;;  %v8539_v24 = vcombine.low %v62_v10, %v70_v13  ;;  %v8541_v25 = vcombine.low %v63_v14, %v71_v15  ;;  %v64_v10 = vld [vmem:[%s14779_s2 + $0xb0] sm:$0xff]  ;;  %v8528_v14 = vcombine.high %v48_v3, %v56_v5  ;;  %v65_v15 = vld [vmem:[%s14779_s2 + $0xb8] sm:$0xff] }
  0x2c   :  { %v8558_v29 = vcombine.high %v79_v22, %v87_v23 }
  0x2e   :  { %981 = vmatpush1.bf16.msra.mxu0 %v8551_v30  ;;  %1022 = vmatpush1.bf16.msra.mxu1 %v8553_v31  ;;  %v95_v30 = vld [vmem:[%s14779_s2 + $0x1a8] sm:$0xff] }
  0x2f   :  { %982 = vmatprep.subr.bf16.mxu0 %v8568_v32  ;;  %1023 = vmatprep.subr.bf16.mxu1 %v8570_v33  ;;  %v103_v31 = vld [vmem:[%s14779_s2 + $0x1e8] sm:$0xff]  ;;  %v8555_v32 = vcombine.low %v78_v19, %v86_v20  ;;  %v8557_v33 = vcombine.low %v79_v22, %v87_v23  ;;  %v80_v19 = vld [vmem:[%s14779_s2 + $0x130] sm:$0xff]  ;;  %v81_v23 = vld [vmem:[%s14779_s2 + $0x138] sm:$0xff] }
  0x30   :  { %v8574_v37 = vcombine.high %v95_v30, %v103_v31  ;;  %v8573_v41 = vcombine.low %v95_v30, %v103_v31  ;;  %v88_v20 = vld [vmem:[%s14779_s2 + $0x170] sm:$0xff]  ;;  %v97_v31 = vld [vmem:[%s14779_s2 + $0x1b8] sm:$0xff] }
  0x31   :  { %v8560_v30 = vcombine.high %v80_v19, %v88_v20 }
  0x32   :  { %983 = vmatpush1.bf16.msra.mxu0 %v8567_v38  ;;  %1024 = vmatpush1.bf16.msra.mxu1 %v8569_v39  ;;  %v111_v38 = vld [vmem:[%s14779_s2 + $0x228] sm:$0xff] }
  0x33   :  { %984 = vmatprep.subr.bf16.mxu0 %v8584_v40  ;;  %1025 = vmatprep.subr.bf16.mxu1 %v8586_v42  ;;  %v119_v39 = vld [vmem:[%s14779_s2 + $0x268] sm:$0xff]  ;;  %v8571_v40 = vcombine.low %v94_v27, %v102_v28  ;;  %v8588_v42 = vcombine.high %v110_v35, %v118_v36  ;;  %v96_v27 = vld [vmem:[%s14779_s2 + $0x1b0] sm:$0xff] }
  0x34   :  { %v8590_v45 = vcombine.high %v111_v38, %v119_v39  ;;  %v8589_v49 = vcombine.low %v111_v38, %v119_v39  ;;  %v104_v28 = vld [vmem:[%s14779_s2 + $0x1f0] sm:$0xff]  ;;  %v113_v39 = vld [vmem:[%s14779_s2 + $0x238] sm:$0xff] }
  0x35   :  { %v8576_v38 = vcombine.high %v96_v27, %v104_v28 }
  0x36   :  { %985 = vmatpush1.bf16.msra.mxu0 %v8583_v46  ;;  %1026 = vmatpush1.bf16.msra.mxu1 %v8585_v47  ;;  %v127_v46 = vld [vmem:[%s14779_s2 + $0x2a8] sm:$0xff] }
  0x37   :  { %986 = vmatprep.subr.bf16.mxu0 %v8600_v48  ;;  %1027 = vmatprep.subr.bf16.mxu1 %v8602_v50  ;;  %v135_v47 = vld [vmem:[%s14779_s2 + $0x2e8] sm:$0xff]  ;;  %v8587_v48 = vcombine.low %v110_v35, %v118_v36  ;;  %v8604_v50 = vcombine.high %v126_v43, %v134_v44  ;;  %v112_v35 = vld [vmem:[%s14779_s2 + $0x230] sm:$0xff] }
  0x38   :  { %v8606_v53 = vcombine.high %v127_v46, %v135_v47  ;;  %v8605_v57 = vcombine.low %v127_v46, %v135_v47  ;;  %v120_v36 = vld [vmem:[%s14779_s2 + $0x270] sm:$0xff]  ;;  %v129_v47 = vld [vmem:[%s14779_s2 + $0x2b8] sm:$0xff] }
  0x39   :  { %v8592_v46 = vcombine.high %v112_v35, %v120_v36 }
  0x3a   :  { %987 = vmatpush1.bf16.msra.mxu0 %v8599_v54  ;;  %1028 = vmatpush1.bf16.msra.mxu1 %v8601_v55  ;;  %v143_v54 = vld [vmem:[%s14779_s2 + $0x328] sm:$0xff] }
  0x3b   :  { %988 = vmatprep.subr.bf16.mxu0 %v8616_v56  ;;  %1029 = vmatprep.subr.bf16.mxu1 %v8618_v58  ;;  %v151_v55 = vld [vmem:[%s14779_s2 + $0x368] sm:$0xff]  ;;  %v8603_v56 = vcombine.low %v126_v43, %v134_v44  ;;  %v8620_v58 = vcombine.high %v142_v51, %v150_v52  ;;  %v128_v43 = vld [vmem:[%s14779_s2 + $0x2b0] sm:$0xff] }
  0x3c   :  { %v8622_v61 = vcombine.high %v143_v54, %v151_v55  ;;  %v8621_v1 = vcombine.low %v143_v54, %v151_v55  ;;  %v136_v44 = vld [vmem:[%s14779_s2 + $0x2f0] sm:$0xff]  ;;  %v145_v55 = vld [vmem:[%s14779_s2 + $0x338] sm:$0xff] }
  0x3d   :  { %v8608_v54 = vcombine.high %v128_v43, %v136_v44 }
  0x3e   :  { %989 = vmatpush1.bf16.msra.mxu0 %v8615_v62  ;;  %1030 = vmatpush1.bf16.msra.mxu1 %v8617_v63  ;;  %v159_v62 = vld [vmem:[%s14779_s2 + $0x3a8] sm:$0xff] }
  0x3f   :  { %990 = vmatprep.subr.bf16.mxu0 %v8632_v0  ;;  %1031 = vmatprep.subr.bf16.mxu1 %v8634_v2  ;;  %v167_v63 = vld [vmem:[%s14779_s2 + $0x3e8] sm:$0xff]  ;;  %v8619_v0 = vcombine.low %v142_v51, %v150_v52  ;;  %v8636_v2 = vcombine.high %v158_v59, %v166_v60  ;;  %v144_v51 = vld [vmem:[%s14779_s2 + $0x330] sm:$0xff] }
  0x40   :  { %v8638_v4 = vcombine.high %v159_v62, %v167_v63  ;;  %v8637_v13 = vcombine.low %v159_v62, %v167_v63  ;;  %v152_v52 = vld [vmem:[%s14779_s2 + $0x370] sm:$0xff]  ;;  %v161_v63 = vld [vmem:[%s14779_s2 + $0x3b8] sm:$0xff] }
  0x41   :  { %v8624_v62 = vcombine.high %v144_v51, %v152_v52 }
  0x42   :  { %991 = vmatpush1.bf16.msra.mxu0 %v8631_v6  ;;  %1032 = vmatpush1.bf16.msra.mxu1 %v8633_v7  ;;  %v49_v6 = vld [vmem:[%s14779_s2 + $0x38] sm:$0xff] }
  0x43   :  { %1058 = vmatprep.subr.bf16.mxu0 %v8524_v9  ;;  %1099 = vmatprep.subr.bf16.mxu1 %v8526_v12  ;;  %v57_v7 = vld [vmem:[%s14779_s2 + $0x78] sm:$0xff]  ;;  %v8635_v9 = vcombine.low %v158_v59, %v166_v60  ;;  %v72_v12 = vld [vmem:[%s14779_s2 + $0xf0] sm:$0xff] }
  0x44   :  { %v8544_v22 = vcombine.high %v64_v10, %v72_v12  ;;  %v160_v59 = vld [vmem:[%s14779_s2 + $0x3b0] sm:$0xff] }
  0x45   :  { %1009 = vmatmul.mubr.bf16.vlgmr.msra.gmra.mrb[4].mxu0 %v11281_v11  ;;  %1050 = vmatmul.mubr.bf16.vlgmr.msra.gmra.mrb[4].mxu1 %v11281_v11  ;;  %v168_v60 = vld [vmem:[%s14779_s2 + $0x3f0] sm:$0xff] }
  0x46   :  { %1059 = vmatpush1.bf16.msra.mxu0 %v8523_v16  ;;  %1100 = vmatpush1.bf16.msra.mxu1 %v8525_v17  ;;  %v73_v16 = vld [vmem:[%s14779_s2 + $0xf8] sm:$0xff]  ;;  %v8530_v17 = vcombine.high %v49_v6, %v57_v7 }
  0x47   :  { %1060 = vmatprep.subr.bf16.mxu0 %v8540_v18  ;;  %1101 = vmatprep.subr.bf16.mxu1 %v8542_v21  ;;  %v8527_v18 = vcombine.low %v48_v3, %v56_v5  ;;  %v8529_v21 = vcombine.low %v49_v6, %v57_v7  ;;  %v8639_v6 = vcombine.low %v160_v59, %v168_v60 }
  0x48   :  { %1090 = vmatprep.mubr.bf16.mxu0 %v11100_v8  ;;  %1131 = vmatprep.mubr.bf16.mxu1 %v11100_v8 }
  0x4a   :  { %1061 = vmatpush1.bf16.msra.mxu0 %v8539_v24  ;;  %1102 = vmatpush1.bf16.msra.mxu1 %v8541_v25  ;;  %v89_v24 = vld [vmem:[%s14779_s2 + $0x178] sm:$0xff]  ;;  %v8546_v25 = vcombine.high %v65_v15, %v73_v16 }
  0x4b   :  { %1062 = vmatprep.subr.bf16.mxu0 %v8556_v26  ;;  %1103 = vmatprep.subr.bf16.mxu1 %v8558_v29  ;;  %v8543_v26 = vcombine.low %v64_v10, %v72_v12  ;;  %v8545_v29 = vcombine.low %v65_v15, %v73_v16  ;;  %v9634_v10 = vld [vmem:[%s14781_s4] ss:$40 sps:$4 sm:$0xff]   ;;  %v9639_v12 = vld [vmem:[%s14781_s4 + $0xc] ss:$40 sps:$4 sm:$0xff]   ;;  %v9645_v15 = vld [vmem:[%s14781_s4 + $0x5c] ss:$40 sps:$4 sm:$0xff]  }
  0x4c   :  { %v9640_v16 = vld [vmem:[%s14781_s4 + $0x50] ss:$40 sps:$4 sm:$0xff]  }
  0x4e   :  { %1063 = vmatpush1.bf16.msra.mxu0 %v8555_v32  ;;  %1104 = vmatpush1.bf16.msra.mxu1 %v8557_v33  ;;  %v105_v32 = vld [vmem:[%s14779_s2 + $0x1f8] sm:$0xff]  ;;  %v8562_v33 = vcombine.high %v81_v23, %v89_v24 }
  0x4f   :  { %1064 = vmatprep.subr.bf16.mxu0 %v8572_v34  ;;  %1105 = vmatprep.subr.bf16.mxu1 %v8574_v37  ;;  %v8559_v34 = vcombine.low %v80_v19, %v88_v20  ;;  %v8561_v37 = vcombine.low %v81_v23, %v89_v24  ;;  %v9651_v19 = vld [vmem:[%s14781_s4 + $0xac] ss:$40 sps:$4 sm:$0xff]   ;;  %v9646_v20 = vld [vmem:[%s14781_s4 + $0xa0] ss:$40 sps:$4 sm:$0xff]   ;;  %v9652_v23 = vld [vmem:[%s14781_s4 + $0xf0] ss:$40 sps:$4 sm:$0xff]  }
  0x50   :  { %v9655_v24 = vld [vmem:[%s14781_s4 + $0xf8] ss:$40 sps:$4 sm:$0xff]  }
  0x52   :  { %1065 = vmatpush1.bf16.msra.mxu0 %v8571_v40  ;;  %1106 = vmatpush1.bf16.msra.mxu1 %v8573_v41  ;;  %v121_v40 = vld [vmem:[%s14779_s2 + $0x278] sm:$0xff]  ;;  %v8578_v41 = vcombine.high %v97_v31, %v105_v32 }
  0x53   :  { %1066 = vmatprep.subr.bf16.mxu0 %v8588_v42  ;;  %1107 = vmatprep.subr.bf16.mxu1 %v8590_v45  ;;  %v8575_v42 = vcombine.low %v96_v27, %v104_v28  ;;  %v8577_v45 = vcombine.low %v97_v31, %v105_v32  ;;  %v9658_v27 = vld [vmem:[%s14781_s4 + $0x140] ss:$40 sps:$4 sm:$0xff]   ;;  %v9664_v31 = vld [vmem:[%s14781_s4 + $0x190] ss:$40 sps:$4 sm:$0xff]  }
  0x54   :  { %v9661_v28 = vld [vmem:[%s14781_s4 + $0x148] ss:$40 sps:$4 sm:$0xff]   ;;  %v9667_v32 = vld [vmem:[%s14781_s4 + $0x198] ss:$40 sps:$4 sm:$0xff]  }
  0x56   :  { %1067 = vmatpush1.bf16.msra.mxu0 %v8587_v48  ;;  %1108 = vmatpush1.bf16.msra.mxu1 %v8589_v49  ;;  %v137_v48 = vld [vmem:[%s14779_s2 + $0x2f8] sm:$0xff]  ;;  %v8594_v49 = vcombine.high %v113_v39, %v121_v40 }
  0x57   :  { %1068 = vmatprep.subr.bf16.mxu0 %v8604_v50  ;;  %1109 = vmatprep.subr.bf16.mxu1 %v8606_v53  ;;  %v8591_v50 = vcombine.low %v112_v35, %v120_v36  ;;  %v8593_v53 = vcombine.low %v113_v39, %v121_v40  ;;  %v9670_v35 = vld [vmem:[%s14781_s4 + $0x1e0] ss:$40 sps:$4 sm:$0xff]   ;;  %v9676_v39 = vld [vmem:[%s14781_s4 + $0x230] ss:$40 sps:$4 sm:$0xff]  }
  0x58   :  { %v9673_v36 = vld [vmem:[%s14781_s4 + $0x1e8] ss:$40 sps:$4 sm:$0xff]   ;;  %v1238_v40 = vld [vmem:[%s14778_s1] sm:$0x3] }
  0x5a   :  { %1069 = vmatpush1.bf16.msra.mxu0 %v8603_v56  ;;  %1110 = vmatpush1.bf16.msra.mxu1 %v8605_v57  ;;  %v153_v56 = vld [vmem:[%s14779_s2 + $0x378] sm:$0xff]  ;;  %v8610_v57 = vcombine.high %v129_v47, %v137_v48 }
  0x5b   :  { %1070 = vmatprep.subr.bf16.mxu0 %v8620_v58  ;;  %1111 = vmatprep.subr.bf16.mxu1 %v8622_v61  ;;  %v8607_v58 = vcombine.low %v128_v43, %v136_v44  ;;  %v8609_v61 = vcombine.low %v129_v47, %v137_v48  ;;  %v8625_v3 = vcombine.low %v145_v55, %v153_v56  ;;  %v9687_v43 = vld [vmem:[%s14781_s4 + $0x1c] ss:$40 sps:$4 sm:$0xff]   ;;  %v9682_v44 = vld [vmem:[%s14781_s4 + $0x10] ss:$40 sps:$4 sm:$0xff]   ;;  %v9693_v48 = vld [vmem:[%s14781_s4 + $0x6c] ss:$40 sps:$4 sm:$0xff]  }
  0x5c   :  { %v9690_v47 = vld [vmem:[%s14781_s4 + $0x64] ss:$40 sps:$4 sm:$0xff]  }
  0x5e   :  { %1071 = vmatpush1.bf16.msra.mxu0 %v8619_v0  ;;  %1112 = vmatpush1.bf16.msra.mxu1 %v8621_v1  ;;  %v8626_v0 = vcombine.high %v145_v55, %v153_v56  ;;  %v169_v1 = vld [vmem:[%s14779_s2 + $0x3f8] sm:$0xff]  ;;  %v9702_v55 = vld [vmem:[%s14781_s4 + $0x104] ss:$40 sps:$4 sm:$0xff]  }
  0x5f   :  { %1072 = vmatprep.subr.bf16.mxu0 %v8636_v2  ;;  %1113 = vmatprep.subr.bf16.mxu1 %v8638_v4  ;;  %v8623_v2 = vcombine.low %v144_v51, %v152_v52  ;;  %v8640_v4 = vcombine.high %v160_v59, %v168_v60  ;;  %v8642_v5 = vcombine.high %v161_v63, %v169_v1  ;;  %v9696_v51 = vld [vmem:[%s14781_s4 + $0xb4] ss:$40 sps:$4 sm:$0xff]  }
  0x60   :  { %v8641_v7 = vcombine.low %v161_v63, %v169_v1  ;;  %v9699_v52 = vld [vmem:[%s14781_s4 + $0xbc] ss:$40 sps:$4 sm:$0xff]   ;;  %v9705_v56 = vld [vmem:[%s14781_s4 + $0x10c] ss:$40 sps:$4 sm:$0xff]   ;;  %v9712_v1 = vld [vmem:[%s14781_s4 + $0x1a0] ss:$40 sps:$4 sm:$0xff]  }
  0x61   :  { %v9708_v59 = vld [vmem:[%s14781_s4 + $0x154] ss:$40 sps:$4 sm:$0xff]   ;;  %v9714_v63 = vld [vmem:[%s14781_s4 + $0x1a4] ss:$40 sps:$4 sm:$0xff]  }
  0x62   :  { %1073 = vmatpush1.bf16.msra.mxu0 %v8635_v9  ;;  %1114 = vmatpush1.bf16.msra.mxu1 %v8637_v13  ;;  %v9636_v9 = vld [vmem:[%s14781_s4 + $0x4] ss:$40 sps:$4 sm:$0xff]   ;;  %v9637_v13 = vld [vmem:[%s14781_s4 + $0x8] ss:$40 sps:$4 sm:$0xff]  }
  0x63   :  { %1140 = vmatprep.subr.bf16.mxu0 %v8528_v14  ;;  %1181 = vmatprep.subr.bf16.mxu1 %v8530_v17  ;;  %v9642_v14 = vld [vmem:[%s14781_s4 + $0x54] ss:$40 sps:$4 sm:$0xff]   ;;  %v9643_v17 = vld [vmem:[%s14781_s4 + $0x58] ss:$40 sps:$4 sm:$0xff]  }
  0x64   :  { %v9711_v60 = vld [vmem:[%s14781_s4 + $0x15c] ss:$40 sps:$4 sm:$0xff]  }
  0x65   :  { %1091 = vmatmul.mubr.bf16.vlgmr.msra.gmra.mrb[8].mxu0 %v11281_v11  ;;  %1132 = vmatmul.mubr.bf16.vlgmr.msra.gmra.mrb[8].mxu1 %v11281_v11 }
  0x66   :  { %1141 = vmatpush1.bf16.msra.mxu0 %v8527_v18  ;;  %1182 = vmatpush1.bf16.msra.mxu1 %v8529_v21  ;;  %v9648_v18 = vld [vmem:[%s14781_s4 + $0xa4] ss:$40 sps:$4 sm:$0xff]   ;;  %v9649_v21 = vld [vmem:[%s14781_s4 + $0xa8] ss:$40 sps:$4 sm:$0xff]  }
  0x67   :  { %1142 = vmatprep.subr.bf16.mxu0 %v8544_v22  ;;  %1183 = vmatprep.subr.bf16.mxu1 %v8546_v25  ;;  %v9657_v22 = vld [vmem:[%s14781_s4 + $0xfc] ss:$40 sps:$4 sm:$0xff]  }
  0x68   :  { %1172 = vmatprep.mubr.bf16.mxu0 %v11100_v8  ;;  %1213 = vmatprep.mubr.bf16.mxu1 %v11100_v8  ;;  %v9660_v25 = vld [vmem:[%s14781_s4 + $0x144] ss:$40 sps:$4 sm:$0xff]  }
  0x6a   :  { %1143 = vmatpush1.bf16.msra.mxu0 %v8543_v26  ;;  %1184 = vmatpush1.bf16.msra.mxu1 %v8545_v29  ;;  %v9663_v26 = vld [vmem:[%s14781_s4 + $0x14c] ss:$40 sps:$4 sm:$0xff]  }
  0x6b   :  { %1144 = vmatprep.subr.bf16.mxu0 %v8560_v30  ;;  %1185 = vmatprep.subr.bf16.mxu1 %v8562_v33  ;;  %v9666_v29 = vld [vmem:[%s14781_s4 + $0x194] ss:$40 sps:$4 sm:$0xff]   ;;  %v9672_v33 = vld [vmem:[%s14781_s4 + $0x1e4] ss:$40 sps:$4 sm:$0xff]  }
  0x6c   :  { %v9669_v30 = vld [vmem:[%s14781_s4 + $0x19c] ss:$40 sps:$4 sm:$0xff]  }
  0x6e   :  { %1145 = vmatpush1.bf16.msra.mxu0 %v8559_v34  ;;  %1186 = vmatpush1.bf16.msra.mxu1 %v8561_v37  ;;  %v9675_v34 = vld [vmem:[%s14781_s4 + $0x1ec] ss:$40 sps:$4 sm:$0xff]  }
  0x6f   :  { %1146 = vmatprep.subr.bf16.mxu0 %v8576_v38  ;;  %1187 = vmatprep.subr.bf16.mxu1 %v8578_v41  ;;  %v9678_v37 = vld [vmem:[%s14781_s4 + $0x234] ss:$40 sps:$4 sm:$0xff]   ;;  %v9679_v41 = vld [vmem:[%s14781_s4 + $0x238] ss:$40 sps:$4 sm:$0xff]  }
  0x70   :  { %v9681_v38 = vld [vmem:[%s14781_s4 + $0x23c] ss:$40 sps:$4 sm:$0xff]  }
  0x72   :  { %1147 = vmatpush1.bf16.msra.mxu0 %v8575_v42  ;;  %1188 = vmatpush1.bf16.msra.mxu1 %v8577_v45  ;;  %v9684_v42 = vld [vmem:[%s14781_s4 + $0x14] ss:$40 sps:$4 sm:$0xff]   ;;  %v11677_v45 = vpack.c.bf16 %v1238_v40, %v1238_v40 }
  0x73   :  { %1148 = vmatprep.subr.bf16.mxu0 %v8592_v46  ;;  %1189 = vmatprep.subr.bf16.mxu1 %v8594_v49  ;;  %v9685_v46 = vld [vmem:[%s14781_s4 + $0x18] ss:$40 sps:$4 sm:$0xff]   ;;  %v9780_v40 = vld [vmem:[%s14784_s7 + $0x84] ss:$16 sps:$4 sm:$0xff]  }
  0x74   :  { %v9688_v49 = vld [vmem:[%s14781_s4 + $0x60] ss:$40 sps:$4 sm:$0xff]  }
  0x76   :  { %1149 = vmatpush1.bf16.msra.mxu0 %v8591_v50  ;;  %1190 = vmatpush1.bf16.msra.mxu1 %v8593_v53  ;;  %v9691_v50 = vld [vmem:[%s14781_s4 + $0x68] ss:$40 sps:$4 sm:$0xff]  }
  0x77   :  { %1150 = vmatprep.subr.bf16.mxu0 %v8608_v54  ;;  %1191 = vmatprep.subr.bf16.mxu1 %v8610_v57  ;;  %v9694_v53 = vld [vmem:[%s14781_s4 + $0xb0] ss:$40 sps:$4 sm:$0xff]   ;;  %v9700_v57 = vld [vmem:[%s14781_s4 + $0x100] ss:$40 sps:$4 sm:$0xff]  }
  0x78   :  { %v9697_v54 = vld [vmem:[%s14781_s4 + $0xb8] ss:$40 sps:$4 sm:$0xff]  }
  0x7a   :  { %1151 = vmatpush1.bf16.msra.mxu0 %v8607_v58  ;;  %1192 = vmatpush1.bf16.msra.mxu1 %v8609_v61  ;;  %v9703_v58 = vld [vmem:[%s14781_s4 + $0x108] ss:$40 sps:$4 sm:$0xff]  }
  0x7b   :  { %1152 = vmatprep.subr.bf16.mxu0 %v8624_v62  ;;  %1193 = vmatprep.subr.bf16.mxu1 %v8626_v0  ;;  %v9706_v61 = vld [vmem:[%s14781_s4 + $0x150] ss:$40 sps:$4 sm:$0xff]   ;;  %v9717_v0 = vld [vmem:[%s14781_s4 + $0x1ac] ss:$40 sps:$4 sm:$0xff]  }
  0x7c   :  { %v9709_v62 = vld [vmem:[%s14781_s4 + $0x158] ss:$40 sps:$4 sm:$0xff]  }
  0x7e   :  { %1153 = vmatpush1.bf16.msra.mxu0 %v8623_v2  ;;  %1194 = vmatpush1.bf16.msra.mxu1 %v8625_v3  ;;  %v9715_v2 = vld [vmem:[%s14781_s4 + $0x1a8] ss:$40 sps:$4 sm:$0xff]   ;;  %v9720_v3 = vld [vmem:[%s14781_s4 + $0x1f4] ss:$40 sps:$4 sm:$0xff]  }
  0x7f   :  { %1154 = vmatprep.subr.bf16.mxu0 %v8640_v4  ;;  %1195 = vmatprep.subr.bf16.mxu1 %v8642_v5  ;;  %v9723_v4 = vld [vmem:[%s14781_s4 + $0x1fc] ss:$40 sps:$4 sm:$0xff]   ;;  %v9718_v5 = vld [vmem:[%s14781_s4 + $0x1f0] ss:$40 sps:$4 sm:$0xff]  }
  0x82   :  { %1155 = vmatpush1.bf16.msra.mxu0 %v8639_v6  ;;  %1196 = vmatpush1.bf16.msra.mxu1 %v8641_v7  ;;  %v9721_v6 = vld [vmem:[%s14781_s4 + $0x1f8] ss:$40 sps:$4 sm:$0xff]   ;;  %v9726_v7 = vld [vmem:[%s14781_s4 + $0x244] ss:$40 sps:$4 sm:$0xff]  }
  0x83   :  { %1774 = vmatprep.subr.bf16.mxu0 %v9636_v9  ;;  %1815 = vmatprep.subr.bf16.mxu1 %v9639_v12  ;;  %v9729_v9 = vld [vmem:[%s14781_s4 + $0x24c] ss:$40 sps:$4 sm:$0xff]   ;;  %v9727_v12 = vld [vmem:[%s14781_s4 + $0x248] ss:$40 sps:$4 sm:$0xff]  }
  0x85   :  { %1173 = vmatmul.mubr.bf16.vlgmr.msra.gmra.mrb[12].mxu0 %v11281_v11  ;;  %1214 = vmatmul.mubr.bf16.vlgmr.msra.gmra.mrb[12].mxu1 %v11281_v11  ;;  %v9654_v11 = vld [vmem:[%s14781_s4 + $0xf4] ss:$40 sps:$4 sm:$0xff]  }
  0x86   :  { %1775 = vmatpush1.bf16.msra.mxu0 %v9634_v10  ;;  %1816 = vmatpush1.bf16.msra.mxu1 %v9637_v13  ;;  %v9724_v10 = vld [vmem:[%s14781_s4 + $0x240] ss:$40 sps:$4 sm:$0xff]   ;;  %v9732_v13 = vld [vmem:[%s14781_s4 + $0x24] ss:$40 sps:$4 sm:$0xff]  }
  0x87   :  { %1776 = vmatprep.subr.bf16.mxu0 %v9642_v14  ;;  %1817 = vmatprep.subr.bf16.mxu1 %v9645_v15  ;;  %v9730_v14 = vld [vmem:[%s14781_s4 + $0x20] ss:$40 sps:$4 sm:$0xff]   ;;  %v9735_v15 = vld [vmem:[%s14781_s4 + $0x74] ss:$40 sps:$4 sm:$0xff]  }
  0x88   :  { %1806 = vmatprep.mubr.bf16.mxu0 %v11100_v8  ;;  %1847 = vmatprep.mubr.bf16.mxu1 %v11100_v8 }
  0x8a   :  { %1777 = vmatpush1.bf16.msra.mxu0 %v9640_v16  ;;  %1818 = vmatpush1.bf16.msra.mxu1 %v9643_v17  ;;  %v9733_v16 = vld [vmem:[%s14781_s4 + $0x70] ss:$40 sps:$4 sm:$0xff]   ;;  %v9738_v17 = vld [vmem:[%s14781_s4 + $0xc4] ss:$40 sps:$4 sm:$0xff]  }
  0x8b   :  { %1778 = vmatprep.subr.bf16.mxu0 %v9648_v18  ;;  %1819 = vmatprep.subr.bf16.mxu1 %v9651_v19  ;;  %v9736_v18 = vld [vmem:[%s14781_s4 + $0xc0] ss:$40 sps:$4 sm:$0xff]   ;;  %v9741_v19 = vld [vmem:[%s14781_s4 + $0x114] ss:$40 sps:$4 sm:$0xff]  }
  0x8e   :  { %1779 = vmatpush1.bf16.msra.mxu0 %v9646_v20  ;;  %1820 = vmatpush1.bf16.msra.mxu1 %v9649_v21  ;;  %v9739_v20 = vld [vmem:[%s14781_s4 + $0x110] ss:$40 sps:$4 sm:$0xff]   ;;  %v9744_v21 = vld [vmem:[%s14781_s4 + $0x164] ss:$40 sps:$4 sm:$0xff]  }
  0x8f   :  { %1780 = vmatprep.subr.bf16.mxu0 %v9654_v11  ;;  %1821 = vmatprep.subr.bf16.mxu1 %v9657_v22  ;;  %v9747_v11 = vld [vmem:[%s14781_s4 + $0x1b4] ss:$40 sps:$4 sm:$0xff]   ;;  %v9745_v22 = vld [vmem:[%s14781_s4 + $0x1b0] ss:$40 sps:$4 sm:$0xff]  }
  0x92   :  { %1781 = vmatpush1.bf16.msra.mxu0 %v9652_v23  ;;  %1822 = vmatpush1.bf16.msra.mxu1 %v9655_v24  ;;  %v9750_v23 = vld [vmem:[%s14781_s4 + $0x204] ss:$40 sps:$4 sm:$0xff]   ;;  %v9748_v24 = vld [vmem:[%s14781_s4 + $0x200] ss:$40 sps:$4 sm:$0xff]  }
  0x93   :  { %1782 = vmatprep.subr.bf16.mxu0 %v9660_v25  ;;  %1823 = vmatprep.subr.bf16.mxu1 %v9663_v26  ;;  %v9753_v25 = vld [vmem:[%s14781_s4 + $0x254] ss:$40 sps:$4 sm:$0xff]  }
  0x94   :  { %v9756_v26 = vld [vmem:[%s14784_s7 + $0x4] ss:$16 sps:$4 sm:$0xff]  }
  0x96   :  { %1783 = vmatpush1.bf16.msra.mxu0 %v9658_v27  ;;  %1824 = vmatpush1.bf16.msra.mxu1 %v9661_v28  ;;  %v9751_v27 = vld [vmem:[%s14781_s4 + $0x250] ss:$40 sps:$4 sm:$0xff]  }
  0x97   :  { %1784 = vmatprep.subr.bf16.mxu0 %v9666_v29  ;;  %1825 = vmatprep.subr.bf16.mxu1 %v9669_v30  ;;  %v9754_v28 = vld [vmem:[%s14784_s7] ss:$16 sps:$4 sm:$0xff]   ;;  %v9759_v29 = vld [vmem:[%s14784_s7 + $0x204] ss:$16 sps:$4 sm:$0xff]  }
  0x98   :  { %v9760_v30 = vld [vmem:[%s14784_s7 + $0x20] ss:$16 sps:$4 sm:$0xff]  }
  0x9a   :  { %1785 = vmatpush1.bf16.msra.mxu0 %v9664_v31  ;;  %1826 = vmatpush1.bf16.msra.mxu1 %v9667_v32  ;;  %v9762_v31 = vld [vmem:[%s14784_s7 + $0x24] ss:$16 sps:$4 sm:$0xff]  }
  0x9b   :  { %1786 = vmatprep.subr.bf16.mxu0 %v9672_v33  ;;  %1827 = vmatprep.subr.bf16.mxu1 %v9675_v34  ;;  %v9768_v32 = vld [vmem:[%s14784_s7 + $0x44] ss:$16 sps:$4 sm:$0xff]   ;;  %v9757_v33 = vld [vmem:[%s14784_s7 + $0x200] ss:$16 sps:$4 sm:$0xff]  }
  0x9c   :  { %v9766_v34 = vld [vmem:[%s14784_s7 + $0x40] ss:$16 sps:$4 sm:$0xff]  }
  0x9e   :  { %1787 = vmatpush1.bf16.msra.mxu0 %v9670_v35  ;;  %1828 = vmatpush1.bf16.msra.mxu1 %v9673_v36  ;;  %v9765_v35 = vld [vmem:[%s14784_s7 + $0x224] ss:$16 sps:$4 sm:$0xff]  }
  0x9f   :  { %1788 = vmatprep.subr.bf16.mxu0 %v9678_v37  ;;  %1829 = vmatprep.subr.bf16.mxu1 %v9681_v38  ;;  %v9774_v36 = vld [vmem:[%s14784_s7 + $0x64] ss:$16 sps:$4 sm:$0xff]   ;;  %v9763_v37 = vld [vmem:[%s14784_s7 + $0x220] ss:$16 sps:$4 sm:$0xff]  }
  0xa0   :  { %v9771_v38 = vld [vmem:[%s14784_s7 + $0x244] ss:$16 sps:$4 sm:$0xff]  }
  0xa2   :  { %1789 = vmatpush1.bf16.msra.mxu0 %v9676_v39  ;;  %1830 = vmatpush1.bf16.msra.mxu1 %v9679_v41  ;;  %v9772_v39 = vld [vmem:[%s14784_s7 + $0x60] ss:$16 sps:$4 sm:$0xff]  }
  0xa3   :  { %1856 = vmatprep.subr.bf16.mxu0 %v9684_v42  ;;  %1897 = vmatprep.subr.bf16.mxu1 %v9687_v43  ;;  %v9769_v41 = vld [vmem:[%s14784_s7 + $0x240] ss:$16 sps:$4 sm:$0xff]   ;;  %v9777_v43 = vld [vmem:[%s14784_s7 + $0x264] ss:$16 sps:$4 sm:$0xff]  }
  0xa4   :  { %v9778_v42 = vld [vmem:[%s14784_s7 + $0x80] ss:$16 sps:$4 sm:$0xff]  }
  0xa5   :  { %1807 = vmatmul.mubr.bf16.vlgmr.msra.gmra.mrb[16].mxu0 %v11677_v45  ;;  %1848 = vmatmul.mubr.bf16.vlgmr.msra.gmra.mrb[16].mxu1 %v11677_v45 }
  0xa6   :  { %1857 = vmatpush1.bf16.msra.mxu0 %v9682_v44  ;;  %1898 = vmatpush1.bf16.msra.mxu1 %v9685_v46  ;;  %v9786_v44 = vld [vmem:[%s14784_s7 + $0xa4] ss:$16 sps:$4 sm:$0xff]   ;;  %v9784_v46 = vld [vmem:[%s14784_s7 + $0xa0] ss:$16 sps:$4 sm:$0xff]  }
  0xa7   :  { %1858 = vmatprep.subr.bf16.mxu0 %v9690_v47  ;;  %1899 = vmatprep.subr.bf16.mxu1 %v9693_v48  ;;  %v9783_v47 = vld [vmem:[%s14784_s7 + $0x284] ss:$16 sps:$4 sm:$0xff]  }
  0xa8   :  { %1888 = vmatprep.mubr.bf16.mxu0 %v11100_v8  ;;  %1929 = vmatprep.mubr.bf16.mxu1 %v11100_v8  ;;  %v9792_v48 = vld [vmem:[%s14784_s7 + $0xc4] ss:$16 sps:$4 sm:$0xff]  }
  0xaa   :  { %1859 = vmatpush1.bf16.msra.mxu0 %v9688_v49  ;;  %1900 = vmatpush1.bf16.msra.mxu1 %v9691_v50  ;;  %v9781_v49 = vld [vmem:[%s14784_s7 + $0x280] ss:$16 sps:$4 sm:$0xff]  }
  0xab   :  { %1860 = vmatprep.subr.bf16.mxu0 %v9696_v51  ;;  %1901 = vmatprep.subr.bf16.mxu1 %v9699_v52  ;;  %v9790_v50 = vld [vmem:[%s14784_s7 + $0xc0] ss:$16 sps:$4 sm:$0xff]   ;;  %v9789_v51 = vld [vmem:[%s14784_s7 + $0x2a4] ss:$16 sps:$4 sm:$0xff]  }
  0xac   :  { %v9787_v52 = vld [vmem:[%s14784_s7 + $0x2a0] ss:$16 sps:$4 sm:$0xff]  }
  0xae   :  { %1861 = vmatpush1.bf16.msra.mxu0 %v9694_v53  ;;  %1902 = vmatpush1.bf16.msra.mxu1 %v9697_v54  ;;  %v9795_v53 = vld [vmem:[%s14784_s7 + $0x2c4] ss:$16 sps:$4 sm:$0xff]  }
  0xaf   :  { %1862 = vmatprep.subr.bf16.mxu0 %v9702_v55  ;;  %1903 = vmatprep.subr.bf16.mxu1 %v9705_v56  ;;  %v9798_v54 = vld [vmem:[%s14784_s7 + $0xe4] ss:$16 sps:$4 sm:$0xff]   ;;  %v9793_v56 = vld [vmem:[%s14784_s7 + $0x2c0] ss:$16 sps:$4 sm:$0xff]  }
  0xb2   :  { %1863 = vmatpush1.bf16.msra.mxu0 %v9700_v57  ;;  %1904 = vmatpush1.bf16.msra.mxu1 %v9703_v58  ;;  %v9796_v57 = vld [vmem:[%s14784_s7 + $0xe0] ss:$16 sps:$4 sm:$0xff]  }
  0xb3   :  { %1864 = vmatprep.subr.bf16.mxu0 %v9708_v59  ;;  %1905 = vmatprep.subr.bf16.mxu1 %v9711_v60  ;;  %v9801_v60 = vld [vmem:[%s14784_s7 + $0x2e4] ss:$16 sps:$4 sm:$0xff]  }
  0xb6   :  { %1865 = vmatpush1.bf16.msra.mxu0 %v9706_v61  ;;  %1906 = vmatpush1.bf16.msra.mxu1 %v9709_v62 }
  0xb7   :  { %1866 = vmatprep.subr.bf16.mxu0 %v9714_v63  ;;  %1907 = vmatprep.subr.bf16.mxu1 %v9717_v0 }
  0xba   :  { %1867 = vmatpush1.bf16.msra.mxu0 %v9712_v1  ;;  %1908 = vmatpush1.bf16.msra.mxu1 %v9715_v2  ;;  %v9804_v2 = vld [vmem:[%s14784_s7 + $0x104] ss:$16 sps:$4 sm:$0xff]  }
  0xbb   :  { %1868 = vmatprep.subr.bf16.mxu0 %v9720_v3  ;;  %1909 = vmatprep.subr.bf16.mxu1 %v9723_v4  ;;  %v9799_v3 = vld [vmem:[%s14784_s7 + $0x2e0] ss:$16 sps:$4 sm:$0xff]  }
  0xbc   :  { %v9802_v4 = vld [vmem:[%s14784_s7 + $0x100] ss:$16 sps:$4 sm:$0xff]  }
  0xbe   :  { %1869 = vmatpush1.bf16.msra.mxu0 %v9718_v5  ;;  %1910 = vmatpush1.bf16.msra.mxu1 %v9721_v6  ;;  %v9807_v5 = vld [vmem:[%s14784_s7 + $0x304] ss:$16 sps:$4 sm:$0xff]   ;;  %v9805_v6 = vld [vmem:[%s14784_s7 + $0x300] ss:$16 sps:$4 sm:$0xff]  }
  0xbf   :  { %1870 = vmatprep.subr.bf16.mxu0 %v9726_v7  ;;  %1911 = vmatprep.subr.bf16.mxu1 %v9729_v9  ;;  %v9810_v7 = vld [vmem:[%s14784_s7 + $0x124] ss:$16 sps:$4 sm:$0xff]   ;;  %v9808_v9 = vld [vmem:[%s14784_s7 + $0x120] ss:$16 sps:$4 sm:$0xff]  }
  0xc2   :  { %1871 = vmatpush1.bf16.msra.mxu0 %v9724_v10  ;;  %1912 = vmatpush1.bf16.msra.mxu1 %v9727_v12  ;;  %v9813_v10 = vld [vmem:[%s14784_s7 + $0x324] ss:$16 sps:$4 sm:$0xff]   ;;  %v9811_v12 = vld [vmem:[%s14784_s7 + $0x320] ss:$16 sps:$4 sm:$0xff]  }
  0xc3   :  { %1938 = vmatprep.subr.bf16.mxu0 %v9732_v13  ;;  %4497 = vmatprep.subr.bf16.mxu1 %v9756_v26  ;;  %v9816_v13 = vld [vmem:[%s14784_s7 + $0x144] ss:$16 sps:$4 sm:$0xff]  }
  0xc5   :  { %1889 = vmatmul.mubr.bf16.vlgmr.msra.gmra.mrb[20].mxu0 %v11677_v45  ;;  %1930 = vmatmul.mubr.bf16.vlgmr.msra.gmra.mrb[20].mxu1 %v11677_v45 }
  0xc6   :  { %1939 = vmatpush1.bf16.msra.mxu0 %v9730_v14  ;;  %1970 = vmatprep.mubr.bf16.mxu0 %v11100_v8  ;;  %v9742_v8 = vld [vmem:[%s14781_s4 + $0x160] ss:$40 sps:$4 sm:$0xff]  }
  0xc7   :  { %1940 = vmatprep.subr.bf16.mxu0 %v9735_v15  ;;  %4498 = vmatpush1.bf16.msra.mxu1 %v9754_v28  ;;  %v9814_v14 = vld [vmem:[%s14784_s7 + $0x140] ss:$16 sps:$4 sm:$0xff]   ;;  %v9819_v15 = vld [vmem:[%s14784_s7 + $0x344] ss:$16 sps:$4 sm:$0xff]  }
  0xc8   :  { %4499 = vmatprep.subr.bf16.mxu1 %v9762_v31  ;;  %v9837_v28 = vld [vmem:[%s14784_s7 + $0x3a4] ss:$16 sps:$4 sm:$0xff]  }
  0xca   :  { %1941 = vmatpush1.bf16.msra.mxu0 %v9733_v16  ;;  %v9817_v16 = vld [vmem:[%s14784_s7 + $0x340] ss:$16 sps:$4 sm:$0xff]  }
  0xcb   :  { %1942 = vmatprep.subr.bf16.mxu0 %v9738_v17  ;;  %4500 = vmatpush1.bf16.msra.mxu1 %v9760_v30  ;;  %v9822_v17 = vld [vmem:[%s14784_s7 + $0x164] ss:$16 sps:$4 sm:$0xff]  }
  0xcc   :  { %4501 = vmatprep.subr.bf16.mxu1 %v9768_v32 }
  0xce   :  { %1943 = vmatpush1.bf16.msra.mxu0 %v9736_v18  ;;  %v9820_v18 = vld [vmem:[%s14784_s7 + $0x160] ss:$16 sps:$4 sm:$0xff]  }
  0xcf   :  { %1944 = vmatprep.subr.bf16.mxu0 %v9741_v19  ;;  %4502 = vmatpush1.bf16.msra.mxu1 %v9766_v34  ;;  %v9825_v19 = vld [vmem:[%s14784_s7 + $0x364] ss:$16 sps:$4 sm:$0xff]  }
  0xd0   :  { %4503 = vmatprep.subr.bf16.mxu1 %v9774_v36  ;;  %v9840_v34 = vld [vmem:[%s14784_s7 + $0x1c4] ss:$16 sps:$4 sm:$0xff]   ;;  %v9838_v36 = vld [vmem:[%s14784_s7 + $0x1c0] ss:$16 sps:$4 sm:$0xff]  }
  0xd2   :  { %1945 = vmatpush1.bf16.msra.mxu0 %v9739_v20  ;;  %v174_v20 = vlaneseq }
  0xd3   :  { %1946 = vmatprep.subr.bf16.mxu0 %v9744_v21  ;;  %4504 = vmatpush1.bf16.msra.mxu1 %v9772_v39  ;;  %v9823_v21 = vld [vmem:[%s14784_s7 + $0x360] ss:$16 sps:$4 sm:$0xff]  }
  0xd4   :  { %4505 = vmatprep.subr.bf16.mxu1 %v9780_v40 }
  0xd6   :  { %1947 = vmatpush1.bf16.msra.mxu0 %v9742_v8  ;;  %v9828_v8 = vld [vmem:[%s14784_s7 + $0x184] ss:$16 sps:$4 sm:$0xff]  }
  0xd7   :  { %1948 = vmatprep.subr.bf16.mxu0 %v9747_v11  ;;  %4506 = vmatpush1.bf16.msra.mxu1 %v9778_v42  ;;  %v9826_v11 = vld [vmem:[%s14784_s7 + $0x180] ss:$16 sps:$4 sm:$0xff]  }
  0xd8   :  { %4507 = vmatprep.subr.bf16.mxu1 %v9786_v44  ;;  %v9841_v42 = vld [vmem:[%s14784_s7 + $0x3c0] ss:$16 sps:$4 sm:$0xff]  }
  0xda   :  { %1949 = vmatpush1.bf16.msra.mxu0 %v9745_v22  ;;  %v9831_v22 = vld [vmem:[%s14784_s7 + $0x384] ss:$16 sps:$4 sm:$0xff]  }
  0xdb   :  { %1950 = vmatprep.subr.bf16.mxu0 %v9750_v23  ;;  %4508 = vmatpush1.bf16.msra.mxu1 %v9784_v46  ;;  %v11983_v23 = vshrl.u32 %v174_v20, 7 }
  0xdc   :  { %4509 = vmatprep.subr.bf16.mxu1 %v9792_v48  ;;  %v9849_v48 = vld [vmem:[%s14784_s7 + $0x3e4] ss:$16 sps:$4 sm:$0xff]  }
  0xdd   :  { %v11992_v26 = vsub.s32 4, %v11983_v23  ;;  %v12004_v30 = vsub.s32 6, %v11983_v23  ;;  %v12007_v31 = vsub.s32 5, %v11983_v23  ;;  %v12010_v32 = vsub.s32 7, %v11983_v23 }
  0xde   :  { %1951 = vmatpush1.bf16.msra.mxu0 %v9748_v24  ;;  %v9829_v24 = vld [vmem:[%s14784_s7 + $0x380] ss:$16 sps:$4 sm:$0xff]  }
  0xdf   :  { %1952 = vmatprep.subr.bf16.mxu0 %v9753_v25  ;;  %4510 = vmatpush1.bf16.msra.mxu1 %v9790_v50  ;;  %v9834_v25 = vld [vmem:[%s14784_s7 + $0x1a4] ss:$16 sps:$4 sm:$0xff]  }
  0xe0   :  { %4511 = vmatprep.subr.bf16.mxu1 %v9798_v54 }
  0xe2   :  { %1953 = vmatpush1.bf16.msra.mxu0 %v9751_v27  ;;  %v9832_v27 = vld [vmem:[%s14784_s7 + $0x1a0] ss:$16 sps:$4 sm:$0xff]  }
  0xe3   :  { %4538 = vmatprep.subr.bf16.mxu0 %v9759_v29  ;;  %4512 = vmatpush1.bf16.msra.mxu1 %v9796_v57  ;;  %v170_v29 = vld [vmem:[%s14780_s3] sm:$0xff] }
  0xe4   :  { %4513 = vmatprep.subr.bf16.mxu1 %v9804_v2  ;;  %v197_v39 = vrot.slane %v170_v29, %v12007_v31  ;;  %v205_v40 = vrot.slane %v170_v29, %v12010_v32 }
  0xe5   :  { %1971 = vmatmul.mubr.bf16.vlgmr.msra.gmra.mrb[24].mxu0 %v11677_v45  ;;  %v9775_v45 = vld [vmem:[%s14784_s7 + $0x260] ss:$16 sps:$4 sm:$0xff]  }
  0xe6   :  { %4539 = vmatpush1.bf16.msra.mxu0 %v9757_v33  ;;  %v9835_v33 = vld [vmem:[%s14784_s7 + $0x3a0] ss:$16 sps:$4 sm:$0xff]  }
  0xe7   :  { %4540 = vmatprep.subr.bf16.mxu0 %v9765_v35  ;;  %4514 = vmatpush1.bf16.msra.mxu1 %v9802_v4  ;;  %v193_v35 = vrot.slane %v170_v29, %v11992_v26 }
  0xe8   :  { %4515 = vmatprep.subr.bf16.mxu1 %v9810_v7 }
  0xea   :  { %4541 = vmatpush1.bf16.msra.mxu0 %v9763_v37  ;;  %v9843_v37 = vld [vmem:[%s14784_s7 + $0x3c4] ss:$16 sps:$4 sm:$0xff]  }
  0xeb   :  { %4542 = vmatprep.subr.bf16.mxu0 %v9771_v38  ;;  %4516 = vmatpush1.bf16.msra.mxu1 %v9808_v9  ;;  %v201_v38 = vrot.slane %v170_v29, %v12004_v30  ;;  %v171_v9 = vld [vmem:[%s14780_s3 + $0x8] sm:$0xff]  ;;  %v12089_v29 = vsub.s32 2, %v11983_v23 }
  0xec   :  { %4517 = vmatprep.subr.bf16.mxu1 %v9816_v13  ;;  %v229_v13 = vrot.slane %v171_v9, %v12007_v31 }
  0xee   :  { %4543 = vmatpush1.bf16.msra.mxu0 %v9769_v41 }
  0xef   :  { %4544 = vmatprep.subr.bf16.mxu0 %v9777_v43  ;;  %4518 = vmatpush1.bf16.msra.mxu1 %v9814_v14  ;;  %v9846_v43 = vld [vmem:[%s14784_s7 + $0x1e4] ss:$16 sps:$4 sm:$0xff]   ;;  %v237_v14 = vrot.slane %v171_v9, %v12010_v32 }
  0xf0   :  { %4519 = vmatprep.subr.bf16.mxu1 %v9822_v17 }
  0xf2   :  { %4545 = vmatpush1.bf16.msra.mxu0 %v9775_v45 }
  0xf3   :  { %4546 = vmatprep.subr.bf16.mxu0 %v9783_v47  ;;  %4520 = vmatpush1.bf16.msra.mxu1 %v9820_v18  ;;  %v9844_v47 = vld [vmem:[%s14784_s7 + $0x1e0] ss:$16 sps:$4 sm:$0xff]  }
  0xf4   :  { %4521 = vmatprep.subr.bf16.mxu1 %v9828_v8 }
  0xf6   :  { %4547 = vmatpush1.bf16.msra.mxu0 %v9781_v49 }
  0xf7   :  { %4548 = vmatprep.subr.bf16.mxu0 %v9789_v51  ;;  %4522 = vmatpush1.bf16.msra.mxu1 %v9826_v11 }
  0xf8   :  { %v11906_v55 = vpop.f32.mrb[0].mxu0  ;;  %v11914_v58 = vpop.f32.mrb[0].mxu1  ;;  %4523 = vmatprep.subr.bf16.mxu1 %v9834_v25 }
  0xf9   :  { %v11916_v59 = vpop.f32.mrb[1].mxu0  ;;  %v11921_v61 = vpop.f32.mrb[1].mxu1 }
  0xfa   :  { %v932_v62 = vpop.f32.mrb[2].mxu0  ;;  %4549 = vmatpush1.bf16.msra.mxu0 %v9787_v52  ;;  %v973_v63 = vpop.f32.mrb[2].mxu1 }
  0xfb   :  { %v933_v0 = vpop.f32.mrb[3].mxu0  ;;  %4550 = vmatprep.subr.bf16.mxu0 %v9795_v53  ;;  %v974_v1 = vpop.f32.mrb[3].mxu1  ;;  %4524 = vmatpush1.bf16.msra.mxu1 %v9832_v27  ;;  %v9847_v62 = vld [vmem:[%s14784_s7 + $0x3e0] ss:$16 sps:$4 sm:$0xff]   ;;  %v9855_v63 = vld [vmem:[%s14784_s7 + $0x604] ss:$16 sps:$4 sm:$0xff]  }
  0xfc   :  { %4525 = vmatprep.subr.bf16.mxu1 %v9840_v34  ;;  %v12083_v27 = vld [vmem:[%s14782_s5] sm:$0xff]  ;;  %v12095_v34 = vsub.s32 3, %v11983_v23 }
  0xfe   :  { %4551 = vmatpush1.bf16.msra.mxu0 %v9793_v56 }
  0xff   :  { %4552 = vmatprep.subr.bf16.mxu0 %v9801_v60  ;;  %4526 = vmatpush1.bf16.msra.mxu1 %v9838_v36  ;;  %v9852_v60 = vld [vmem:[%s14784_s7 + $0x404] ss:$16 sps:$4 sm:$0xff]   ;;  %v1335_v36 = vrot.slane %v12083_v27, %v12089_v29 }
 0x100   :  { %4527 = vmatprep.subr.bf16.mxu1 %v9846_v43 }
 0x102   :  { %4553 = vmatpush1.bf16.msra.mxu0 %v9799_v3 }
 0x103   :  { %4554 = vmatprep.subr.bf16.mxu0 %v9807_v5  ;;  %4528 = vmatpush1.bf16.msra.mxu1 %v9844_v47 }
 0x104   :  { %4579 = vmatprep.subr.bf16.mxu1 %v9852_v60 }
 0x106   :  { %4555 = vmatpush1.bf16.msra.mxu0 %v9805_v6 }
 0x107   :  { %4556 = vmatprep.subr.bf16.mxu0 %v9813_v10  ;;  %v225_v10 = vrot.slane %v171_v9, %v11992_v26 }
 0x10a   :  { %4557 = vmatpush1.bf16.msra.mxu0 %v9811_v12  ;;  %v233_v12 = vrot.slane %v171_v9, %v12004_v30 }
 0x10b   :  { %4558 = vmatprep.subr.bf16.mxu0 %v9819_v15 }
 0x10e   :  { %4559 = vmatpush1.bf16.msra.mxu0 %v9817_v16 }
 0x10f   :  { %4560 = vmatprep.subr.bf16.mxu0 %v9825_v19 }
 0x112   :  { %4561 = vmatpush1.bf16.msra.mxu0 %v9823_v21 }
 0x113   :  { %4562 = vmatprep.subr.bf16.mxu0 %v9831_v22 }
 0x116   :  { %4563 = vmatpush1.bf16.msra.mxu0 %v9829_v24 }
 0x117   :  { %4564 = vmatprep.subr.bf16.mxu0 %v9837_v28  ;;  %v12086_v28 = vsub.s32 0, %v11983_v23 }
 0x118   :  { %v1010_v41 = vpop.f32.mrb[4].mxu0  ;;  %v1051_v45 = vpop.f32.mrb[4].mxu1 }
 0x119   :  { %v12034_v44 = vadd.f32 %v1010_v41, %v193_v35  ;;  %v1012_v46 = vpop.f32.mrb[5].mxu0  ;;  %v12042_v49 = vadd.f32 %v1051_v45, %v201_v38  ;;  %v1053_v51 = vpop.f32.mrb[5].mxu1  ;;  %v1327_v35 = vrot.slane %v12083_v27, %v12086_v28  ;;  %v1339_v38 = vrot.slane %v12083_v27, %v12095_v34 }
 0x11a   :  { %v12044_v50 = vadd.f32 %v1012_v46, %v197_v39  ;;  %v1014_v52 = vpop.f32.mrb[6].mxu0  ;;  %4565 = vmatpush1.bf16.msra.mxu0 %v9835_v33  ;;  %v12046_v53 = vadd.f32 %v1053_v51, %v205_v40  ;;  %v1055_v54 = vpop.f32.mrb[6].mxu1  ;;  %v12092_v33 = vsub.s32 1, %v11983_v23 }
 0x11b   :  { %v1015_v56 = vpop.f32.mrb[7].mxu0  ;;  %4566 = vmatprep.subr.bf16.mxu0 %v9843_v37  ;;  %v1056_v57 = vpop.f32.mrb[7].mxu1 }
 0x11c   :  { %v1331_v37 = vrot.slane %v12083_v27, %v12092_v33 }
 0x11e   :  { %4567 = vmatpush1.bf16.msra.mxu0 %v9841_v42 }
 0x11f   :  { %4568 = vmatprep.subr.bf16.mxu0 %v9849_v48 }
 0x122   :  { %4569 = vmatpush1.bf16.msra.mxu0 %v9847_v62 }
 0x123   :  { %4620 = vmatprep.subr.bf16.mxu0 %v9855_v63 }
 0x138   :  { %v12057_v0 = vpop.f32.mrb[8].mxu0  ;;  %v12059_v1 = vpop.f32.mrb[8].mxu1 }
 0x139   :  { %v12061_v2 = vpop.f32.mrb[9].mxu0  ;;  %v12063_v3 = vpop.f32.mrb[9].mxu1 }
 0x13a   :  { %v1096_v4 = vpop.f32.mrb[10].mxu0  ;;  %v1137_v5 = vpop.f32.mrb[10].mxu1 }
 0x13b   :  { %v1097_v6 = vpop.f32.mrb[11].mxu0  ;;  %v1138_v7 = vpop.f32.mrb[11].mxu1 }
 0x158   :  { %v1174_v15 = vpop.f32.mrb[12].mxu0  ;;  %v1215_v17 = vpop.f32.mrb[12].mxu1 }
 0x159   :  { %v12072_v16 = vadd.f32 %v1174_v15, %v225_v10  ;;  %v1176_v18 = vpop.f32.mrb[13].mxu0  ;;  %v12074_v19 = vadd.f32 %v1215_v17, %v233_v12  ;;  %v1217_v21 = vpop.f32.mrb[13].mxu1  ;;  %v1343_v17 = vrot.slane %v12083_v27, %v11992_v26 }
 0x15a   :  { %v12076_v20 = vadd.f32 %v1176_v18, %v229_v13  ;;  %v1178_v8 = vpop.f32.mrb[14].mxu0  ;;  %v12078_v11 = vadd.f32 %v1217_v21, %v237_v14  ;;  %v1219_v22 = vpop.f32.mrb[14].mxu1  ;;  %v1347_v21 = vrot.slane %v12083_v27, %v12007_v31  ;;  %v9850_v31 = vld [vmem:[%s14784_s7 + $0x400] ss:$16 sps:$4 sm:$0xff]  }
 0x15b   :  { %v1179_v24 = vpop.f32.mrb[15].mxu0  ;;  %v1220_v25 = vpop.f32.mrb[15].mxu1  ;;  %v1351_v8 = vrot.slane %v12083_v27, %v12004_v30 }
 0x15c   :  { %v1355_v24 = vrot.slane %v12083_v27, %v12010_v32  ;;  %v9853_v32 = vld [vmem:[%s14784_s7 + $0x600] ss:$16 sps:$4 sm:$0xff]  }
 0x178   :  { %v1808_v39 = vpop.f32.mrb[16].mxu0  ;;  %v1849_v41 = vpop.f32.mrb[16].mxu1 }
 0x179   :  { %v1809_v40 = vadd.f32 %v1808_v39, %v1327_v35  ;;  %v1810_v42 = vpop.f32.mrb[17].mxu0  ;;  %v1850_v43 = vadd.f32 %v1849_v41, %v1335_v36  ;;  %v1851_v23 = vpop.f32.mrb[17].mxu1 }
 0x17a   :  { %v1811_v45 = vadd.f32 %v1810_v42, %v1331_v37  ;;  %v1812_v46 = vpop.f32.mrb[18].mxu0  ;;  %v1852_v48 = vadd.f32 %v1851_v23, %v1339_v38  ;;  %v1853_v51 = vpop.f32.mrb[18].mxu1 }
 0x17b   :  { %v1979_v47 = vsub.f32 0.0, %v1809_v40  ;;  %v1813_v52 = vpop.f32.mrb[19].mxu0  ;;  %v1981_v54 = vsub.f32 0.0, %v1850_v43  ;;  %v1854_v57 = vpop.f32.mrb[19].mxu1 }
 0x17c   :  { %v1980_v56 = vsub.f32 0.0, %v1811_v45  ;;  %v1982_v62 = vsub.f32 0.0, %v1852_v48 }
 0x17d   :  { %v1989_v60 = vmul.f32 1.442695, %v1979_v47  ;;  %v1993_v63 = vmul.f32 1.442695, %v1981_v54 }
 0x17e   :  { %v1991_v4 = vmul.f32 1.442695, %v1980_v56  ;;  %v1995_v5 = vmul.f32 1.442695, %v1982_v62 }
 0x17f   :  { %11034 = vpow2.f32 %v1989_v60 }
 0x180   :  { %11036 = vpow2.f32 %v1993_v63  ;;  %v9861_v63 = vld [vmem:[%s14784_s7 + $0x624] ss:$16 sps:$4 sm:$0xff]  }
 0x181   :  { %11038 = vpow2.f32 %v1991_v4 }
 0x182   :  { %11040 = vpow2.f32 %v1995_v5  ;;  %v9856_v5 = vld [vmem:[%s14784_s7 + $0x420] ss:$16 sps:$4 sm:$0xff]  }
 0x189   :  { %v11035_v6 = vpop.eup %11034 }
 0x18a   :  { %v11037_v7 = vpop.eup %11036  ;;  %v2009_v9 = vadd.f32 1.0, %v11035_v6 }
 0x18b   :  { %v11039_v10 = vpop.eup %11038  ;;  %v2011_v12 = vadd.f32 1.0, %v11037_v7  ;;  %v9859_v7 = vld [vmem:[%s14784_s7 + $0x620] ss:$16 sps:$4 sm:$0xff]  }
 0x18c   :  { %v11041_v13 = vpop.eup %11040  ;;  %11042 = vrcp.f32 %v2009_v9  ;;  %v2010_v14 = vadd.f32 1.0, %v11039_v10  ;;  %v9864_v9 = vld [vmem:[%s14784_s7 + $0x444] ss:$16 sps:$4 sm:$0xff]  }
 0x18d   :  { %11044 = vrcp.f32 %v2011_v12  ;;  %v2012_v15 = vadd.f32 1.0, %v11041_v13  ;;  %v9867_v10 = vld [vmem:[%s14784_s7 + $0x644] ss:$16 sps:$4 sm:$0xff]   ;;  %v9862_v12 = vld [vmem:[%s14784_s7 + $0x440] ss:$16 sps:$4 sm:$0xff]  }
 0x18e   :  { %11046 = vrcp.f32 %v2010_v14  ;;  %v9865_v13 = vld [vmem:[%s14784_s7 + $0x640] ss:$16 sps:$4 sm:$0xff]   ;;  %v9870_v14 = vld [vmem:[%s14784_s7 + $0x464] ss:$16 sps:$4 sm:$0xff]  }
 0x18f   :  { %11048 = vrcp.f32 %v2012_v15  ;;  %v9873_v15 = vld [vmem:[%s14784_s7 + $0x664] ss:$16 sps:$4 sm:$0xff]  }
 0x196   :  { %v11043_v18 = vpop.eup %11042 }
 0x197   :  { %v11045_v22 = vpop.eup %11044  ;;  %v2029_v35 = vmul.f32 %v11043_v18, %v1809_v40  ;;  %v9871_v18 = vld [vmem:[%s14784_s7 + $0x660] ss:$16 sps:$4 sm:$0xff]  }
 0x198   :  { %v11047_v25 = vpop.eup %11046  ;;  %v1890_v36 = vpop.f32.mrb[20].mxu0  ;;  %v2031_v38 = vmul.f32 %v11045_v22, %v1850_v43  ;;  %v9858_v43 = vld [vmem:[%s14784_s7 + $0x424] ss:$16 sps:$4 sm:$0xff]   ;;  %v9874_v22 = vld [vmem:[%s14784_s7 + $0x480] ss:$16 sps:$4 sm:$0xff]  }
 0x199   :  { %v11049_v37 = vpop.eup %11048  ;;  %v2030_v39 = vmul.f32 %v11047_v25, %v1811_v45  ;;  %v12113_v41 = vadd.f32 %v1890_v36, %v1343_v17  ;;  %v1892_v26 = vpop.f32.mrb[21].mxu0  ;;  %v12132_v52 = vpack.c.bf16 %v2029_v35, %v2029_v35  ;;  %v9868_v17 = vld [vmem:[%s14784_s7 + $0x460] ss:$16 sps:$4 sm:$0xff]  }
 0x19a   :  { %v1931_v42 = vpop.f32.mrb[20].mxu1  ;;  %v2032_v23 = vmul.f32 %v11049_v37, %v1852_v48  ;;  %v12118_v30 = vadd.f32 %v1892_v26, %v1347_v21  ;;  %v1894_v45 = vpop.f32.mrb[22].mxu0  ;;  %v12137_v60 = vpack.c.bf16 %v2031_v38, %v2031_v38  ;;  %v9876_v21 = vld [vmem:[%s14784_s7 + $0x484] ss:$16 sps:$4 sm:$0xff]   ;;  %v9877_v36 = vld [vmem:[%s14784_s7 + $0x680] ss:$16 sps:$4 sm:$0xff]  }
 0x19b   :  { %v12123_v27 = vadd.f32 %v1931_v42, %v1351_v8  ;;  %v1933_v40 = vpop.f32.mrb[21].mxu1  ;;  %v12128_v46 = vpack.c.bf16 %v2030_v39, %v2030_v39  ;;  %v1895_v51 = vpop.f32.mrb[23].mxu0  ;;  %v9879_v8 = vld [vmem:[%s14784_s7 + $0x684] ss:$16 sps:$4 sm:$0xff]   ;;  %v9880_v39 = vld [vmem:[%s14784_s7 + $0x4a0] ss:$16 sps:$4 sm:$0xff]  }
 0x19c   :  { %v12130_v47 = vadd.f32 %v1933_v40, %v1355_v24  ;;  %v1935_v48 = vpop.f32.mrb[22].mxu1  ;;  %v12134_v54 = vpack.c.bf16 %v2032_v23, %v2032_v23  ;;  %v1984_v56 = vsub.f32 0.0, %v12118_v30  ;;  %v9882_v37 = vld [vmem:[%s14784_s7 + $0x4a4] ss:$16 sps:$4 sm:$0xff]   ;;  %v12213_v40 = vld [vmem:[%s14782_s5 + $0x8] sm:$0x3] }
 0x19d   :  { %v1936_v57 = vpop.f32.mrb[23].mxu1  ;;  %4529 = vmatprep.mubr.bf16.mxu1 %v12128_v46  ;;  %v9885_v26 = vld [vmem:[%s14784_s7 + $0x6a4] ss:$16 sps:$4 sm:$0xff]   ;;  %v1985_v45 = vsub.f32 0.0, %v12123_v27  ;;  %v9889_v51 = vld [vmem:[%s14784_s7 + $0x6c0] ss:$16 sps:$4 sm:$0xff]  }
 0x19e   :  { %v1986_v62 = vsub.f32 0.0, %v12130_v47  ;;  %v1999_v4 = vmul.f32 1.442695, %v1984_v56  ;;  %4570 = vmatprep.mubr.bf16.mxu0 %v12134_v54  ;;  %4530 = vmatmul.mubr.bf16.vlgmr.msra.gmra.mrb[24].mxu1 %v12132_v52  ;;  %v9888_v42 = vld [vmem:[%s14784_s7 + $0x4c4] ss:$16 sps:$4 sm:$0xff]  }
 0x19f   :  { %4571 = vmatmul.mubr.bf16.vlgmr.msra.gmra.mrb[28].mxu0 %v12137_v60  ;;  %4580 = vmatpush1.bf16.msra.mxu1 %v9850_v31  ;;  %v9883_v31 = vld [vmem:[%s14784_s7 + $0x6a0] ss:$16 sps:$4 sm:$0xff]   ;;  %v9891_v23 = vld [vmem:[%s14784_s7 + $0x6c4] ss:$16 sps:$4 sm:$0xff]  }
 0x1a0   :  { %v2003_v6 = vmul.f32 1.442695, %v1986_v62  ;;  %11050 = vpow2.f32 %v1999_v4  ;;  %4621 = vmatpush1.bf16.msra.mxu0 %v9853_v32  ;;  %4581 = vmatprep.subr.bf16.mxu1 %v9858_v43  ;;  %v9886_v32 = vld [vmem:[%s14784_s7 + $0x4c0] ss:$16 sps:$4 sm:$0xff]   ;;  %v1983_v43 = vsub.f32 0.0, %v12113_v41 }
 0x1a1   :  { %4622 = vmatprep.subr.bf16.mxu0 %v9861_v63  ;;  %v9894_v48 = vld [vmem:[%s14784_s7 + $0x4e4] ss:$16 sps:$4 sm:$0xff]   ;;  %v9892_v57 = vld [vmem:[%s14784_s7 + $0x4e0] ss:$16 sps:$4 sm:$0xff]   ;;  %v1363_v63 = vrot.slane %v12213_v40, %v12092_v33 }
 0x1a2   :  { %11052 = vpow2.f32 %v2003_v6  ;;  %v9897_v56 = vld [vmem:[%s14784_s7 + $0x6e4] ss:$16 sps:$4 sm:$0xff]   ;;  %v1997_v62 = vmul.f32 1.442695, %v1983_v43 }
 0x1a3   :  { %4582 = vmatpush1.bf16.msra.mxu1 %v9856_v5  ;;  %v2001_v5 = vmul.f32 1.442695, %v1985_v45  ;;  %v9916_v45 = vld [vmem:[%s14784_s7 + $0x560] ss:$16 sps:$4 sm:$0xff]  }
 0x1a4   :  { %4623 = vmatpush1.bf16.msra.mxu0 %v9859_v7  ;;  %4583 = vmatprep.subr.bf16.mxu1 %v9864_v9  ;;  %v9895_v7 = vld [vmem:[%s14784_s7 + $0x6e0] ss:$16 sps:$4 sm:$0xff]   ;;  %v9900_v9 = vld [vmem:[%s14784_s7 + $0x504] ss:$16 sps:$4 sm:$0xff]  }
 0x1a5   :  { %4624 = vmatprep.subr.bf16.mxu0 %v9867_v10 }
 0x1a7   :  { %4584 = vmatpush1.bf16.msra.mxu1 %v9862_v12 }
 0x1a8   :  { %4625 = vmatpush1.bf16.msra.mxu0 %v9865_v13  ;;  %4585 = vmatprep.subr.bf16.mxu1 %v9870_v14  ;;  %v9898_v13 = vld [vmem:[%s14784_s7 + $0x500] ss:$16 sps:$4 sm:$0xff]  }
 0x1a9   :  { %4626 = vmatprep.subr.bf16.mxu0 %v9873_v15 }
 0x1aa   :  { %v11051_v24 = vpop.eup %11050 }
 0x1ab   :  { %v2014_v25 = vadd.f32 1.0, %v11051_v24  ;;  %4586 = vmatpush1.bf16.msra.mxu1 %v9868_v17  ;;  %v9901_v24 = vld [vmem:[%s14784_s7 + $0x700] ss:$16 sps:$4 sm:$0xff]  }
 0x1ac   :  { %v11053_v35 = vpop.eup %11052  ;;  %4627 = vmatpush1.bf16.msra.mxu0 %v9871_v18  ;;  %4587 = vmatprep.subr.bf16.mxu1 %v9876_v21 }
 0x1ad   :  { %11054 = vrcp.f32 %v2014_v25  ;;  %v2016_v38 = vadd.f32 1.0, %v11053_v35  ;;  %4628 = vmatprep.subr.bf16.mxu0 %v9879_v8  ;;  %v9906_v25 = vld [vmem:[%s14784_s7 + $0x524] ss:$16 sps:$4 sm:$0xff]   ;;  %v9904_v35 = vld [vmem:[%s14784_s7 + $0x520] ss:$16 sps:$4 sm:$0xff]  }
 0x1af   :  { %11056 = vrcp.f32 %v2016_v38  ;;  %4588 = vmatpush1.bf16.msra.mxu1 %v9874_v22  ;;  %v9907_v38 = vld [vmem:[%s14784_s7 + $0x720] ss:$16 sps:$4 sm:$0xff]  }
 0x1b0   :  { %4629 = vmatpush1.bf16.msra.mxu0 %v9877_v36  ;;  %4589 = vmatprep.subr.bf16.mxu1 %v9882_v37  ;;  %11058 = vpow2.f32 %v1997_v62  ;;  %v9909_v36 = vld [vmem:[%s14784_s7 + $0x724] ss:$16 sps:$4 sm:$0xff]  }
 0x1b1   :  { %4630 = vmatprep.subr.bf16.mxu0 %v9885_v26  ;;  %11060 = vpow2.f32 %v2001_v5  ;;  %v9910_v26 = vld [vmem:[%s14784_s7 + $0x540] ss:$16 sps:$4 sm:$0xff]   ;;  %v9924_v62 = vld [vmem:[%s14784_s7 + $0x584] ss:$16 sps:$4 sm:$0xff]  }
 0x1b3   :  { %4590 = vmatpush1.bf16.msra.mxu1 %v9880_v39  ;;  %v9912_v39 = vld [vmem:[%s14784_s7 + $0x544] ss:$16 sps:$4 sm:$0xff]  }
 0x1b4   :  { %4631 = vmatpush1.bf16.msra.mxu0 %v9883_v31  ;;  %4591 = vmatprep.subr.bf16.mxu1 %v9888_v42  ;;  %v9915_v31 = vld [vmem:[%s14784_s7 + $0x744] ss:$16 sps:$4 sm:$0xff]  }
 0x1b5   :  { %4632 = vmatprep.subr.bf16.mxu0 %v9891_v23  ;;  %v9913_v23 = vld [vmem:[%s14784_s7 + $0x740] ss:$16 sps:$4 sm:$0xff]  }
 0x1b7   :  { %v11055_v4 = vpop.eup %11054  ;;  %4592 = vmatpush1.bf16.msra.mxu1 %v9886_v32  ;;  %v9918_v32 = vld [vmem:[%s14784_s7 + $0x564] ss:$16 sps:$4 sm:$0xff]  }
 0x1b8   :  { %v2034_v6 = vmul.f32 %v11055_v4, %v12118_v30  ;;  %4633 = vmatpush1.bf16.msra.mxu0 %v9889_v51  ;;  %4593 = vmatprep.subr.bf16.mxu1 %v9894_v48  ;;  %v12238_v10 = vpop.f32.mrb[24].mxu0  ;;  %v9903_v30 = vld [vmem:[%s14784_s7 + $0x704] ss:$16 sps:$4 sm:$0xff]  }
 0x1b9   :  { %v11057_v12 = vpop.eup %11056  ;;  %4634 = vmatprep.subr.bf16.mxu0 %v9897_v56  ;;  %v1974_v14 = vpop.f32.mrb[25].mxu0  ;;  %v9921_v51 = vld [vmem:[%s14784_s7 + $0x764] ss:$16 sps:$4 sm:$0xff]  }
 0x1ba   :  { %v12246_v15 = vpack.c.bf16 %v2034_v6, %v2034_v6  ;;  %v2036_v17 = vmul.f32 %v11057_v12, %v12130_v47  ;;  %v12249_v18 = vadd.f32 %v1974_v14, %v1363_v63  ;;  %v1976_v21 = vpop.f32.mrb[26].mxu0  ;;  %v11059_v42 = vpop.eup %11058  ;;  %v9922_v63 = vld [vmem:[%s14784_s7 + $0x580] ss:$16 sps:$4 sm:$0xff]   ;;  %v9927_v4 = vld [vmem:[%s14784_s7 + $0x784] ss:$16 sps:$4 sm:$0xff]  }
 0x1bb   :  { %4594 = vmatpush1.bf16.msra.mxu1 %v9892_v57  ;;  %v1977_v8 = vpop.f32.mrb[27].mxu0  ;;  %v11061_v43 = vpop.eup %11060  ;;  %v2013_v48 = vadd.f32 1.0, %v11059_v42  ;;  %v9919_v57 = vld [vmem:[%s14784_s7 + $0x760] ss:$16 sps:$4 sm:$0xff]   ;;  %v9936_v14 = vld [vmem:[%s14784_s7 + $0x5c4] ss:$16 sps:$4 sm:$0xff]  }
 0x1bc   :  { %v12251_v22 = vpack.c.bf16 %v2036_v17, %v2036_v17  ;;  %4635 = vmatpush1.bf16.msra.mxu0 %v9895_v7  ;;  %4595 = vmatprep.subr.bf16.mxu1 %v9900_v9  ;;  %v1988_v47 = vsub.f32 0.0, %v12249_v18  ;;  %v2015_v56 = vadd.f32 1.0, %v11061_v43  ;;  %v9925_v7 = vld [vmem:[%s14784_s7 + $0x780] ss:$16 sps:$4 sm:$0xff]   ;;  %v9930_v9 = vld [vmem:[%s14784_s7 + $0x5a4] ss:$16 sps:$4 sm:$0xff]  }
 0x1bd   :  { %4636 = vmatprep.subr.bf16.mxu0 %v9903_v30  ;;  %4611 = vmatprep.mubr.bf16.mxu1 %v12246_v15  ;;  %v9928_v12 = vld [vmem:[%s14784_s7 + $0x5a0] ss:$16 sps:$4 sm:$0xff]   ;;  %v9939_v21 = vld [vmem:[%s14784_s7 + $0x7c4] ss:$16 sps:$4 sm:$0xff]  }
 0x1be   :  { %4652 = vmatprep.mubr.bf16.mxu0 %v12251_v22  ;;  %v2007_v37 = vmul.f32 1.442695, %v1988_v47  ;;  %v9931_v30 = vld [vmem:[%s14784_s7 + $0x7a0] ss:$16 sps:$4 sm:$0xff]   ;;  %v9954_v43 = vld [vmem:[%s14784_s7 + $0x824] ss:$16 sps:$4 sm:$0xff]  }
 0x1bf   :  { %4596 = vmatpush1.bf16.msra.mxu1 %v9898_v13  ;;  %v9933_v13 = vld [vmem:[%s14784_s7 + $0x7a4] ss:$16 sps:$4 sm:$0xff]   ;;  %v9934_v17 = vld [vmem:[%s14784_s7 + $0x5c0] ss:$16 sps:$4 sm:$0xff]  }
 0x1c0   :  { %4637 = vmatpush1.bf16.msra.mxu0 %v9901_v24  ;;  %4597 = vmatprep.subr.bf16.mxu1 %v9906_v25  ;;  %11062 = vpow2.f32 %v2007_v37  ;;  %v9937_v8 = vld [vmem:[%s14784_s7 + $0x7c0] ss:$16 sps:$4 sm:$0xff]   ;;  %v9942_v24 = vld [vmem:[%s14784_s7 + $0x5e4] ss:$16 sps:$4 sm:$0xff]  }
 0x1c1   :  { %4638 = vmatprep.subr.bf16.mxu0 %v9909_v36  ;;  %11064 = vrcp.f32 %v2013_v48  ;;  %v9940_v47 = vld [vmem:[%s14784_s7 + $0x5e0] ss:$16 sps:$4 sm:$0xff]  }
 0x1c2   :  { %11066 = vrcp.f32 %v2015_v56  ;;  %v9952_v48 = vld [vmem:[%s14784_s7 + $0x820] ss:$16 sps:$4 sm:$0xff]   ;;  %v9955_v56 = vld [vmem:[%s14784_s7 + $0x28] ss:$16 sps:$4 sm:$0xff]  }
 0x1c3   :  { %4598 = vmatpush1.bf16.msra.mxu1 %v9904_v35  ;;  %v9945_v35 = vld [vmem:[%s14784_s7 + $0x7e4] ss:$16 sps:$4 sm:$0xff]  }
 0x1c4   :  { %4639 = vmatpush1.bf16.msra.mxu0 %v9907_v38  ;;  %4599 = vmatprep.subr.bf16.mxu1 %v9912_v39  ;;  %v9943_v39 = vld [vmem:[%s14784_s7 + $0x7e0] ss:$16 sps:$4 sm:$0xff]  }
 0x1c5   :  { %4640 = vmatprep.subr.bf16.mxu0 %v9915_v31  ;;  %v9951_v31 = vld [vmem:[%s14784_s7 + $0xc] ss:$16 sps:$4 sm:$0xff]  }
 0x1c7   :  { %4600 = vmatpush1.bf16.msra.mxu1 %v9910_v26  ;;  %v9948_v26 = vld [vmem:[%s14784_s7 + $0x804] ss:$16 sps:$4 sm:$0xff]  }
 0x1c8   :  { %4641 = vmatpush1.bf16.msra.mxu0 %v9913_v23  ;;  %4601 = vmatprep.subr.bf16.mxu1 %v9918_v32  ;;  %v9949_v32 = vld [vmem:[%s14784_s7 + $0x8] ss:$16 sps:$4 sm:$0xff]  }
 0x1c9   :  { %4642 = vmatprep.subr.bf16.mxu0 %v9921_v51 }
 0x1ca   :  { %v11063_v5 = vpop.eup %11062 }
 0x1cb   :  { %4602 = vmatpush1.bf16.msra.mxu1 %v9916_v45  ;;  %v2018_v6 = vadd.f32 1.0, %v11063_v5  ;;  %v11065_v25 = vpop.eup %11064  ;;  %v9964_v5 = vld [vmem:[%s14784_s7 + $0x860] ss:$16 sps:$4 sm:$0xff]  }
 0x1cc   :  { %4643 = vmatpush1.bf16.msra.mxu0 %v9919_v57  ;;  %4603 = vmatprep.subr.bf16.mxu1 %v9924_v62  ;;  %v11067_v36 = vpop.eup %11066  ;;  %v2033_v38 = vmul.f32 %v11065_v25, %v12113_v41  ;;  %v9946_v41 = vld [vmem:[%s14784_s7 + $0x800] ss:$16 sps:$4 sm:$0xff]   ;;  %v9960_v57 = vld [vmem:[%s14784_s7 + $0x844] ss:$16 sps:$4 sm:$0xff]   ;;  %v9963_v62 = vld [vmem:[%s14784_s7 + $0x4c] ss:$16 sps:$4 sm:$0xff]  }
 0x1cd   :  { %4644 = vmatprep.subr.bf16.mxu0 %v9927_v4  ;;  %11068 = vrcp.f32 %v2018_v6  ;;  %v2035_v42 = vmul.f32 %v11067_v36, %v12123_v27  ;;  %v9957_v27 = vld [vmem:[%s14784_s7 + $0x2c] ss:$16 sps:$4 sm:$0xff]   ;;  %v9961_v4 = vld [vmem:[%s14784_s7 + $0x48] ss:$16 sps:$4 sm:$0xff]   ;;  %v9984_v25 = vld [vmem:[%s14784_s7 + $0x8c4] ss:$16 sps:$4 sm:$0xff]  }
 0x1ce   :  { %v12364_v45 = vpack.c.bf16 %v2033_v38, %v2033_v38  ;;  %v9969_v6 = vld [vmem:[%s14784_s7 + $0x6c] ss:$16 sps:$4 sm:$0xff]  }
 0x1cf   :  { %4604 = vmatpush1.bf16.msra.mxu1 %v9922_v63  ;;  %v12366_v51 = vpack.c.bf16 %v2035_v42, %v2035_v42  ;;  %v9958_v63 = vld [vmem:[%s14784_s7 + $0x840] ss:$16 sps:$4 sm:$0xff]  }
 0x1d0   :  { %4645 = vmatpush1.bf16.msra.mxu0 %v9925_v7  ;;  %4605 = vmatprep.subr.bf16.mxu1 %v9930_v9  ;;  %v9967_v7 = vld [vmem:[%s14784_s7 + $0x68] ss:$16 sps:$4 sm:$0xff]   ;;  %v9972_v9 = vld [vmem:[%s14784_s7 + $0x884] ss:$16 sps:$4 sm:$0xff]  }
 0x1d1   :  { %4646 = vmatprep.subr.bf16.mxu0 %v9933_v13  ;;  %v9975_v13 = vld [vmem:[%s14784_s7 + $0x8c] ss:$16 sps:$4 sm:$0xff]  }
 0x1d3   :  { %4606 = vmatpush1.bf16.msra.mxu1 %v9928_v12  ;;  %v9970_v12 = vld [vmem:[%s14784_s7 + $0x880] ss:$16 sps:$4 sm:$0xff]  }
 0x1d4   :  { %4647 = vmatpush1.bf16.msra.mxu0 %v9931_v30  ;;  %4607 = vmatprep.subr.bf16.mxu1 %v9936_v14  ;;  %v1359_v30 = vrot.slane %v12213_v40, %v12086_v28  ;;  %v9973_v14 = vld [vmem:[%s14784_s7 + $0x88] ss:$16 sps:$4 sm:$0xff]   ;;  %v9981_v40 = vld [vmem:[%s14784_s7 + $0xac] ss:$16 sps:$4 sm:$0xff]  }
 0x1d5   :  { %4648 = vmatprep.subr.bf16.mxu0 %v9939_v21  ;;  %v9976_v21 = vld [vmem:[%s14784_s7 + $0x8a0] ss:$16 sps:$4 sm:$0xff]  }
 0x1d7   :  { %v11069_v37 = vpop.eup %11068  ;;  %4608 = vmatpush1.bf16.msra.mxu1 %v9934_v17  ;;  %v9978_v17 = vld [vmem:[%s14784_s7 + $0x8a4] ss:$16 sps:$4 sm:$0xff]  }
 0x1d8   :  { %4649 = vmatpush1.bf16.msra.mxu0 %v9937_v8  ;;  %4609 = vmatprep.subr.bf16.mxu1 %v9942_v24  ;;  %v2038_v23 = vmul.f32 %v11069_v37, %v12249_v18  ;;  %v12428_v8 = vadd.f32 %v12238_v10, %v1359_v30  ;;  %v9979_v24 = vld [vmem:[%s14784_s7 + $0xa8] ss:$16 sps:$4 sm:$0xff]  }
 0x1d9   :  { %4650 = vmatprep.subr.bf16.mxu0 %v9945_v35 }
 0x1da   :  { %v12368_v18 = vpack.c.bf16 %v2038_v23, %v2038_v23 }
 0x1db   :  { %4610 = vmatpush1.bf16.msra.mxu1 %v9940_v47  ;;  %v9987_v47 = vld [vmem:[%s14784_s7 + $0xcc] ss:$16 sps:$4 sm:$0xff]  }
 0x1dc   :  { %4651 = vmatpush1.bf16.msra.mxu0 %v9943_v39  ;;  %4661 = vmatprep.subr.bf16.mxu1 %v9948_v26 }
 0x1dd   :  { %4702 = vmatprep.subr.bf16.mxu0 %v9951_v31 }
 0x1de   :  { %4612 = vmatmul.mubr.bf16.vlgmr.msra.gmra.mrb[28].mxu1 %v12364_v45 }
 0x1df   :  { %4653 = vmatmul.mubr.bf16.vlgmr.msra.gmra.mrb[32].mxu0 %v12366_v51  ;;  %4662 = vmatpush1.bf16.msra.mxu1 %v9946_v41 }
 0x1e0   :  { %4703 = vmatpush1.bf16.msra.mxu0 %v9949_v32  ;;  %4734 = vmatprep.mubr.bf16.mxu0 %v12128_v46  ;;  %v9966_v46 = vld [vmem:[%s14784_s7 + $0x864] ss:$16 sps:$4 sm:$0xff]  }
 0x1e1   :  { %4663 = vmatprep.subr.bf16.mxu1 %v9954_v43  ;;  %4704 = vmatprep.subr.bf16.mxu0 %v9957_v27 }
 0x1e2   :  { %4693 = vmatprep.mubr.bf16.mxu1 %v12368_v18 }
 0x1e3   :  { %4664 = vmatpush1.bf16.msra.mxu1 %v9952_v48 }
 0x1e4   :  { %4705 = vmatpush1.bf16.msra.mxu0 %v9955_v56  ;;  %4665 = vmatprep.subr.bf16.mxu1 %v9960_v57 }
 0x1e5   :  { %4706 = vmatprep.subr.bf16.mxu0 %v9963_v62 }
 0x1e7   :  { %4666 = vmatpush1.bf16.msra.mxu1 %v9958_v63 }
 0x1e8   :  { %4707 = vmatpush1.bf16.msra.mxu0 %v9961_v4  ;;  %4667 = vmatprep.subr.bf16.mxu1 %v9966_v46 }
 0x1e9   :  { %4708 = vmatprep.subr.bf16.mxu0 %v9969_v6 }
 0x1eb   :  { %4668 = vmatpush1.bf16.msra.mxu1 %v9964_v5 }
 0x1ec   :  { %4709 = vmatpush1.bf16.msra.mxu0 %v9967_v7  ;;  %4669 = vmatprep.subr.bf16.mxu1 %v9972_v9 }
 0x1ed   :  { %4710 = vmatprep.subr.bf16.mxu0 %v9975_v13 }
 0x1ef   :  { %4670 = vmatpush1.bf16.msra.mxu1 %v9970_v12 }
 0x1f0   :  { %4711 = vmatpush1.bf16.msra.mxu0 %v9973_v14  ;;  %4671 = vmatprep.subr.bf16.mxu1 %v9978_v17 }
 0x1f1   :  { %4712 = vmatprep.subr.bf16.mxu0 %v9981_v40 }
 0x1f2   :  { %16 = vsyncpa [#allocation3], 0  ;;  %v1987_v10 = vsub.f32 0.0, %v12428_v8  ;;  %v9982_v35 = vld [vmem:[%s14784_s7 + $0x8c0] ss:$16 sps:$4 sm:$0xff]   ;;  %s11101_s20 = smov [#allocation2]  }
 0x1f3   :  { %4672 = vmatpush1.bf16.msra.mxu1 %v9976_v21  ;;  %v9985_v36 = vld [vmem:[%s14784_s7 + $0xc8] ss:$16 sps:$4 sm:$0xff]   ;;  %v9990_v37 = vld [vmem:[%s14784_s7 + $0x8e4] ss:$16 sps:$4 sm:$0xff]   ;;  %v9993_v38 = vld [vmem:[%s14784_s7 + $0xec] ss:$16 sps:$4 sm:$0xff]  }
 0x1f4   :  { %4713 = vmatpush1.bf16.msra.mxu0 %v9979_v24  ;;  %4673 = vmatprep.subr.bf16.mxu1 %v9984_v25  ;;  %v2005_v39 = vmul.f32 1.442695, %v1987_v10  ;;  %v9988_v26 = vld [vmem:[%s14784_s7 + $0x8e0] ss:$16 sps:$4 sm:$0xff]   ;;  %v9991_v31 = vld [vmem:[%s14784_s7 + $0xe8] ss:$16 sps:$4 sm:$0xff]  }
 0x1f5   :  { %4714 = vmatprep.subr.bf16.mxu0 %v9987_v47  ;;  %v9996_v42 = vld [vmem:[%s14784_s7 + $0x904] ss:$16 sps:$4 sm:$0xff]   ;;  %v9999_v41 = vld [vmem:[%s14784_s7 + $0x10c] ss:$16 sps:$4 sm:$0xff]   ;;  %v9994_v23 = vld [vmem:[%s14784_s7 + $0x900] ss:$16 sps:$4 sm:$0xff]  }
 0x1f6   :  { %11070 = vpow2.f32 %v2005_v39  ;;  %v9997_v32 = vld [vmem:[%s14784_s7 + $0x108] ss:$16 sps:$4 sm:$0xff]   ;;  %v10002_v43 = vld [vmem:[%s14784_s7 + $0x924] ss:$16 sps:$4 sm:$0xff]   ;;  %v10005_v27 = vld [vmem:[%s14784_s7 + $0x12c] ss:$16 sps:$4 sm:$0xff]  }
 0x1f7   :  { %4674 = vmatpush1.bf16.msra.mxu1 %v9982_v35  ;;  %v10000_v48 = vld [vmem:[%s14784_s7 + $0x920] ss:$16 sps:$4 sm:$0xff]   ;;  %v10003_v56 = vld [vmem:[%s14784_s7 + $0x128] ss:$16 sps:$4 sm:$0xff]   ;;  %v10008_v57 = vld [vmem:[%s14784_s7 + $0x944] ss:$16 sps:$4 sm:$0xff]  }
 0x1f8   :  { %4715 = vmatpush1.bf16.msra.mxu0 %v9985_v36  ;;  %4675 = vmatprep.subr.bf16.mxu1 %v9990_v37  ;;  %v10011_v62 = vld [vmem:[%s14784_s7 + $0x14c] ss:$16 sps:$4 sm:$0xff]   ;;  %v10006_v63 = vld [vmem:[%s14784_s7 + $0x940] ss:$16 sps:$4 sm:$0xff]   ;;  %v10009_v46 = vld [vmem:[%s14784_s7 + $0x148] ss:$16 sps:$4 sm:$0xff]  }
 0x1f9   :  { %4716 = vmatprep.subr.bf16.mxu0 %v9993_v38  ;;  %v10014_v5 = vld [vmem:[%s14784_s7 + $0x964] ss:$16 sps:$4 sm:$0xff]   ;;  %v10017_v6 = vld [vmem:[%s14784_s7 + $0x16c] ss:$16 sps:$4 sm:$0xff]   ;;  %v10012_v9 = vld [vmem:[%s14784_s7 + $0x960] ss:$16 sps:$4 sm:$0xff]  }
 0x1fa   :  { %v10015_v12 = vld [vmem:[%s14784_s7 + $0x168] ss:$16 sps:$4 sm:$0xff]   ;;  %v10020_v13 = vld [vmem:[%s14784_s7 + $0x984] ss:$16 sps:$4 sm:$0xff]   ;;  %v10023_v30 = vld [vmem:[%s14784_s7 + $0x18c] ss:$16 sps:$4 sm:$0xff]  }
 0x1fb   :  { %4676 = vmatpush1.bf16.msra.mxu1 %v9988_v26  ;;  %v10018_v14 = vld [vmem:[%s14784_s7 + $0x980] ss:$16 sps:$4 sm:$0xff]   ;;  %v10021_v17 = vld [vmem:[%s14784_s7 + $0x188] ss:$16 sps:$4 sm:$0xff]   ;;  %v10026_v21 = vld [vmem:[%s14784_s7 + $0x9a4] ss:$16 sps:$4 sm:$0xff]  }
 0x1fc   :  { %4717 = vmatpush1.bf16.msra.mxu0 %v9991_v31  ;;  %4677 = vmatprep.subr.bf16.mxu1 %v9996_v42  ;;  %v10029_v40 = vld [vmem:[%s14784_s7 + $0x1ac] ss:$16 sps:$4 sm:$0xff]   ;;  %v10024_v24 = vld [vmem:[%s14784_s7 + $0x9a0] ss:$16 sps:$4 sm:$0xff]   ;;  %v10027_v25 = vld [vmem:[%s14784_s7 + $0x1a8] ss:$16 sps:$4 sm:$0xff]  }
 0x1fd   :  { %4718 = vmatprep.subr.bf16.mxu0 %v9999_v41  ;;  %v10032_v47 = vld [vmem:[%s14784_s7 + $0x9c4] ss:$16 sps:$4 sm:$0xff]   ;;  %v10035_v10 = vld [vmem:[%s14784_s7 + $0x1cc] ss:$16 sps:$4 sm:$0xff]   ;;  %v10030_v35 = vld [vmem:[%s14784_s7 + $0x9c0] ss:$16 sps:$4 sm:$0xff]  }
 0x1fe   :  { %v10033_v36 = vld [vmem:[%s14784_s7 + $0x1c8] ss:$16 sps:$4 sm:$0xff]   ;;  %v10038_v37 = vld [vmem:[%s14784_s7 + $0x9e4] ss:$16 sps:$4 sm:$0xff]   ;;  %v10041_v39 = vld [vmem:[%s14784_s7 + $0x1ec] ss:$16 sps:$4 sm:$0xff]  }
 0x1ff   :  { %4678 = vmatpush1.bf16.msra.mxu1 %v9994_v23  ;;  %v10036_v26 = vld [vmem:[%s14784_s7 + $0x9e0] ss:$16 sps:$4 sm:$0xff]   ;;  %v10039_v42 = vld [vmem:[%s14784_s7 + $0x1e8] ss:$16 sps:$4 sm:$0xff]   ;;  %v10044_v41 = vld [vmem:[%s14784_s7 + $0x20c] ss:$16 sps:$4 sm:$0xff]  }
 0x200   :  { %4719 = vmatpush1.bf16.msra.mxu0 %v9997_v32  ;;  %4679 = vmatprep.subr.bf16.mxu1 %v10002_v43  ;;  %v11071_v4 = vpop.eup %11070  ;;  %v10047_v23 = vld [vmem:[%s14784_s7 + $0x40c] ss:$16 sps:$4 sm:$0xff]   ;;  %v10045_v43 = vld [vmem:[%s14784_s7 + $0x408] ss:$16 sps:$4 sm:$0xff]   ;;  %s8507_s0 = sshll.u32 %s11101_s20, 4  ;;  %s8508_s0 = int_to_ptr.vmem [resolvable:$true] %s8507_s0 }
 0x201   :  { %4720 = vmatprep.subr.bf16.mxu0 %v10005_v27  ;;  %v2017_v7 = vadd.f32 1.0, %v11071_v4  ;;  %v10050_v27 = vld [vmem:[%s14784_s7 + $0x22c] ss:$16 sps:$4 sm:$0xff]   ;;  %s11076_s2 = scalar_lea.vmem %s8508_s0, 32  ;;  %p11081_p1 = scmp.lt.s32.totalorder %s8508_s0, %s8508_s0 }
 0x202   :  { %v10065_v4 = vld [vmem:[%s14784_s7 + $0x46c] ss:$16 sps:$4 sm:$0xff]   ;;  %p11077_p0 = scmp.ne.s32.totalorder %s8508_s0, %s11076_s2  ;;  %p11082_p2 = scmp.lt.s32.totalorder %s11076_s2, %s11076_s2 }
 0x203   :  { %4680 = vmatpush1.bf16.msra.mxu1 %v10000_v48  ;;  %11072 = vrcp.f32 %v2017_v7  ;;  %v10053_v48 = vld [vmem:[%s14784_s7 + $0x42c] ss:$16 sps:$4 sm:$0xff]  }
 0x204   :  { %4721 = vmatpush1.bf16.msra.mxu0 %v10003_v56  ;;  %4681 = vmatprep.subr.bf16.mxu1 %v10008_v57  ;;  %v10048_v56 = vld [vmem:[%s14784_s7 + $0x228] ss:$16 sps:$4 sm:$0xff]   ;;  %v10071_v7 = vld [vmem:[%s14784_s7 + $0x48c] ss:$16 sps:$4 sm:$0xff]   ;;  %p11083_p3 = por %p11082_p2, %p11081_p1 }
 0x205   :  { %4722 = vmatprep.subr.bf16.mxu0 %v10011_v62  ;;  %v10051_v57 = vld [vmem:[%s14784_s7 + $0x428] ss:$16 sps:$4 sm:$0xff]   ;;  %v10056_v62 = vld [vmem:[%s14784_s7 + $0x24c] ss:$16 sps:$4 sm:$0xff]  }
 0x206   :  { %p11084_p4 = pnand %p11083_p3, %p11077_p0 }
 0x207   :  { %4682 = vmatpush1.bf16.msra.mxu1 %v10006_v63  ;;  %v10057_v63 = vld [vmem:[%s14784_s7 + $0x448] ss:$16 sps:$4 sm:$0xff]  }
 0x208   :  { %4723 = vmatpush1.bf16.msra.mxu0 %v10009_v46  ;;  %4683 = vmatprep.subr.bf16.mxu1 %v10014_v5  ;;  %v10060_v46 = vld [vmem:[%s14784_s7 + $0x268] ss:$16 sps:$4 sm:$0xff]  }
 0x209   :  { %4724 = vmatprep.subr.bf16.mxu0 %v10017_v6  ;;  %v10063_v5 = vld [vmem:[%s14784_s7 + $0x468] ss:$16 sps:$4 sm:$0xff]   ;;  %v10068_v6 = vld [vmem:[%s14784_s7 + $0x28c] ss:$16 sps:$4 sm:$0xff]  }
 0x20b   :  { %4684 = vmatpush1.bf16.msra.mxu1 %v10012_v9  ;;  %v10066_v9 = vld [vmem:[%s14784_s7 + $0x288] ss:$16 sps:$4 sm:$0xff]  }
 0x20c   :  { %4725 = vmatpush1.bf16.msra.mxu0 %v10015_v12  ;;  %4685 = vmatprep.subr.bf16.mxu1 %v10020_v13  ;;  %v10069_v12 = vld [vmem:[%s14784_s7 + $0x488] ss:$16 sps:$4 sm:$0xff]   ;;  %v10074_v13 = vld [vmem:[%s14784_s7 + $0x2ac] ss:$16 sps:$4 sm:$0xff]  }
 0x20d   :  { %4726 = vmatprep.subr.bf16.mxu0 %v10023_v30  ;;  %v11073_v38 = vpop.eup %11072  ;;  %v10077_v30 = vld [vmem:[%s14784_s7 + $0x4ac] ss:$16 sps:$4 sm:$0xff]  }
 0x20e   :  { %v2037_v31 = vmul.f32 %v11073_v38, %v12428_v8  ;;  %v10042_v8 = vld [vmem:[%s14784_s7 + $0x208] ss:$16 sps:$4 sm:$0xff]   ;;  %v10095_v38 = vld [vmem:[%s14784_s7 + $0x50c] ss:$16 sps:$4 sm:$0xff]  }
 0x20f   :  { %4686 = vmatpush1.bf16.msra.mxu1 %v10018_v14  ;;  %v10072_v14 = vld [vmem:[%s14784_s7 + $0x2a8] ss:$16 sps:$4 sm:$0xff]  }
 0x210   :  { %4727 = vmatpush1.bf16.msra.mxu0 %v10021_v17  ;;  %4687 = vmatprep.subr.bf16.mxu1 %v10026_v21  ;;  %v12564_v32 = vpack.c.bf16 %v2037_v31, %v2037_v31  ;;  %v10075_v17 = vld [vmem:[%s14784_s7 + $0x4a8] ss:$16 sps:$4 sm:$0xff]   ;;  %v10080_v21 = vld [vmem:[%s14784_s7 + $0x2cc] ss:$16 sps:$4 sm:$0xff]  }
 0x211   :  { %4728 = vmatprep.subr.bf16.mxu0 %v10029_v40  ;;  %v10083_v40 = vld [vmem:[%s14784_s7 + $0x4cc] ss:$16 sps:$4 sm:$0xff]  }
 0x212   :  { %v10098_v31 = vld [vmem:[%s14784_s7 + $0x32c] ss:$16 sps:$4 sm:$0xff]  }
 0x213   :  { %4688 = vmatpush1.bf16.msra.mxu1 %v10024_v24  ;;  %v10078_v24 = vld [vmem:[%s14784_s7 + $0x2c8] ss:$16 sps:$4 sm:$0xff]  }
 0x214   :  { %4729 = vmatpush1.bf16.msra.mxu0 %v10027_v25  ;;  %4689 = vmatprep.subr.bf16.mxu1 %v10032_v47  ;;  %v10081_v25 = vld [vmem:[%s14784_s7 + $0x4c8] ss:$16 sps:$4 sm:$0xff]   ;;  %v10086_v47 = vld [vmem:[%s14784_s7 + $0x2ec] ss:$16 sps:$4 sm:$0xff]  }
 0x215   :  { %4730 = vmatprep.subr.bf16.mxu0 %v10035_v10  ;;  %v10089_v10 = vld [vmem:[%s14784_s7 + $0x4ec] ss:$16 sps:$4 sm:$0xff]  }
 0x217   :  { %4690 = vmatpush1.bf16.msra.mxu1 %v10030_v35  ;;  %v10084_v35 = vld [vmem:[%s14784_s7 + $0x2e8] ss:$16 sps:$4 sm:$0xff]  }
 0x218   :  { %4731 = vmatpush1.bf16.msra.mxu0 %v10033_v36  ;;  %4691 = vmatprep.subr.bf16.mxu1 %v10038_v37  ;;  %v10087_v36 = vld [vmem:[%s14784_s7 + $0x4e8] ss:$16 sps:$4 sm:$0xff]   ;;  %v10092_v37 = vld [vmem:[%s14784_s7 + $0x30c] ss:$16 sps:$4 sm:$0xff]  }
 0x219   :  { %4732 = vmatprep.subr.bf16.mxu0 %v10041_v39  ;;  %v10090_v39 = vld [vmem:[%s14784_s7 + $0x308] ss:$16 sps:$4 sm:$0xff]  }
 0x21b   :  { %4692 = vmatpush1.bf16.msra.mxu1 %v10036_v26  ;;  %v10093_v26 = vld [vmem:[%s14784_s7 + $0x508] ss:$16 sps:$4 sm:$0xff]  }
 0x21c   :  { %4733 = vmatpush1.bf16.msra.mxu0 %v10039_v42  ;;  %4743 = vmatprep.subr.bf16.mxu1 %v10044_v41  ;;  %v10101_v42 = vld [vmem:[%s14784_s7 + $0x52c] ss:$16 sps:$4 sm:$0xff]   ;;  %v10096_v41 = vld [vmem:[%s14784_s7 + $0x328] ss:$16 sps:$4 sm:$0xff]  }
 0x21d   :  { %4784 = vmatprep.subr.bf16.mxu0 %v10047_v23  ;;  %v10099_v23 = vld [vmem:[%s14784_s7 + $0x528] ss:$16 sps:$4 sm:$0xff]  }
 0x21e   :  { %4694 = vmatmul.mubr.bf16.vlgmr.msra.gmra.mrb[32].mxu1 %v12564_v32 }
 0x21f   :  { %4735 = vmatmul.mubr.bf16.vlgmr.msra.gmra.mrb[36].mxu0 %v12132_v52  ;;  %4744 = vmatpush1.bf16.msra.mxu1 %v10042_v8  ;;  %v10059_v52 = vld [vmem:[%s14784_s7 + $0x44c] ss:$16 sps:$4 sm:$0xff]  }
 0x220   :  { %4775 = vmatprep.mubr.bf16.mxu1 %v12134_v54  ;;  %4785 = vmatpush1.bf16.msra.mxu0 %v10045_v43  ;;  %v10054_v54 = vld [vmem:[%s14784_s7 + $0x248] ss:$16 sps:$4 sm:$0xff]   ;;  %v10104_v8 = vld [vmem:[%s14784_s7 + $0x34c] ss:$16 sps:$4 sm:$0xff]  }
 0x221   :  { %4816 = vmatprep.mubr.bf16.mxu0 %v12246_v15  ;;  %4745 = vmatprep.subr.bf16.mxu1 %v10050_v27  ;;  %v10062_v15 = vld [vmem:[%s14784_s7 + $0x26c] ss:$16 sps:$4 sm:$0xff]   ;;  %v10102_v27 = vld [vmem:[%s14784_s7 + $0x348] ss:$16 sps:$4 sm:$0xff]  }
 0x222   :  { %4786 = vmatprep.subr.bf16.mxu0 %v10053_v48  ;;  %v10107_v43 = vld [vmem:[%s14784_s7 + $0x54c] ss:$16 sps:$4 sm:$0xff]   ;;  %v10105_v48 = vld [vmem:[%s14784_s7 + $0x548] ss:$16 sps:$4 sm:$0xff]  }
 0x223   :  { %4746 = vmatpush1.bf16.msra.mxu1 %v10048_v56  ;;  %v10110_v56 = vld [vmem:[%s14784_s7 + $0x36c] ss:$16 sps:$4 sm:$0xff]  }
 0x224   :  { %4787 = vmatpush1.bf16.msra.mxu0 %v10051_v57  ;;  %4747 = vmatprep.subr.bf16.mxu1 %v10056_v62  ;;  %v10113_v57 = vld [vmem:[%s14784_s7 + $0x56c] ss:$16 sps:$4 sm:$0xff]   ;;  %v10108_v62 = vld [vmem:[%s14784_s7 + $0x368] ss:$16 sps:$4 sm:$0xff]  }
 0x225   :  { %4788 = vmatprep.subr.bf16.mxu0 %v10059_v52  ;;  %v10111_v52 = vld [vmem:[%s14784_s7 + $0x568] ss:$16 sps:$4 sm:$0xff]  }
 0x227   :  { %4748 = vmatpush1.bf16.msra.mxu1 %v10054_v54  ;;  %v10116_v54 = vld [vmem:[%s14784_s7 + $0x38c] ss:$16 sps:$4 sm:$0xff]  }
 0x228   :  { %4789 = vmatpush1.bf16.msra.mxu0 %v10057_v63  ;;  %4749 = vmatprep.subr.bf16.mxu1 %v10062_v15  ;;  %v10119_v63 = vld [vmem:[%s14784_s7 + $0x58c] ss:$16 sps:$4 sm:$0xff]   ;;  %v10114_v15 = vld [vmem:[%s14784_s7 + $0x388] ss:$16 sps:$4 sm:$0xff]  }
 0x229   :  { %4790 = vmatprep.subr.bf16.mxu0 %v10065_v4  ;;  %v10117_v4 = vld [vmem:[%s14784_s7 + $0x588] ss:$16 sps:$4 sm:$0xff]  }
 0x22b   :  { %4750 = vmatpush1.bf16.msra.mxu1 %v10060_v46  ;;  %v10122_v46 = vld [vmem:[%s14784_s7 + $0x3ac] ss:$16 sps:$4 sm:$0xff]  }
 0x22c   :  { %4791 = vmatpush1.bf16.msra.mxu0 %v10063_v5  ;;  %4751 = vmatprep.subr.bf16.mxu1 %v10068_v6  ;;  %v10125_v5 = vld [vmem:[%s14784_s7 + $0x5ac] ss:$16 sps:$4 sm:$0xff]   ;;  %v10120_v6 = vld [vmem:[%s14784_s7 + $0x3a8] ss:$16 sps:$4 sm:$0xff]  }
 0x22d   :  { %4792 = vmatprep.subr.bf16.mxu0 %v10071_v7  ;;  %v10123_v7 = vld [vmem:[%s14784_s7 + $0x5a8] ss:$16 sps:$4 sm:$0xff]  }
 0x22f   :  { %4752 = vmatpush1.bf16.msra.mxu1 %v10066_v9  ;;  %v10128_v9 = vld [vmem:[%s14784_s7 + $0x3cc] ss:$16 sps:$4 sm:$0xff]  }
 0x230   :  { %4793 = vmatpush1.bf16.msra.mxu0 %v10069_v12  ;;  %4753 = vmatprep.subr.bf16.mxu1 %v10074_v13  ;;  %v10131_v12 = vld [vmem:[%s14784_s7 + $0x5cc] ss:$16 sps:$4 sm:$0xff]   ;;  %v10126_v13 = vld [vmem:[%s14784_s7 + $0x3c8] ss:$16 sps:$4 sm:$0xff]  }
 0x231   :  { %4794 = vmatprep.subr.bf16.mxu0 %v10077_v30  ;;  %v10129_v30 = vld [vmem:[%s14784_s7 + $0x5c8] ss:$16 sps:$4 sm:$0xff]  }
 0x233   :  { %4754 = vmatpush1.bf16.msra.mxu1 %v10072_v14  ;;  %v10134_v14 = vld [vmem:[%s14784_s7 + $0x3ec] ss:$16 sps:$4 sm:$0xff]  }
 0x234   :  { %4795 = vmatpush1.bf16.msra.mxu0 %v10075_v17  ;;  %4755 = vmatprep.subr.bf16.mxu1 %v10080_v21  ;;  %v10137_v17 = vld [vmem:[%s14784_s7 + $0x5ec] ss:$16 sps:$4 sm:$0xff]   ;;  %v10132_v21 = vld [vmem:[%s14784_s7 + $0x3e8] ss:$16 sps:$4 sm:$0xff]  }
 0x235   :  { %4796 = vmatprep.subr.bf16.mxu0 %v10083_v40  ;;  %v10135_v40 = vld [vmem:[%s14784_s7 + $0x5e8] ss:$16 sps:$4 sm:$0xff]  }
 0x237   :  { %4756 = vmatpush1.bf16.msra.mxu1 %v10078_v24  ;;  %v10140_v24 = vld [vmem:[%s14784_s7 + $0x60c] ss:$16 sps:$4 sm:$0xff]  }
 0x238   :  { %4797 = vmatpush1.bf16.msra.mxu0 %v10081_v25  ;;  %4757 = vmatprep.subr.bf16.mxu1 %v10086_v47  ;;  %v10143_v25 = vld [vmem:[%s14784_s7 + $0x80c] ss:$16 sps:$4 sm:$0xff]   ;;  %v10138_v47 = vld [vmem:[%s14784_s7 + $0x608] ss:$16 sps:$4 sm:$0xff]  }
 0x239   :  { %4798 = vmatprep.subr.bf16.mxu0 %v10089_v10  ;;  %v10141_v10 = vld [vmem:[%s14784_s7 + $0x808] ss:$16 sps:$4 sm:$0xff]  }
 0x23b   :  { %4758 = vmatpush1.bf16.msra.mxu1 %v10084_v35  ;;  %v10146_v35 = vld [vmem:[%s14784_s7 + $0x62c] ss:$16 sps:$4 sm:$0xff]  }
 0x23c   :  { %4799 = vmatpush1.bf16.msra.mxu0 %v10087_v36  ;;  %4759 = vmatprep.subr.bf16.mxu1 %v10092_v37  ;;  %v10149_v36 = vld [vmem:[%s14784_s7 + $0x82c] ss:$16 sps:$4 sm:$0xff]   ;;  %v10144_v37 = vld [vmem:[%s14784_s7 + $0x628] ss:$16 sps:$4 sm:$0xff]  }
 0x23d   :  { %4800 = vmatprep.subr.bf16.mxu0 %v10095_v38  ;;  %v10147_v38 = vld [vmem:[%s14784_s7 + $0x828] ss:$16 sps:$4 sm:$0xff]  }
 0x23f   :  { %4760 = vmatpush1.bf16.msra.mxu1 %v10090_v39  ;;  %v10153_v39 = vld [vmem:[%s14784_s7 + $0x848] ss:$16 sps:$4 sm:$0xff]  }
 0x240   :  { %4801 = vmatpush1.bf16.msra.mxu0 %v10093_v26  ;;  %4761 = vmatprep.subr.bf16.mxu1 %v10098_v31  ;;  %v10161_v26 = vld [vmem:[%s14784_s7 + $0x86c] ss:$16 sps:$4 sm:$0xff]   ;;  %v10156_v31 = vld [vmem:[%s14784_s7 + $0x668] ss:$16 sps:$4 sm:$0xff]  }
 0x241   :  { %4802 = vmatprep.subr.bf16.mxu0 %v10101_v42  ;;  %v10159_v42 = vld [vmem:[%s14784_s7 + $0x868] ss:$16 sps:$4 sm:$0xff]  }
 0x243   :  { %4762 = vmatpush1.bf16.msra.mxu1 %v10096_v41  ;;  %v10164_v41 = vld [vmem:[%s14784_s7 + $0x68c] ss:$16 sps:$4 sm:$0xff]  }
 0x244   :  { %4803 = vmatpush1.bf16.msra.mxu0 %v10099_v23  ;;  %4763 = vmatprep.subr.bf16.mxu1 %v10104_v8  ;;  %v10167_v23 = vld [vmem:[%s14784_s7 + $0x88c] ss:$16 sps:$4 sm:$0xff]   ;;  %v10162_v8 = vld [vmem:[%s14784_s7 + $0x688] ss:$16 sps:$4 sm:$0xff]  }
 0x245   :  { %4804 = vmatprep.subr.bf16.mxu0 %v10107_v43  ;;  %v10165_v43 = vld [vmem:[%s14784_s7 + $0x888] ss:$16 sps:$4 sm:$0xff]  }
 0x247   :  { %4764 = vmatpush1.bf16.msra.mxu1 %v10102_v27  ;;  %v10170_v27 = vld [vmem:[%s14784_s7 + $0x6ac] ss:$16 sps:$4 sm:$0xff]  }
 0x248   :  { %4805 = vmatpush1.bf16.msra.mxu0 %v10105_v48  ;;  %4765 = vmatprep.subr.bf16.mxu1 %v10110_v56  ;;  %v10173_v48 = vld [vmem:[%s14784_s7 + $0x8ac] ss:$16 sps:$4 sm:$0xff]   ;;  %v10168_v56 = vld [vmem:[%s14784_s7 + $0x6a8] ss:$16 sps:$4 sm:$0xff]  }
 0x249   :  { %4806 = vmatprep.subr.bf16.mxu0 %v10113_v57  ;;  %v10171_v57 = vld [vmem:[%s14784_s7 + $0x8a8] ss:$16 sps:$4 sm:$0xff]  }
 0x24b   :  { %4766 = vmatpush1.bf16.msra.mxu1 %v10108_v62  ;;  %v10176_v62 = vld [vmem:[%s14784_s7 + $0x6cc] ss:$16 sps:$4 sm:$0xff]  }
 0x24c   :  { %4807 = vmatpush1.bf16.msra.mxu0 %v10111_v52  ;;  %4767 = vmatprep.subr.bf16.mxu1 %v10116_v54  ;;  %v10179_v54 = vld [vmem:[%s14784_s7 + $0x8cc] ss:$16 sps:$4 sm:$0xff]  }
 0x24d   :  { %4808 = vmatprep.subr.bf16.mxu0 %v10119_v63 }
 0x24f   :  { %4768 = vmatpush1.bf16.msra.mxu1 %v10114_v15 }
 0x250   :  { %4809 = vmatpush1.bf16.msra.mxu0 %v10117_v4  ;;  %4769 = vmatprep.subr.bf16.mxu1 %v10122_v46 }
 0x251   :  { %4810 = vmatprep.subr.bf16.mxu0 %v10125_v5 }
 0x253   :  { %4770 = vmatpush1.bf16.msra.mxu1 %v10120_v6  ;;  %v10174_v6 = vld [vmem:[%s14784_s7 + $0x6c8] ss:$16 sps:$4 sm:$0xff]  }
 0x254   :  { %4811 = vmatpush1.bf16.msra.mxu0 %v10123_v7  ;;  %4771 = vmatprep.subr.bf16.mxu1 %v10128_v9 }
 0x255   :  { %4812 = vmatprep.subr.bf16.mxu0 %v10131_v12 }
 0x257   :  { %4772 = vmatpush1.bf16.msra.mxu1 %v10126_v13  ;;  %v10177_v13 = vld [vmem:[%s14784_s7 + $0x8c8] ss:$16 sps:$4 sm:$0xff]  }
 0x258   :  { %4813 = vmatpush1.bf16.msra.mxu0 %v10129_v30  ;;  %4773 = vmatprep.subr.bf16.mxu1 %v10134_v14  ;;  %v10182_v30 = vld [vmem:[%s14784_s7 + $0x6ec] ss:$16 sps:$4 sm:$0xff]  }
 0x259   :  { %4814 = vmatprep.subr.bf16.mxu0 %v10137_v17  ;;  %v10185_v17 = vld [vmem:[%s14784_s7 + $0x8ec] ss:$16 sps:$4 sm:$0xff]  }
 0x25b   :  { %4774 = vmatpush1.bf16.msra.mxu1 %v10132_v21  ;;  %v10180_v21 = vld [vmem:[%s14784_s7 + $0x6e8] ss:$16 sps:$4 sm:$0xff]  }
 0x25c   :  { %4815 = vmatpush1.bf16.msra.mxu0 %v10135_v40  ;;  %4825 = vmatprep.subr.bf16.mxu1 %v10140_v24  ;;  %v10183_v40 = vld [vmem:[%s14784_s7 + $0x8e8] ss:$16 sps:$4 sm:$0xff]   ;;  %v10188_v24 = vld [vmem:[%s14784_s7 + $0x70c] ss:$16 sps:$4 sm:$0xff]  }
 0x25d   :  { %4866 = vmatprep.subr.bf16.mxu0 %v10143_v25  ;;  %v10191_v25 = vld [vmem:[%s14784_s7 + $0x90c] ss:$16 sps:$4 sm:$0xff]  }
 0x25e   :  { %4776 = vmatmul.mubr.bf16.vlgmr.msra.gmra.mrb[36].mxu1 %v12137_v60  ;;  %v10152_v60 = vld [vmem:[%s14784_s7 + $0x64c] ss:$16 sps:$4 sm:$0xff]  }
 0x25f   :  { %4817 = vmatmul.mubr.bf16.vlgmr.msra.gmra.mrb[40].mxu0 %v12364_v45  ;;  %4826 = vmatpush1.bf16.msra.mxu1 %v10138_v47  ;;  %v10155_v45 = vld [vmem:[%s14784_s7 + $0x84c] ss:$16 sps:$4 sm:$0xff]   ;;  %v10186_v47 = vld [vmem:[%s14784_s7 + $0x708] ss:$16 sps:$4 sm:$0xff]  }
 0x260   :  { %4857 = vmatprep.mubr.bf16.mxu1 %v12251_v22  ;;  %4867 = vmatpush1.bf16.msra.mxu0 %v10141_v10  ;;  %v10150_v22 = vld [vmem:[%s14784_s7 + $0x648] ss:$16 sps:$4 sm:$0xff]  }
 0x261   :  { %4898 = vmatprep.mubr.bf16.mxu0 %v12368_v18  ;;  %4827 = vmatprep.subr.bf16.mxu1 %v10146_v35  ;;  %v10158_v18 = vld [vmem:[%s14784_s7 + $0x66c] ss:$16 sps:$4 sm:$0xff]   ;;  %v10189_v10 = vld [vmem:[%s14784_s7 + $0x908] ss:$16 sps:$4 sm:$0xff]  }
 0x262   :  { %4868 = vmatprep.subr.bf16.mxu0 %v10149_v36  ;;  %v10194_v35 = vld [vmem:[%s14784_s7 + $0x72c] ss:$16 sps:$4 sm:$0xff]  }
 0x263   :  { %4828 = vmatpush1.bf16.msra.mxu1 %v10144_v37  ;;  %v10197_v36 = vld [vmem:[%s14784_s7 + $0x92c] ss:$16 sps:$4 sm:$0xff]   ;;  %v10192_v37 = vld [vmem:[%s14784_s7 + $0x728] ss:$16 sps:$4 sm:$0xff]  }
 0x264   :  { %4869 = vmatpush1.bf16.msra.mxu0 %v10147_v38  ;;  %4829 = vmatprep.subr.bf16.mxu1 %v10152_v60  ;;  %v10195_v38 = vld [vmem:[%s14784_s7 + $0x928] ss:$16 sps:$4 sm:$0xff]   ;;  %v10200_v60 = vld [vmem:[%s14784_s7 + $0x74c] ss:$16 sps:$4 sm:$0xff]  }
 0x265   :  { %4870 = vmatprep.subr.bf16.mxu0 %v10155_v45  ;;  %v10203_v45 = vld [vmem:[%s14784_s7 + $0x94c] ss:$16 sps:$4 sm:$0xff]  }
 0x267   :  { %4830 = vmatpush1.bf16.msra.mxu1 %v10150_v22  ;;  %v10198_v22 = vld [vmem:[%s14784_s7 + $0x748] ss:$16 sps:$4 sm:$0xff]  }
 0x268   :  { %4871 = vmatpush1.bf16.msra.mxu0 %v10153_v39  ;;  %4831 = vmatprep.subr.bf16.mxu1 %v10158_v18  ;;  %v10201_v39 = vld [vmem:[%s14784_s7 + $0x948] ss:$16 sps:$4 sm:$0xff]   ;;  %v10206_v18 = vld [vmem:[%s14784_s7 + $0x76c] ss:$16 sps:$4 sm:$0xff]  }
 0x269   :  { %4872 = vmatprep.subr.bf16.mxu0 %v10161_v26  ;;  %v10209_v26 = vld [vmem:[%s14784_s7 + $0x96c] ss:$16 sps:$4 sm:$0xff]  }
 0x26b   :  { %4832 = vmatpush1.bf16.msra.mxu1 %v10156_v31  ;;  %v10204_v31 = vld [vmem:[%s14784_s7 + $0x768] ss:$16 sps:$4 sm:$0xff]  }
 0x26c   :  { %4873 = vmatpush1.bf16.msra.mxu0 %v10159_v42  ;;  %4833 = vmatprep.subr.bf16.mxu1 %v10164_v41  ;;  %v10207_v42 = vld [vmem:[%s14784_s7 + $0x968] ss:$16 sps:$4 sm:$0xff]   ;;  %v10212_v41 = vld [vmem:[%s14784_s7 + $0x78c] ss:$16 sps:$4 sm:$0xff]  }
 0x26d   :  { %4874 = vmatprep.subr.bf16.mxu0 %v10167_v23  ;;  %v10215_v23 = vld [vmem:[%s14784_s7 + $0x98c] ss:$16 sps:$4 sm:$0xff]  }
 0x26f   :  { %4834 = vmatpush1.bf16.msra.mxu1 %v10162_v8  ;;  %v10210_v8 = vld [vmem:[%s14784_s7 + $0x788] ss:$16 sps:$4 sm:$0xff]  }
 0x270   :  { %4875 = vmatpush1.bf16.msra.mxu0 %v10165_v43  ;;  %4835 = vmatprep.subr.bf16.mxu1 %v10170_v27  ;;  %v10213_v43 = vld [vmem:[%s14784_s7 + $0x988] ss:$16 sps:$4 sm:$0xff]   ;;  %v10218_v27 = vld [vmem:[%s14784_s7 + $0x7ac] ss:$16 sps:$4 sm:$0xff]  }
 0x271   :  { %v4531_v52 = vpop.f32.mrb[24].mxu1  ;;  %4876 = vmatprep.subr.bf16.mxu0 %v10173_v48  ;;  %v10221_v48 = vld [vmem:[%s14784_s7 + $0x9ac] ss:$16 sps:$4 sm:$0xff]  }
 0x272   :  { %v4572_v63 = vpop.f32.mrb[28].mxu0  ;;  %v4533_v15 = vpop.f32.mrb[25].mxu1 }
 0x273   :  { %v12835_v4 = vadd.f32 %v4572_v63, %v4531_v52  ;;  %v4574_v46 = vpop.f32.mrb[29].mxu0  ;;  %4836 = vmatpush1.bf16.msra.mxu1 %v10168_v56  ;;  %v4535_v5 = vpop.f32.mrb[26].mxu1  ;;  %v10216_v56 = vld [vmem:[%s14784_s7 + $0x7a8] ss:$16 sps:$4 sm:$0xff]   ;;  %v10227_v52 = vld [vmem:[%s14784_s7 + $0x9cc] ss:$16 sps:$4 sm:$0xff]  }
 0x274   :  { %v12840_v7 = vadd.f32 %v4574_v46, %v4533_v15  ;;  %4877 = vmatpush1.bf16.msra.mxu0 %v10171_v57  ;;  %v4576_v9 = vpop.f32.mrb[30].mxu0  ;;  %v4536_v12 = vpop.f32.mrb[27].mxu1  ;;  %4837 = vmatprep.subr.bf16.mxu1 %v10176_v62  ;;  %v10219_v57 = vld [vmem:[%s14784_s7 + $0x9a8] ss:$16 sps:$4 sm:$0xff]   ;;  %v10224_v62 = vld [vmem:[%s14784_s7 + $0x7cc] ss:$16 sps:$4 sm:$0xff]  }
 0x275   :  { %v4577_v14 = vpop.f32.mrb[31].mxu0  ;;  %4878 = vmatprep.subr.bf16.mxu0 %v10179_v54  ;;  %v12938_v54 = vld [vmem:[%s14780_s3] sm:$0xff]  ;;  %v10222_v46 = vld [vmem:[%s14784_s7 + $0x7c8] ss:$16 sps:$4 sm:$0xff]   ;;  %v10233_v9 = vld [vmem:[%s14784_s7 + $0x9ec] ss:$16 sps:$4 sm:$0xff]  }
 0x276   :  { %v181_v63 = vrot.slane %v12938_v54, %v12092_v33  ;;  %v189_v15 = vrot.slane %v12938_v54, %v12095_v34  ;;  %v10225_v5 = vld [vmem:[%s14784_s7 + $0x9c8] ss:$16 sps:$4 sm:$0xff]  }
 0x277   :  { %4838 = vmatpush1.bf16.msra.mxu1 %v10174_v6  ;;  %v10230_v6 = vld [vmem:[%s14784_s7 + $0x7ec] ss:$16 sps:$4 sm:$0xff]   ;;  %v10231_v14 = vld [vmem:[%s14784_s7 + $0x9e8] ss:$16 sps:$4 sm:$0xff]  }
 0x278   :  { %4879 = vmatpush1.bf16.msra.mxu0 %v10177_v13  ;;  %4839 = vmatprep.subr.bf16.mxu1 %v10182_v30  ;;  %v931_v12 = vadd.f32 %v11916_v59, %v181_v63  ;;  %v972_v13 = vadd.f32 %v11921_v61, %v189_v15  ;;  %v10228_v30 = vld [vmem:[%s14784_s7 + $0x7e8] ss:$16 sps:$4 sm:$0xff]   ;;  %v10239_v59 = vld [vmem:[%s14783_s6 + $0x204] ss:$16 sps:$4 sm:$0xff]  }
 0x279   :  { %4880 = vmatprep.subr.bf16.mxu0 %v10185_v17  ;;  %v10236_v17 = vld [vmem:[%s14783_s6 + $0x4] ss:$16 sps:$4 sm:$0xff]  }
 0x27a   :  { %v1223_v61 = vmax.f32 %v931_v12, 0.0 }
 0x27b   :  { %4840 = vmatpush1.bf16.msra.mxu1 %v10180_v21  ;;  %v1225_v21 = vmax.f32 %v972_v13, 0.0 }
 0x27c   :  { %4881 = vmatpush1.bf16.msra.mxu0 %v10183_v40  ;;  %4841 = vmatprep.subr.bf16.mxu1 %v10188_v24  ;;  %v10234_v40 = vld [vmem:[%s14783_s6] ss:$16 sps:$4 sm:$0xff]  }
 0x27d   :  { %4882 = vmatprep.subr.bf16.mxu0 %v10191_v25  ;;  %v10237_v24 = vld [vmem:[%s14783_s6 + $0x200] ss:$16 sps:$4 sm:$0xff]   ;;  %v10242_v25 = vld [vmem:[%s14783_s6 + $0x24] ss:$16 sps:$4 sm:$0xff]  }
 0x27f   :  { %4842 = vmatpush1.bf16.msra.mxu1 %v10186_v47  ;;  %v12979_v47 = vpack.c.bf16 %v1223_v61, %v1223_v61  ;;  %v10279_v61 = vld [vmem:[%s14783_s6 + $0x2e0] ss:$16 sps:$4 sm:$0xff]  }
 0x280   :  { %4883 = vmatpush1.bf16.msra.mxu0 %v10189_v10  ;;  %4843 = vmatprep.subr.bf16.mxu1 %v10194_v35  ;;  %v10245_v10 = vld [vmem:[%s14783_s6 + $0x224] ss:$16 sps:$4 sm:$0xff]   ;;  %v12985_v35 = vpack.c.bf16 %v1225_v21, %v1225_v21 }
 0x281   :  { %4884 = vmatprep.subr.bf16.mxu0 %v10197_v36  ;;  %v10240_v36 = vld [vmem:[%s14783_s6 + $0x20] ss:$16 sps:$4 sm:$0xff]   ;;  %v10284_v21 = vld [vmem:[%s14783_s6 + $0x104] ss:$16 sps:$4 sm:$0xff]  }
 0x283   :  { %4844 = vmatpush1.bf16.msra.mxu1 %v10192_v37  ;;  %v10248_v37 = vld [vmem:[%s14783_s6 + $0x44] ss:$16 sps:$4 sm:$0xff]  }
 0x284   :  { %4885 = vmatpush1.bf16.msra.mxu0 %v10195_v38  ;;  %4845 = vmatprep.subr.bf16.mxu1 %v10200_v60  ;;  %v10246_v38 = vld [vmem:[%s14783_s6 + $0x40] ss:$16 sps:$4 sm:$0xff]  }
 0x285   :  { %4886 = vmatprep.subr.bf16.mxu0 %v10203_v45  ;;  %v10249_v60 = vld [vmem:[%s14783_s6 + $0x240] ss:$16 sps:$4 sm:$0xff]   ;;  %v10254_v45 = vld [vmem:[%s14783_s6 + $0x64] ss:$16 sps:$4 sm:$0xff]  }
 0x287   :  { %4846 = vmatpush1.bf16.msra.mxu1 %v10198_v22  ;;  %v10257_v22 = vld [vmem:[%s14783_s6 + $0x264] ss:$16 sps:$4 sm:$0xff]  }
 0x288   :  { %4887 = vmatpush1.bf16.msra.mxu0 %v10201_v39  ;;  %4847 = vmatprep.subr.bf16.mxu1 %v10206_v18  ;;  %v10252_v39 = vld [vmem:[%s14783_s6 + $0x60] ss:$16 sps:$4 sm:$0xff]  }
 0x289   :  { %4888 = vmatprep.subr.bf16.mxu0 %v10209_v26  ;;  %v10255_v18 = vld [vmem:[%s14783_s6 + $0x260] ss:$16 sps:$4 sm:$0xff]   ;;  %v10260_v26 = vld [vmem:[%s14783_s6 + $0x84] ss:$16 sps:$4 sm:$0xff]  }
 0x28b   :  { %4848 = vmatpush1.bf16.msra.mxu1 %v10204_v31  ;;  %v10263_v31 = vld [vmem:[%s14783_s6 + $0x284] ss:$16 sps:$4 sm:$0xff]  }
 0x28c   :  { %4889 = vmatpush1.bf16.msra.mxu0 %v10207_v42  ;;  %4849 = vmatprep.subr.bf16.mxu1 %v10212_v41  ;;  %v10258_v42 = vld [vmem:[%s14783_s6 + $0x80] ss:$16 sps:$4 sm:$0xff]  }
 0x28d   :  { %4890 = vmatprep.subr.bf16.mxu0 %v10215_v23  ;;  %v10261_v41 = vld [vmem:[%s14783_s6 + $0x280] ss:$16 sps:$4 sm:$0xff]   ;;  %v10266_v23 = vld [vmem:[%s14783_s6 + $0xa4] ss:$16 sps:$4 sm:$0xff]  }
 0x28f   :  { %4850 = vmatpush1.bf16.msra.mxu1 %v10210_v8  ;;  %v10269_v8 = vld [vmem:[%s14783_s6 + $0x2a4] ss:$16 sps:$4 sm:$0xff]  }
 0x290   :  { %4891 = vmatpush1.bf16.msra.mxu0 %v10213_v43  ;;  %4851 = vmatprep.subr.bf16.mxu1 %v10218_v27  ;;  %v10264_v43 = vld [vmem:[%s14783_s6 + $0xa0] ss:$16 sps:$4 sm:$0xff]  }
 0x291   :  { %4892 = vmatprep.subr.bf16.mxu0 %v10221_v48  ;;  %v10267_v27 = vld [vmem:[%s14783_s6 + $0x2a0] ss:$16 sps:$4 sm:$0xff]   ;;  %v10272_v48 = vld [vmem:[%s14783_s6 + $0xc4] ss:$16 sps:$4 sm:$0xff]  }
 0x293   :  { %4852 = vmatpush1.bf16.msra.mxu1 %v10216_v56 }
 0x294   :  { %4893 = vmatpush1.bf16.msra.mxu0 %v10219_v57  ;;  %4853 = vmatprep.subr.bf16.mxu1 %v10224_v62  ;;  %v10275_v57 = vld [vmem:[%s14783_s6 + $0x2c4] ss:$16 sps:$4 sm:$0xff]  }
 0x295   :  { %4894 = vmatprep.subr.bf16.mxu0 %v10227_v52 }
 0x297   :  { %4854 = vmatpush1.bf16.msra.mxu1 %v10222_v46 }
 0x298   :  { %4895 = vmatpush1.bf16.msra.mxu0 %v10225_v5  ;;  %4855 = vmatprep.subr.bf16.mxu1 %v10230_v6  ;;  %v10270_v6 = vld [vmem:[%s14783_s6 + $0xc0] ss:$16 sps:$4 sm:$0xff]  }
 0x299   :  { %4896 = vmatprep.subr.bf16.mxu0 %v10233_v9 }
 0x29b   :  { %4856 = vmatpush1.bf16.msra.mxu1 %v10228_v30 }
 0x29c   :  { %4897 = vmatpush1.bf16.msra.mxu0 %v10231_v14  ;;  %7467 = vmatprep.subr.bf16.mxu1 %v10236_v17  ;;  %v10281_v17 = vld [vmem:[%s14783_s6 + $0x2e4] ss:$16 sps:$4 sm:$0xff]  }
 0x29d   :  { %7508 = vmatprep.subr.bf16.mxu0 %v10239_v59  ;;  %v10276_v59 = vld [vmem:[%s14783_s6 + $0xe0] ss:$16 sps:$4 sm:$0xff]  }
 0x29e   :  { %4858 = vmatmul.mubr.bf16.vlgmr.msra.gmra.mrb[40].mxu1 %v12366_v51  ;;  %v10243_v51 = vld [vmem:[%s14783_s6 + $0x220] ss:$16 sps:$4 sm:$0xff]  }
 0x29f   :  { %4899 = vmatmul.mubr.bf16.vlgmr.msra.gmra.mrb[44].mxu0 %v12564_v32  ;;  %7468 = vmatpush1.bf16.msra.mxu1 %v10234_v40  ;;  %v10251_v32 = vld [vmem:[%s14783_s6 + $0x244] ss:$16 sps:$4 sm:$0xff]  }
 0x2a0   :  { %7499 = vmatprep.mubr.bf16.mxu1 %v12979_v47  ;;  %7509 = vmatpush1.bf16.msra.mxu0 %v10237_v24  ;;  %v10287_v40 = vld [vmem:[%s14783_s6 + $0x304] ss:$16 sps:$4 sm:$0xff]   ;;  %v10282_v24 = vld [vmem:[%s14783_s6 + $0x100] ss:$16 sps:$4 sm:$0xff]  }
 0x2a1   :  { %7540 = vmatprep.mubr.bf16.mxu0 %v12985_v35  ;;  %7469 = vmatprep.subr.bf16.mxu1 %v10242_v25  ;;  %v10285_v25 = vld [vmem:[%s14783_s6 + $0x300] ss:$16 sps:$4 sm:$0xff]  }
 0x2a2   :  { %7510 = vmatprep.subr.bf16.mxu0 %v10245_v10  ;;  %v10290_v10 = vld [vmem:[%s14783_s6 + $0x124] ss:$16 sps:$4 sm:$0xff]  }
 0x2a3   :  { %7470 = vmatpush1.bf16.msra.mxu1 %v10240_v36  ;;  %v10293_v36 = vld [vmem:[%s14783_s6 + $0x324] ss:$16 sps:$4 sm:$0xff]  }
 0x2a4   :  { %7511 = vmatpush1.bf16.msra.mxu0 %v10243_v51  ;;  %7471 = vmatprep.subr.bf16.mxu1 %v10248_v37  ;;  %v10288_v51 = vld [vmem:[%s14783_s6 + $0x120] ss:$16 sps:$4 sm:$0xff]  }
 0x2a5   :  { %7512 = vmatprep.subr.bf16.mxu0 %v10251_v32  ;;  %v10291_v37 = vld [vmem:[%s14783_s6 + $0x320] ss:$16 sps:$4 sm:$0xff]   ;;  %v10296_v32 = vld [vmem:[%s14783_s6 + $0x144] ss:$16 sps:$4 sm:$0xff]  }
 0x2a7   :  { %7472 = vmatpush1.bf16.msra.mxu1 %v10246_v38  ;;  %v10299_v38 = vld [vmem:[%s14783_s6 + $0x344] ss:$16 sps:$4 sm:$0xff]  }
 0x2a8   :  { %7513 = vmatpush1.bf16.msra.mxu0 %v10249_v60  ;;  %7473 = vmatprep.subr.bf16.mxu1 %v10254_v45  ;;  %v10294_v60 = vld [vmem:[%s14783_s6 + $0x140] ss:$16 sps:$4 sm:$0xff]  }
 0x2a9   :  { %7514 = vmatprep.subr.bf16.mxu0 %v10257_v22  ;;  %v10297_v45 = vld [vmem:[%s14783_s6 + $0x340] ss:$16 sps:$4 sm:$0xff]   ;;  %v10302_v22 = vld [vmem:[%s14783_s6 + $0x164] ss:$16 sps:$4 sm:$0xff]  }
 0x2ab   :  { %7474 = vmatpush1.bf16.msra.mxu1 %v10252_v39  ;;  %v10305_v39 = vld [vmem:[%s14783_s6 + $0x364] ss:$16 sps:$4 sm:$0xff]  }
 0x2ac   :  { %7515 = vmatpush1.bf16.msra.mxu0 %v10255_v18  ;;  %7475 = vmatprep.subr.bf16.mxu1 %v10260_v26  ;;  %v10300_v18 = vld [vmem:[%s14783_s6 + $0x160] ss:$16 sps:$4 sm:$0xff]  }
 0x2ad   :  { %7516 = vmatprep.subr.bf16.mxu0 %v10263_v31  ;;  %v10303_v26 = vld [vmem:[%s14783_s6 + $0x360] ss:$16 sps:$4 sm:$0xff]   ;;  %v10308_v31 = vld [vmem:[%s14783_s6 + $0x184] ss:$16 sps:$4 sm:$0xff]  }
 0x2af   :  { %7476 = vmatpush1.bf16.msra.mxu1 %v10258_v42  ;;  %v10311_v42 = vld [vmem:[%s14783_s6 + $0x384] ss:$16 sps:$4 sm:$0xff]  }
 0x2b0   :  { %7517 = vmatpush1.bf16.msra.mxu0 %v10261_v41  ;;  %7477 = vmatprep.subr.bf16.mxu1 %v10266_v23  ;;  %v10306_v41 = vld [vmem:[%s14783_s6 + $0x180] ss:$16 sps:$4 sm:$0xff]  }
 0x2b1   :  { %v4613_v56 = vpop.f32.mrb[28].mxu1  ;;  %7518 = vmatprep.subr.bf16.mxu0 %v10269_v8  ;;  %v10309_v23 = vld [vmem:[%s14783_s6 + $0x380] ss:$16 sps:$4 sm:$0xff]   ;;  %v10314_v8 = vld [vmem:[%s14783_s6 + $0x1a4] ss:$16 sps:$4 sm:$0xff]  }
 0x2b2   :  { %v4614_v62 = vadd.f32 %v4613_v56, %v12835_v4  ;;  %v4654_v52 = vpop.f32.mrb[32].mxu0  ;;  %v4615_v63 = vpop.f32.mrb[29].mxu1  ;;  %v10273_v4 = vld [vmem:[%s14783_s6 + $0x2c0] ss:$16 sps:$4 sm:$0xff]  }
 0x2b3   :  { %v4616_v15 = vadd.f32 %v4615_v63, %v12840_v7  ;;  %v4656_v46 = vpop.f32.mrb[33].mxu0  ;;  %v4617_v5 = vpop.f32.mrb[30].mxu1  ;;  %7478 = vmatpush1.bf16.msra.mxu1 %v10264_v43  ;;  %v10278_v7 = vld [vmem:[%s14783_s6 + $0xe4] ss:$16 sps:$4 sm:$0xff]   ;;  %v10315_v56 = vld [vmem:[%s14783_s6 + $0x3a0] ss:$16 sps:$4 sm:$0xff]  }
 0x2b4   :  { %v13055_v9 = vadd.f32 %v4654_v52, %v4614_v62  ;;  %v4658_v12 = vpop.f32.mrb[34].mxu0  ;;  %7519 = vmatpush1.bf16.msra.mxu0 %v10267_v27  ;;  %v4618_v13 = vpop.f32.mrb[31].mxu1  ;;  %7479 = vmatprep.subr.bf16.mxu1 %v10272_v48  ;;  %v10317_v43 = vld [vmem:[%s14783_s6 + $0x3a4] ss:$16 sps:$4 sm:$0xff]   ;;  %v10312_v27 = vld [vmem:[%s14783_s6 + $0x1a0] ss:$16 sps:$4 sm:$0xff]   ;;  %v177_v48 = vrot.slane %v12938_v54, %v12086_v28  ;;  %v185_v62 = vrot.slane %v12938_v54, %v12089_v29 }
 0x2b5   :  { %v13063_v30 = vadd.f32 %v4656_v46, %v4616_v15  ;;  %v4659_v14 = vpop.f32.mrb[35].mxu0  ;;  %7520 = vmatprep.subr.bf16.mxu0 %v10275_v57  ;;  %v10320_v57 = vld [vmem:[%s14783_s6 + $0x1c4] ss:$16 sps:$4 sm:$0xff]   ;;  %v10318_v63 = vld [vmem:[%s14783_s6 + $0x1c0] ss:$16 sps:$4 sm:$0xff]  }
 0x2b6   :  { %v10323_v52 = vld [vmem:[%s14783_s6 + $0x3c4] ss:$16 sps:$4 sm:$0xff]   ;;  %v929_v15 = vadd.f32 %v11906_v55, %v177_v48  ;;  %v10321_v46 = vld [vmem:[%s14783_s6 + $0x3c0] ss:$16 sps:$4 sm:$0xff]   ;;  %v970_v5 = vadd.f32 %v11914_v58, %v185_v62  ;;  %v1227_v14 = vmax.f32 %v12044_v50, 0.0 }
 0x2b7   :  { %7480 = vmatpush1.bf16.msra.mxu1 %v10270_v6  ;;  %v10326_v54 = vld [vmem:[%s14783_s6 + $0x1e4] ss:$16 sps:$4 sm:$0xff]   ;;  %v10324_v55 = vld [vmem:[%s14783_s6 + $0x1e0] ss:$16 sps:$4 sm:$0xff]  }
 0x2b8   :  { %7521 = vmatpush1.bf16.msra.mxu0 %v10273_v4  ;;  %7481 = vmatprep.subr.bf16.mxu1 %v10278_v7  ;;  %v10329_v6 = vld [vmem:[%s14783_s6 + $0x3e4] ss:$16 sps:$4 sm:$0xff]   ;;  %v1222_v12 = vmax.f32 %v929_v15, 0.0  ;;  %v10327_v13 = vld [vmem:[%s14783_s6 + $0x3e0] ss:$16 sps:$4 sm:$0xff]   ;;  %v1224_v4 = vmax.f32 %v970_v5, 0.0 }
 0x2b9   :  { %7522 = vmatprep.subr.bf16.mxu0 %v10281_v17  ;;  %v10332_v58 = vld [vmem:[%s14783_s6 + $0x404] ss:$16 sps:$4 sm:$0xff]   ;;  %v1229_v17 = vmax.f32 %v12046_v53, 0.0  ;;  %v13197_v53 = vpack.c.bf16 %v1227_v14, %v1227_v14  ;;  %v10378_v14 = vld [vmem:[%s14783_s6 + $0x500] ss:$16 sps:$4 sm:$0xff]  }
 0x2ba   :  { %v10335_v7 = vld [vmem:[%s14783_s6 + $0x604] ss:$16 sps:$4 sm:$0xff]  }
 0x2bb   :  { %7482 = vmatpush1.bf16.msra.mxu1 %v10276_v59  ;;  %v10330_v59 = vld [vmem:[%s14783_s6 + $0x400] ss:$16 sps:$4 sm:$0xff]   ;;  %v10338_v50 = vld [vmem:[%s14783_s6 + $0x424] ss:$16 sps:$4 sm:$0xff]  }
 0x2bc   :  { %7523 = vmatpush1.bf16.msra.mxu0 %v10279_v61  ;;  %7483 = vmatprep.subr.bf16.mxu1 %v10284_v21  ;;  %v13187_v61 = vpack.c.bf16 %v1222_v12, %v1222_v12  ;;  %v10333_v21 = vld [vmem:[%s14783_s6 + $0x600] ss:$16 sps:$4 sm:$0xff]   ;;  %v10377_v12 = vld [vmem:[%s14783_s6 + $0x6e4] ss:$16 sps:$4 sm:$0xff]  }
 0x2bd   :  { %7524 = vmatprep.subr.bf16.mxu0 %v10287_v40  ;;  %v13192_v40 = vpack.c.bf16 %v1224_v4, %v1224_v4  ;;  %v10380_v4 = vld [vmem:[%s14783_s6 + $0x504] ss:$16 sps:$4 sm:$0xff]  }
 0x2bf   :  { %7484 = vmatpush1.bf16.msra.mxu1 %v10282_v24  ;;  %v10341_v24 = vld [vmem:[%s14783_s6 + $0x624] ss:$16 sps:$4 sm:$0xff]  }
 0x2c0   :  { %7525 = vmatpush1.bf16.msra.mxu0 %v10285_v25  ;;  %7485 = vmatprep.subr.bf16.mxu1 %v10290_v10  ;;  %v13203_v25 = vpack.c.bf16 %v1229_v17, %v1229_v17  ;;  %v10336_v10 = vld [vmem:[%s14783_s6 + $0x420] ss:$16 sps:$4 sm:$0xff]  }
 0x2c1   :  { %7526 = vmatprep.subr.bf16.mxu0 %v10293_v36  ;;  %v10339_v36 = vld [vmem:[%s14783_s6 + $0x620] ss:$16 sps:$4 sm:$0xff]  }
 0x2c2   :  { %v10381_v17 = vld [vmem:[%s14783_s6 + $0x700] ss:$16 sps:$4 sm:$0xff]  }
 0x2c3   :  { %7486 = vmatpush1.bf16.msra.mxu1 %v10288_v51  ;;  %v10344_v51 = vld [vmem:[%s14783_s6 + $0x444] ss:$16 sps:$4 sm:$0xff]  }
 0x2c4   :  { %7527 = vmatpush1.bf16.msra.mxu0 %v10291_v37  ;;  %7487 = vmatprep.subr.bf16.mxu1 %v10296_v32  ;;  %v10347_v37 = vld [vmem:[%s14783_s6 + $0x644] ss:$16 sps:$4 sm:$0xff]   ;;  %v10342_v32 = vld [vmem:[%s14783_s6 + $0x440] ss:$16 sps:$4 sm:$0xff]  }
 0x2c5   :  { %7528 = vmatprep.subr.bf16.mxu0 %v10299_v38  ;;  %v10345_v38 = vld [vmem:[%s14783_s6 + $0x640] ss:$16 sps:$4 sm:$0xff]  }
 0x2c7   :  { %7488 = vmatpush1.bf16.msra.mxu1 %v10294_v60  ;;  %v10350_v60 = vld [vmem:[%s14783_s6 + $0x464] ss:$16 sps:$4 sm:$0xff]  }
 0x2c8   :  { %7529 = vmatpush1.bf16.msra.mxu0 %v10297_v45  ;;  %7489 = vmatprep.subr.bf16.mxu1 %v10302_v22  ;;  %v10353_v45 = vld [vmem:[%s14783_s6 + $0x664] ss:$16 sps:$4 sm:$0xff]   ;;  %v10348_v22 = vld [vmem:[%s14783_s6 + $0x460] ss:$16 sps:$4 sm:$0xff]  }
 0x2c9   :  { %7530 = vmatprep.subr.bf16.mxu0 %v10305_v39  ;;  %v10351_v39 = vld [vmem:[%s14783_s6 + $0x660] ss:$16 sps:$4 sm:$0xff]  }
 0x2cb   :  { %7490 = vmatpush1.bf16.msra.mxu1 %v10300_v18  ;;  %v10356_v18 = vld [vmem:[%s14783_s6 + $0x484] ss:$16 sps:$4 sm:$0xff]  }
 0x2cc   :  { %7531 = vmatpush1.bf16.msra.mxu0 %v10303_v26  ;;  %7491 = vmatprep.subr.bf16.mxu1 %v10308_v31  ;;  %v10359_v26 = vld [vmem:[%s14783_s6 + $0x684] ss:$16 sps:$4 sm:$0xff]   ;;  %v10354_v31 = vld [vmem:[%s14783_s6 + $0x480] ss:$16 sps:$4 sm:$0xff]  }
 0x2cd   :  { %7532 = vmatprep.subr.bf16.mxu0 %v10311_v42  ;;  %v10357_v42 = vld [vmem:[%s14783_s6 + $0x680] ss:$16 sps:$4 sm:$0xff]  }
 0x2cf   :  { %7492 = vmatpush1.bf16.msra.mxu1 %v10306_v41  ;;  %v10362_v41 = vld [vmem:[%s14783_s6 + $0x4a4] ss:$16 sps:$4 sm:$0xff]  }
 0x2d0   :  { %7533 = vmatpush1.bf16.msra.mxu0 %v10309_v23  ;;  %7493 = vmatprep.subr.bf16.mxu1 %v10314_v8  ;;  %v10365_v23 = vld [vmem:[%s14783_s6 + $0x6a4] ss:$16 sps:$4 sm:$0xff]   ;;  %v10360_v8 = vld [vmem:[%s14783_s6 + $0x4a0] ss:$16 sps:$4 sm:$0xff]  }
 0x2d1   :  { %7534 = vmatprep.subr.bf16.mxu0 %v10317_v43  ;;  %v10363_v43 = vld [vmem:[%s14783_s6 + $0x6a0] ss:$16 sps:$4 sm:$0xff]  }
 0x2d3   :  { %7494 = vmatpush1.bf16.msra.mxu1 %v10312_v27  ;;  %v10368_v27 = vld [vmem:[%s14783_s6 + $0x4c4] ss:$16 sps:$4 sm:$0xff]  }
 0x2d4   :  { %7535 = vmatpush1.bf16.msra.mxu0 %v10315_v56  ;;  %7495 = vmatprep.subr.bf16.mxu1 %v10320_v57  ;;  %v10371_v56 = vld [vmem:[%s14783_s6 + $0x6c4] ss:$16 sps:$4 sm:$0xff]  }
 0x2d5   :  { %7536 = vmatprep.subr.bf16.mxu0 %v10323_v52 }
 0x2d7   :  { %7496 = vmatpush1.bf16.msra.mxu1 %v10318_v63 }
 0x2d8   :  { %7537 = vmatpush1.bf16.msra.mxu0 %v10321_v46  ;;  %7497 = vmatprep.subr.bf16.mxu1 %v10326_v54  ;;  %v10366_v54 = vld [vmem:[%s14783_s6 + $0x4c0] ss:$16 sps:$4 sm:$0xff]  }
 0x2d9   :  { %7538 = vmatprep.subr.bf16.mxu0 %v10329_v6 }
 0x2db   :  { %7498 = vmatpush1.bf16.msra.mxu1 %v10324_v55 }
 0x2dc   :  { %7539 = vmatpush1.bf16.msra.mxu0 %v10327_v13  ;;  %7549 = vmatprep.subr.bf16.mxu1 %v10332_v58  ;;  %v10372_v13 = vld [vmem:[%s14783_s6 + $0x4e0] ss:$16 sps:$4 sm:$0xff]  }
 0x2dd   :  { %7590 = vmatprep.subr.bf16.mxu0 %v10335_v7  ;;  %v10375_v58 = vld [vmem:[%s14783_s6 + $0x6e0] ss:$16 sps:$4 sm:$0xff]   ;;  %v10383_v7 = vld [vmem:[%s14783_s6 + $0x704] ss:$16 sps:$4 sm:$0xff]  }
 0x2de   :  { %7500 = vmatmul.mubr.bf16.vlgmr.msra.gmra.mrb[44].mxu1 %v13187_v61 }
 0x2df   :  { %7541 = vmatmul.mubr.bf16.vlgmr.msra.gmra.mrb[48].mxu0 %v13192_v40  ;;  %7550 = vmatpush1.bf16.msra.mxu1 %v10330_v59  ;;  %v10386_v59 = vld [vmem:[%s14783_s6 + $0x524] ss:$16 sps:$4 sm:$0xff]  }
 0x2e0   :  { %7581 = vmatprep.mubr.bf16.mxu1 %v13197_v53  ;;  %7591 = vmatpush1.bf16.msra.mxu0 %v10333_v21  ;;  %v10389_v21 = vld [vmem:[%s14783_s6 + $0x724] ss:$16 sps:$4 sm:$0xff]  }
 0x2e1   :  { %7622 = vmatprep.mubr.bf16.mxu0 %v13203_v25  ;;  %7551 = vmatprep.subr.bf16.mxu1 %v10338_v50  ;;  %v10384_v50 = vld [vmem:[%s14783_s6 + $0x520] ss:$16 sps:$4 sm:$0xff]  }
 0x2e2   :  { %7592 = vmatprep.subr.bf16.mxu0 %v10341_v24  ;;  %v10387_v24 = vld [vmem:[%s14783_s6 + $0x720] ss:$16 sps:$4 sm:$0xff]  }
 0x2e3   :  { %7552 = vmatpush1.bf16.msra.mxu1 %v10336_v10  ;;  %v10392_v10 = vld [vmem:[%s14783_s6 + $0x544] ss:$16 sps:$4 sm:$0xff]  }
 0x2e4   :  { %7593 = vmatpush1.bf16.msra.mxu0 %v10339_v36  ;;  %7553 = vmatprep.subr.bf16.mxu1 %v10344_v51  ;;  %v10395_v36 = vld [vmem:[%s14783_s6 + $0x744] ss:$16 sps:$4 sm:$0xff]   ;;  %v10390_v51 = vld [vmem:[%s14783_s6 + $0x540] ss:$16 sps:$4 sm:$0xff]  }
 0x2e5   :  { %7594 = vmatprep.subr.bf16.mxu0 %v10347_v37  ;;  %v10393_v37 = vld [vmem:[%s14783_s6 + $0x740] ss:$16 sps:$4 sm:$0xff]  }
 0x2e7   :  { %7554 = vmatpush1.bf16.msra.mxu1 %v10342_v32  ;;  %v10398_v32 = vld [vmem:[%s14783_s6 + $0x564] ss:$16 sps:$4 sm:$0xff]  }
 0x2e8   :  { %7595 = vmatpush1.bf16.msra.mxu0 %v10345_v38  ;;  %7555 = vmatprep.subr.bf16.mxu1 %v10350_v60  ;;  %v10401_v38 = vld [vmem:[%s14783_s6 + $0x764] ss:$16 sps:$4 sm:$0xff]   ;;  %v10396_v60 = vld [vmem:[%s14783_s6 + $0x560] ss:$16 sps:$4 sm:$0xff]  }
 0x2e9   :  { %7596 = vmatprep.subr.bf16.mxu0 %v10353_v45  ;;  %v10399_v45 = vld [vmem:[%s14783_s6 + $0x760] ss:$16 sps:$4 sm:$0xff]  }
 0x2eb   :  { %7556 = vmatpush1.bf16.msra.mxu1 %v10348_v22  ;;  %v10404_v22 = vld [vmem:[%s14783_s6 + $0x584] ss:$16 sps:$4 sm:$0xff]  }
 0x2ec   :  { %7597 = vmatpush1.bf16.msra.mxu0 %v10351_v39  ;;  %7557 = vmatprep.subr.bf16.mxu1 %v10356_v18  ;;  %v10407_v39 = vld [vmem:[%s14783_s6 + $0x784] ss:$16 sps:$4 sm:$0xff]   ;;  %v10402_v18 = vld [vmem:[%s14783_s6 + $0x580] ss:$16 sps:$4 sm:$0xff]  }
 0x2ed   :  { %7598 = vmatprep.subr.bf16.mxu0 %v10359_v26  ;;  %v10405_v26 = vld [vmem:[%s14783_s6 + $0x780] ss:$16 sps:$4 sm:$0xff]  }
 0x2ef   :  { %7558 = vmatpush1.bf16.msra.mxu1 %v10354_v31  ;;  %v10410_v31 = vld [vmem:[%s14783_s6 + $0x5a4] ss:$16 sps:$4 sm:$0xff]  }
 0x2f0   :  { %7599 = vmatpush1.bf16.msra.mxu0 %v10357_v42  ;;  %7559 = vmatprep.subr.bf16.mxu1 %v10362_v41  ;;  %v10413_v42 = vld [vmem:[%s14783_s6 + $0x7a4] ss:$16 sps:$4 sm:$0xff]   ;;  %v10408_v41 = vld [vmem:[%s14783_s6 + $0x5a0] ss:$16 sps:$4 sm:$0xff]  }
 0x2f1   :  { %v4695_v48 = vpop.f32.mrb[32].mxu1  ;;  %7600 = vmatprep.subr.bf16.mxu0 %v10365_v23  ;;  %v10411_v23 = vld [vmem:[%s14783_s6 + $0x7a0] ss:$16 sps:$4 sm:$0xff]  }
 0x2f2   :  { %v13269_v57 = vadd.f32 %v4695_v48, %v13055_v9  ;;  %v13271_v62 = vpop.f32.mrb[36].mxu0  ;;  %v4697_v52 = vpop.f32.mrb[33].mxu1  ;;  %v10369_v9 = vld [vmem:[%s14783_s6 + $0x6c0] ss:$16 sps:$4 sm:$0xff]  }
 0x2f3   :  { %v13274_v63 = vadd.f32 %v4697_v52, %v13063_v30  ;;  %v13276_v15 = vpop.f32.mrb[37].mxu0  ;;  %v4699_v46 = vpop.f32.mrb[34].mxu1  ;;  %7560 = vmatpush1.bf16.msra.mxu1 %v10360_v8  ;;  %v10374_v30 = vld [vmem:[%s14783_s6 + $0x4e4] ss:$16 sps:$4 sm:$0xff]   ;;  %v10414_v52 = vld [vmem:[%s14783_s6 + $0x5c0] ss:$16 sps:$4 sm:$0xff]  }
 0x2f4   :  { %v4740_v5 = vpop.f32.mrb[38].mxu0  ;;  %7601 = vmatpush1.bf16.msra.mxu0 %v10363_v43  ;;  %v4700_v6 = vpop.f32.mrb[35].mxu1  ;;  %7561 = vmatprep.subr.bf16.mxu1 %v10368_v27  ;;  %v10416_v8 = vld [vmem:[%s14783_s6 + $0x5c4] ss:$16 sps:$4 sm:$0xff]   ;;  %v13377_v27 = vld [vmem:[%s14780_s3 + $0x8] sm:$0xff] }
 0x2f5   :  { %v4741_v55 = vpop.f32.mrb[39].mxu0  ;;  %7602 = vmatprep.subr.bf16.mxu0 %v10371_v56  ;;  %v10419_v43 = vld [vmem:[%s14783_s6 + $0x7c4] ss:$16 sps:$4 sm:$0xff]   ;;  %v213_v48 = vrot.slane %v13377_v27, %v12092_v33  ;;  %v221_v56 = vrot.slane %v13377_v27, %v12095_v34  ;;  %v10417_v46 = vld [vmem:[%s14783_s6 + $0x7c0] ss:$16 sps:$4 sm:$0xff]  }
 0x2f6   :  { %v10425_v5 = vld [vmem:[%s14783_s6 + $0x7e4] ss:$16 sps:$4 sm:$0xff]   ;;  %v1226_v55 = vmax.f32 %v12034_v44, 0.0  ;;  %v10426_v44 = vld [vmem:[%s14783_s6 + $0x800] ss:$16 sps:$4 sm:$0xff]  }
 0x2f7   :  { %7562 = vmatpush1.bf16.msra.mxu1 %v10366_v54  ;;  %v10422_v54 = vld [vmem:[%s14783_s6 + $0x5e4] ss:$16 sps:$4 sm:$0xff]   ;;  %v1095_v6 = vadd.f32 %v12061_v2, %v213_v48  ;;  %v1228_v2 = vmax.f32 %v12042_v49, 0.0  ;;  %v10429_v49 = vld [vmem:[%s14783_s6 + $0xa00] ss:$16 sps:$4 sm:$0xff]  }
 0x2f8   :  { %7603 = vmatpush1.bf16.msra.mxu0 %v10369_v9  ;;  %7563 = vmatprep.subr.bf16.mxu1 %v10374_v30  ;;  %v1136_v9 = vadd.f32 %v12063_v3, %v221_v56  ;;  %v10420_v30 = vld [vmem:[%s14783_s6 + $0x5e0] ss:$16 sps:$4 sm:$0xff]   ;;  %v10431_v3 = vld [vmem:[%s14783_s6 + $0xa04] ss:$16 sps:$4 sm:$0xff]  }
 0x2f9   :  { %7604 = vmatprep.subr.bf16.mxu0 %v10377_v12  ;;  %v10423_v12 = vld [vmem:[%s14783_s6 + $0x7e0] ss:$16 sps:$4 sm:$0xff]   ;;  %v10467_v56 = vld [vmem:[%s14783_s6 + $0xac4] ss:$16 sps:$4 sm:$0xff]  }
 0x2fb   :  { %7564 = vmatpush1.bf16.msra.mxu1 %v10372_v13  ;;  %v10428_v13 = vld [vmem:[%s14783_s6 + $0x804] ss:$16 sps:$4 sm:$0xff]  }
 0x2fc   :  { %7605 = vmatpush1.bf16.msra.mxu0 %v10375_v58  ;;  %7565 = vmatprep.subr.bf16.mxu1 %v10380_v4  ;;  %v1231_v58 = vmax.f32 %v1095_v6, 0.0  ;;  %v1233_v4 = vmax.f32 %v1136_v9, 0.0 }
 0x2fd   :  { %7606 = vmatprep.subr.bf16.mxu0 %v10383_v7  ;;  %v13414_v7 = vpack.c.bf16 %v1226_v55, %v1226_v55 }
 0x2ff   :  { %7566 = vmatpush1.bf16.msra.mxu1 %v10378_v14  ;;  %v13419_v14 = vpack.c.bf16 %v1228_v2, %v1228_v2 }
 0x300   :  { %7607 = vmatpush1.bf16.msra.mxu0 %v10381_v17  ;;  %7567 = vmatprep.subr.bf16.mxu1 %v10386_v59  ;;  %v10434_v17 = vld [vmem:[%s14783_s6 + $0x824] ss:$16 sps:$4 sm:$0xff]   ;;  %v13424_v59 = vpack.c.bf16 %v1231_v58, %v1231_v58 }
 0x301   :  { %7608 = vmatprep.subr.bf16.mxu0 %v10389_v21  ;;  %v10437_v21 = vld [vmem:[%s14783_s6 + $0xa24] ss:$16 sps:$4 sm:$0xff]  }
 0x302   :  { %v10473_v58 = vld [vmem:[%s14783_s6 + $0xae4] ss:$16 sps:$4 sm:$0xff]  }
 0x303   :  { %7568 = vmatpush1.bf16.msra.mxu1 %v10384_v50  ;;  %v13430_v50 = vpack.c.bf16 %v1233_v4, %v1233_v4  ;;  %v10468_v4 = vld [vmem:[%s14783_s6 + $0x8e0] ss:$16 sps:$4 sm:$0xff]  }
 0x304   :  { %7609 = vmatpush1.bf16.msra.mxu0 %v10387_v24  ;;  %7569 = vmatprep.subr.bf16.mxu1 %v10392_v10  ;;  %v10432_v24 = vld [vmem:[%s14783_s6 + $0x820] ss:$16 sps:$4 sm:$0xff]  }
 0x305   :  { %7610 = vmatprep.subr.bf16.mxu0 %v10395_v36  ;;  %v10435_v10 = vld [vmem:[%s14783_s6 + $0xa20] ss:$16 sps:$4 sm:$0xff]   ;;  %v10440_v36 = vld [vmem:[%s14783_s6 + $0x844] ss:$16 sps:$4 sm:$0xff]  }
 0x307   :  { %7570 = vmatpush1.bf16.msra.mxu1 %v10390_v51  ;;  %v10443_v51 = vld [vmem:[%s14783_s6 + $0xa44] ss:$16 sps:$4 sm:$0xff]  }
 0x308   :  { %7611 = vmatpush1.bf16.msra.mxu0 %v10393_v37  ;;  %7571 = vmatprep.subr.bf16.mxu1 %v10398_v32  ;;  %v10438_v37 = vld [vmem:[%s14783_s6 + $0x840] ss:$16 sps:$4 sm:$0xff]  }
 0x309   :  { %7612 = vmatprep.subr.bf16.mxu0 %v10401_v38  ;;  %v10441_v32 = vld [vmem:[%s14783_s6 + $0xa40] ss:$16 sps:$4 sm:$0xff]   ;;  %v10446_v38 = vld [vmem:[%s14783_s6 + $0x864] ss:$16 sps:$4 sm:$0xff]  }
 0x30b   :  { %7572 = vmatpush1.bf16.msra.mxu1 %v10396_v60  ;;  %v10449_v60 = vld [vmem:[%s14783_s6 + $0xa64] ss:$16 sps:$4 sm:$0xff]  }
 0x30c   :  { %7613 = vmatpush1.bf16.msra.mxu0 %v10399_v45  ;;  %7573 = vmatprep.subr.bf16.mxu1 %v10404_v22  ;;  %v10444_v45 = vld [vmem:[%s14783_s6 + $0x860] ss:$16 sps:$4 sm:$0xff]  }
 0x30d   :  { %7614 = vmatprep.subr.bf16.mxu0 %v10407_v39  ;;  %v10447_v22 = vld [vmem:[%s14783_s6 + $0xa60] ss:$16 sps:$4 sm:$0xff]   ;;  %v10452_v39 = vld [vmem:[%s14783_s6 + $0x884] ss:$16 sps:$4 sm:$0xff]  }
 0x30f   :  { %7574 = vmatpush1.bf16.msra.mxu1 %v10402_v18  ;;  %v10455_v18 = vld [vmem:[%s14783_s6 + $0xa84] ss:$16 sps:$4 sm:$0xff]  }
 0x310   :  { %7615 = vmatpush1.bf16.msra.mxu0 %v10405_v26  ;;  %7575 = vmatprep.subr.bf16.mxu1 %v10410_v31  ;;  %v10450_v26 = vld [vmem:[%s14783_s6 + $0x880] ss:$16 sps:$4 sm:$0xff]  }
 0x311   :  { %7616 = vmatprep.subr.bf16.mxu0 %v10413_v42  ;;  %v10453_v31 = vld [vmem:[%s14783_s6 + $0xa80] ss:$16 sps:$4 sm:$0xff]   ;;  %v10458_v42 = vld [vmem:[%s14783_s6 + $0x8a4] ss:$16 sps:$4 sm:$0xff]  }
 0x313   :  { %7576 = vmatpush1.bf16.msra.mxu1 %v10408_v41  ;;  %v10461_v41 = vld [vmem:[%s14783_s6 + $0xaa4] ss:$16 sps:$4 sm:$0xff]  }
 0x314   :  { %7617 = vmatpush1.bf16.msra.mxu0 %v10411_v23  ;;  %7577 = vmatprep.subr.bf16.mxu1 %v10416_v8  ;;  %v10456_v23 = vld [vmem:[%s14783_s6 + $0x8a0] ss:$16 sps:$4 sm:$0xff]  }
 0x315   :  { %7618 = vmatprep.subr.bf16.mxu0 %v10419_v43  ;;  %v10459_v8 = vld [vmem:[%s14783_s6 + $0xaa0] ss:$16 sps:$4 sm:$0xff]   ;;  %v10464_v43 = vld [vmem:[%s14783_s6 + $0x8c4] ss:$16 sps:$4 sm:$0xff]  }
 0x317   :  { %7578 = vmatpush1.bf16.msra.mxu1 %v10414_v52 }
 0x318   :  { %7619 = vmatpush1.bf16.msra.mxu0 %v10417_v46  ;;  %7579 = vmatprep.subr.bf16.mxu1 %v10422_v54 }
 0x319   :  { %7620 = vmatprep.subr.bf16.mxu0 %v10425_v5 }
 0x31b   :  { %7580 = vmatpush1.bf16.msra.mxu1 %v10420_v30  ;;  %v10462_v30 = vld [vmem:[%s14783_s6 + $0x8c0] ss:$16 sps:$4 sm:$0xff]  }
 0x31c   :  { %7621 = vmatpush1.bf16.msra.mxu0 %v10423_v12  ;;  %7631 = vmatprep.subr.bf16.mxu1 %v10428_v13 }
 0x31d   :  { %7672 = vmatprep.subr.bf16.mxu0 %v10431_v3 }
 0x31e   :  { %7582 = vmatmul.mubr.bf16.vlgmr.msra.gmra.mrb[48].mxu1 %v13414_v7 }
 0x31f   :  { %7623 = vmatmul.mubr.bf16.vlgmr.msra.gmra.mrb[52].mxu0 %v13419_v14  ;;  %7632 = vmatpush1.bf16.msra.mxu1 %v10426_v44  ;;  %v10471_v44 = vld [vmem:[%s14783_s6 + $0xae0] ss:$16 sps:$4 sm:$0xff]  }
 0x320   :  { %7663 = vmatprep.mubr.bf16.mxu1 %v13424_v59  ;;  %7673 = vmatpush1.bf16.msra.mxu0 %v10429_v49  ;;  %v10476_v49 = vld [vmem:[%s14783_s6 + $0x904] ss:$16 sps:$4 sm:$0xff]  }
 0x321   :  { %7704 = vmatprep.mubr.bf16.mxu0 %v13430_v50  ;;  %7633 = vmatprep.subr.bf16.mxu1 %v10434_v17  ;;  %v10479_v17 = vld [vmem:[%s14783_s6 + $0xb04] ss:$16 sps:$4 sm:$0xff]  }
 0x322   :  { %7674 = vmatprep.subr.bf16.mxu0 %v10437_v21  ;;  %v10474_v21 = vld [vmem:[%s14783_s6 + $0x900] ss:$16 sps:$4 sm:$0xff]  }
 0x323   :  { %7634 = vmatpush1.bf16.msra.mxu1 %v10432_v24  ;;  %v10477_v24 = vld [vmem:[%s14783_s6 + $0xb00] ss:$16 sps:$4 sm:$0xff]  }
 0x324   :  { %7675 = vmatpush1.bf16.msra.mxu0 %v10435_v10  ;;  %7635 = vmatprep.subr.bf16.mxu1 %v10440_v36  ;;  %v10482_v10 = vld [vmem:[%s14783_s6 + $0x924] ss:$16 sps:$4 sm:$0xff]  }
 0x325   :  { %7676 = vmatprep.subr.bf16.mxu0 %v10443_v51  ;;  %v10485_v36 = vld [vmem:[%s14783_s6 + $0xb24] ss:$16 sps:$4 sm:$0xff]   ;;  %v10480_v51 = vld [vmem:[%s14783_s6 + $0x920] ss:$16 sps:$4 sm:$0xff]  }
 0x327   :  { %7636 = vmatpush1.bf16.msra.mxu1 %v10438_v37  ;;  %v10483_v37 = vld [vmem:[%s14783_s6 + $0xb20] ss:$16 sps:$4 sm:$0xff]  }
 0x328   :  { %7677 = vmatpush1.bf16.msra.mxu0 %v10441_v32  ;;  %7637 = vmatprep.subr.bf16.mxu1 %v10446_v38  ;;  %v10488_v32 = vld [vmem:[%s14783_s6 + $0x944] ss:$16 sps:$4 sm:$0xff]  }
 0x329   :  { %7678 = vmatprep.subr.bf16.mxu0 %v10449_v60  ;;  %v10491_v38 = vld [vmem:[%s14783_s6 + $0xb44] ss:$16 sps:$4 sm:$0xff]   ;;  %v10486_v60 = vld [vmem:[%s14783_s6 + $0x940] ss:$16 sps:$4 sm:$0xff]  }
 0x32b   :  { %7638 = vmatpush1.bf16.msra.mxu1 %v10444_v45  ;;  %v10489_v45 = vld [vmem:[%s14783_s6 + $0xb40] ss:$16 sps:$4 sm:$0xff]  }
 0x32c   :  { %7679 = vmatpush1.bf16.msra.mxu0 %v10447_v22  ;;  %7639 = vmatprep.subr.bf16.mxu1 %v10452_v39  ;;  %v10494_v22 = vld [vmem:[%s14783_s6 + $0x964] ss:$16 sps:$4 sm:$0xff]  }
 0x32d   :  { %7680 = vmatprep.subr.bf16.mxu0 %v10455_v18  ;;  %v10497_v39 = vld [vmem:[%s14783_s6 + $0xb64] ss:$16 sps:$4 sm:$0xff]   ;;  %v10492_v18 = vld [vmem:[%s14783_s6 + $0x960] ss:$16 sps:$4 sm:$0xff]  }
 0x32f   :  { %7640 = vmatpush1.bf16.msra.mxu1 %v10450_v26  ;;  %v10495_v26 = vld [vmem:[%s14783_s6 + $0xb60] ss:$16 sps:$4 sm:$0xff]  }
 0x330   :  { %7681 = vmatpush1.bf16.msra.mxu0 %v10453_v31  ;;  %7641 = vmatprep.subr.bf16.mxu1 %v10458_v42  ;;  %v10500_v31 = vld [vmem:[%s14783_s6 + $0x984] ss:$16 sps:$4 sm:$0xff]  }
 0x331   :  { %v4777_v48 = vpop.f32.mrb[36].mxu1  ;;  %7682 = vmatprep.subr.bf16.mxu0 %v10461_v41  ;;  %v10503_v42 = vld [vmem:[%s14783_s6 + $0xb84] ss:$16 sps:$4 sm:$0xff]   ;;  %v10498_v41 = vld [vmem:[%s14783_s6 + $0x980] ss:$16 sps:$4 sm:$0xff]  }
 0x332   :  { %v4778_v52 = vadd.f32 %v4777_v48, %v13271_v62  ;;  %v4818_v46 = vpop.f32.mrb[40].mxu0  ;;  %v4779_v54 = vpop.f32.mrb[37].mxu1  ;;  %v10465_v62 = vld [vmem:[%s14783_s6 + $0xac0] ss:$16 sps:$4 sm:$0xff]  }
 0x333   :  { %v4780_v5 = vadd.f32 %v4779_v54, %v13276_v15  ;;  %v4820_v6 = vpop.f32.mrb[41].mxu0  ;;  %v4781_v9 = vpop.f32.mrb[38].mxu1  ;;  %7642 = vmatpush1.bf16.msra.mxu1 %v10456_v23  ;;  %v10470_v15 = vld [vmem:[%s14783_s6 + $0x8e4] ss:$16 sps:$4 sm:$0xff]   ;;  %v10501_v23 = vld [vmem:[%s14783_s6 + $0xb80] ss:$16 sps:$4 sm:$0xff]   ;;  %v217_v54 = vrot.slane %v13377_v27, %v12089_v29 }
 0x334   :  { %v13500_v55 = vadd.f32 %v4818_v46, %v4778_v52  ;;  %v4822_v12 = vpop.f32.mrb[42].mxu0  ;;  %7683 = vmatpush1.bf16.msra.mxu0 %v10459_v8  ;;  %v4782_v13 = vpop.f32.mrb[39].mxu1  ;;  %7643 = vmatprep.subr.bf16.mxu1 %v10464_v43  ;;  %v10506_v8 = vld [vmem:[%s14783_s6 + $0x9a4] ss:$16 sps:$4 sm:$0xff]   ;;  %v10504_v48 = vld [vmem:[%s14783_s6 + $0x9a0] ss:$16 sps:$4 sm:$0xff]  }
 0x335   :  { %v13508_v2 = vadd.f32 %v4820_v6, %v4780_v5  ;;  %v4823_v3 = vpop.f32.mrb[43].mxu0  ;;  %7684 = vmatprep.subr.bf16.mxu0 %v10467_v56  ;;  %v10509_v43 = vld [vmem:[%s14783_s6 + $0xba4] ss:$16 sps:$4 sm:$0xff]   ;;  %v209_v56 = vrot.slane %v13377_v27, %v12086_v28  ;;  %v10507_v52 = vld [vmem:[%s14783_s6 + $0xba0] ss:$16 sps:$4 sm:$0xff]   ;;  %v1134_v12 = vadd.f32 %v12059_v1, %v217_v54 }
 0x336   :  { %v10512_v46 = vld [vmem:[%s14783_s6 + $0x9c4] ss:$16 sps:$4 sm:$0xff]   ;;  %v10510_v6 = vld [vmem:[%s14783_s6 + $0x9c0] ss:$16 sps:$4 sm:$0xff]  }
 0x337   :  { %7644 = vmatpush1.bf16.msra.mxu1 %v10462_v30  ;;  %v10515_v5 = vld [vmem:[%s14783_s6 + $0xbc4] ss:$16 sps:$4 sm:$0xff]   ;;  %v1093_v9 = vadd.f32 %v12057_v0, %v209_v56  ;;  %v10513_v30 = vld [vmem:[%s14783_s6 + $0xbc0] ss:$16 sps:$4 sm:$0xff]   ;;  %v1232_v3 = vmax.f32 %v1134_v12, 0.0 }
 0x338   :  { %7685 = vmatpush1.bf16.msra.mxu0 %v10465_v62  ;;  %7645 = vmatprep.subr.bf16.mxu1 %v10470_v15  ;;  %v10518_v27 = vld [vmem:[%s14783_s6 + $0x9e4] ss:$16 sps:$4 sm:$0xff]   ;;  %v10516_v0 = vld [vmem:[%s14783_s6 + $0x9e0] ss:$16 sps:$4 sm:$0xff]  }
 0x339   :  { %7686 = vmatprep.subr.bf16.mxu0 %v10473_v58  ;;  %v10521_v13 = vld [vmem:[%s14783_s6 + $0xbe4] ss:$16 sps:$4 sm:$0xff]   ;;  %v1230_v62 = vmax.f32 %v1093_v9, 0.0  ;;  %v10519_v15 = vld [vmem:[%s14783_s6 + $0xbe0] ss:$16 sps:$4 sm:$0xff]  }
 0x33a   :  { %v10524_v1 = vld [vmem:[%s14783_s6 + $0xc04] ss:$16 sps:$4 sm:$0xff]   ;;  %v10555_v56 = vld [vmem:[%s14783_s6 + $0xea0] ss:$16 sps:$4 sm:$0xff]  }
 0x33b   :  { %7646 = vmatpush1.bf16.msra.mxu1 %v10468_v4  ;;  %v10527_v58 = vld [vmem:[%s14783_s6 + $0xe04] ss:$16 sps:$4 sm:$0xff]   ;;  %v1235_v4 = vmax.f32 %v12076_v20, 0.0 }
 0x33c   :  { %7687 = vmatpush1.bf16.msra.mxu0 %v10471_v44  ;;  %7647 = vmatprep.subr.bf16.mxu1 %v10476_v49  ;;  %v1237_v44 = vmax.f32 %v12078_v11, 0.0  ;;  %v10522_v49 = vld [vmem:[%s14783_s6 + $0xc00] ss:$16 sps:$4 sm:$0xff]   ;;  %v10530_v20 = vld [vmem:[%s14783_s6 + $0xc24] ss:$16 sps:$4 sm:$0xff]  }
 0x33d   :  { %7688 = vmatprep.subr.bf16.mxu0 %v10479_v17  ;;  %v13632_v17 = vpack.c.bf16 %v1230_v62, %v1230_v62  ;;  %v13642_v11 = vpack.c.bf16 %v1235_v4, %v1235_v4  ;;  %v10563_v54 = vld [vmem:[%s14783_s6 + $0xec4] ss:$16 sps:$4 sm:$0xff]   ;;  %v10564_v4 = vld [vmem:[%s14783_s6 + $0xce0] ss:$16 sps:$4 sm:$0xff]  }
 0x33f   :  { %7648 = vmatpush1.bf16.msra.mxu1 %v10474_v21  ;;  %v10525_v21 = vld [vmem:[%s14783_s6 + $0xe00] ss:$16 sps:$4 sm:$0xff]  }
 0x340   :  { %7689 = vmatpush1.bf16.msra.mxu0 %v10477_v24  ;;  %7649 = vmatprep.subr.bf16.mxu1 %v10482_v10  ;;  %v13637_v24 = vpack.c.bf16 %v1232_v3, %v1232_v3  ;;  %v10533_v10 = vld [vmem:[%s14783_s6 + $0xe24] ss:$16 sps:$4 sm:$0xff]  }
 0x341   :  { %7690 = vmatprep.subr.bf16.mxu0 %v10485_v36  ;;  %v13648_v36 = vpack.c.bf16 %v1237_v44, %v1237_v44  ;;  %v10567_v44 = vld [vmem:[%s14783_s6 + $0xee0] ss:$16 sps:$4 sm:$0xff]  }
 0x343   :  { %7650 = vmatpush1.bf16.msra.mxu1 %v10480_v51  ;;  %v10528_v51 = vld [vmem:[%s14783_s6 + $0xc20] ss:$16 sps:$4 sm:$0xff]  }
 0x344   :  { %7691 = vmatpush1.bf16.msra.mxu0 %v10483_v37  ;;  %7651 = vmatprep.subr.bf16.mxu1 %v10488_v32  ;;  %v10531_v37 = vld [vmem:[%s14783_s6 + $0xe20] ss:$16 sps:$4 sm:$0xff]   ;;  %v10536_v32 = vld [vmem:[%s14783_s6 + $0xc44] ss:$16 sps:$4 sm:$0xff]  }
 0x345   :  { %7692 = vmatprep.subr.bf16.mxu0 %v10491_v38  ;;  %v10539_v38 = vld [vmem:[%s14783_s6 + $0xe44] ss:$16 sps:$4 sm:$0xff]  }
 0x347   :  { %7652 = vmatpush1.bf16.msra.mxu1 %v10486_v60  ;;  %v10534_v60 = vld [vmem:[%s14783_s6 + $0xc40] ss:$16 sps:$4 sm:$0xff]  }
 0x348   :  { %7693 = vmatpush1.bf16.msra.mxu0 %v10489_v45  ;;  %7653 = vmatprep.subr.bf16.mxu1 %v10494_v22  ;;  %v10537_v45 = vld [vmem:[%s14783_s6 + $0xe40] ss:$16 sps:$4 sm:$0xff]   ;;  %v10542_v22 = vld [vmem:[%s14783_s6 + $0xc64] ss:$16 sps:$4 sm:$0xff]  }
 0x349   :  { %7694 = vmatprep.subr.bf16.mxu0 %v10497_v39  ;;  %v10545_v39 = vld [vmem:[%s14783_s6 + $0xe64] ss:$16 sps:$4 sm:$0xff]  }
 0x34b   :  { %7654 = vmatpush1.bf16.msra.mxu1 %v10492_v18  ;;  %v10540_v18 = vld [vmem:[%s14783_s6 + $0xc60] ss:$16 sps:$4 sm:$0xff]  }
 0x34c   :  { %7695 = vmatpush1.bf16.msra.mxu0 %v10495_v26  ;;  %7655 = vmatprep.subr.bf16.mxu1 %v10500_v31  ;;  %v10543_v26 = vld [vmem:[%s14783_s6 + $0xe60] ss:$16 sps:$4 sm:$0xff]   ;;  %v10548_v31 = vld [vmem:[%s14783_s6 + $0xc84] ss:$16 sps:$4 sm:$0xff]  }
 0x34d   :  { %7696 = vmatprep.subr.bf16.mxu0 %v10503_v42  ;;  %v10551_v42 = vld [vmem:[%s14783_s6 + $0xe84] ss:$16 sps:$4 sm:$0xff]  }
 0x34f   :  { %7656 = vmatpush1.bf16.msra.mxu1 %v10498_v41  ;;  %v10546_v41 = vld [vmem:[%s14783_s6 + $0xc80] ss:$16 sps:$4 sm:$0xff]  }
 0x350   :  { %7697 = vmatpush1.bf16.msra.mxu0 %v10501_v23  ;;  %7657 = vmatprep.subr.bf16.mxu1 %v10506_v8  ;;  %v10549_v23 = vld [vmem:[%s14783_s6 + $0xe80] ss:$16 sps:$4 sm:$0xff]   ;;  %v10554_v8 = vld [vmem:[%s14783_s6 + $0xca4] ss:$16 sps:$4 sm:$0xff]  }
 0x351   :  { %7698 = vmatprep.subr.bf16.mxu0 %v10509_v43  ;;  %v10557_v43 = vld [vmem:[%s14783_s6 + $0xea4] ss:$16 sps:$4 sm:$0xff]  }
 0x353   :  { %7658 = vmatpush1.bf16.msra.mxu1 %v10504_v48  ;;  %v10552_v48 = vld [vmem:[%s14783_s6 + $0xca0] ss:$16 sps:$4 sm:$0xff]  }
 0x354   :  { %7699 = vmatpush1.bf16.msra.mxu0 %v10507_v52  ;;  %7659 = vmatprep.subr.bf16.mxu1 %v10512_v46  ;;  %v10560_v52 = vld [vmem:[%s14783_s6 + $0xcc4] ss:$16 sps:$4 sm:$0xff]  }
 0x355   :  { %7700 = vmatprep.subr.bf16.mxu0 %v10515_v5 }
 0x357   :  { %7660 = vmatpush1.bf16.msra.mxu1 %v10510_v6 }
 0x358   :  { %7701 = vmatpush1.bf16.msra.mxu0 %v10513_v30  ;;  %7661 = vmatprep.subr.bf16.mxu1 %v10518_v27 }
 0x359   :  { %7702 = vmatprep.subr.bf16.mxu0 %v10521_v13  ;;  %v10558_v13 = vld [vmem:[%s14783_s6 + $0xcc0] ss:$16 sps:$4 sm:$0xff]  }
 0x35b   :  { %7662 = vmatpush1.bf16.msra.mxu1 %v10516_v0 }
 0x35c   :  { %7703 = vmatpush1.bf16.msra.mxu0 %v10519_v15  ;;  %7713 = vmatprep.subr.bf16.mxu1 %v10524_v1 }
 0x35d   :  { %7754 = vmatprep.subr.bf16.mxu0 %v10527_v58  ;;  %v10569_v58 = vld [vmem:[%s14783_s6 + $0xee4] ss:$16 sps:$4 sm:$0xff]  }
 0x35e   :  { %7664 = vmatmul.mubr.bf16.vlgmr.msra.gmra.mrb[52].mxu1 %v13632_v17 }
 0x35f   :  { %7705 = vmatmul.mubr.bf16.vlgmr.msra.gmra.mrb[56].mxu0 %v13637_v24  ;;  %7714 = vmatpush1.bf16.msra.mxu1 %v10522_v49  ;;  %v10572_v49 = vld [vmem:[%s14783_s6 + $0xd04] ss:$16 sps:$4 sm:$0xff]  }
 0x360   :  { %7745 = vmatprep.mubr.bf16.mxu1 %v13642_v11  ;;  %7755 = vmatpush1.bf16.msra.mxu0 %v10525_v21  ;;  %v10575_v21 = vld [vmem:[%s14783_s6 + $0xf04] ss:$16 sps:$4 sm:$0xff]  }
 0x361   :  { %7786 = vmatprep.mubr.bf16.mxu0 %v13648_v36  ;;  %7715 = vmatprep.subr.bf16.mxu1 %v10530_v20  ;;  %v10570_v20 = vld [vmem:[%s14783_s6 + $0xd00] ss:$16 sps:$4 sm:$0xff]  }
 0x362   :  { %7756 = vmatprep.subr.bf16.mxu0 %v10533_v10  ;;  %v10573_v10 = vld [vmem:[%s14783_s6 + $0xf00] ss:$16 sps:$4 sm:$0xff]  }
 0x363   :  { %7716 = vmatpush1.bf16.msra.mxu1 %v10528_v51  ;;  %v10578_v51 = vld [vmem:[%s14783_s6 + $0xd24] ss:$16 sps:$4 sm:$0xff]  }
 0x364   :  { %7757 = vmatpush1.bf16.msra.mxu0 %v10531_v37  ;;  %7717 = vmatprep.subr.bf16.mxu1 %v10536_v32  ;;  %v10581_v37 = vld [vmem:[%s14783_s6 + $0xf24] ss:$16 sps:$4 sm:$0xff]   ;;  %v10576_v32 = vld [vmem:[%s14783_s6 + $0xd20] ss:$16 sps:$4 sm:$0xff]  }
 0x365   :  { %7758 = vmatprep.subr.bf16.mxu0 %v10539_v38  ;;  %v10579_v38 = vld [vmem:[%s14783_s6 + $0xf20] ss:$16 sps:$4 sm:$0xff]  }
 0x367   :  { %7718 = vmatpush1.bf16.msra.mxu1 %v10534_v60  ;;  %v10584_v60 = vld [vmem:[%s14783_s6 + $0xd44] ss:$16 sps:$4 sm:$0xff]  }
 0x368   :  { %7759 = vmatpush1.bf16.msra.mxu0 %v10537_v45  ;;  %7719 = vmatprep.subr.bf16.mxu1 %v10542_v22  ;;  %v10587_v45 = vld [vmem:[%s14783_s6 + $0xf44] ss:$16 sps:$4 sm:$0xff]   ;;  %v10582_v22 = vld [vmem:[%s14783_s6 + $0xd40] ss:$16 sps:$4 sm:$0xff]  }
 0x369   :  { %7760 = vmatprep.subr.bf16.mxu0 %v10545_v39  ;;  %v10585_v39 = vld [vmem:[%s14783_s6 + $0xf40] ss:$16 sps:$4 sm:$0xff]  }
 0x36b   :  { %7720 = vmatpush1.bf16.msra.mxu1 %v10540_v18  ;;  %v10590_v18 = vld [vmem:[%s14783_s6 + $0xd64] ss:$16 sps:$4 sm:$0xff]  }
 0x36c   :  { %7761 = vmatpush1.bf16.msra.mxu0 %v10543_v26  ;;  %7721 = vmatprep.subr.bf16.mxu1 %v10548_v31  ;;  %v10593_v26 = vld [vmem:[%s14783_s6 + $0xf64] ss:$16 sps:$4 sm:$0xff]   ;;  %v10588_v31 = vld [vmem:[%s14783_s6 + $0xd60] ss:$16 sps:$4 sm:$0xff]  }
 0x36d   :  { %7762 = vmatprep.subr.bf16.mxu0 %v10551_v42  ;;  %v10591_v42 = vld [vmem:[%s14783_s6 + $0xf60] ss:$16 sps:$4 sm:$0xff]  }
 0x36f   :  { %7722 = vmatpush1.bf16.msra.mxu1 %v10546_v41  ;;  %v10596_v41 = vld [vmem:[%s14783_s6 + $0xd84] ss:$16 sps:$4 sm:$0xff]  }
 0x370   :  { %7763 = vmatpush1.bf16.msra.mxu0 %v10549_v23  ;;  %7723 = vmatprep.subr.bf16.mxu1 %v10554_v8  ;;  %v10599_v23 = vld [vmem:[%s14783_s6 + $0xf84] ss:$16 sps:$4 sm:$0xff]   ;;  %v10594_v8 = vld [vmem:[%s14783_s6 + $0xd80] ss:$16 sps:$4 sm:$0xff]  }
 0x371   :  { %v4859_v46 = vpop.f32.mrb[40].mxu1  ;;  %7764 = vmatprep.subr.bf16.mxu0 %v10557_v43  ;;  %v10597_v43 = vld [vmem:[%s14783_s6 + $0xf80] ss:$16 sps:$4 sm:$0xff]  }
 0x372   :  { %v4860_v5 = vadd.f32 %v4859_v46, %v13500_v55  ;;  %v4900_v6 = vpop.f32.mrb[44].mxu0  ;;  %v4861_v9 = vpop.f32.mrb[41].mxu1  ;;  %v10561_v55 = vld [vmem:[%s14783_s6 + $0xec0] ss:$16 sps:$4 sm:$0xff]  }
 0x373   :  { %v4862_v30 = vadd.f32 %v4861_v9, %v13508_v2  ;;  %v4902_v27 = vpop.f32.mrb[45].mxu0  ;;  %v4863_v12 = vpop.f32.mrb[42].mxu1  ;;  %7724 = vmatpush1.bf16.msra.mxu1 %v10552_v48  ;;  %v10566_v2 = vld [vmem:[%s14783_s6 + $0xce4] ss:$16 sps:$4 sm:$0xff]   ;;  %v10603_v46 = vld [vmem:[%s14783_s6 + $0xfa0] ss:$16 sps:$4 sm:$0xff]  }
 0x374   :  { %v13718_v0 = vadd.f32 %v4900_v6, %v4860_v5  ;;  %v4904_v62 = vpop.f32.mrb[46].mxu0  ;;  %7765 = vmatpush1.bf16.msra.mxu0 %v10555_v56  ;;  %v4864_v15 = vpop.f32.mrb[43].mxu1  ;;  %7725 = vmatprep.subr.bf16.mxu1 %v10560_v52  ;;  %v10602_v48 = vld [vmem:[%s14783_s6 + $0xda4] ss:$16 sps:$4 sm:$0xff]   ;;  %v10600_v52 = vld [vmem:[%s14783_s6 + $0xda0] ss:$16 sps:$4 sm:$0xff]  }
 0x375   :  { %v13726_v1 = vadd.f32 %v4902_v27, %v4862_v30  ;;  %v4905_v3 = vpop.f32.mrb[47].mxu0  ;;  %7766 = vmatprep.subr.bf16.mxu0 %v10563_v54  ;;  %v10605_v56 = vld [vmem:[%s14783_s6 + $0xfa4] ss:$16 sps:$4 sm:$0xff]   ;;  %v10606_v6 = vld [vmem:[%s14783_s6 + $0xdc0] ss:$16 sps:$4 sm:$0xff]  }
 0x376   :  { %v10608_v54 = vld [vmem:[%s14783_s6 + $0xdc4] ss:$16 sps:$4 sm:$0xff]   ;;  %v10609_v9 = vld [vmem:[%s14783_s6 + $0xfc0] ss:$16 sps:$4 sm:$0xff]   ;;  %v10620_v15 = vld [vmem:[%s14783_s6 + $0xc] ss:$16 sps:$4 sm:$0xff]  }
 0x377   :  { %7726 = vmatpush1.bf16.msra.mxu1 %v10558_v13  ;;  %v10611_v5 = vld [vmem:[%s14783_s6 + $0xfc4] ss:$16 sps:$4 sm:$0xff]   ;;  %v10612_v12 = vld [vmem:[%s14783_s6 + $0xde0] ss:$16 sps:$4 sm:$0xff]   ;;  %v1234_v13 = vmax.f32 %v12072_v16, 0.0 }
 0x378   :  { %7767 = vmatpush1.bf16.msra.mxu0 %v10561_v55  ;;  %7727 = vmatprep.subr.bf16.mxu1 %v10566_v2  ;;  %v10614_v30 = vld [vmem:[%s14783_s6 + $0xde4] ss:$16 sps:$4 sm:$0xff]   ;;  %v10615_v62 = vld [vmem:[%s14783_s6 + $0xfe0] ss:$16 sps:$4 sm:$0xff]   ;;  %v1236_v55 = vmax.f32 %v12074_v19, 0.0 }
 0x379   :  { %7768 = vmatprep.subr.bf16.mxu0 %v10569_v58  ;;  %v10617_v27 = vld [vmem:[%s14783_s6 + $0xfe4] ss:$16 sps:$4 sm:$0xff]   ;;  %v10623_v2 = vld [vmem:[%s14783_s6 + $0x20c] ss:$16 sps:$4 sm:$0xff]   ;;  %v10618_v16 = vld [vmem:[%s14783_s6 + $0x8] ss:$16 sps:$4 sm:$0xff]   ;;  %v13844_v3 = vpack.c.bf16 %v1234_v13, %v1234_v13 }
 0x37a   :  { %v10621_v58 = vld [vmem:[%s14783_s6 + $0x208] ss:$16 sps:$4 sm:$0xff]   ;;  %v10626_v19 = vld [vmem:[%s14783_s6 + $0x2c] ss:$16 sps:$4 sm:$0xff]  }
 0x37b   :  { %7728 = vmatpush1.bf16.msra.mxu1 %v10564_v4  ;;  %v13849_v4 = vpack.c.bf16 %v1236_v55, %v1236_v55  ;;  %v10665_v13 = vld [vmem:[%s14783_s6 + $0x2ec] ss:$16 sps:$4 sm:$0xff]  }
 0x37c   :  { %7769 = vmatpush1.bf16.msra.mxu0 %v10567_v44  ;;  %7729 = vmatprep.subr.bf16.mxu1 %v10572_v49  ;;  %v10629_v44 = vld [vmem:[%s14783_s6 + $0x22c] ss:$16 sps:$4 sm:$0xff]   ;;  %v10624_v49 = vld [vmem:[%s14783_s6 + $0x28] ss:$16 sps:$4 sm:$0xff]  }
 0x37d   :  { %7770 = vmatprep.subr.bf16.mxu0 %v10575_v21  ;;  %v10627_v21 = vld [vmem:[%s14783_s6 + $0x228] ss:$16 sps:$4 sm:$0xff]   ;;  %v10668_v55 = vld [vmem:[%s14783_s6 + $0x10c] ss:$16 sps:$4 sm:$0xff]  }
 0x37f   :  { %7730 = vmatpush1.bf16.msra.mxu1 %v10570_v20  ;;  %v10632_v20 = vld [vmem:[%s14783_s6 + $0x4c] ss:$16 sps:$4 sm:$0xff]  }
 0x380   :  { %7771 = vmatpush1.bf16.msra.mxu0 %v10573_v10  ;;  %7731 = vmatprep.subr.bf16.mxu1 %v10578_v51  ;;  %v10635_v10 = vld [vmem:[%s14783_s6 + $0x24c] ss:$16 sps:$4 sm:$0xff]   ;;  %v10633_v51 = vld [vmem:[%s14783_s6 + $0x248] ss:$16 sps:$4 sm:$0xff]  }
 0x381   :  { %7772 = vmatprep.subr.bf16.mxu0 %v10581_v37  ;;  %v10641_v37 = vld [vmem:[%s14783_s6 + $0x26c] ss:$16 sps:$4 sm:$0xff]  }
 0x383   :  { %7732 = vmatpush1.bf16.msra.mxu1 %v10576_v32  ;;  %v10636_v32 = vld [vmem:[%s14783_s6 + $0x68] ss:$16 sps:$4 sm:$0xff]  }
 0x384   :  { %7773 = vmatpush1.bf16.msra.mxu0 %v10579_v38  ;;  %7733 = vmatprep.subr.bf16.mxu1 %v10584_v60  ;;  %v10639_v38 = vld [vmem:[%s14783_s6 + $0x268] ss:$16 sps:$4 sm:$0xff]   ;;  %v10644_v60 = vld [vmem:[%s14783_s6 + $0x8c] ss:$16 sps:$4 sm:$0xff]  }
 0x385   :  { %7774 = vmatprep.subr.bf16.mxu0 %v10587_v45  ;;  %v10647_v45 = vld [vmem:[%s14783_s6 + $0x28c] ss:$16 sps:$4 sm:$0xff]  }
 0x387   :  { %7734 = vmatpush1.bf16.msra.mxu1 %v10582_v22  ;;  %v10642_v22 = vld [vmem:[%s14783_s6 + $0x88] ss:$16 sps:$4 sm:$0xff]  }
 0x388   :  { %7775 = vmatpush1.bf16.msra.mxu0 %v10585_v39  ;;  %7735 = vmatprep.subr.bf16.mxu1 %v10590_v18  ;;  %v10645_v39 = vld [vmem:[%s14783_s6 + $0x288] ss:$16 sps:$4 sm:$0xff]   ;;  %v10650_v18 = vld [vmem:[%s14783_s6 + $0xac] ss:$16 sps:$4 sm:$0xff]  }
 0x389   :  { %7776 = vmatprep.subr.bf16.mxu0 %v10593_v26  ;;  %v10653_v26 = vld [vmem:[%s14783_s6 + $0x2ac] ss:$16 sps:$4 sm:$0xff]  }
 0x38b   :  { %7736 = vmatpush1.bf16.msra.mxu1 %v10588_v31  ;;  %v10648_v31 = vld [vmem:[%s14783_s6 + $0xa8] ss:$16 sps:$4 sm:$0xff]  }
 0x38c   :  { %7777 = vmatpush1.bf16.msra.mxu0 %v10591_v42  ;;  %7737 = vmatprep.subr.bf16.mxu1 %v10596_v41  ;;  %v10651_v42 = vld [vmem:[%s14783_s6 + $0x2a8] ss:$16 sps:$4 sm:$0xff]   ;;  %v10656_v41 = vld [vmem:[%s14783_s6 + $0xcc] ss:$16 sps:$4 sm:$0xff]  }
 0x38d   :  { %7778 = vmatprep.subr.bf16.mxu0 %v10599_v23 }
 0x38f   :  { %7738 = vmatpush1.bf16.msra.mxu1 %v10594_v8  ;;  %v10659_v8 = vld [vmem:[%s14783_s6 + $0x2cc] ss:$16 sps:$4 sm:$0xff]  }
 0x390   :  { %7779 = vmatpush1.bf16.msra.mxu0 %v10597_v43  ;;  %7739 = vmatprep.subr.bf16.mxu1 %v10602_v48 }
 0x391   :  { %7780 = vmatprep.subr.bf16.mxu0 %v10605_v56 }
 0x393   :  { %7740 = vmatpush1.bf16.msra.mxu1 %v10600_v52 }
 0x394   :  { %7781 = vmatpush1.bf16.msra.mxu0 %v10603_v46  ;;  %7741 = vmatprep.subr.bf16.mxu1 %v10608_v54 }
 0x395   :  { %7782 = vmatprep.subr.bf16.mxu0 %v10611_v5  ;;  %v10654_v5 = vld [vmem:[%s14783_s6 + $0xc8] ss:$16 sps:$4 sm:$0xff]  }
 0x397   :  { %7742 = vmatpush1.bf16.msra.mxu1 %v10606_v6 }
 0x398   :  { %7783 = vmatpush1.bf16.msra.mxu0 %v10609_v9  ;;  %7743 = vmatprep.subr.bf16.mxu1 %v10614_v30 }
 0x399   :  { %7784 = vmatprep.subr.bf16.mxu0 %v10617_v27 }
 0x39b   :  { %7744 = vmatpush1.bf16.msra.mxu1 %v10612_v12 }
 0x39c   :  { %7785 = vmatpush1.bf16.msra.mxu0 %v10615_v62  ;;  %7795 = vmatprep.subr.bf16.mxu1 %v10620_v15  ;;  %v10660_v62 = vld [vmem:[%s14783_s6 + $0xe8] ss:$16 sps:$4 sm:$0xff]  }
 0x39d   :  { %7836 = vmatprep.subr.bf16.mxu0 %v10623_v2  ;;  %v10663_v15 = vld [vmem:[%s14783_s6 + $0x2e8] ss:$16 sps:$4 sm:$0xff]   ;;  %v10671_v2 = vld [vmem:[%s14783_s6 + $0x30c] ss:$16 sps:$4 sm:$0xff]  }
 0x39e   :  { %7746 = vmatmul.mubr.bf16.vlgmr.msra.gmra.mrb[56].mxu1 %v13844_v3 }
 0x39f   :  { %7787 = vmatmul.mubr.bf16.vlgmr.msra.gmra.mrb[60].mxu0 %v13849_v4  ;;  %7796 = vmatpush1.bf16.msra.mxu1 %v10618_v16  ;;  %v10666_v16 = vld [vmem:[%s14783_s6 + $0x108] ss:$16 sps:$4 sm:$0xff]  }
 0x3a0   :  { %7827 = vmatprep.mubr.bf16.mxu1 %v12979_v47  ;;  %7837 = vmatpush1.bf16.msra.mxu0 %v10621_v58  ;;  %v10630_v47 = vld [vmem:[%s14783_s6 + $0x48] ss:$16 sps:$4 sm:$0xff]  }
 0x3a1   :  { %7868 = vmatprep.mubr.bf16.mxu0 %v12985_v35  ;;  %7797 = vmatprep.subr.bf16.mxu1 %v10626_v19  ;;  %v10638_v35 = vld [vmem:[%s14783_s6 + $0x6c] ss:$16 sps:$4 sm:$0xff]   ;;  %v10669_v58 = vld [vmem:[%s14783_s6 + $0x308] ss:$16 sps:$4 sm:$0xff]  }
 0x3a2   :  { %7838 = vmatprep.subr.bf16.mxu0 %v10629_v44  ;;  %v10674_v19 = vld [vmem:[%s14783_s6 + $0x12c] ss:$16 sps:$4 sm:$0xff]  }
 0x3a3   :  { %7798 = vmatpush1.bf16.msra.mxu1 %v10624_v49  ;;  %v10677_v44 = vld [vmem:[%s14783_s6 + $0x32c] ss:$16 sps:$4 sm:$0xff]   ;;  %v10672_v49 = vld [vmem:[%s14783_s6 + $0x128] ss:$16 sps:$4 sm:$0xff]  }
 0x3a4   :  { %7839 = vmatpush1.bf16.msra.mxu0 %v10627_v21  ;;  %7799 = vmatprep.subr.bf16.mxu1 %v10632_v20  ;;  %v10675_v21 = vld [vmem:[%s14783_s6 + $0x328] ss:$16 sps:$4 sm:$0xff]   ;;  %v10680_v20 = vld [vmem:[%s14783_s6 + $0x14c] ss:$16 sps:$4 sm:$0xff]  }
 0x3a5   :  { %7840 = vmatprep.subr.bf16.mxu0 %v10635_v10  ;;  %v10683_v10 = vld [vmem:[%s14783_s6 + $0x34c] ss:$16 sps:$4 sm:$0xff]  }
 0x3a7   :  { %7800 = vmatpush1.bf16.msra.mxu1 %v10630_v47  ;;  %v10678_v47 = vld [vmem:[%s14783_s6 + $0x148] ss:$16 sps:$4 sm:$0xff]  }
 0x3a8   :  { %7841 = vmatpush1.bf16.msra.mxu0 %v10633_v51  ;;  %7801 = vmatprep.subr.bf16.mxu1 %v10638_v35  ;;  %v10681_v51 = vld [vmem:[%s14783_s6 + $0x348] ss:$16 sps:$4 sm:$0xff]   ;;  %v10686_v35 = vld [vmem:[%s14783_s6 + $0x16c] ss:$16 sps:$4 sm:$0xff]  }
 0x3a9   :  { %7842 = vmatprep.subr.bf16.mxu0 %v10641_v37  ;;  %v10689_v37 = vld [vmem:[%s14783_s6 + $0x36c] ss:$16 sps:$4 sm:$0xff]  }
 0x3ab   :  { %7802 = vmatpush1.bf16.msra.mxu1 %v10636_v32  ;;  %v10684_v32 = vld [vmem:[%s14783_s6 + $0x168] ss:$16 sps:$4 sm:$0xff]  }
 0x3ac   :  { %7843 = vmatpush1.bf16.msra.mxu0 %v10639_v38  ;;  %7803 = vmatprep.subr.bf16.mxu1 %v10644_v60  ;;  %v10687_v38 = vld [vmem:[%s14783_s6 + $0x368] ss:$16 sps:$4 sm:$0xff]   ;;  %v10692_v60 = vld [vmem:[%s14783_s6 + $0x18c] ss:$16 sps:$4 sm:$0xff]  }
 0x3ad   :  { %7844 = vmatprep.subr.bf16.mxu0 %v10647_v45  ;;  %v10695_v45 = vld [vmem:[%s14783_s6 + $0x38c] ss:$16 sps:$4 sm:$0xff]  }
 0x3af   :  { %7804 = vmatpush1.bf16.msra.mxu1 %v10642_v22  ;;  %v10690_v22 = vld [vmem:[%s14783_s6 + $0x188] ss:$16 sps:$4 sm:$0xff]  }
 0x3b0   :  { %7845 = vmatpush1.bf16.msra.mxu0 %v10645_v39  ;;  %7805 = vmatprep.subr.bf16.mxu1 %v10650_v18  ;;  %v10693_v39 = vld [vmem:[%s14783_s6 + $0x388] ss:$16 sps:$4 sm:$0xff]   ;;  %v10698_v18 = vld [vmem:[%s14783_s6 + $0x1ac] ss:$16 sps:$4 sm:$0xff]  }
 0x3b1   :  { %v7501_v23 = vpop.f32.mrb[44].mxu1  ;;  %7846 = vmatprep.subr.bf16.mxu0 %v10653_v26  ;;  %v10701_v26 = vld [vmem:[%s14783_s6 + $0x3ac] ss:$16 sps:$4 sm:$0xff]  }
 0x3b2   :  { %v7502_v43 = vadd.f32 %v7501_v23, %v13269_v57  ;;  %v7542_v48 = vpop.f32.mrb[48].mxu0  ;;  %v7503_v56 = vpop.f32.mrb[45].mxu1  ;;  %v10657_v57 = vld [vmem:[%s14783_s6 + $0x2c8] ss:$16 sps:$4 sm:$0xff]   ;;  %v10707_v23 = vld [vmem:[%s14783_s6 + $0x3cc] ss:$16 sps:$4 sm:$0xff]  }
 0x3b3   :  { %v7504_v52 = vadd.f32 %v7503_v56, %v13274_v63  ;;  %v7544_v46 = vpop.f32.mrb[49].mxu0  ;;  %v7505_v54 = vpop.f32.mrb[46].mxu1  ;;  %7806 = vmatpush1.bf16.msra.mxu1 %v10648_v31  ;;  %v10662_v63 = vld [vmem:[%s14783_s6 + $0xec] ss:$16 sps:$4 sm:$0xff]   ;;  %v10696_v31 = vld [vmem:[%s14783_s6 + $0x1a8] ss:$16 sps:$4 sm:$0xff]  }
 0x3b4   :  { %v13926_v6 = vadd.f32 %v7542_v48, %v7502_v43  ;;  %v7546_v9 = vpop.f32.mrb[50].mxu0  ;;  %7847 = vmatpush1.bf16.msra.mxu0 %v10651_v42  ;;  %v7506_v30 = vpop.f32.mrb[47].mxu1  ;;  %7807 = vmatprep.subr.bf16.mxu1 %v10656_v41  ;;  %v10699_v42 = vld [vmem:[%s14783_s6 + $0x3a8] ss:$16 sps:$4 sm:$0xff]   ;;  %v10704_v41 = vld [vmem:[%s14783_s6 + $0x1cc] ss:$16 sps:$4 sm:$0xff]  }
 0x3b5   :  { %v13934_v27 = vadd.f32 %v7544_v46, %v7504_v52  ;;  %v7547_v12 = vpop.f32.mrb[51].mxu0  ;;  %7848 = vmatprep.subr.bf16.mxu0 %v10659_v8  ;;  %v10702_v8 = vld [vmem:[%s14783_s6 + $0x1c8] ss:$16 sps:$4 sm:$0xff]   ;;  %v10710_v48 = vld [vmem:[%s14783_s6 + $0x1ec] ss:$16 sps:$4 sm:$0xff]  }
 0x3b6   :  { %v10705_v43 = vld [vmem:[%s14783_s6 + $0x3c8] ss:$16 sps:$4 sm:$0xff]   ;;  %v10713_v56 = vld [vmem:[%s14783_s6 + $0x3ec] ss:$16 sps:$4 sm:$0xff]  }
 0x3b7   :  { %7808 = vmatpush1.bf16.msra.mxu1 %v10654_v5  ;;  %v10708_v52 = vld [vmem:[%s14783_s6 + $0x1e8] ss:$16 sps:$4 sm:$0xff]   ;;  %v10716_v54 = vld [vmem:[%s14783_s6 + $0x40c] ss:$16 sps:$4 sm:$0xff]  }
 0x3b8   :  { %7849 = vmatpush1.bf16.msra.mxu0 %v10657_v57  ;;  %7809 = vmatprep.subr.bf16.mxu1 %v10662_v63  ;;  %v10711_v46 = vld [vmem:[%s14783_s6 + $0x3e8] ss:$16 sps:$4 sm:$0xff]   ;;  %v10719_v5 = vld [vmem:[%s14783_s6 + $0x60c] ss:$16 sps:$4 sm:$0xff]  }
 0x3b9   :  { %7850 = vmatprep.subr.bf16.mxu0 %v10665_v13  ;;  %v10714_v9 = vld [vmem:[%s14783_s6 + $0x408] ss:$16 sps:$4 sm:$0xff]   ;;  %v10722_v57 = vld [vmem:[%s14783_s6 + $0x42c] ss:$16 sps:$4 sm:$0xff]  }
 0x3ba   :  { %v10717_v30 = vld [vmem:[%s14783_s6 + $0x608] ss:$16 sps:$4 sm:$0xff]   ;;  %v10725_v63 = vld [vmem:[%s14783_s6 + $0x62c] ss:$16 sps:$4 sm:$0xff]  }
 0x3bb   :  { %7810 = vmatpush1.bf16.msra.mxu1 %v10660_v62  ;;  %v10720_v12 = vld [vmem:[%s14783_s6 + $0x428] ss:$16 sps:$4 sm:$0xff]  }
 0x3bc   :  { %7851 = vmatpush1.bf16.msra.mxu0 %v10663_v15  ;;  %7811 = vmatprep.subr.bf16.mxu1 %v10668_v55  ;;  %v10723_v13 = vld [vmem:[%s14783_s6 + $0x628] ss:$16 sps:$4 sm:$0xff]   ;;  %v10737_v15 = vld [vmem:[%s14783_s6 + $0x66c] ss:$16 sps:$4 sm:$0xff]  }
 0x3bd   :  { %7852 = vmatprep.subr.bf16.mxu0 %v10671_v2  ;;  %v10729_v62 = vld [vmem:[%s14783_s6 + $0x648] ss:$16 sps:$4 sm:$0xff]  }
 0x3be   :  { %v10732_v55 = vld [vmem:[%s14783_s6 + $0x468] ss:$16 sps:$4 sm:$0xff]  }
 0x3bf   :  { %7812 = vmatpush1.bf16.msra.mxu1 %v10666_v16  ;;  %v10735_v2 = vld [vmem:[%s14783_s6 + $0x668] ss:$16 sps:$4 sm:$0xff]   ;;  %v10740_v16 = vld [vmem:[%s14783_s6 + $0x48c] ss:$16 sps:$4 sm:$0xff]  }
 0x3c0   :  { %7853 = vmatpush1.bf16.msra.mxu0 %v10669_v58  ;;  %7813 = vmatprep.subr.bf16.mxu1 %v10674_v19  ;;  %v10743_v58 = vld [vmem:[%s14783_s6 + $0x68c] ss:$16 sps:$4 sm:$0xff]   ;;  %v10738_v19 = vld [vmem:[%s14783_s6 + $0x488] ss:$16 sps:$4 sm:$0xff]  }
 0x3c1   :  { %7854 = vmatprep.subr.bf16.mxu0 %v10677_v44  ;;  %v10741_v44 = vld [vmem:[%s14783_s6 + $0x688] ss:$16 sps:$4 sm:$0xff]  }
 0x3c3   :  { %7814 = vmatpush1.bf16.msra.mxu1 %v10672_v49  ;;  %v10746_v49 = vld [vmem:[%s14783_s6 + $0x4ac] ss:$16 sps:$4 sm:$0xff]  }
 0x3c4   :  { %7855 = vmatpush1.bf16.msra.mxu0 %v10675_v21  ;;  %7815 = vmatprep.subr.bf16.mxu1 %v10680_v20  ;;  %v10749_v21 = vld [vmem:[%s14783_s6 + $0x6ac] ss:$16 sps:$4 sm:$0xff]   ;;  %v10744_v20 = vld [vmem:[%s14783_s6 + $0x4a8] ss:$16 sps:$4 sm:$0xff]  }
 0x3c5   :  { %7856 = vmatprep.subr.bf16.mxu0 %v10683_v10  ;;  %v10747_v10 = vld [vmem:[%s14783_s6 + $0x6a8] ss:$16 sps:$4 sm:$0xff]  }
 0x3c7   :  { %7816 = vmatpush1.bf16.msra.mxu1 %v10678_v47  ;;  %v10752_v47 = vld [vmem:[%s14783_s6 + $0x4cc] ss:$16 sps:$4 sm:$0xff]  }
 0x3c8   :  { %7857 = vmatpush1.bf16.msra.mxu0 %v10681_v51  ;;  %7817 = vmatprep.subr.bf16.mxu1 %v10686_v35  ;;  %v10755_v35 = vld [vmem:[%s14783_s6 + $0x6cc] ss:$16 sps:$4 sm:$0xff]  }
 0x3c9   :  { %7858 = vmatprep.subr.bf16.mxu0 %v10689_v37 }
 0x3cb   :  { %7818 = vmatpush1.bf16.msra.mxu1 %v10684_v32 }
 0x3cc   :  { %7859 = vmatpush1.bf16.msra.mxu0 %v10687_v38  ;;  %7819 = vmatprep.subr.bf16.mxu1 %v10692_v60 }
 0x3cd   :  { %7860 = vmatprep.subr.bf16.mxu0 %v10695_v45 }
 0x3cf   :  { %7820 = vmatpush1.bf16.msra.mxu1 %v10690_v22 }
 0x3d0   :  { %7861 = vmatpush1.bf16.msra.mxu0 %v10693_v39  ;;  %7821 = vmatprep.subr.bf16.mxu1 %v10698_v18  ;;  %v10750_v39 = vld [vmem:[%s14783_s6 + $0x4c8] ss:$16 sps:$4 sm:$0xff]  }
 0x3d1   :  { %7862 = vmatprep.subr.bf16.mxu0 %v10701_v26 }
 0x3d3   :  { %7822 = vmatpush1.bf16.msra.mxu1 %v10696_v31 }
 0x3d4   :  { %7863 = vmatpush1.bf16.msra.mxu0 %v10699_v42  ;;  %7823 = vmatprep.subr.bf16.mxu1 %v10704_v41 }
 0x3d5   :  { %7864 = vmatprep.subr.bf16.mxu0 %v10707_v23  ;;  %v10761_v23 = vld [vmem:[%s14783_s6 + $0x6ec] ss:$16 sps:$4 sm:$0xff]  }
 0x3d7   :  { %7824 = vmatpush1.bf16.msra.mxu1 %v10702_v8  ;;  %v10756_v8 = vld [vmem:[%s14783_s6 + $0x4e8] ss:$16 sps:$4 sm:$0xff]  }
 0x3d8   :  { %7865 = vmatpush1.bf16.msra.mxu0 %v10705_v43  ;;  %7825 = vmatprep.subr.bf16.mxu1 %v10710_v48  ;;  %v10759_v43 = vld [vmem:[%s14783_s6 + $0x6e8] ss:$16 sps:$4 sm:$0xff]   ;;  %v10764_v48 = vld [vmem:[%s14783_s6 + $0x50c] ss:$16 sps:$4 sm:$0xff]  }
 0x3d9   :  { %7866 = vmatprep.subr.bf16.mxu0 %v10713_v56  ;;  %v10767_v56 = vld [vmem:[%s14783_s6 + $0x70c] ss:$16 sps:$4 sm:$0xff]  }
 0x3db   :  { %7826 = vmatpush1.bf16.msra.mxu1 %v10708_v52  ;;  %v10762_v52 = vld [vmem:[%s14783_s6 + $0x508] ss:$16 sps:$4 sm:$0xff]  }
 0x3dc   :  { %7867 = vmatpush1.bf16.msra.mxu0 %v10711_v46  ;;  %7877 = vmatprep.subr.bf16.mxu1 %v10716_v54  ;;  %v10765_v46 = vld [vmem:[%s14783_s6 + $0x708] ss:$16 sps:$4 sm:$0xff]   ;;  %v10770_v54 = vld [vmem:[%s14783_s6 + $0x52c] ss:$16 sps:$4 sm:$0xff]  }
 0x3dd   :  { %7918 = vmatprep.subr.bf16.mxu0 %v10719_v5  ;;  %v10773_v5 = vld [vmem:[%s14783_s6 + $0x72c] ss:$16 sps:$4 sm:$0xff]  }
 0x3de   :  { %7828 = vmatmul.mubr.bf16.vlgmr.msra.gmra.mrb[60].mxu1 %v13187_v61  ;;  %v10728_v61 = vld [vmem:[%s14783_s6 + $0x44c] ss:$16 sps:$4 sm:$0xff]  }
 0x3df   :  { %7869 = vmatmul.mubr.bf16.vlgmr.msra.gmra.mrb[64].mxu0 %v13192_v40  ;;  %7878 = vmatpush1.bf16.msra.mxu1 %v10714_v9  ;;  %v10731_v40 = vld [vmem:[%s14783_s6 + $0x64c] ss:$16 sps:$4 sm:$0xff]   ;;  %v10768_v9 = vld [vmem:[%s14783_s6 + $0x528] ss:$16 sps:$4 sm:$0xff]  }
 0x3e0   :  { %7909 = vmatprep.mubr.bf16.mxu1 %v13197_v53  ;;  %7919 = vmatpush1.bf16.msra.mxu0 %v10717_v30  ;;  %v10726_v53 = vld [vmem:[%s14783_s6 + $0x448] ss:$16 sps:$4 sm:$0xff]  }
 0x3e1   :  { %7950 = vmatprep.mubr.bf16.mxu0 %v13203_v25  ;;  %7879 = vmatprep.subr.bf16.mxu1 %v10722_v57  ;;  %v10734_v25 = vld [vmem:[%s14783_s6 + $0x46c] ss:$16 sps:$4 sm:$0xff]   ;;  %v10771_v30 = vld [vmem:[%s14783_s6 + $0x728] ss:$16 sps:$4 sm:$0xff]  }
 0x3e2   :  { %7920 = vmatprep.subr.bf16.mxu0 %v10725_v63  ;;  %v10776_v57 = vld [vmem:[%s14783_s6 + $0x54c] ss:$16 sps:$4 sm:$0xff]  }
 0x3e3   :  { %7880 = vmatpush1.bf16.msra.mxu1 %v10720_v12  ;;  %v10779_v63 = vld [vmem:[%s14783_s6 + $0x74c] ss:$16 sps:$4 sm:$0xff]   ;;  %v10774_v12 = vld [vmem:[%s14783_s6 + $0x548] ss:$16 sps:$4 sm:$0xff]  }
 0x3e4   :  { %7921 = vmatpush1.bf16.msra.mxu0 %v10723_v13  ;;  %7881 = vmatprep.subr.bf16.mxu1 %v10728_v61  ;;  %v10777_v13 = vld [vmem:[%s14783_s6 + $0x748] ss:$16 sps:$4 sm:$0xff]   ;;  %v10782_v61 = vld [vmem:[%s14783_s6 + $0x56c] ss:$16 sps:$4 sm:$0xff]  }
 0x3e5   :  { %7922 = vmatprep.subr.bf16.mxu0 %v10731_v40  ;;  %v10785_v40 = vld [vmem:[%s14783_s6 + $0x76c] ss:$16 sps:$4 sm:$0xff]  }
 0x3e7   :  { %7882 = vmatpush1.bf16.msra.mxu1 %v10726_v53  ;;  %v10780_v53 = vld [vmem:[%s14783_s6 + $0x568] ss:$16 sps:$4 sm:$0xff]  }
 0x3e8   :  { %7923 = vmatpush1.bf16.msra.mxu0 %v10729_v62  ;;  %7883 = vmatprep.subr.bf16.mxu1 %v10734_v25  ;;  %v10783_v62 = vld [vmem:[%s14783_s6 + $0x768] ss:$16 sps:$4 sm:$0xff]   ;;  %v10788_v25 = vld [vmem:[%s14783_s6 + $0x58c] ss:$16 sps:$4 sm:$0xff]  }
 0x3e9   :  { %7924 = vmatprep.subr.bf16.mxu0 %v10737_v15  ;;  %v10791_v15 = vld [vmem:[%s14783_s6 + $0x78c] ss:$16 sps:$4 sm:$0xff]  }
 0x3eb   :  { %7884 = vmatpush1.bf16.msra.mxu1 %v10732_v55  ;;  %v10786_v55 = vld [vmem:[%s14783_s6 + $0x588] ss:$16 sps:$4 sm:$0xff]  }
 0x3ec   :  { %7925 = vmatpush1.bf16.msra.mxu0 %v10735_v2  ;;  %7885 = vmatprep.subr.bf16.mxu1 %v10740_v16  ;;  %v10789_v2 = vld [vmem:[%s14783_s6 + $0x788] ss:$16 sps:$4 sm:$0xff]   ;;  %v10794_v16 = vld [vmem:[%s14783_s6 + $0x5ac] ss:$16 sps:$4 sm:$0xff]  }
 0x3ed   :  { %7926 = vmatprep.subr.bf16.mxu0 %v10743_v58  ;;  %v10797_v58 = vld [vmem:[%s14783_s6 + $0x7ac] ss:$16 sps:$4 sm:$0xff]  }
 0x3ef   :  { %7886 = vmatpush1.bf16.msra.mxu1 %v10738_v19  ;;  %v10792_v19 = vld [vmem:[%s14783_s6 + $0x5a8] ss:$16 sps:$4 sm:$0xff]  }
 0x3f0   :  { %7927 = vmatpush1.bf16.msra.mxu0 %v10741_v44  ;;  %7887 = vmatprep.subr.bf16.mxu1 %v10746_v49  ;;  %v10795_v44 = vld [vmem:[%s14783_s6 + $0x7a8] ss:$16 sps:$4 sm:$0xff]   ;;  %v10800_v49 = vld [vmem:[%s14783_s6 + $0x5cc] ss:$16 sps:$4 sm:$0xff]  }
 0x3f1   :  { %v7583_v51 = vpop.f32.mrb[48].mxu1  ;;  %7928 = vmatprep.subr.bf16.mxu0 %v10749_v21  ;;  %v10803_v21 = vld [vmem:[%s14783_s6 + $0x7cc] ss:$16 sps:$4 sm:$0xff]  }
 0x3f2   :  { %v7584_v37 = vadd.f32 %v7583_v51, %v13926_v6  ;;  %v7624_v32 = vpop.f32.mrb[52].mxu0  ;;  %v7585_v38 = vpop.f32.mrb[49].mxu1  ;;  %v10753_v6 = vld [vmem:[%s14783_s6 + $0x6c8] ss:$16 sps:$4 sm:$0xff]   ;;  %v10809_v51 = vld [vmem:[%s14783_s6 + $0x7ec] ss:$16 sps:$4 sm:$0xff]  }
 0x3f3   :  { %v7586_v60 = vadd.f32 %v7585_v38, %v13934_v27  ;;  %v7626_v45 = vpop.f32.mrb[53].mxu0  ;;  %v7587_v22 = vpop.f32.mrb[50].mxu1  ;;  %7888 = vmatpush1.bf16.msra.mxu1 %v10744_v20  ;;  %v10758_v27 = vld [vmem:[%s14783_s6 + $0x4ec] ss:$16 sps:$4 sm:$0xff]   ;;  %v10798_v20 = vld [vmem:[%s14783_s6 + $0x5c8] ss:$16 sps:$4 sm:$0xff]  }
 0x3f4   :  { %v14128_v18 = vadd.f32 %v7624_v32, %v7584_v37  ;;  %v7628_v26 = vpop.f32.mrb[54].mxu0  ;;  %7929 = vmatpush1.bf16.msra.mxu0 %v10747_v10  ;;  %v7588_v31 = vpop.f32.mrb[51].mxu1  ;;  %7889 = vmatprep.subr.bf16.mxu1 %v10752_v47  ;;  %v10801_v10 = vld [vmem:[%s14783_s6 + $0x7c8] ss:$16 sps:$4 sm:$0xff]   ;;  %v10806_v47 = vld [vmem:[%s14783_s6 + $0x5ec] ss:$16 sps:$4 sm:$0xff]  }
 0x3f5   :  { %v14136_v42 = vadd.f32 %v7626_v45, %v7586_v60  ;;  %v7629_v41 = vpop.f32.mrb[55].mxu0  ;;  %7930 = vmatprep.subr.bf16.mxu0 %v10755_v35  ;;  %v10804_v35 = vld [vmem:[%s14783_s6 + $0x5e8] ss:$16 sps:$4 sm:$0xff]   ;;  %v10812_v32 = vld [vmem:[%s14783_s6 + $0x80c] ss:$16 sps:$4 sm:$0xff]  }
 0x3f6   :  { %v10807_v37 = vld [vmem:[%s14783_s6 + $0x7e8] ss:$16 sps:$4 sm:$0xff]   ;;  %v10815_v38 = vld [vmem:[%s14783_s6 + $0xa0c] ss:$16 sps:$4 sm:$0xff]  }
 0x3f7   :  { %7890 = vmatpush1.bf16.msra.mxu1 %v10750_v39  ;;  %v10810_v60 = vld [vmem:[%s14783_s6 + $0x808] ss:$16 sps:$4 sm:$0xff]   ;;  %v10818_v22 = vld [vmem:[%s14783_s6 + $0x82c] ss:$16 sps:$4 sm:$0xff]  }
 0x3f8   :  { %7931 = vmatpush1.bf16.msra.mxu0 %v10753_v6  ;;  %7891 = vmatprep.subr.bf16.mxu1 %v10758_v27  ;;  %v10813_v45 = vld [vmem:[%s14783_s6 + $0xa08] ss:$16 sps:$4 sm:$0xff]   ;;  %v10821_v39 = vld [vmem:[%s14783_s6 + $0xa2c] ss:$16 sps:$4 sm:$0xff]  }
 0x3f9   :  { %7932 = vmatprep.subr.bf16.mxu0 %v10761_v23  ;;  %v10816_v26 = vld [vmem:[%s14783_s6 + $0x828] ss:$16 sps:$4 sm:$0xff]   ;;  %v10833_v27 = vld [vmem:[%s14783_s6 + $0xa6c] ss:$16 sps:$4 sm:$0xff]  }
 0x3fa   :  { %v10819_v31 = vld [vmem:[%s14783_s6 + $0xa28] ss:$16 sps:$4 sm:$0xff]  }
 0x3fb   :  { %7892 = vmatpush1.bf16.msra.mxu1 %v10756_v8  ;;  %v10825_v6 = vld [vmem:[%s14783_s6 + $0xa48] ss:$16 sps:$4 sm:$0xff]   ;;  %v10836_v8 = vld [vmem:[%s14783_s6 + $0x88c] ss:$16 sps:$4 sm:$0xff]  }
 0x3fc   :  { %7933 = vmatpush1.bf16.msra.mxu0 %v10759_v43  ;;  %7893 = vmatprep.subr.bf16.mxu1 %v10764_v48  ;;  %v10828_v41 = vld [vmem:[%s14783_s6 + $0x868] ss:$16 sps:$4 sm:$0xff]   ;;  %v10839_v43 = vld [vmem:[%s14783_s6 + $0xa8c] ss:$16 sps:$4 sm:$0xff]  }
 0x3fd   :  { %7934 = vmatprep.subr.bf16.mxu0 %v10767_v56  ;;  %v10831_v23 = vld [vmem:[%s14783_s6 + $0xa68] ss:$16 sps:$4 sm:$0xff]  }
 0x3fe   :  { %v10834_v48 = vld [vmem:[%s14783_s6 + $0x888] ss:$16 sps:$4 sm:$0xff]  }
 0x3ff   :  { %7894 = vmatpush1.bf16.msra.mxu1 %v10762_v52  ;;  %v10837_v56 = vld [vmem:[%s14783_s6 + $0xa88] ss:$16 sps:$4 sm:$0xff]   ;;  %v10842_v52 = vld [vmem:[%s14783_s6 + $0x8ac] ss:$16 sps:$4 sm:$0xff]  }
 0x400   :  { %7935 = vmatpush1.bf16.msra.mxu0 %v10765_v46  ;;  %7895 = vmatprep.subr.bf16.mxu1 %v10770_v54  ;;  %v10845_v46 = vld [vmem:[%s14783_s6 + $0xaac] ss:$16 sps:$4 sm:$0xff]   ;;  %v10840_v54 = vld [vmem:[%s14783_s6 + $0x8a8] ss:$16 sps:$4 sm:$0xff]  }
 0x401   :  { %7936 = vmatprep.subr.bf16.mxu0 %v10773_v5  ;;  %v10843_v5 = vld [vmem:[%s14783_s6 + $0xaa8] ss:$16 sps:$4 sm:$0xff]  }
 0x403   :  { %7896 = vmatpush1.bf16.msra.mxu1 %v10768_v9  ;;  %v10848_v9 = vld [vmem:[%s14783_s6 + $0x8cc] ss:$16 sps:$4 sm:$0xff]  }
 0x404   :  { %7937 = vmatpush1.bf16.msra.mxu0 %v10771_v30  ;;  %7897 = vmatprep.subr.bf16.mxu1 %v10776_v57  ;;  %v10851_v57 = vld [vmem:[%s14783_s6 + $0xacc] ss:$16 sps:$4 sm:$0xff]  }
 0x405   :  { %7938 = vmatprep.subr.bf16.mxu0 %v10779_v63 }
 0x407   :  { %7898 = vmatpush1.bf16.msra.mxu1 %v10774_v12 }
 0x408   :  { %7939 = vmatpush1.bf16.msra.mxu0 %v10777_v13  ;;  %7899 = vmatprep.subr.bf16.mxu1 %v10782_v61 }
 0x409   :  { %7940 = vmatprep.subr.bf16.mxu0 %v10785_v40 }
 0x40b   :  { %7900 = vmatpush1.bf16.msra.mxu1 %v10780_v53 }
 0x40c   :  { %7941 = vmatpush1.bf16.msra.mxu0 %v10783_v62  ;;  %7901 = vmatprep.subr.bf16.mxu1 %v10788_v25  ;;  %v10846_v62 = vld [vmem:[%s14783_s6 + $0x8c8] ss:$16 sps:$4 sm:$0xff]  }
 0x40d   :  { %7942 = vmatprep.subr.bf16.mxu0 %v10791_v15 }
 0x40f   :  { %7902 = vmatpush1.bf16.msra.mxu1 %v10786_v55 }
 0x410   :  { %7943 = vmatpush1.bf16.msra.mxu0 %v10789_v2  ;;  %7903 = vmatprep.subr.bf16.mxu1 %v10794_v16 }
 0x411   :  { %7944 = vmatprep.subr.bf16.mxu0 %v10797_v58  ;;  %v10857_v58 = vld [vmem:[%s14783_s6 + $0xaec] ss:$16 sps:$4 sm:$0xff]  }
 0x413   :  { %7904 = vmatpush1.bf16.msra.mxu1 %v10792_v19  ;;  %v10852_v19 = vld [vmem:[%s14783_s6 + $0x8e8] ss:$16 sps:$4 sm:$0xff]  }
 0x414   :  { %7945 = vmatpush1.bf16.msra.mxu0 %v10795_v44  ;;  %7905 = vmatprep.subr.bf16.mxu1 %v10800_v49  ;;  %v10855_v44 = vld [vmem:[%s14783_s6 + $0xae8] ss:$16 sps:$4 sm:$0xff]   ;;  %v10860_v49 = vld [vmem:[%s14783_s6 + $0x90c] ss:$16 sps:$4 sm:$0xff]  }
 0x415   :  { %7946 = vmatprep.subr.bf16.mxu0 %v10803_v21  ;;  %v10863_v21 = vld [vmem:[%s14783_s6 + $0xb0c] ss:$16 sps:$4 sm:$0xff]  }
 0x417   :  { %7906 = vmatpush1.bf16.msra.mxu1 %v10798_v20  ;;  %v10858_v20 = vld [vmem:[%s14783_s6 + $0x908] ss:$16 sps:$4 sm:$0xff]  }
 0x418   :  { %7947 = vmatpush1.bf16.msra.mxu0 %v10801_v10  ;;  %7907 = vmatprep.subr.bf16.mxu1 %v10806_v47  ;;  %v10861_v10 = vld [vmem:[%s14783_s6 + $0xb08] ss:$16 sps:$4 sm:$0xff]   ;;  %v10866_v47 = vld [vmem:[%s14783_s6 + $0x92c] ss:$16 sps:$4 sm:$0xff]  }
 0x419   :  { %7948 = vmatprep.subr.bf16.mxu0 %v10809_v51  ;;  %v10869_v51 = vld [vmem:[%s14783_s6 + $0xb2c] ss:$16 sps:$4 sm:$0xff]  }
 0x41b   :  { %7908 = vmatpush1.bf16.msra.mxu1 %v10804_v35  ;;  %v10864_v35 = vld [vmem:[%s14783_s6 + $0x928] ss:$16 sps:$4 sm:$0xff]  }
 0x41c   :  { %7949 = vmatpush1.bf16.msra.mxu0 %v10807_v37  ;;  %7959 = vmatprep.subr.bf16.mxu1 %v10812_v32  ;;  %v10867_v37 = vld [vmem:[%s14783_s6 + $0xb28] ss:$16 sps:$4 sm:$0xff]   ;;  %v10872_v32 = vld [vmem:[%s14783_s6 + $0x94c] ss:$16 sps:$4 sm:$0xff]  }
 0x41d   :  { %8000 = vmatprep.subr.bf16.mxu0 %v10815_v38  ;;  %v10875_v38 = vld [vmem:[%s14783_s6 + $0xb4c] ss:$16 sps:$4 sm:$0xff]  }
 0x41e   :  { %7910 = vmatmul.mubr.bf16.vlgmr.msra.gmra.mrb[64].mxu1 %v13414_v7  ;;  %v10824_v7 = vld [vmem:[%s14783_s6 + $0x84c] ss:$16 sps:$4 sm:$0xff]  }
 0x41f   :  { %7951 = vmatmul.mubr.bf16.vlgmr.msra.gmra.mrb[68].mxu0 %v13419_v14  ;;  %7960 = vmatpush1.bf16.msra.mxu1 %v10810_v60  ;;  %v10827_v14 = vld [vmem:[%s14783_s6 + $0xa4c] ss:$16 sps:$4 sm:$0xff]   ;;  %v10870_v60 = vld [vmem:[%s14783_s6 + $0x948] ss:$16 sps:$4 sm:$0xff]  }
 0x420   :  { %7991 = vmatprep.mubr.bf16.mxu1 %v13424_v59  ;;  %8001 = vmatpush1.bf16.msra.mxu0 %v10813_v45  ;;  %v10822_v59 = vld [vmem:[%s14783_s6 + $0x848] ss:$16 sps:$4 sm:$0xff]  }
 0x421   :  { %8032 = vmatprep.mubr.bf16.mxu0 %v13430_v50  ;;  %7961 = vmatprep.subr.bf16.mxu1 %v10818_v22  ;;  %v10830_v50 = vld [vmem:[%s14783_s6 + $0x86c] ss:$16 sps:$4 sm:$0xff]   ;;  %v10873_v45 = vld [vmem:[%s14783_s6 + $0xb48] ss:$16 sps:$4 sm:$0xff]  }
 0x422   :  { %8002 = vmatprep.subr.bf16.mxu0 %v10821_v39  ;;  %v10878_v22 = vld [vmem:[%s14783_s6 + $0x96c] ss:$16 sps:$4 sm:$0xff]  }
 0x423   :  { %7962 = vmatpush1.bf16.msra.mxu1 %v10816_v26  ;;  %v10881_v39 = vld [vmem:[%s14783_s6 + $0xb6c] ss:$16 sps:$4 sm:$0xff]   ;;  %v10876_v26 = vld [vmem:[%s14783_s6 + $0x968] ss:$16 sps:$4 sm:$0xff]  }
 0x424   :  { %8003 = vmatpush1.bf16.msra.mxu0 %v10819_v31  ;;  %7963 = vmatprep.subr.bf16.mxu1 %v10824_v7  ;;  %v10879_v31 = vld [vmem:[%s14783_s6 + $0xb68] ss:$16 sps:$4 sm:$0xff]   ;;  %v10884_v7 = vld [vmem:[%s14783_s6 + $0x98c] ss:$16 sps:$4 sm:$0xff]  }
 0x425   :  { %8004 = vmatprep.subr.bf16.mxu0 %v10827_v14  ;;  %v10887_v14 = vld [vmem:[%s14783_s6 + $0xb8c] ss:$16 sps:$4 sm:$0xff]  }
 0x427   :  { %7964 = vmatpush1.bf16.msra.mxu1 %v10822_v59  ;;  %v10882_v59 = vld [vmem:[%s14783_s6 + $0x988] ss:$16 sps:$4 sm:$0xff]  }
 0x428   :  { %8005 = vmatpush1.bf16.msra.mxu0 %v10825_v6  ;;  %7965 = vmatprep.subr.bf16.mxu1 %v10830_v50  ;;  %v10885_v6 = vld [vmem:[%s14783_s6 + $0xb88] ss:$16 sps:$4 sm:$0xff]   ;;  %v10890_v50 = vld [vmem:[%s14783_s6 + $0x9ac] ss:$16 sps:$4 sm:$0xff]  }
 0x429   :  { %8006 = vmatprep.subr.bf16.mxu0 %v10833_v27  ;;  %v10893_v27 = vld [vmem:[%s14783_s6 + $0xbac] ss:$16 sps:$4 sm:$0xff]  }
 0x42b   :  { %7966 = vmatpush1.bf16.msra.mxu1 %v10828_v41  ;;  %v10888_v41 = vld [vmem:[%s14783_s6 + $0x9a8] ss:$16 sps:$4 sm:$0xff]  }
 0x42c   :  { %8007 = vmatpush1.bf16.msra.mxu0 %v10831_v23  ;;  %7967 = vmatprep.subr.bf16.mxu1 %v10836_v8  ;;  %v10891_v23 = vld [vmem:[%s14783_s6 + $0xba8] ss:$16 sps:$4 sm:$0xff]   ;;  %v10896_v8 = vld [vmem:[%s14783_s6 + $0x9cc] ss:$16 sps:$4 sm:$0xff]  }
 0x42d   :  { %8008 = vmatprep.subr.bf16.mxu0 %v10839_v43  ;;  %v10899_v43 = vld [vmem:[%s14783_s6 + $0xbcc] ss:$16 sps:$4 sm:$0xff]  }
 0x42f   :  { %7968 = vmatpush1.bf16.msra.mxu1 %v10834_v48  ;;  %v10894_v48 = vld [vmem:[%s14783_s6 + $0x9c8] ss:$16 sps:$4 sm:$0xff]  }
 0x430   :  { %8009 = vmatpush1.bf16.msra.mxu0 %v10837_v56  ;;  %7969 = vmatprep.subr.bf16.mxu1 %v10842_v52  ;;  %v10897_v56 = vld [vmem:[%s14783_s6 + $0xbc8] ss:$16 sps:$4 sm:$0xff]   ;;  %v10902_v52 = vld [vmem:[%s14783_s6 + $0x9ec] ss:$16 sps:$4 sm:$0xff]  }
 0x431   :  { %v7665_v30 = vpop.f32.mrb[52].mxu1  ;;  %8010 = vmatprep.subr.bf16.mxu0 %v10845_v46  ;;  %v10905_v46 = vld [vmem:[%s14783_s6 + $0xbec] ss:$16 sps:$4 sm:$0xff]  }
 0x432   :  { %v7666_v63 = vadd.f32 %v7665_v30, %v14128_v18  ;;  %v7706_v12 = vpop.f32.mrb[56].mxu0  ;;  %v7667_v13 = vpop.f32.mrb[53].mxu1  ;;  %v10849_v18 = vld [vmem:[%s14783_s6 + $0xac8] ss:$16 sps:$4 sm:$0xff]   ;;  %v10911_v30 = vld [vmem:[%s14783_s6 + $0xe0c] ss:$16 sps:$4 sm:$0xff]  }
 0x433   :  { %v7668_v61 = vadd.f32 %v7667_v13, %v14136_v42  ;;  %v7708_v40 = vpop.f32.mrb[57].mxu0  ;;  %v7669_v53 = vpop.f32.mrb[54].mxu1  ;;  %7970 = vmatpush1.bf16.msra.mxu1 %v10840_v54  ;;  %v10854_v42 = vld [vmem:[%s14783_s6 + $0x8ec] ss:$16 sps:$4 sm:$0xff]   ;;  %v10900_v54 = vld [vmem:[%s14783_s6 + $0x9e8] ss:$16 sps:$4 sm:$0xff]  }
 0x434   :  { %v14330_v25 = vadd.f32 %v7706_v12, %v7666_v63  ;;  %v7710_v15 = vpop.f32.mrb[58].mxu0  ;;  %8011 = vmatpush1.bf16.msra.mxu0 %v10843_v5  ;;  %v7670_v55 = vpop.f32.mrb[55].mxu1  ;;  %7971 = vmatprep.subr.bf16.mxu1 %v10848_v9  ;;  %v10903_v5 = vld [vmem:[%s14783_s6 + $0xbe8] ss:$16 sps:$4 sm:$0xff]   ;;  %v10908_v9 = vld [vmem:[%s14783_s6 + $0xc0c] ss:$16 sps:$4 sm:$0xff]  }
 0x435   :  { %v14338_v2 = vadd.f32 %v7708_v40, %v7668_v61  ;;  %v7711_v16 = vpop.f32.mrb[59].mxu0  ;;  %8012 = vmatprep.subr.bf16.mxu0 %v10851_v57  ;;  %v10906_v57 = vld [vmem:[%s14783_s6 + $0xc08] ss:$16 sps:$4 sm:$0xff]   ;;  %v10914_v12 = vld [vmem:[%s14783_s6 + $0xc2c] ss:$16 sps:$4 sm:$0xff]  }
 0x436   :  { %v10909_v63 = vld [vmem:[%s14783_s6 + $0xe08] ss:$16 sps:$4 sm:$0xff]   ;;  %v10917_v13 = vld [vmem:[%s14783_s6 + $0xe2c] ss:$16 sps:$4 sm:$0xff]  }
 0x437   :  { %7972 = vmatpush1.bf16.msra.mxu1 %v10846_v62  ;;  %v10912_v61 = vld [vmem:[%s14783_s6 + $0xc28] ss:$16 sps:$4 sm:$0xff]   ;;  %v10929_v62 = vld [vmem:[%s14783_s6 + $0xe6c] ss:$16 sps:$4 sm:$0xff]  }
 0x438   :  { %8013 = vmatpush1.bf16.msra.mxu0 %v10849_v18  ;;  %7973 = vmatprep.subr.bf16.mxu1 %v10854_v42  ;;  %v10915_v40 = vld [vmem:[%s14783_s6 + $0xe28] ss:$16 sps:$4 sm:$0xff]   ;;  %v10932_v18 = vld [vmem:[%s14783_s6 + $0xc8c] ss:$16 sps:$4 sm:$0xff]  }
 0x439   :  { %8014 = vmatprep.subr.bf16.mxu0 %v10857_v58  ;;  %v10921_v53 = vld [vmem:[%s14783_s6 + $0xe48] ss:$16 sps:$4 sm:$0xff]   ;;  %v10935_v42 = vld [vmem:[%s14783_s6 + $0xe8c] ss:$16 sps:$4 sm:$0xff]  }
 0x43a   :  { %v10924_v15 = vld [vmem:[%s14783_s6 + $0xc68] ss:$16 sps:$4 sm:$0xff]  }
 0x43b   :  { %7974 = vmatpush1.bf16.msra.mxu1 %v10852_v19  ;;  %v10927_v55 = vld [vmem:[%s14783_s6 + $0xe68] ss:$16 sps:$4 sm:$0xff]   ;;  %v10938_v19 = vld [vmem:[%s14783_s6 + $0xcac] ss:$16 sps:$4 sm:$0xff]  }
 0x43c   :  { %8015 = vmatpush1.bf16.msra.mxu0 %v10855_v44  ;;  %7975 = vmatprep.subr.bf16.mxu1 %v10860_v49  ;;  %v10930_v16 = vld [vmem:[%s14783_s6 + $0xc88] ss:$16 sps:$4 sm:$0xff]   ;;  %v10941_v44 = vld [vmem:[%s14783_s6 + $0xeac] ss:$16 sps:$4 sm:$0xff]  }
 0x43d   :  { %8016 = vmatprep.subr.bf16.mxu0 %v10863_v21  ;;  %v10933_v58 = vld [vmem:[%s14783_s6 + $0xe88] ss:$16 sps:$4 sm:$0xff]  }
 0x43e   :  { %v10936_v49 = vld [vmem:[%s14783_s6 + $0xca8] ss:$16 sps:$4 sm:$0xff]  }
 0x43f   :  { %7976 = vmatpush1.bf16.msra.mxu1 %v10858_v20  ;;  %v10939_v21 = vld [vmem:[%s14783_s6 + $0xea8] ss:$16 sps:$4 sm:$0xff]   ;;  %v10944_v20 = vld [vmem:[%s14783_s6 + $0xccc] ss:$16 sps:$4 sm:$0xff]  }
 0x440   :  { %8017 = vmatpush1.bf16.msra.mxu0 %v10861_v10  ;;  %7977 = vmatprep.subr.bf16.mxu1 %v10866_v47  ;;  %v10947_v47 = vld [vmem:[%s14783_s6 + $0xecc] ss:$16 sps:$4 sm:$0xff]  }
 0x441   :  { %8018 = vmatprep.subr.bf16.mxu0 %v10869_v51 }
 0x443   :  { %7978 = vmatpush1.bf16.msra.mxu1 %v10864_v35 }
 0x444   :  { %8019 = vmatpush1.bf16.msra.mxu0 %v10867_v37  ;;  %7979 = vmatprep.subr.bf16.mxu1 %v10872_v32 }
 0x445   :  { %8020 = vmatprep.subr.bf16.mxu0 %v10875_v38 }
 0x447   :  { %7980 = vmatpush1.bf16.msra.mxu1 %v10870_v60 }
 0x448   :  { %8021 = vmatpush1.bf16.msra.mxu0 %v10873_v45  ;;  %7981 = vmatprep.subr.bf16.mxu1 %v10878_v22  ;;  %v10942_v45 = vld [vmem:[%s14783_s6 + $0xcc8] ss:$16 sps:$4 sm:$0xff]  }
 0x449   :  { %8022 = vmatprep.subr.bf16.mxu0 %v10881_v39 }
 0x44b   :  { %7982 = vmatpush1.bf16.msra.mxu1 %v10876_v26 }
 0x44c   :  { %8023 = vmatpush1.bf16.msra.mxu0 %v10879_v31  ;;  %7983 = vmatprep.subr.bf16.mxu1 %v10884_v7 }
 0x44d   :  { %8024 = vmatprep.subr.bf16.mxu0 %v10887_v14  ;;  %v10953_v14 = vld [vmem:[%s14783_s6 + $0xeec] ss:$16 sps:$4 sm:$0xff]  }
 0x44f   :  { %7984 = vmatpush1.bf16.msra.mxu1 %v10882_v59  ;;  %v10948_v59 = vld [vmem:[%s14783_s6 + $0xce8] ss:$16 sps:$4 sm:$0xff]  }
 0x450   :  { %8025 = vmatpush1.bf16.msra.mxu0 %v10885_v6  ;;  %7985 = vmatprep.subr.bf16.mxu1 %v10890_v50  ;;  %v10951_v6 = vld [vmem:[%s14783_s6 + $0xee8] ss:$16 sps:$4 sm:$0xff]   ;;  %v10956_v50 = vld [vmem:[%s14783_s6 + $0xd0c] ss:$16 sps:$4 sm:$0xff]  }
 0x451   :  { %8026 = vmatprep.subr.bf16.mxu0 %v10893_v27  ;;  %v10959_v27 = vld [vmem:[%s14783_s6 + $0xf0c] ss:$16 sps:$4 sm:$0xff]  }
 0x453   :  { %7986 = vmatpush1.bf16.msra.mxu1 %v10888_v41  ;;  %v10954_v41 = vld [vmem:[%s14783_s6 + $0xd08] ss:$16 sps:$4 sm:$0xff]  }
 0x454   :  { %8027 = vmatpush1.bf16.msra.mxu0 %v10891_v23  ;;  %7987 = vmatprep.subr.bf16.mxu1 %v10896_v8  ;;  %v10957_v23 = vld [vmem:[%s14783_s6 + $0xf08] ss:$16 sps:$4 sm:$0xff]   ;;  %v10962_v8 = vld [vmem:[%s14783_s6 + $0xd2c] ss:$16 sps:$4 sm:$0xff]  }
 0x455   :  { %8028 = vmatprep.subr.bf16.mxu0 %v10899_v43  ;;  %v10965_v43 = vld [vmem:[%s14783_s6 + $0xf2c] ss:$16 sps:$4 sm:$0xff]  }
 0x457   :  { %7988 = vmatpush1.bf16.msra.mxu1 %v10894_v48  ;;  %v10960_v48 = vld [vmem:[%s14783_s6 + $0xd28] ss:$16 sps:$4 sm:$0xff]  }
 0x458   :  { %8029 = vmatpush1.bf16.msra.mxu0 %v10897_v56  ;;  %7989 = vmatprep.subr.bf16.mxu1 %v10902_v52  ;;  %v10963_v56 = vld [vmem:[%s14783_s6 + $0xf28] ss:$16 sps:$4 sm:$0xff]   ;;  %v10968_v52 = vld [vmem:[%s14783_s6 + $0xd4c] ss:$16 sps:$4 sm:$0xff]  }
 0x459   :  { %8030 = vmatprep.subr.bf16.mxu0 %v10905_v46  ;;  %v10971_v46 = vld [vmem:[%s14783_s6 + $0xf4c] ss:$16 sps:$4 sm:$0xff]  }
 0x45b   :  { %7990 = vmatpush1.bf16.msra.mxu1 %v10900_v54  ;;  %v10966_v54 = vld [vmem:[%s14783_s6 + $0xd48] ss:$16 sps:$4 sm:$0xff]  }
 0x45c   :  { %8031 = vmatpush1.bf16.msra.mxu0 %v10903_v5  ;;  %8041 = vmatprep.subr.bf16.mxu1 %v10908_v9  ;;  %v10969_v5 = vld [vmem:[%s14783_s6 + $0xf48] ss:$16 sps:$4 sm:$0xff]   ;;  %v10974_v9 = vld [vmem:[%s14783_s6 + $0xd6c] ss:$16 sps:$4 sm:$0xff]  }
 0x45d   :  { %8082 = vmatprep.subr.bf16.mxu0 %v10911_v30  ;;  %v10977_v30 = vld [vmem:[%s14783_s6 + $0xf6c] ss:$16 sps:$4 sm:$0xff]  }
 0x45e   :  { %7992 = vmatmul.mubr.bf16.vlgmr.msra.gmra.mrb[68].mxu1 %v13632_v17  ;;  %v10920_v17 = vld [vmem:[%s14783_s6 + $0xc4c] ss:$16 sps:$4 sm:$0xff]  }
 0x45f   :  { %8033 = vmatmul.mubr.bf16.vlgmr.msra.gmra.mrb[72].mxu0 %v13637_v24  ;;  %8042 = vmatpush1.bf16.msra.mxu1 %v10906_v57  ;;  %v10923_v24 = vld [vmem:[%s14783_s6 + $0xe4c] ss:$16 sps:$4 sm:$0xff]   ;;  %v10972_v57 = vld [vmem:[%s14783_s6 + $0xd68] ss:$16 sps:$4 sm:$0xff]  }
 0x460   :  { %8073 = vmatprep.mubr.bf16.mxu1 %v13642_v11  ;;  %8083 = vmatpush1.bf16.msra.mxu0 %v10909_v63  ;;  %v10918_v11 = vld [vmem:[%s14783_s6 + $0xc48] ss:$16 sps:$4 sm:$0xff]  }
 0x461   :  { %8114 = vmatprep.mubr.bf16.mxu0 %v13648_v36  ;;  %8043 = vmatprep.subr.bf16.mxu1 %v10914_v12  ;;  %v10926_v36 = vld [vmem:[%s14783_s6 + $0xc6c] ss:$16 sps:$4 sm:$0xff]   ;;  %v10975_v63 = vld [vmem:[%s14783_s6 + $0xf68] ss:$16 sps:$4 sm:$0xff]  }
 0x462   :  { %8084 = vmatprep.subr.bf16.mxu0 %v10917_v13  ;;  %v10980_v12 = vld [vmem:[%s14783_s6 + $0xd8c] ss:$16 sps:$4 sm:$0xff]  }
 0x463   :  { %8044 = vmatpush1.bf16.msra.mxu1 %v10912_v61  ;;  %v10983_v13 = vld [vmem:[%s14783_s6 + $0xf8c] ss:$16 sps:$4 sm:$0xff]   ;;  %v10978_v61 = vld [vmem:[%s14783_s6 + $0xd88] ss:$16 sps:$4 sm:$0xff]  }
 0x464   :  { %8085 = vmatpush1.bf16.msra.mxu0 %v10915_v40  ;;  %8045 = vmatprep.subr.bf16.mxu1 %v10920_v17  ;;  %v10981_v40 = vld [vmem:[%s14783_s6 + $0xf88] ss:$16 sps:$4 sm:$0xff]   ;;  %v10986_v17 = vld [vmem:[%s14783_s6 + $0xdac] ss:$16 sps:$4 sm:$0xff]  }
 0x465   :  { %8086 = vmatprep.subr.bf16.mxu0 %v10923_v24  ;;  %v10989_v24 = vld [vmem:[%s14783_s6 + $0xfac] ss:$16 sps:$4 sm:$0xff]  }
 0x467   :  { %8046 = vmatpush1.bf16.msra.mxu1 %v10918_v11  ;;  %v14620_v11 = vld [vmem:[%s14785_s8] sm:$0xf] }
 0x468   :  { %8087 = vmatpush1.bf16.msra.mxu0 %v10921_v53  ;;  %8047 = vmatprep.subr.bf16.mxu1 %v10926_v36  ;;  %v10984_v53 = vld [vmem:[%s14783_s6 + $0xda8] ss:$16 sps:$4 sm:$0xff]  }
 0x469   :  { %8088 = vmatprep.subr.bf16.mxu0 %v10929_v62  ;;  %v10987_v36 = vld [vmem:[%s14783_s6 + $0xfa8] ss:$16 sps:$4 sm:$0xff]   ;;  %v10992_v62 = vld [vmem:[%s14783_s6 + $0xdcc] ss:$16 sps:$4 sm:$0xff]  }
 0x46b   :  { %8048 = vmatpush1.bf16.msra.mxu1 %v10924_v15  ;;  %v10995_v15 = vld [vmem:[%s14783_s6 + $0xfcc] ss:$16 sps:$4 sm:$0xff]  }
 0x46c   :  { %8089 = vmatpush1.bf16.msra.mxu0 %v10927_v55  ;;  %8049 = vmatprep.subr.bf16.mxu1 %v10932_v18  ;;  %v8132_v55 = vrot.slane %v14620_v11, %v12092_v33  ;;  %v10990_v18 = vld [vmem:[%s14783_s6 + $0xdc8] ss:$16 sps:$4 sm:$0xff]   ;;  %v11001_v33 = vld [vmem:[%s14783_s6 + $0xfec] ss:$16 sps:$4 sm:$0xff]  }
 0x46d   :  { %8090 = vmatprep.subr.bf16.mxu0 %v10935_v42  ;;  %v10993_v42 = vld [vmem:[%s14783_s6 + $0xfc8] ss:$16 sps:$4 sm:$0xff]  }
 0x46f   :  { %8050 = vmatpush1.bf16.msra.mxu1 %v10930_v16  ;;  %v10998_v16 = vld [vmem:[%s14783_s6 + $0xdec] ss:$16 sps:$4 sm:$0xff]  }
 0x470   :  { %8091 = vmatpush1.bf16.msra.mxu0 %v10933_v58  ;;  %8051 = vmatprep.subr.bf16.mxu1 %v10938_v19  ;;  %v10996_v19 = vld [vmem:[%s14783_s6 + $0xde8] ss:$16 sps:$4 sm:$0xff]  }
 0x471   :  { %v7747_v10 = vpop.f32.mrb[56].mxu1  ;;  %8092 = vmatprep.subr.bf16.mxu0 %v10941_v44  ;;  %v10999_v44 = vld [vmem:[%s14783_s6 + $0xfe8] ss:$16 sps:$4 sm:$0xff]  }
 0x472   :  { %v7748_v51 = vadd.f32 %v7747_v10, %v14330_v25  ;;  %v7788_v35 = vpop.f32.mrb[60].mxu0  ;;  %v7749_v37 = vpop.f32.mrb[57].mxu1  ;;  %v10945_v25 = vld [vmem:[%s14783_s6 + $0xec8] ss:$16 sps:$4 sm:$0xff]  }
 0x473   :  { %v7750_v32 = vadd.f32 %v7749_v37, %v14338_v2  ;;  %v7790_v38 = vpop.f32.mrb[61].mxu0  ;;  %v7751_v60 = vpop.f32.mrb[58].mxu1  ;;  %8052 = vmatpush1.bf16.msra.mxu1 %v10936_v49  ;;  %v10950_v2 = vld [vmem:[%s14783_s6 + $0xcec] ss:$16 sps:$4 sm:$0xff]   ;;  %v11002_v49 = vld [vmem:[%s14786_s9 + $0x40] sm:$0xff]   ;;  %v11007_v37 = vld [vmem:[%s14786_s9 + $0x10] sm:$0xff]  }
 0x474   :  { %v14532_v22 = vadd.f32 %v7788_v35, %v7748_v51  ;;  %v7792_v39 = vpop.f32.mrb[62].mxu0  ;;  %8093 = vmatpush1.bf16.msra.mxu0 %v10939_v21  ;;  %v7752_v26 = vpop.f32.mrb[59].mxu1  ;;  %8053 = vmatprep.subr.bf16.mxu1 %v10944_v20  ;;  %v11003_v20 = vld [vmem:[%s14786_s9] sm:$0xff]   ;;  %v11004_v10 = vld [vmem:[%s14786_s9 + $0x48] sm:$0xff]   ;;  %v11006_v35 = vld [vmem:[%s14786_s9 + $0x50] sm:$0xff]  }
 0x475   :  { %v14540_v31 = vadd.f32 %v7790_v38, %v7750_v32  ;;  %v7793_v7 = vpop.f32.mrb[63].mxu0  ;;  %8094 = vmatprep.subr.bf16.mxu0 %v10947_v47  ;;  %v11005_v51 = vld [vmem:[%s14786_s9 + $0x8] sm:$0xff]   ;;  %v11010_v32 = vld [vmem:[%s14786_s9 + $0x60] sm:$0xff]   ;;  %v8128_v39 = vrot.slane %v14620_v11, %v12086_v28  ;;  %v11014_v26 = vld [vmem:[%s14786_s9 + $0x70] sm:$0xff]  }
 0x476   :  { %v11011_v38 = vld [vmem:[%s14786_s9 + $0x20] sm:$0xff]   ;;  %v11012_v60 = vld [vmem:[%s14786_s9 + $0x68] sm:$0xff]  }
 0x477   :  { %8054 = vmatpush1.bf16.msra.mxu1 %v10942_v45  ;;  %v8146_v58 = vadd.f32 %v8132_v55, %v14540_v31  ;;  %v11013_v45 = vld [vmem:[%s14786_s9 + $0x28] sm:$0xff]   ;;  %v8145_v28 = vadd.f32 %v8128_v39, %v14532_v22 }
 0x478   :  { %8095 = vmatpush1.bf16.msra.mxu0 %v10945_v25  ;;  %8055 = vmatprep.subr.bf16.mxu1 %v10950_v2  ;;  %v11020_v22 = vld [vmem:[%s14786_s9 + $0xc8] sm:$0xff]  }
 0x479   :  { %8096 = vmatprep.subr.bf16.mxu0 %v10953_v14  ;;  %v8150_v21 = vmax.f32 %v8146_v58, 0.0  ;;  %v11030_v58 = vld [vmem:[%s14786_s9 + $0xf0] sm:$0xff]  }
 0x47b   :  { %8056 = vmatpush1.bf16.msra.mxu1 %v10948_v59  ;;  %v8154_v47 = vpack.c.bf16 %v8150_v21, %v8150_v21 }
 0x47c   :  { %8097 = vmatpush1.bf16.msra.mxu0 %v10951_v6  ;;  %8057 = vmatprep.subr.bf16.mxu1 %v10956_v50  ;;  %v11015_v50 = vld [vmem:[%s14786_s9 + $0x30] sm:$0xff]  }
 0x47d   :  { %8098 = vmatprep.subr.bf16.mxu0 %v10959_v27 }
 0x47f   :  { %8058 = vmatpush1.bf16.msra.mxu1 %v10954_v41 }
 0x480   :  { %8099 = vmatpush1.bf16.msra.mxu0 %v10957_v23  ;;  %8059 = vmatprep.subr.bf16.mxu1 %v10962_v8 }
 0x481   :  { %8100 = vmatprep.subr.bf16.mxu0 %v10965_v43 }
 0x483   :  { %8060 = vmatpush1.bf16.msra.mxu1 %v10960_v48  ;;  %v11019_v48 = vld [vmem:[%s14786_s9 + $0x80] sm:$0xff]  }
 0x484   :  { %8101 = vmatpush1.bf16.msra.mxu0 %v10963_v56  ;;  %8061 = vmatprep.subr.bf16.mxu1 %v10968_v52  ;;  %v11017_v56 = vld [vmem:[%s14786_s9 + $0x38] sm:$0xff]   ;;  %v8149_v52 = vmax.f32 %v8145_v28, 0.0 }
 0x485   :  { %8102 = vmatprep.subr.bf16.mxu0 %v10971_v46  ;;  %v11021_v46 = vld [vmem:[%s14786_s9 + $0x88] sm:$0xff]  }
 0x487   :  { %8062 = vmatpush1.bf16.msra.mxu1 %v10966_v54  ;;  %v11022_v54 = vld [vmem:[%s14786_s9 + $0xd0] sm:$0xff]  }
 0x488   :  { %8103 = vmatpush1.bf16.msra.mxu0 %v10969_v5  ;;  %8063 = vmatprep.subr.bf16.mxu1 %v10974_v9  ;;  %v8153_v5 = vpack.c.bf16 %v8149_v52, %v8149_v52  ;;  %v11023_v9 = vld [vmem:[%s14786_s9 + $0x90] sm:$0xff]  }
 0x489   :  { %8104 = vmatprep.subr.bf16.mxu0 %v10977_v30  ;;  %v11024_v30 = vld [vmem:[%s14786_s9 + $0xd8] sm:$0xff]  }
 0x48b   :  { %8064 = vmatpush1.bf16.msra.mxu1 %v10972_v57  ;;  %v11025_v57 = vld [vmem:[%s14786_s9 + $0x98] sm:$0xff]  }
 0x48c   :  { %8105 = vmatpush1.bf16.msra.mxu0 %v10975_v63  ;;  %8065 = vmatprep.subr.bf16.mxu1 %v10980_v12  ;;  %v11026_v63 = vld [vmem:[%s14786_s9 + $0xe0] sm:$0xff]  }
 0x48d   :  { %8106 = vmatprep.subr.bf16.mxu0 %v10983_v13  ;;  %v11027_v12 = vld [vmem:[%s14786_s9 + $0xa0] sm:$0xff]  }
 0x48f   :  { %8066 = vmatpush1.bf16.msra.mxu1 %v10978_v61 }
 0x490   :  { %8107 = vmatpush1.bf16.msra.mxu0 %v10981_v40  ;;  %8067 = vmatprep.subr.bf16.mxu1 %v10986_v17 }
 0x491   :  { %8108 = vmatprep.subr.bf16.mxu0 %v10989_v24  ;;  %v11028_v24 = vld [vmem:[%s14786_s9 + $0xe8] sm:$0xff]  }
 0x493   :  { %8068 = vmatpush1.bf16.msra.mxu1 %v10984_v53 }
 0x494   :  { %8109 = vmatpush1.bf16.msra.mxu0 %v10987_v36  ;;  %8069 = vmatprep.subr.bf16.mxu1 %v10992_v62 }
 0x495   :  { %8110 = vmatprep.subr.bf16.mxu0 %v10995_v15  ;;  %v11029_v15 = vld [vmem:[%s14786_s9 + $0xa8] sm:$0xff]  }
 0x497   :  { %8070 = vmatpush1.bf16.msra.mxu1 %v10990_v18 }
 0x498   :  { %8111 = vmatpush1.bf16.msra.mxu0 %v10993_v42  ;;  %8071 = vmatprep.subr.bf16.mxu1 %v10998_v16 }
 0x499   :  { %8112 = vmatprep.subr.bf16.mxu0 %v11001_v33 }
 0x49b   :  { %8072 = vmatpush1.bf16.msra.mxu1 %v10996_v19  ;;  %v11031_v19 = vld [vmem:[%s14786_s9 + $0xb0] sm:$0xff]  }
 0x49c   :  { %8113 = vmatpush1.bf16.msra.mxu0 %v10999_v44  ;;  %9588 = vmatprep.subr.bf16.mxu1 %v11002_v49  ;;  %v11032_v44 = vld [vmem:[%s14786_s9 + $0xf8] sm:$0xff]  }
 0x49d   :  { %v11033_v49 = vld [vmem:[%s14786_s9 + $0xb8] sm:$0xff]  }
 0x49e   :  { %8074 = vmatmul.mubr.bf16.vlgmr.msra.gmra.mrb[72].mxu1 %v13844_v3  ;;  %v11008_v3 = vld [vmem:[%s14786_s9 + $0x58] sm:$0xff]  }
 0x49f   :  { %8115 = vmatmul.mubr.bf16.vlgmr.msra.gmra.mrb[76].mxu0 %v13849_v4  ;;  %9589 = vmatpush3.bf16.msra.mxu1 %v11003_v20  ;;  %v11009_v4 = vld [vmem:[%s14786_s9 + $0x18] sm:$0xff]  }
 0x4a0   :  { %8452 = vmatprep.mubr.bf16.mxu1 %v8154_v47  ;;  %9590 = vmatprep.subr.bf16.mxu1 %v11004_v10 }
 0x4a3   :  { %9591 = vmatpush3.bf16.msra.mxu1 %v11005_v51 }
 0x4a4   :  { %9592 = vmatprep.subr.bf16.mxu1 %v11006_v35 }
 0x4a7   :  { %9593 = vmatpush3.bf16.msra.mxu1 %v11007_v37 }
 0x4a8   :  { %9594 = vmatprep.subr.bf16.mxu1 %v11008_v3 }
 0x4ab   :  { %9595 = vmatpush3.bf16.msra.mxu1 %v11009_v4 }
 0x4ac   :  { %9596 = vmatprep.subr.bf16.mxu1 %v11010_v32 }
 0x4af   :  { %9597 = vmatpush3.bf16.msra.mxu1 %v11011_v38 }
 0x4b0   :  { %9598 = vmatprep.subr.bf16.mxu1 %v11012_v60 }
 0x4b1   :  { %v7829_v25 = vpop.f32.mrb[60].mxu1 }
 0x4b2   :  { %v7830_v2 = vadd.f32 %v7829_v25, %v13718_v0  ;;  %v7870_v31 = vpop.f32.mrb[64].mxu0  ;;  %v7831_v7 = vpop.f32.mrb[61].mxu1  ;;  %v11016_v0 = vld [vmem:[%s14786_s9 + $0x78] sm:$0xff]   ;;  %v8136_v25 = vrot.slane %v14620_v11, %v12089_v29 }
 0x4b3   :  { %v7832_v14 = vadd.f32 %v7831_v7, %v13726_v1  ;;  %v7872_v59 = vpop.f32.mrb[65].mxu0  ;;  %v7833_v6 = vpop.f32.mrb[62].mxu1  ;;  %9599 = vmatpush3.bf16.msra.mxu1 %v11013_v45  ;;  %v11018_v1 = vld [vmem:[%s14786_s9 + $0xc0] sm:$0xff]  }
 0x4b4   :  { %v7871_v27 = vadd.f32 %v7870_v31, %v7830_v2  ;;  %v7874_v41 = vpop.f32.mrb[66].mxu0  ;;  %v7834_v23 = vpop.f32.mrb[63].mxu1  ;;  %9600 = vmatprep.subr.bf16.mxu1 %v11014_v26  ;;  %9610 = vmatprep.subr.bf16.mxu0 %v11018_v1 }
 0x4b5   :  { %v7873_v8 = vadd.f32 %v7872_v59, %v7832_v14  ;;  %v7875_v43 = vpop.f32.mrb[67].mxu0  ;;  %9611 = vmatpush3.bf16.msra.mxu0 %v11019_v48  ;;  %v8140_v14 = vrot.slane %v14620_v11, %v12095_v34  ;;  %v9555_v34 = vld [vmem:[%s14787_s10] ss:$0 sm:$0xff] }
 0x4b6   :  { %9612 = vmatprep.subr.bf16.mxu0 %v11020_v22 }
 0x4b7   :  { %9601 = vmatpush3.bf16.msra.mxu1 %v11015_v50 }
 0x4b8   :  { %9602 = vmatprep.subr.bf16.mxu1 %v11016_v0 }
 0x4b9   :  { %9613 = vmatpush3.bf16.msra.mxu0 %v11021_v46 }
 0x4ba   :  { %9614 = vmatprep.subr.bf16.mxu0 %v11022_v54 }
 0x4bb   :  { %9603 = vmatpush3.bf16.msra.mxu1 %v11017_v56 }
 0x4bd   :  { %9615 = vmatpush3.bf16.msra.mxu0 %v11023_v9 }
 0x4be   :  { %8453 = vmatmul.mubr.bf16.vlgmr.msra.gmra.mrb[76].mxu1 %v8153_v5  ;;  %9616 = vmatprep.subr.bf16.mxu0 %v11024_v30 }
 0x4c1   :  { %9617 = vmatpush3.bf16.msra.mxu0 %v11025_v57 }
 0x4c2   :  { %9618 = vmatprep.subr.bf16.mxu0 %v11026_v63 }
 0x4c5   :  { %9619 = vmatpush3.bf16.msra.mxu0 %v11027_v12 }
 0x4c6   :  { %9620 = vmatprep.subr.bf16.mxu0 %v11028_v24 }
 0x4c9   :  { %9621 = vmatpush3.bf16.msra.mxu0 %v11029_v15 }
 0x4ca   :  { %9622 = vmatprep.subr.bf16.mxu0 %v11030_v58 }
 0x4cd   :  { %9623 = vmatpush3.bf16.msra.mxu0 %v11031_v19 }
 0x4ce   :  { %9624 = vmatprep.subr.bf16.mxu0 %v11032_v44 }
 0x4d1   :  { %9625 = vmatpush3.bf16.msra.mxu0 %v11033_v49 }
 0x4f1   :  { %v7911_v13 = vpop.f32.mrb[64].mxu1 }
 0x4f2   :  { %v7912_v61 = vadd.f32 %v7911_v13, %v7871_v27  ;;  %v7952_v40 = vpop.f32.mrb[68].mxu0  ;;  %v7913_v17 = vpop.f32.mrb[65].mxu1 }
 0x4f3   :  { %v7914_v53 = vadd.f32 %v7913_v17, %v7873_v8  ;;  %v7954_v36 = vpop.f32.mrb[69].mxu0  ;;  %v7915_v62 = vpop.f32.mrb[66].mxu1 }
 0x4f4   :  { %v7953_v55 = vadd.f32 %v7952_v40, %v7912_v61  ;;  %v7956_v18 = vpop.f32.mrb[70].mxu0  ;;  %v7916_v42 = vpop.f32.mrb[67].mxu1 }
 0x4f5   :  { %v7955_v16 = vadd.f32 %v7954_v36, %v7914_v53  ;;  %v7957_v33 = vpop.f32.mrb[71].mxu0 }
 0x531   :  { %v7993_v21 = vpop.f32.mrb[68].mxu1 }
 0x532   :  { %v7994_v20 = vadd.f32 %v7993_v21, %v7953_v55  ;;  %v8034_v10 = vpop.f32.mrb[72].mxu0  ;;  %v7995_v47 = vpop.f32.mrb[69].mxu1 }
 0x533   :  { %v7996_v51 = vadd.f32 %v7995_v47, %v7955_v16  ;;  %v8036_v35 = vpop.f32.mrb[73].mxu0  ;;  %v7997_v37 = vpop.f32.mrb[70].mxu1 }
 0x534   :  { %v8035_v3 = vadd.f32 %v8034_v10, %v7994_v20  ;;  %v8038_v4 = vpop.f32.mrb[74].mxu0  ;;  %v7998_v32 = vpop.f32.mrb[71].mxu1 }
 0x535   :  { %v8037_v38 = vadd.f32 %v8036_v35, %v7996_v51  ;;  %v8039_v60 = vpop.f32.mrb[75].mxu0 }
 0x571   :  { %v8075_v45 = vpop.f32.mrb[72].mxu1 }
 0x572   :  { %v8076_v39 = vadd.f32 %v8075_v45, %v8035_v3  ;;  %v8116_v26 = vpop.f32.mrb[76].mxu0  ;;  %v8077_v2 = vpop.f32.mrb[73].mxu1 }
 0x573   :  { %v8078_v31 = vadd.f32 %v8077_v2, %v8037_v38  ;;  %v8118_v7 = vpop.f32.mrb[77].mxu0  ;;  %v8079_v59 = vpop.f32.mrb[74].mxu1 }
 0x574   :  { %v8117_v6 = vadd.f32 %v8116_v26, %v8076_v39  ;;  %v8120_v50 = vpop.f32.mrb[78].mxu0  ;;  %v8080_v28 = vpop.f32.mrb[75].mxu1 }
 0x575   :  { %v8119_v27 = vadd.f32 %v8118_v7, %v8078_v31  ;;  %v8121_v41 = vpop.f32.mrb[79].mxu0 }
 0x576   :  { %v8147_v23 = vadd.f32 %v8136_v25, %v8117_v6 }
 0x577   :  { %v8148_v0 = vadd.f32 %v8140_v14, %v8119_v27 }
 0x578   :  { %v8151_v8 = vmax.f32 %v8147_v23, 0.0 }
 0x579   :  { %v8152_v43 = vmax.f32 %v8148_v0, 0.0 }
 0x57a   :  { %v8155_v48 = vpack.c.bf16 %v8151_v8, %v8151_v8 }
 0x57b   :  { %v8156_v1 = vpack.c.bf16 %v8152_v43, %v8152_v43 }
 0x57d   :  { %8492 = vmatprep.mubr.bf16.mxu0 %v8156_v1 }
 0x57e   :  { %8493 = vmatmul.mubr.bf16.vlgmr.msra.gmra.mrb[80].mxu0 %v8155_v48 }
 0x591   :  { %v9604_v29 = vpop.f32.mrb[76].mxu1 }
 0x592   :  { %v9605_v22 = vpop.f32.mrb[77].mxu1 }
 0x593   :  { %v9606_v56 = vadd.f32 %v9605_v22, %v9604_v29  ;;  %v9607_v52 = vpop.f32.mrb[78].mxu1 }
 0x594   :  { %v9608_v46 = vpop.f32.mrb[79].mxu1 }
 0x595   :  { %v8455_v5 = vadd.f32 %v9606_v56, %v9555_v34 }
 0x651   :  { %v9626_v11 = vpop.f32.mrb[80].mxu0 }
 0x652   :  { %v9627_v54 = vpop.f32.mrb[81].mxu0 }
 0x653   :  { %v9628_v9 = vadd.f32 %v9627_v54, %v9626_v11  ;;  %v9629_v30 = vpop.f32.mrb[82].mxu0 }
 0x654   :  { %v9630_v57 = vpop.f32.mrb[83].mxu0 }
 0x655   :  { %v8495_v63 = vadd.f32 %v9628_v9, %v8455_v5 }
 0x657   :  { %8500 = vst [vmem:[#allocation2] sm:$0x3] %v8495_v63 }
 0x658   :  { %11087 = shalt.err (!%p11084_p4)
}
 0x659   :  { %s11088_s21 = scalar_lea.hbm %s14788_s11, 32 }
 0x65a   :  { %p11089_p5 = scmp.ne.s32.totalorder %s14788_s11, %s11088_s21  ;;  %p11092_p6 = scmp.lt.u32.totalorder %s11088_s21, %s14788_s11 }
 0x65c   :  { %p11094_p7 = pnand %p11092_p6, %p11089_p5 }
 0x65e   :  { %11097 = shalt.err (!%p11094_p7)
}
 0x65f   :  { %8510 = dma.vmem_to_hbm [thread:$0]  %s8508_s0, 32, %s14788_s11, [#allocation3]  }
 0x660   :  { %11098 = dma.done.wait [#allocation3], 32  }
 0x661   :  { %11099 = vsyncadd [#allocation3], 4294967264 }
 0x662   :  { %8514 = vsyncpa [#allocation3], 1 }

</bundles_post_ra>
